<compile_context>
chip_gen: v7x
topology: tpu7x:2x2x1
jax: 0.10.0
libtpu: 0.0.40
codegen_flags: <defaults>
</compile_context>

<pallas_src>
import functools

import jax
import jax.numpy as jnp
from jax.experimental import pallas as pl
from jax.experimental.pallas import tpu as pltpu


# ----------------------------------------------------------------------------
# Pallas kernels
# ----------------------------------------------------------------------------

def _conv_tap_kernel(x_ref, w_ref, s_ref, o_ref, *, taps, m_rows):
    """Fused conv + BN-shift + ReLU for one batch element.

    x_ref: (1, P, L, C)     flattened (phase, spatial) activation, bf16
    w_ref: (T, C, Cout)     per-tap BN-folded weights, bf16
    s_ref: (1, Cout)        BN shift, f32
    o_ref: (1, M, Cout)     over-computed full-width output rows
    taps:  static tuple of (phase_index, flat_row_offset), one per tap
    """
    acc = None
    for t, (p, off) in enumerate(taps):
        a = x_ref[0, p, off:off + m_rows, :]                 # (M, C) bf16
        d = jnp.dot(a, w_ref[t], preferred_element_type=jnp.float32)
        acc = d if acc is None else acc + d
    y = jnp.maximum(acc + s_ref[...], 0.0)
    o_ref[0] = y.astype(o_ref.dtype)


def _pool_tap_kernel(x_ref, o_ref, *, taps, m_rows):
    """Max pool for one batch element (same flattened tap layout as conv)."""
    p0, off0 = taps[0]
    acc = x_ref[0, p0, off0:off0 + m_rows, :]
    for (p, off) in taps[1:]:
        acc = jnp.maximum(acc, x_ref[0, p, off:off + m_rows, :])
    o_ref[0] = acc


# ----------------------------------------------------------------------------
# XLA-side layout glue (single cheap pass; no patch tensors)
# ----------------------------------------------------------------------------

def _flatten_taps(x, kh, kw, stride, padding):
    """Prepare a flattened tap-addressable source buffer.

    x: (N, H, W, C) NHWC.
    Returns (src, taps, m_rows, Ho, Wo, w_row) where src is (N, P, L, C) and
    tap t of the conv/pool reads src[n, taps[t][0], taps[t][1]:+m_rows, :].
    Output row m = ho * w_row + w; columns w >= Wo are over-computed garbage
    (sliced off by the caller).
    """
    N, H, W, C = x.shape
    if padding:
        x = jnp.pad(x, ((0, 0), (padding, padding), (padding, padding), (0, 0)))
    Hp, Wp = H + 2 * padding, W + 2 * padding
    Ho = (Hp - kh) // stride + 1
    Wo = (Wp - kw) // stride + 1

    if stride == 1:
        Hs, Ws = Hp, Wp
        src = x.reshape(N, 1, Hs * Ws, C)
        taps = tuple((0, i * Ws + j) for i in range(kh) for j in range(kw))
    elif stride == 2:
        # Space-to-depth: phases[n, a*2+b, u*Ws+v, c] = x[n, 2u+a, 2v+b, c].
        Hs, Ws = (Hp + 1) // 2, (Wp + 1) // 2
        x2 = x
        if (2 * Hs, 2 * Ws) != (Hp, Wp):
            x2 = jnp.pad(x, ((0, 0), (0, 2 * Hs - Hp), (0, 2 * Ws - Wp), (0, 0)))
        x2 = x2.reshape(N, Hs, 2, Ws, 2, C).transpose(0, 2, 4, 1, 3, 5)
        src = x2.reshape(N, 4, Hs * Ws, C)
        taps = tuple(((i % 2) * 2 + (j % 2), (i // 2) * Ws + (j // 2))
                     for i in range(kh) for j in range(kw))
    else:
        raise NotImplementedError(f"stride={stride}")

    m_rows = Ho * Ws
    L = Hs * Ws
    l_need = max(off for _, off in taps) + m_rows
    if l_need > L:
        src = jnp.pad(src, ((0, 0), (0, 0), (0, l_need - L), (0, 0)))
    return src, taps, m_rows, Ho, Wo, Ws


# ----------------------------------------------------------------------------
# Op wrappers
# ----------------------------------------------------------------------------

def basic_conv2d(params, x, *, stride=1, padding=0, out_dtype=jnp.float32):
    """Conv2d(bias=False) + BatchNorm2d(eps=1e-3, eval) + ReLU.  x is NHWC."""
    w = params["w"]                                   # (Cout, Cin, kh, kw)
    cout, cin, kh, kw = w.shape

    eps = 1e-3
    scale = params["gamma"] * jax.lax.rsqrt(params["running_var"] + eps)
    shift = (params["beta"] - params["running_mean"] * scale)
    shift = shift.reshape(1, cout).astype(jnp.float32)

    # Per-tap weight matrices (kh*kw, Cin, Cout) with BN scale folded in.
    wt = jnp.transpose(w, (2, 3, 1, 0)).reshape(kh * kw, cin, cout)
    wt = (wt * scale[None, None, :]).astype(jnp.bfloat16)

    src, taps, m_rows, Ho, Wo, w_row = _flatten_taps(
        x.astype(jnp.bfloat16), kh, kw, stride, padding)
    N, P, L, C = src.shape
    T = kh * kw

    kernel = functools.partial(_conv_tap_kernel, taps=taps, m_rows=m_rows)
    out = pl.pallas_call(
        kernel,
        out_shape=jax.ShapeDtypeStruct((N, m_rows, cout), out_dtype),
        grid=(N,),
        in_specs=[
            pl.BlockSpec((1, P, L, C), lambda n: (n, 0, 0, 0)),
            pl.BlockSpec((T, C, cout), lambda n: (0, 0, 0)),
            pl.BlockSpec((1, cout), lambda n: (0, 0)),
        ],
        out_specs=pl.BlockSpec((1, m_rows, cout), lambda n: (n, 0, 0)),
        compiler_params=pltpu.CompilerParams(
            dimension_semantics=("parallel",)),
    )(src, wt, shift)

    out = out.reshape(N, Ho, w_row, cout)
    if w_row != Wo:
        out = out[:, :, :Wo, :]
    return out


def max_pool(x, k=3, stride=2):
    """MaxPool2d(kernel_size=k, stride=stride, padding=0).  x is NHWC f32."""
    src, taps, m_rows, Ho, Wo, w_row = _flatten_taps(x, k, k, stride, 0)
    N, P, L, C = src.shape

    kernel = functools.partial(_pool_tap_kernel, taps=taps, m_rows=m_rows)
    out = pl.pallas_call(
        kernel,
        out_shape=jax.ShapeDtypeStruct((N, m_rows, C), x.dtype),
        grid=(N,),
        in_specs=[pl.BlockSpec((1, P, L, C), lambda n: (n, 0, 0, 0))],
        out_specs=pl.BlockSpec((1, m_rows, C), lambda n: (n, 0, 0)),
        compiler_params=pltpu.CompilerParams(
            dimension_semantics=("parallel",)),
    )(src)

    out = out.reshape(N, Ho, w_row, C)
    if w_row != Wo:
        out = out[:, :, :Wo, :]
    return out


# ----------------------------------------------------------------------------
# InceptionB parameters & forward
# ----------------------------------------------------------------------------

def conv_bn_params(key, cin, cout, kh, kw):
    fan_in = cin * kh * kw
    w = jax.random.normal(key, (cout, cin, kh, kw), jnp.float32) * jnp.sqrt(
        2.0 / fan_in)
    return {
        "w": w,
        "gamma": jnp.ones((cout,), jnp.float32),
        "beta": jnp.zeros((cout,), jnp.float32),
        "running_mean": jnp.zeros((cout,), jnp.float32),
        "running_var": jnp.ones((cout,), jnp.float32),
    }


def init_inception_b(key, in_dims):
    k0, k1, k2, k3 = jax.random.split(key, 4)
    return {
        "b3": conv_bn_params(k0, in_dims, 384, 3, 3),   # branch3x3: 3x3 s2
        "bd1": conv_bn_params(k1, in_dims, 64, 1, 1),   # branch3x3dbl_1: 1x1
        "bd2": conv_bn_params(k2, 64, 96, 3, 3),        # branch3x3dbl_2: 3x3 p1
        "bd3": conv_bn_params(k3, 96, 96, 3, 3),        # branch3x3dbl_3: 3x3 s2
    }


def inception_b_forward(P, x_nchw):
    x = jnp.transpose(x_nchw, (0, 2, 3, 1)).astype(jnp.float32)   # NCHW->NHWC
    b3 = basic_conv2d(P["b3"], x, stride=2, out_dtype=jnp.float32)
    bd = basic_conv2d(P["bd1"], x, out_dtype=jnp.bfloat16)
    bd = basic_conv2d(P["bd2"], bd, padding=1, out_dtype=jnp.bfloat16)
    bd = basic_conv2d(P["bd3"], bd, stride=2, out_dtype=jnp.float32)
    bp = max_pool(x, 3, 2)
    # TODO(synk): write the three branches straight into one aliased
    # (N,Ho,Wo,Ctot) buffer via channel-offset out_specs to save the XLA
    # concat pass (input_output_aliases); kept as a plain concat for clarity.
    out = jnp.concatenate([b3, bd, bp], axis=-1)                  # cat(dim=1)
    return jnp.transpose(out, (0, 3, 1, 2))                       # NHWC->NCHW


# ----------------------------------------------------------------------------
# Pure-JAX reference (f32) for a tolerance check
# ----------------------------------------------------------------------------

def _ref_forward(P, x_nchw):
    x = jnp.transpose(x_nchw, (0, 2, 3, 1)).astype(jnp.float32)

    def conv(p, y, stride, padding):
        w = jnp.transpose(p["w"], (2, 3, 1, 0))     # OIHW -> HWIO
        y = jax.lax.conv_general_dilated(
            y, w, (stride, stride), [(padding, padding)] * 2,
            dimension_numbers=("NHWC", "HWIO", "NHWC"))
        scale = p["gamma"] * jax.lax.rsqrt(p["running_var"] + 1e-3)
        y = y * scale + (p["beta"] - p["running_mean"] * scale)
        return jnp.maximum(y, 0.0)

    b3 = conv(P["b3"], x, 2, 0)
    bd = conv(P["bd1"], x, 1, 0)
    bd = conv(P["bd2"], bd, 1, 1)
    bd = conv(P["bd3"], bd, 2, 0)
    bp = jax.lax.reduce_window(x, -jnp.inf, jax.lax.max,
                               (1, 3, 3, 1), (1, 2, 2, 1), "VALID")
    out = jnp.concatenate([b3, bd, bp], axis=-1)
    return jnp.transpose(out, (0, 3, 1, 2))


if __name__ == "__main__":
    key = jax.random.PRNGKey(0)
    k_params, k_x = jax.random.split(key)

    in_dims = 32                       # small analog of the usual 288
    params = init_inception_b(k_params, in_dims)

    # NCHW input, 17x17 spatial (small analog of the usual 35x35).
    x = jax.random.normal(k_x, (2, in_dims, 17, 17), jnp.float32)

    fwd = jax.jit(inception_b_forward)
    out = jax.block_until_ready(fwd(params, x))

    # Expected: (2, 384 + 96 + in_dims, 8, 8)
    assert out.shape == (2, 384 + 96 + in_dims, 8, 8), out.shape
    assert bool(jnp.all(jnp.isfinite(out)))

    ref = jax.block_until_ready(_ref_forward(params, x))
    assert bool(jnp.allclose(out, ref, rtol=0.05, atol=0.1)), (
        float(jnp.max(jnp.abs(out - ref))))

    print("KERNEL_OK")
</pallas_src>

<mosaic_0001>
module attributes {stable_mosaic.version = 11 : i64} {
  func.func @_conv_tap_kernel(%arg0: i32, %arg1: memref<1x1x289x32xbf16, #tpu.memory_space<vmem>>, %arg2: memref<1x32x64xbf16, #tpu.memory_space<vmem>>, %arg3: memref<1x64xf32, #tpu.memory_space<vmem>>, %arg4: memref<1x289x64xbf16, #tpu.memory_space<vmem>>) attributes {dimension_semantics = [#tpu.dimension_semantics<parallel>], iteration_bounds = array<i64: 2>, scalar_prefetch = 0 : i64, scratch_operands = 0 : i64, tpu.core_type = #tpu.core_type<tc>, window_params = [{transform_indices = @transform_0, window_bounds = array<i64: 1, 1, 289, 32>}, {pipeline_mode = #tpu.pipeline_mode<synchronous>, transform_indices = @transform_1, window_bounds = array<i64: 1, 32, 64>}, {pipeline_mode = #tpu.pipeline_mode<synchronous>, transform_indices = @transform_2, window_bounds = array<i64: 1, 64>}, {transform_indices = @transform_3, window_bounds = array<i64: 1, 289, 64>}]} {
    %c0 = arith.constant 0 : index
    %c0_0 = arith.constant 0 : index
    %c0_1 = arith.constant 0 : index
    %c0_2 = arith.constant 0 : index
    %0 = vector.load %arg1[%c0, %c0_0, %c0_1, %c0_2] : memref<1x1x289x32xbf16, #tpu.memory_space<vmem>>, vector<1x1x289x32xbf16>
    %1 = vector.shape_cast %0 : vector<1x1x289x32xbf16> to vector<289x32xbf16>
    %c0_3 = arith.constant 0 : index
    %c0_4 = arith.constant 0 : index
    %c0_5 = arith.constant 0 : index
    %2 = vector.load %arg2[%c0_3, %c0_4, %c0_5] : memref<1x32x64xbf16, #tpu.memory_space<vmem>>, vector<1x32x64xbf16>
    %3 = vector.shape_cast %2 : vector<1x32x64xbf16> to vector<32x64xbf16>
    %cst = arith.constant dense<0.000000e+00> : vector<289x64xf32>
    %4 = tpu.matmul %1, %3, %cst {dimension_numbers = #tpu.dot_dimension_numbers<[1], [0], [0], [1], [0, 0, 1, 1], [], []>} : vector<289x32xbf16>, vector<32x64xbf16>, vector<289x64xf32> -> vector<289x64xf32>
    %c0_6 = arith.constant 0 : index
    %c0_7 = arith.constant 0 : index
    %5 = vector.load %arg3[%c0_6, %c0_7] : memref<1x64xf32, #tpu.memory_space<vmem>>, vector<1x64xf32>
    %6 = vector.broadcast %5 : vector<1x64xf32> to vector<289x64xf32>
    %7 = arith.addf %4, %6 : vector<289x64xf32>
    %cst_8 = arith.constant 0.000000e+00 : f32
    %8 = vector.broadcast %cst_8 : f32 to vector<289x64xf32>
    %9 = arith.maximumf %7, %8 : vector<289x64xf32>
    %10 = arith.truncf %9 : vector<289x64xf32> to vector<289x64xbf16>
    %c0_9 = arith.constant 0 : index
    %c0_10 = arith.constant 0 : index
    %c0_11 = arith.constant 0 : index
    %11 = vector.load %arg4[%c0_9, %c0_10, %c0_11] : memref<1x289x64xbf16, #tpu.memory_space<vmem>>, vector<1x289x64xbf16>
    %12 = vector.shape_cast %11 : vector<1x289x64xbf16> to vector<289x64xbf16>
    %13 = vector.shape_cast %10 : vector<289x64xbf16> to vector<1x289x64xbf16>
    tpu.vector_store %arg4[%c0_9, %c0_10, %c0_11], %13 {strides = array<i32>} : memref<1x289x64xbf16, #tpu.memory_space<vmem>>, vector<1x289x64xbf16>,
    return
  }
  func.func @transform_0(%arg0: i32) -> (i32, i32, i32, i32) {
    %c0_i32 = arith.constant 0 : i32
    %c0_i32_0 = arith.constant 0 : i32
    %c0_i32_1 = arith.constant 0 : i32
    %c0_i32_2 = arith.constant 0 : i32
    return %arg0, %c0_i32, %c0_i32_0, %c0_i32_1 : i32, i32, i32, i32
  }
  func.func @transform_1(%arg0: i32) -> (i32, i32, i32) {
    %c0_i32 = arith.constant 0 : i32
    %c0_i32_0 = arith.constant 0 : i32
    %c0_i32_1 = arith.constant 0 : i32
    %c0_i32_2 = arith.constant 0 : i32
    return %c0_i32, %c0_i32_0, %c0_i32_1 : i32, i32, i32
  }
  func.func @transform_2(%arg0: i32) -> (i32, i32) {
    %c0_i32 = arith.constant 0 : i32
    %c0_i32_0 = arith.constant 0 : i32
    %c0_i32_1 = arith.constant 0 : i32
    return %c0_i32, %c0_i32_0 : i32, i32
  }
  func.func @transform_3(%arg0: i32) -> (i32, i32, i32) {
    %c0_i32 = arith.constant 0 : i32
    %c0_i32_0 = arith.constant 0 : i32
    %c0_i32_1 = arith.constant 0 : i32
    return %arg0, %c0_i32, %c0_i32_0 : i32, i32, i32
  }
}

module attributes {stable_mosaic.version = 11 : i64} {
  func.func @_conv_tap_kernel(%arg0: i32, %arg1: memref<1x1x363x64xbf16, #tpu.memory_space<vmem>>, %arg2: memref<9x64x96xbf16, #tpu.memory_space<vmem>>, %arg3: memref<1x96xf32, #tpu.memory_space<vmem>>, %arg4: memref<1x323x96xbf16, #tpu.memory_space<vmem>>) attributes {dimension_semantics = [#tpu.dimension_semantics<parallel>], iteration_bounds = array<i64: 2>, scalar_prefetch = 0 : i64, scratch_operands = 0 : i64, tpu.core_type = #tpu.core_type<tc>, window_params = [{transform_indices = @transform_0, window_bounds = array<i64: 1, 1, 363, 64>}, {pipeline_mode = #tpu.pipeline_mode<synchronous>, transform_indices = @transform_1, window_bounds = array<i64: 9, 64, 96>}, {pipeline_mode = #tpu.pipeline_mode<synchronous>, transform_indices = @transform_2, window_bounds = array<i64: 1, 96>}, {transform_indices = @transform_3, window_bounds = array<i64: 1, 323, 96>}]} {
    %c0 = arith.constant 0 : index
    %c0_0 = arith.constant 0 : index
    %c0_1 = arith.constant 0 : index
    %c0_2 = arith.constant 0 : index
    %0 = vector.load %arg1[%c0, %c0_0, %c0_1, %c0_2] : memref<1x1x363x64xbf16, #tpu.memory_space<vmem>>, vector<1x1x323x64xbf16>
    %1 = vector.shape_cast %0 : vector<1x1x323x64xbf16> to vector<323x64xbf16>
    %c0_3 = arith.constant 0 : index
    %c0_4 = arith.constant 0 : index
    %c0_5 = arith.constant 0 : index
    %2 = vector.load %arg2[%c0_3, %c0_4, %c0_5] : memref<9x64x96xbf16, #tpu.memory_space<vmem>>, vector<1x64x96xbf16>
    %3 = vector.shape_cast %2 : vector<1x64x96xbf16> to vector<64x96xbf16>
    %cst = arith.constant dense<0.000000e+00> : vector<323x96xf32>
    %4 = tpu.matmul %1, %3, %cst {dimension_numbers = #tpu.dot_dimension_numbers<[1], [0], [0], [1], [0, 0, 1, 1], [], []>} : vector<323x64xbf16>, vector<64x96xbf16>, vector<323x96xf32> -> vector<323x96xf32>
    %c0_6 = arith.constant 0 : index
    %c0_7 = arith.constant 0 : index
    %c1 = arith.constant 1 : index
    %c0_8 = arith.constant 0 : index
    %5 = vector.load %arg1[%c0_6, %c0_7, %c1, %c0_8] : memref<1x1x363x64xbf16, #tpu.memory_space<vmem>>, vector<1x1x323x64xbf16>
    %6 = vector.shape_cast %5 : vector<1x1x323x64xbf16> to vector<323x64xbf16>
    %c1_9 = arith.constant 1 : index
    %c0_10 = arith.constant 0 : index
    %c0_11 = arith.constant 0 : index
    %7 = vector.load %arg2[%c1_9, %c0_10, %c0_11] : memref<9x64x96xbf16, #tpu.memory_space<vmem>>, vector<1x64x96xbf16>
    %8 = vector.shape_cast %7 : vector<1x64x96xbf16> to vector<64x96xbf16>
    %cst_12 = arith.constant dense<0.000000e+00> : vector<323x96xf32>
    %9 = tpu.matmul %6, %8, %cst_12 {dimension_numbers = #tpu.dot_dimension_numbers<[1], [0], [0], [1], [0, 0, 1, 1], [], []>} : vector<323x64xbf16>, vector<64x96xbf16>, vector<323x96xf32> -> vector<323x96xf32>
    %10 = arith.addf %4, %9 : vector<323x96xf32>
    %c0_13 = arith.constant 0 : index
    %c0_14 = arith.constant 0 : index
    %c2 = arith.constant 2 : index
    %c0_15 = arith.constant 0 : index
    %11 = vector.load %arg1[%c0_13, %c0_14, %c2, %c0_15] : memref<1x1x363x64xbf16, #tpu.memory_space<vmem>>, vector<1x1x323x64xbf16>
    %12 = vector.shape_cast %11 : vector<1x1x323x64xbf16> to vector<323x64xbf16>
    %c2_16 = arith.constant 2 : index
    %c0_17 = arith.constant 0 : index
    %c0_18 = arith.constant 0 : index
    %13 = vector.load %arg2[%c2_16, %c0_17, %c0_18] : memref<9x64x96xbf16, #tpu.memory_space<vmem>>, vector<1x64x96xbf16>
    %14 = vector.shape_cast %13 : vector<1x64x96xbf16> to vector<64x96xbf16>
    %cst_19 = arith.constant dense<0.000000e+00> : vector<323x96xf32>
    %15 = tpu.matmul %12, %14, %cst_19 {dimension_numbers = #tpu.dot_dimension_numbers<[1], [0], [0], [1], [0, 0, 1, 1], [], []>} : vector<323x64xbf16>, vector<64x96xbf16>, vector<323x96xf32> -> vector<323x96xf32>
    %16 = arith.addf %10, %15 : vector<323x96xf32>
    %c0_20 = arith.constant 0 : index
    %c0_21 = arith.constant 0 : index
    %c19 = arith.constant 19 : index
    %c0_22 = arith.constant 0 : index
    %17 = vector.load %arg1[%c0_20, %c0_21, %c19, %c0_22] : memref<1x1x363x64xbf16, #tpu.memory_space<vmem>>, vector<1x1x323x64xbf16>
    %18 = vector.shape_cast %17 : vector<1x1x323x64xbf16> to vector<323x64xbf16>
    %c3 = arith.constant 3 : index
    %c0_23 = arith.constant 0 : index
    %c0_24 = arith.constant 0 : index
    %19 = vector.load %arg2[%c3, %c0_23, %c0_24] : memref<9x64x96xbf16, #tpu.memory_space<vmem>>, vector<1x64x96xbf16>
    %20 = vector.shape_cast %19 : vector<1x64x96xbf16> to vector<64x96xbf16>
    %cst_25 = arith.constant dense<0.000000e+00> : vector<323x96xf32>
    %21 = tpu.matmul %18, %20, %cst_25 {dimension_numbers = #tpu.dot_dimension_numbers<[1], [0], [0], [1], [0, 0, 1, 1], [], []>} : vector<323x64xbf16>, vector<64x96xbf16>, vector<323x96xf32> -> vector<323x96xf32>
    %22 = arith.addf %16, %21 : vector<323x96xf32>
    %c0_26 = arith.constant 0 : index
    %c0_27 = arith.constant 0 : index
    %c20 = arith.constant 20 : index
    %c0_28 = arith.constant 0 : index
    %23 = vector.load %arg1[%c0_26, %c0_27, %c20, %c0_28] : memref<1x1x363x64xbf16, #tpu.memory_space<vmem>>, vector<1x1x323x64xbf16>
    %24 = vector.shape_cast %23 : vector<1x1x323x64xbf16> to vector<323x64xbf16>
    %c4 = arith.constant 4 : index
    %c0_29 = arith.constant 0 : index
    %c0_30 = arith.constant 0 : index
    %25 = vector.load %arg2[%c4, %c0_29, %c0_30] : memref<9x64x96xbf16, #tpu.memory_space<vmem>>, vector<1x64x96xbf16>
    %26 = vector.shape_cast %25 : vector<1x64x96xbf16> to vector<64x96xbf16>
    %cst_31 = arith.constant dense<0.000000e+00> : vector<323x96xf32>
    %27 = tpu.matmul %24, %26, %cst_31 {dimension_numbers = #tpu.dot_dimension_numbers<[1], [0], [0], [1], [0, 0, 1, 1], [], []>} : vector<323x64xbf16>, vector<64x96xbf16>, vector<323x96xf32> -> vector<323x96xf32>
    %28 = arith.addf %22, %27 : vector<323x96xf32>
    %c0_32 = arith.constant 0 : index
    %c0_33 = arith.constant 0 : index
    %c21 = arith.constant 21 : index
    %c0_34 = arith.constant 0 : index
    %29 = vector.load %arg1[%c0_32, %c0_33, %c21, %c0_34] : memref<1x1x363x64xbf16, #tpu.memory_space<vmem>>, vector<1x1x323x64xbf16>
    %30 = vector.shape_cast %29 : vector<1x1x323x64xbf16> to vector<323x64xbf16>
    %c5 = arith.constant 5 : index
    %c0_35 = arith.constant 0 : index
    %c0_36 = arith.constant 0 : index
    %31 = vector.load %arg2[%c5, %c0_35, %c0_36] : memref<9x64x96xbf16, #tpu.memory_space<vmem>>, vector<1x64x96xbf16>
    %32 = vector.shape_cast %31 : vector<1x64x96xbf16> to vector<64x96xbf16>
    %cst_37 = arith.constant dense<0.000000e+00> : vector<323x96xf32>
    %33 = tpu.matmul %30, %32, %cst_37 {dimension_numbers = #tpu.dot_dimension_numbers<[1], [0], [0], [1], [0, 0, 1, 1], [], []>} : vector<323x64xbf16>, vector<64x96xbf16>, vector<323x96xf32> -> vector<323x96xf32>
    %34 = arith.addf %28, %33 : vector<323x96xf32>
    %c0_38 = arith.constant 0 : index
    %c0_39 = arith.constant 0 : index
    %c38 = arith.constant 38 : index
    %c0_40 = arith.constant 0 : index
    %35 = vector.load %arg1[%c0_38, %c0_39, %c38, %c0_40] : memref<1x1x363x64xbf16, #tpu.memory_space<vmem>>, vector<1x1x323x64xbf16>
    %36 = vector.shape_cast %35 : vector<1x1x323x64xbf16> to vector<323x64xbf16>
    %c6 = arith.constant 6 : index
    %c0_41 = arith.constant 0 : index
    %c0_42 = arith.constant 0 : index
    %37 = vector.load %arg2[%c6, %c0_41, %c0_42] : memref<9x64x96xbf16, #tpu.memory_space<vmem>>, vector<1x64x96xbf16>
    %38 = vector.shape_cast %37 : vector<1x64x96xbf16> to vector<64x96xbf16>
    %cst_43 = arith.constant dense<0.000000e+00> : vector<323x96xf32>
    %39 = tpu.matmul %36, %38, %cst_43 {dimension_numbers = #tpu.dot_dimension_numbers<[1], [0], [0], [1], [0, 0, 1, 1], [], []>} : vector<323x64xbf16>, vector<64x96xbf16>, vector<323x96xf32> -> vector<323x96xf32>
    %40 = arith.addf %34, %39 : vector<323x96xf32>
    %c0_44 = arith.constant 0 : index
    %c0_45 = arith.constant 0 : index
    %c39 = arith.constant 39 : index
    %c0_46 = arith.constant 0 : index
    %41 = vector.load %arg1[%c0_44, %c0_45, %c39, %c0_46] : memref<1x1x363x64xbf16, #tpu.memory_space<vmem>>, vector<1x1x323x64xbf16>
    %42 = vector.shape_cast %41 : vector<1x1x323x64xbf16> to vector<323x64xbf16>
    %c7 = arith.constant 7 : index
    %c0_47 = arith.constant 0 : index
    %c0_48 = arith.constant 0 : index
    %43 = vector.load %arg2[%c7, %c0_47, %c0_48] : memref<9x64x96xbf16, #tpu.memory_space<vmem>>, vector<1x64x96xbf16>
    %44 = vector.shape_cast %43 : vector<1x64x96xbf16> to vector<64x96xbf16>
    %cst_49 = arith.constant dense<0.000000e+00> : vector<323x96xf32>
    %45 = tpu.matmul %42, %44, %cst_49 {dimension_numbers = #tpu.dot_dimension_numbers<[1], [0], [0], [1], [0, 0, 1, 1], [], []>} : vector<323x64xbf16>, vector<64x96xbf16>, vector<323x96xf32> -> vector<323x96xf32>
    %46 = arith.addf %40, %45 : vector<323x96xf32>
    %c0_50 = arith.constant 0 : index
    %c0_51 = arith.constant 0 : index
    %c40 = arith.constant 40 : index
    %c0_52 = arith.constant 0 : index
    %47 = vector.load %arg1[%c0_50, %c0_51, %c40, %c0_52] : memref<1x1x363x64xbf16, #tpu.memory_space<vmem>>, vector<1x1x323x64xbf16>
    %48 = vector.shape_cast %47 : vector<1x1x323x64xbf16> to vector<323x64xbf16>
    %c8 = arith.constant 8 : index
    %c0_53 = arith.constant 0 : index
    %c0_54 = arith.constant 0 : index
    %49 = vector.load %arg2[%c8, %c0_53, %c0_54] : memref<9x64x96xbf16, #tpu.memory_space<vmem>>, vector<1x64x96xbf16>
    %50 = vector.shape_cast %49 : vector<1x64x96xbf16> to vector<64x96xbf16>
    %cst_55 = arith.constant dense<0.000000e+00> : vector<323x96xf32>
    %51 = tpu.matmul %48, %50, %cst_55 {dimension_numbers = #tpu.dot_dimension_numbers<[1], [0], [0], [1], [0, 0, 1, 1], [], []>} : vector<323x64xbf16>, vector<64x96xbf16>, vector<323x96xf32> -> vector<323x96xf32>
    %52 = arith.addf %46, %51 : vector<323x96xf32>
    %c0_56 = arith.constant 0 : index
    %c0_57 = arith.constant 0 : index
    %53 = vector.load %arg3[%c0_56, %c0_57] : memref<1x96xf32, #tpu.memory_space<vmem>>, vector<1x96xf32>
    %54 = vector.broadcast %53 : vector<1x96xf32> to vector<323x96xf32>
    %55 = arith.addf %52, %54 : vector<323x96xf32>
    %cst_58 = arith.constant 0.000000e+00 : f32
    %56 = vector.broadcast %cst_58 : f32 to vector<323x96xf32>
    %57 = arith.maximumf %55, %56 : vector<323x96xf32>
    %58 = arith.truncf %57 : vector<323x96xf32> to vector<323x96xbf16>
    %c0_59 = arith.constant 0 : index
    %c0_60 = arith.constant 0 : index
    %c0_61 = arith.constant 0 : index
    %59 = vector.load %arg4[%c0_59, %c0_60, %c0_61] : memref<1x323x96xbf16, #tpu.memory_space<vmem>>, vector<1x323x96xbf16>
    %60 = vector.shape_cast %59 : vector<1x323x96xbf16> to vector<323x96xbf16>
    %61 = vector.shape_cast %58 : vector<323x96xbf16> to vector<1x323x96xbf16>
    tpu.vector_store %arg4[%c0_59, %c0_60, %c0_61], %61 {strides = array<i32>} : memref<1x323x96xbf16, #tpu.memory_space<vmem>>, vector<1x323x96xbf16>,
    return
  }
  func.func @transform_0(%arg0: i32) -> (i32, i32, i32, i32) {
    %c0_i32 = arith.constant 0 : i32
    %c0_i32_0 = arith.constant 0 : i32
    %c0_i32_1 = arith.constant 0 : i32
    %c0_i32_2 = arith.constant 0 : i32
    return %arg0, %c0_i32, %c0_i32_0, %c0_i32_1 : i32, i32, i32, i32
  }
  func.func @transform_1(%arg0: i32) -> (i32, i32, i32) {
    %c0_i32 = arith.constant 0 : i32
    %c0_i32_0 = arith.constant 0 : i32
    %c0_i32_1 = arith.constant 0 : i32
    %c0_i32_2 = arith.constant 0 : i32
    return %c0_i32, %c0_i32_0, %c0_i32_1 : i32, i32, i32
  }
  func.func @transform_2(%arg0: i32) -> (i32, i32) {
    %c0_i32 = arith.constant 0 : i32
    %c0_i32_0 = arith.constant 0 : i32
    %c0_i32_1 = arith.constant 0 : i32
    return %c0_i32, %c0_i32_0 : i32, i32
  }
  func.func @transform_3(%arg0: i32) -> (i32, i32, i32) {
    %c0_i32 = arith.constant 0 : i32
    %c0_i32_0 = arith.constant 0 : i32
    %c0_i32_1 = arith.constant 0 : i32
    return %arg0, %c0_i32, %c0_i32_0 : i32, i32, i32
  }
}

module attributes {stable_mosaic.version = 11 : i64} {
  func.func @_conv_tap_kernel(%arg0: i32, %arg1: memref<1x4x82x96xbf16, #tpu.memory_space<vmem>>, %arg2: memref<9x96x96xbf16, #tpu.memory_space<vmem>>, %arg3: memref<1x96xf32, #tpu.memory_space<vmem>>, %arg4: memref<1x72x96xf32, #tpu.memory_space<vmem>>) attributes {dimension_semantics = [#tpu.dimension_semantics<parallel>], iteration_bounds = array<i64: 2>, scalar_prefetch = 0 : i64, scratch_operands = 0 : i64, tpu.core_type = #tpu.core_type<tc>, window_params = [{transform_indices = @transform_0, window_bounds = array<i64: 1, 4, 82, 96>}, {pipeline_mode = #tpu.pipeline_mode<synchronous>, transform_indices = @transform_1, window_bounds = array<i64: 9, 96, 96>}, {pipeline_mode = #tpu.pipeline_mode<synchronous>, transform_indices = @transform_2, window_bounds = array<i64: 1, 96>}, {transform_indices = @transform_3, window_bounds = array<i64: 1, 72, 96>}]} {
    %c0 = arith.constant 0 : index
    %c0_0 = arith.constant 0 : index
    %c0_1 = arith.constant 0 : index
    %c0_2 = arith.constant 0 : index
    %0 = vector.load %arg1[%c0, %c0_0, %c0_1, %c0_2] : memref<1x4x82x96xbf16, #tpu.memory_space<vmem>>, vector<1x1x72x96xbf16>
    %1 = vector.shape_cast %0 : vector<1x1x72x96xbf16> to vector<72x96xbf16>
    %c0_3 = arith.constant 0 : index
    %c0_4 = arith.constant 0 : index
    %c0_5 = arith.constant 0 : index
    %2 = vector.load %arg2[%c0_3, %c0_4, %c0_5] : memref<9x96x96xbf16, #tpu.memory_space<vmem>>, vector<1x96x96xbf16>
    %3 = vector.shape_cast %2 : vector<1x96x96xbf16> to vector<96x96xbf16>
    %cst = arith.constant dense<0.000000e+00> : vector<72x96xf32>
    %4 = tpu.matmul %1, %3, %cst {dimension_numbers = #tpu.dot_dimension_numbers<[1], [0], [0], [1], [0, 0, 1, 1], [], []>} : vector<72x96xbf16>, vector<96x96xbf16>, vector<72x96xf32> -> vector<72x96xf32>
    %c0_6 = arith.constant 0 : index
    %c1 = arith.constant 1 : index
    %c0_7 = arith.constant 0 : index
    %c0_8 = arith.constant 0 : index
    %5 = vector.load %arg1[%c0_6, %c1, %c0_7, %c0_8] : memref<1x4x82x96xbf16, #tpu.memory_space<vmem>>, vector<1x1x72x96xbf16>
    %6 = vector.shape_cast %5 : vector<1x1x72x96xbf16> to vector<72x96xbf16>
    %c1_9 = arith.constant 1 : index
    %c0_10 = arith.constant 0 : index
    %c0_11 = arith.constant 0 : index
    %7 = vector.load %arg2[%c1_9, %c0_10, %c0_11] : memref<9x96x96xbf16, #tpu.memory_space<vmem>>, vector<1x96x96xbf16>
    %8 = vector.shape_cast %7 : vector<1x96x96xbf16> to vector<96x96xbf16>
    %cst_12 = arith.constant dense<0.000000e+00> : vector<72x96xf32>
    %9 = tpu.matmul %6, %8, %cst_12 {dimension_numbers = #tpu.dot_dimension_numbers<[1], [0], [0], [1], [0, 0, 1, 1], [], []>} : vector<72x96xbf16>, vector<96x96xbf16>, vector<72x96xf32> -> vector<72x96xf32>
    %10 = arith.addf %4, %9 : vector<72x96xf32>
    %c0_13 = arith.constant 0 : index
    %c0_14 = arith.constant 0 : index
    %c1_15 = arith.constant 1 : index
    %c0_16 = arith.constant 0 : index
    %11 = vector.load %arg1[%c0_13, %c0_14, %c1_15, %c0_16] : memref<1x4x82x96xbf16, #tpu.memory_space<vmem>>, vector<1x1x72x96xbf16>
    %12 = vector.shape_cast %11 : vector<1x1x72x96xbf16> to vector<72x96xbf16>
    %c2 = arith.constant 2 : index
    %c0_17 = arith.constant 0 : index
    %c0_18 = arith.constant 0 : index
    %13 = vector.load %arg2[%c2, %c0_17, %c0_18] : memref<9x96x96xbf16, #tpu.memory_space<vmem>>, vector<1x96x96xbf16>
    %14 = vector.shape_cast %13 : vector<1x96x96xbf16> to vector<96x96xbf16>
    %cst_19 = arith.constant dense<0.000000e+00> : vector<72x96xf32>
    %15 = tpu.matmul %12, %14, %cst_19 {dimension_numbers = #tpu.dot_dimension_numbers<[1], [0], [0], [1], [0, 0, 1, 1], [], []>} : vector<72x96xbf16>, vector<96x96xbf16>, vector<72x96xf32> -> vector<72x96xf32>
    %16 = arith.addf %10, %15 : vector<72x96xf32>
    %c0_20 = arith.constant 0 : index
    %c2_21 = arith.constant 2 : index
    %c0_22 = arith.constant 0 : index
    %c0_23 = arith.constant 0 : index
    %17 = vector.load %arg1[%c0_20, %c2_21, %c0_22, %c0_23] : memref<1x4x82x96xbf16, #tpu.memory_space<vmem>>, vector<1x1x72x96xbf16>
    %18 = vector.shape_cast %17 : vector<1x1x72x96xbf16> to vector<72x96xbf16>
    %c3 = arith.constant 3 : index
    %c0_24 = arith.constant 0 : index
    %c0_25 = arith.constant 0 : index
    %19 = vector.load %arg2[%c3, %c0_24, %c0_25] : memref<9x96x96xbf16, #tpu.memory_space<vmem>>, vector<1x96x96xbf16>
    %20 = vector.shape_cast %19 : vector<1x96x96xbf16> to vector<96x96xbf16>
    %cst_26 = arith.constant dense<0.000000e+00> : vector<72x96xf32>
    %21 = tpu.matmul %18, %20, %cst_26 {dimension_numbers = #tpu.dot_dimension_numbers<[1], [0], [0], [1], [0, 0, 1, 1], [], []>} : vector<72x96xbf16>, vector<96x96xbf16>, vector<72x96xf32> -> vector<72x96xf32>
    %22 = arith.addf %16, %21 : vector<72x96xf32>
    %c0_27 = arith.constant 0 : index
    %c3_28 = arith.constant 3 : index
    %c0_29 = arith.constant 0 : index
    %c0_30 = arith.constant 0 : index
    %23 = vector.load %arg1[%c0_27, %c3_28, %c0_29, %c0_30] : memref<1x4x82x96xbf16, #tpu.memory_space<vmem>>, vector<1x1x72x96xbf16>
    %24 = vector.shape_cast %23 : vector<1x1x72x96xbf16> to vector<72x96xbf16>
    %c4 = arith.constant 4 : index
    %c0_31 = arith.constant 0 : index
    %c0_32 = arith.constant 0 : index
    %25 = vector.load %arg2[%c4, %c0_31, %c0_32] : memref<9x96x96xbf16, #tpu.memory_space<vmem>>, vector<1x96x96xbf16>
    %26 = vector.shape_cast %25 : vector<1x96x96xbf16> to vector<96x96xbf16>
    %cst_33 = arith.constant dense<0.000000e+00> : vector<72x96xf32>
    %27 = tpu.matmul %24, %26, %cst_33 {dimension_numbers = #tpu.dot_dimension_numbers<[1], [0], [0], [1], [0, 0, 1, 1], [], []>} : vector<72x96xbf16>, vector<96x96xbf16>, vector<72x96xf32> -> vector<72x96xf32>
    %28 = arith.addf %22, %27 : vector<72x96xf32>
    %c0_34 = arith.constant 0 : index
    %c2_35 = arith.constant 2 : index
    %c1_36 = arith.constant 1 : index
    %c0_37 = arith.constant 0 : index
    %29 = vector.load %arg1[%c0_34, %c2_35, %c1_36, %c0_37] : memref<1x4x82x96xbf16, #tpu.memory_space<vmem>>, vector<1x1x72x96xbf16>
    %30 = vector.shape_cast %29 : vector<1x1x72x96xbf16> to vector<72x96xbf16>
    %c5 = arith.constant 5 : index
    %c0_38 = arith.constant 0 : index
    %c0_39 = arith.constant 0 : index
    %31 = vector.load %arg2[%c5, %c0_38, %c0_39] : memref<9x96x96xbf16, #tpu.memory_space<vmem>>, vector<1x96x96xbf16>
    %32 = vector.shape_cast %31 : vector<1x96x96xbf16> to vector<96x96xbf16>
    %cst_40 = arith.constant dense<0.000000e+00> : vector<72x96xf32>
    %33 = tpu.matmul %30, %32, %cst_40 {dimension_numbers = #tpu.dot_dimension_numbers<[1], [0], [0], [1], [0, 0, 1, 1], [], []>} : vector<72x96xbf16>, vector<96x96xbf16>, vector<72x96xf32> -> vector<72x96xf32>
    %34 = arith.addf %28, %33 : vector<72x96xf32>
    %c0_41 = arith.constant 0 : index
    %c0_42 = arith.constant 0 : index
    %c9 = arith.constant 9 : index
    %c0_43 = arith.constant 0 : index
    %35 = vector.load %arg1[%c0_41, %c0_42, %c9, %c0_43] : memref<1x4x82x96xbf16, #tpu.memory_space<vmem>>, vector<1x1x72x96xbf16>
    %36 = vector.shape_cast %35 : vector<1x1x72x96xbf16> to vector<72x96xbf16>
    %c6 = arith.constant 6 : index
    %c0_44 = arith.constant 0 : index
    %c0_45 = arith.constant 0 : index
    %37 = vector.load %arg2[%c6, %c0_44, %c0_45] : memref<9x96x96xbf16, #tpu.memory_space<vmem>>, vector<1x96x96xbf16>
    %38 = vector.shape_cast %37 : vector<1x96x96xbf16> to vector<96x96xbf16>
    %cst_46 = arith.constant dense<0.000000e+00> : vector<72x96xf32>
    %39 = tpu.matmul %36, %38, %cst_46 {dimension_numbers = #tpu.dot_dimension_numbers<[1], [0], [0], [1], [0, 0, 1, 1], [], []>} : vector<72x96xbf16>, vector<96x96xbf16>, vector<72x96xf32> -> vector<72x96xf32>
    %40 = arith.addf %34, %39 : vector<72x96xf32>
    %c0_47 = arith.constant 0 : index
    %c1_48 = arith.constant 1 : index
    %c9_49 = arith.constant 9 : index
    %c0_50 = arith.constant 0 : index
    %41 = vector.load %arg1[%c0_47, %c1_48, %c9_49, %c0_50] : memref<1x4x82x96xbf16, #tpu.memory_space<vmem>>, vector<1x1x72x96xbf16>
    %42 = vector.shape_cast %41 : vector<1x1x72x96xbf16> to vector<72x96xbf16>
    %c7 = arith.constant 7 : index
    %c0_51 = arith.constant 0 : index
    %c0_52 = arith.constant 0 : index
    %43 = vector.load %arg2[%c7, %c0_51, %c0_52] : memref<9x96x96xbf16, #tpu.memory_space<vmem>>, vector<1x96x96xbf16>
    %44 = vector.shape_cast %43 : vector<1x96x96xbf16> to vector<96x96xbf16>
    %cst_53 = arith.constant dense<0.000000e+00> : vector<72x96xf32>
    %45 = tpu.matmul %42, %44, %cst_53 {dimension_numbers = #tpu.dot_dimension_numbers<[1], [0], [0], [1], [0, 0, 1, 1], [], []>} : vector<72x96xbf16>, vector<96x96xbf16>, vector<72x96xf32> -> vector<72x96xf32>
    %46 = arith.addf %40, %45 : vector<72x96xf32>
    %c0_54 = arith.constant 0 : index
    %c0_55 = arith.constant 0 : index
    %c10 = arith.constant 10 : index
    %c0_56 = arith.constant 0 : index
    %47 = vector.load %arg1[%c0_54, %c0_55, %c10, %c0_56] : memref<1x4x82x96xbf16, #tpu.memory_space<vmem>>, vector<1x1x72x96xbf16>
    %48 = vector.shape_cast %47 : vector<1x1x72x96xbf16> to vector<72x96xbf16>
    %c8 = arith.constant 8 : index
    %c0_57 = arith.constant 0 : index
    %c0_58 = arith.constant 0 : index
    %49 = vector.load %arg2[%c8, %c0_57, %c0_58] : memref<9x96x96xbf16, #tpu.memory_space<vmem>>, vector<1x96x96xbf16>
    %50 = vector.shape_cast %49 : vector<1x96x96xbf16> to vector<96x96xbf16>
    %cst_59 = arith.constant dense<0.000000e+00> : vector<72x96xf32>
    %51 = tpu.matmul %48, %50, %cst_59 {dimension_numbers = #tpu.dot_dimension_numbers<[1], [0], [0], [1], [0, 0, 1, 1], [], []>} : vector<72x96xbf16>, vector<96x96xbf16>, vector<72x96xf32> -> vector<72x96xf32>
    %52 = arith.addf %46, %51 : vector<72x96xf32>
    %c0_60 = arith.constant 0 : index
    %c0_61 = arith.constant 0 : index
    %53 = vector.load %arg3[%c0_60, %c0_61] : memref<1x96xf32, #tpu.memory_space<vmem>>, vector<1x96xf32>
    %54 = vector.broadcast %53 : vector<1x96xf32> to vector<72x96xf32>
    %55 = arith.addf %52, %54 : vector<72x96xf32>
    %cst_62 = arith.constant 0.000000e+00 : f32
    %56 = vector.broadcast %cst_62 : f32 to vector<72x96xf32>
    %57 = arith.maximumf %55, %56 : vector<72x96xf32>
    %c0_63 = arith.constant 0 : index
    %c0_64 = arith.constant 0 : index
    %c0_65 = arith.constant 0 : index
    %58 = vector.load %arg4[%c0_63, %c0_64, %c0_65] : memref<1x72x96xf32, #tpu.memory_space<vmem>>, vector<1x72x96xf32>
    %59 = vector.shape_cast %58 : vector<1x72x96xf32> to vector<72x96xf32>
    %60 = vector.shape_cast %57 : vector<72x96xf32> to vector<1x72x96xf32>
    tpu.vector_store %arg4[%c0_63, %c0_64, %c0_65], %60 {strides = array<i32>} : memref<1x72x96xf32, #tpu.memory_space<vmem>>, vector<1x72x96xf32>,
    return
  }
  func.func @transform_0(%arg0: i32) -> (i32, i32, i32, i32) {
    %c0_i32 = arith.constant 0 : i32
    %c0_i32_0 = arith.constant 0 : i32
    %c0_i32_1 = arith.constant 0 : i32
    %c0_i32_2 = arith.constant 0 : i32
    return %arg0, %c0_i32, %c0_i32_0, %c0_i32_1 : i32, i32, i32, i32
  }
  func.func @transform_1(%arg0: i32) -> (i32, i32, i32) {
    %c0_i32 = arith.constant 0 : i32
    %c0_i32_0 = arith.constant 0 : i32
    %c0_i32_1 = arith.constant 0 : i32
    %c0_i32_2 = arith.constant 0 : i32
    return %c0_i32, %c0_i32_0, %c0_i32_1 : i32, i32, i32
  }
  func.func @transform_2(%arg0: i32) -> (i32, i32) {
    %c0_i32 = arith.constant 0 : i32
    %c0_i32_0 = arith.constant 0 : i32
    %c0_i32_1 = arith.constant 0 : i32
    return %c0_i32, %c0_i32_0 : i32, i32
  }
  func.func @transform_3(%arg0: i32) -> (i32, i32, i32) {
    %c0_i32 = arith.constant 0 : i32
    %c0_i32_0 = arith.constant 0 : i32
    %c0_i32_1 = arith.constant 0 : i32
    return %arg0, %c0_i32, %c0_i32_0 : i32, i32, i32
  }
}

module attributes {stable_mosaic.version = 11 : i64} {
  func.func @_conv_tap_kernel(%arg0: i32, %arg1: memref<1x4x82x32xbf16, #tpu.memory_space<vmem>>, %arg2: memref<9x32x384xbf16, #tpu.memory_space<vmem>>, %arg3: memref<1x384xf32, #tpu.memory_space<vmem>>, %arg4: memref<1x72x384xf32, #tpu.memory_space<vmem>>) attributes {dimension_semantics = [#tpu.dimension_semantics<parallel>], iteration_bounds = array<i64: 2>, scalar_prefetch = 0 : i64, scratch_operands = 0 : i64, tpu.core_type = #tpu.core_type<tc>, window_params = [{transform_indices = @transform_0, window_bounds = array<i64: 1, 4, 82, 32>}, {pipeline_mode = #tpu.pipeline_mode<synchronous>, transform_indices = @transform_1, window_bounds = array<i64: 9, 32, 384>}, {pipeline_mode = #tpu.pipeline_mode<synchronous>, transform_indices = @transform_2, window_bounds = array<i64: 1, 384>}, {transform_indices = @transform_3, window_bounds = array<i64: 1, 72, 384>}]} {
    %c0 = arith.constant 0 : index
    %c0_0 = arith.constant 0 : index
    %c0_1 = arith.constant 0 : index
    %c0_2 = arith.constant 0 : index
    %0 = vector.load %arg1[%c0, %c0_0, %c0_1, %c0_2] : memref<1x4x82x32xbf16, #tpu.memory_space<vmem>>, vector<1x1x72x32xbf16>
    %1 = vector.shape_cast %0 : vector<1x1x72x32xbf16> to vector<72x32xbf16>
    %c0_3 = arith.constant 0 : index
    %c0_4 = arith.constant 0 : index
    %c0_5 = arith.constant 0 : index
    %2 = vector.load %arg2[%c0_3, %c0_4, %c0_5] : memref<9x32x384xbf16, #tpu.memory_space<vmem>>, vector<1x32x384xbf16>
    %3 = vector.shape_cast %2 : vector<1x32x384xbf16> to vector<32x384xbf16>
    %cst = arith.constant dense<0.000000e+00> : vector<72x384xf32>
    %4 = tpu.matmul %1, %3, %cst {dimension_numbers = #tpu.dot_dimension_numbers<[1], [0], [0], [1], [0, 0, 1, 1], [], []>} : vector<72x32xbf16>, vector<32x384xbf16>, vector<72x384xf32> -> vector<72x384xf32>
    %c0_6 = arith.constant 0 : index
    %c1 = arith.constant 1 : index
    %c0_7 = arith.constant 0 : index
    %c0_8 = arith.constant 0 : index
    %5 = vector.load %arg1[%c0_6, %c1, %c0_7, %c0_8] : memref<1x4x82x32xbf16, #tpu.memory_space<vmem>>, vector<1x1x72x32xbf16>
    %6 = vector.shape_cast %5 : vector<1x1x72x32xbf16> to vector<72x32xbf16>
    %c1_9 = arith.constant 1 : index
    %c0_10 = arith.constant 0 : index
    %c0_11 = arith.constant 0 : index
    %7 = vector.load %arg2[%c1_9, %c0_10, %c0_11] : memref<9x32x384xbf16, #tpu.memory_space<vmem>>, vector<1x32x384xbf16>
    %8 = vector.shape_cast %7 : vector<1x32x384xbf16> to vector<32x384xbf16>
    %cst_12 = arith.constant dense<0.000000e+00> : vector<72x384xf32>
    %9 = tpu.matmul %6, %8, %cst_12 {dimension_numbers = #tpu.dot_dimension_numbers<[1], [0], [0], [1], [0, 0, 1, 1], [], []>} : vector<72x32xbf16>, vector<32x384xbf16>, vector<72x384xf32> -> vector<72x384xf32>
    %10 = arith.addf %4, %9 : vector<72x384xf32>
    %c0_13 = arith.constant 0 : index
    %c0_14 = arith.constant 0 : index
    %c1_15 = arith.constant 1 : index
    %c0_16 = arith.constant 0 : index
    %11 = vector.load %arg1[%c0_13, %c0_14, %c1_15, %c0_16] : memref<1x4x82x32xbf16, #tpu.memory_space<vmem>>, vector<1x1x72x32xbf16>
    %12 = vector.shape_cast %11 : vector<1x1x72x32xbf16> to vector<72x32xbf16>
    %c2 = arith.constant 2 : index
    %c0_17 = arith.constant 0 : index
    %c0_18 = arith.constant 0 : index
    %13 = vector.load %arg2[%c2, %c0_17, %c0_18] : memref<9x32x384xbf16, #tpu.memory_space<vmem>>, vector<1x32x384xbf16>
    %14 = vector.shape_cast %13 : vector<1x32x384xbf16> to vector<32x384xbf16>
    %cst_19 = arith.constant dense<0.000000e+00> : vector<72x384xf32>
    %15 = tpu.matmul %12, %14, %cst_19 {dimension_numbers = #tpu.dot_dimension_numbers<[1], [0], [0], [1], [0, 0, 1, 1], [], []>} : vector<72x32xbf16>, vector<32x384xbf16>, vector<72x384xf32> -> vector<72x384xf32>
    %16 = arith.addf %10, %15 : vector<72x384xf32>
    %c0_20 = arith.constant 0 : index
    %c2_21 = arith.constant 2 : index
    %c0_22 = arith.constant 0 : index
    %c0_23 = arith.constant 0 : index
    %17 = vector.load %arg1[%c0_20, %c2_21, %c0_22, %c0_23] : memref<1x4x82x32xbf16, #tpu.memory_space<vmem>>, vector<1x1x72x32xbf16>
    %18 = vector.shape_cast %17 : vector<1x1x72x32xbf16> to vector<72x32xbf16>
    %c3 = arith.constant 3 : index
    %c0_24 = arith.constant 0 : index
    %c0_25 = arith.constant 0 : index
    %19 = vector.load %arg2[%c3, %c0_24, %c0_25] : memref<9x32x384xbf16, #tpu.memory_space<vmem>>, vector<1x32x384xbf16>
    %20 = vector.shape_cast %19 : vector<1x32x384xbf16> to vector<32x384xbf16>
    %cst_26 = arith.constant dense<0.000000e+00> : vector<72x384xf32>
    %21 = tpu.matmul %18, %20, %cst_26 {dimension_numbers = #tpu.dot_dimension_numbers<[1], [0], [0], [1], [0, 0, 1, 1], [], []>} : vector<72x32xbf16>, vector<32x384xbf16>, vector<72x384xf32> -> vector<72x384xf32>
    %22 = arith.addf %16, %21 : vector<72x384xf32>
    %c0_27 = arith.constant 0 : index
    %c3_28 = arith.constant 3 : index
    %c0_29 = arith.constant 0 : index
    %c0_30 = arith.constant 0 : index
    %23 = vector.load %arg1[%c0_27, %c3_28, %c0_29, %c0_30] : memref<1x4x82x32xbf16, #tpu.memory_space<vmem>>, vector<1x1x72x32xbf16>
    %24 = vector.shape_cast %23 : vector<1x1x72x32xbf16> to vector<72x32xbf16>
    %c4 = arith.constant 4 : index
    %c0_31 = arith.constant 0 : index
    %c0_32 = arith.constant 0 : index
    %25 = vector.load %arg2[%c4, %c0_31, %c0_32] : memref<9x32x384xbf16, #tpu.memory_space<vmem>>, vector<1x32x384xbf16>
    %26 = vector.shape_cast %25 : vector<1x32x384xbf16> to vector<32x384xbf16>
    %cst_33 = arith.constant dense<0.000000e+00> : vector<72x384xf32>
    %27 = tpu.matmul %24, %26, %cst_33 {dimension_numbers = #tpu.dot_dimension_numbers<[1], [0], [0], [1], [0, 0, 1, 1], [], []>} : vector<72x32xbf16>, vector<32x384xbf16>, vector<72x384xf32> -> vector<72x384xf32>
    %28 = arith.addf %22, %27 : vector<72x384xf32>
    %c0_34 = arith.constant 0 : index
    %c2_35 = arith.constant 2 : index
    %c1_36 = arith.constant 1 : index
    %c0_37 = arith.constant 0 : index
    %29 = vector.load %arg1[%c0_34, %c2_35, %c1_36, %c0_37] : memref<1x4x82x32xbf16, #tpu.memory_space<vmem>>, vector<1x1x72x32xbf16>
    %30 = vector.shape_cast %29 : vector<1x1x72x32xbf16> to vector<72x32xbf16>
    %c5 = arith.constant 5 : index
    %c0_38 = arith.constant 0 : index
    %c0_39 = arith.constant 0 : index
    %31 = vector.load %arg2[%c5, %c0_38, %c0_39] : memref<9x32x384xbf16, #tpu.memory_space<vmem>>, vector<1x32x384xbf16>
    %32 = vector.shape_cast %31 : vector<1x32x384xbf16> to vector<32x384xbf16>
    %cst_40 = arith.constant dense<0.000000e+00> : vector<72x384xf32>
    %33 = tpu.matmul %30, %32, %cst_40 {dimension_numbers = #tpu.dot_dimension_numbers<[1], [0], [0], [1], [0, 0, 1, 1], [], []>} : vector<72x32xbf16>, vector<32x384xbf16>, vector<72x384xf32> -> vector<72x384xf32>
    %34 = arith.addf %28, %33 : vector<72x384xf32>
    %c0_41 = arith.constant 0 : index
    %c0_42 = arith.constant 0 : index
    %c9 = arith.constant 9 : index
    %c0_43 = arith.constant 0 : index
    %35 = vector.load %arg1[%c0_41, %c0_42, %c9, %c0_43] : memref<1x4x82x32xbf16, #tpu.memory_space<vmem>>, vector<1x1x72x32xbf16>
    %36 = vector.shape_cast %35 : vector<1x1x72x32xbf16> to vector<72x32xbf16>
    %c6 = arith.constant 6 : index
    %c0_44 = arith.constant 0 : index
    %c0_45 = arith.constant 0 : index
    %37 = vector.load %arg2[%c6, %c0_44, %c0_45] : memref<9x32x384xbf16, #tpu.memory_space<vmem>>, vector<1x32x384xbf16>
    %38 = vector.shape_cast %37 : vector<1x32x384xbf16> to vector<32x384xbf16>
    %cst_46 = arith.constant dense<0.000000e+00> : vector<72x384xf32>
    %39 = tpu.matmul %36, %38, %cst_46 {dimension_numbers = #tpu.dot_dimension_numbers<[1], [0], [0], [1], [0, 0, 1, 1], [], []>} : vector<72x32xbf16>, vector<32x384xbf16>, vector<72x384xf32> -> vector<72x384xf32>
    %40 = arith.addf %34, %39 : vector<72x384xf32>
    %c0_47 = arith.constant 0 : index
    %c1_48 = arith.constant 1 : index
    %c9_49 = arith.constant 9 : index
    %c0_50 = arith.constant 0 : index
    %41 = vector.load %arg1[%c0_47, %c1_48, %c9_49, %c0_50] : memref<1x4x82x32xbf16, #tpu.memory_space<vmem>>, vector<1x1x72x32xbf16>
    %42 = vector.shape_cast %41 : vector<1x1x72x32xbf16> to vector<72x32xbf16>
    %c7 = arith.constant 7 : index
    %c0_51 = arith.constant 0 : index
    %c0_52 = arith.constant 0 : index
    %43 = vector.load %arg2[%c7, %c0_51, %c0_52] : memref<9x32x384xbf16, #tpu.memory_space<vmem>>, vector<1x32x384xbf16>
    %44 = vector.shape_cast %43 : vector<1x32x384xbf16> to vector<32x384xbf16>
    %cst_53 = arith.constant dense<0.000000e+00> : vector<72x384xf32>
    %45 = tpu.matmul %42, %44, %cst_53 {dimension_numbers = #tpu.dot_dimension_numbers<[1], [0], [0], [1], [0, 0, 1, 1], [], []>} : vector<72x32xbf16>, vector<32x384xbf16>, vector<72x384xf32> -> vector<72x384xf32>
    %46 = arith.addf %40, %45 : vector<72x384xf32>
    %c0_54 = arith.constant 0 : index
    %c0_55 = arith.constant 0 : index
    %c10 = arith.constant 10 : index
    %c0_56 = arith.constant 0 : index
    %47 = vector.load %arg1[%c0_54, %c0_55, %c10, %c0_56] : memref<1x4x82x32xbf16, #tpu.memory_space<vmem>>, vector<1x1x72x32xbf16>
    %48 = vector.shape_cast %47 : vector<1x1x72x32xbf16> to vector<72x32xbf16>
    %c8 = arith.constant 8 : index
    %c0_57 = arith.constant 0 : index
    %c0_58 = arith.constant 0 : index
    %49 = vector.load %arg2[%c8, %c0_57, %c0_58] : memref<9x32x384xbf16, #tpu.memory_space<vmem>>, vector<1x32x384xbf16>
    %50 = vector.shape_cast %49 : vector<1x32x384xbf16> to vector<32x384xbf16>
    %cst_59 = arith.constant dense<0.000000e+00> : vector<72x384xf32>
    %51 = tpu.matmul %48, %50, %cst_59 {dimension_numbers = #tpu.dot_dimension_numbers<[1], [0], [0], [1], [0, 0, 1, 1], [], []>} : vector<72x32xbf16>, vector<32x384xbf16>, vector<72x384xf32> -> vector<72x384xf32>
    %52 = arith.addf %46, %51 : vector<72x384xf32>
    %c0_60 = arith.constant 0 : index
    %c0_61 = arith.constant 0 : index
    %53 = vector.load %arg3[%c0_60, %c0_61] : memref<1x384xf32, #tpu.memory_space<vmem>>, vector<1x384xf32>
    %54 = vector.broadcast %53 : vector<1x384xf32> to vector<72x384xf32>
    %55 = arith.addf %52, %54 : vector<72x384xf32>
    %cst_62 = arith.constant 0.000000e+00 : f32
    %56 = vector.broadcast %cst_62 : f32 to vector<72x384xf32>
    %57 = arith.maximumf %55, %56 : vector<72x384xf32>
    %c0_63 = arith.constant 0 : index
    %c0_64 = arith.constant 0 : index
    %c0_65 = arith.constant 0 : index
    %58 = vector.load %arg4[%c0_63, %c0_64, %c0_65] : memref<1x72x384xf32, #tpu.memory_space<vmem>>, vector<1x72x384xf32>
    %59 = vector.shape_cast %58 : vector<1x72x384xf32> to vector<72x384xf32>
    %60 = vector.shape_cast %57 : vector<72x384xf32> to vector<1x72x384xf32>
    tpu.vector_store %arg4[%c0_63, %c0_64, %c0_65], %60 {strides = array<i32>} : memref<1x72x384xf32, #tpu.memory_space<vmem>>, vector<1x72x384xf32>,
    return
  }
  func.func @transform_0(%arg0: i32) -> (i32, i32, i32, i32) {
    %c0_i32 = arith.constant 0 : i32
    %c0_i32_0 = arith.constant 0 : i32
    %c0_i32_1 = arith.constant 0 : i32
    %c0_i32_2 = arith.constant 0 : i32
    return %arg0, %c0_i32, %c0_i32_0, %c0_i32_1 : i32, i32, i32, i32
  }
  func.func @transform_1(%arg0: i32) -> (i32, i32, i32) {
    %c0_i32 = arith.constant 0 : i32
    %c0_i32_0 = arith.constant 0 : i32
    %c0_i32_1 = arith.constant 0 : i32
    %c0_i32_2 = arith.constant 0 : i32
    return %c0_i32, %c0_i32_0, %c0_i32_1 : i32, i32, i32
  }
  func.func @transform_2(%arg0: i32) -> (i32, i32) {
    %c0_i32 = arith.constant 0 : i32
    %c0_i32_0 = arith.constant 0 : i32
    %c0_i32_1 = arith.constant 0 : i32
    return %c0_i32, %c0_i32_0 : i32, i32
  }
  func.func @transform_3(%arg0: i32) -> (i32, i32, i32) {
    %c0_i32 = arith.constant 0 : i32
    %c0_i32_0 = arith.constant 0 : i32
    %c0_i32_1 = arith.constant 0 : i32
    return %arg0, %c0_i32, %c0_i32_0 : i32, i32, i32
  }
}

module attributes {stable_mosaic.version = 11 : i64} {
  func.func @_pool_tap_kernel(%arg0: i32, %arg1: memref<1x4x82x32xf32, #tpu.memory_space<vmem>>, %arg2: memref<1x72x32xf32, #tpu.memory_space<vmem>>) attributes {dimension_semantics = [#tpu.dimension_semantics<parallel>], iteration_bounds = array<i64: 2>, scalar_prefetch = 0 : i64, scratch_operands = 0 : i64, tpu.core_type = #tpu.core_type<tc>, window_params = [{transform_indices = @transform_0, window_bounds = array<i64: 1, 4, 82, 32>}, {transform_indices = @transform_1, window_bounds = array<i64: 1, 72, 32>}]} {
    %c0 = arith.constant 0 : index
    %c0_0 = arith.constant 0 : index
    %c0_1 = arith.constant 0 : index
    %c0_2 = arith.constant 0 : index
    %0 = vector.load %arg1[%c0, %c0_0, %c0_1, %c0_2] : memref<1x4x82x32xf32, #tpu.memory_space<vmem>>, vector<1x1x72x32xf32>
    %1 = vector.shape_cast %0 : vector<1x1x72x32xf32> to vector<72x32xf32>
    %c0_3 = arith.constant 0 : index
    %c1 = arith.constant 1 : index
    %c0_4 = arith.constant 0 : index
    %c0_5 = arith.constant 0 : index
    %2 = vector.load %arg1[%c0_3, %c1, %c0_4, %c0_5] : memref<1x4x82x32xf32, #tpu.memory_space<vmem>>, vector<1x1x72x32xf32>
    %3 = vector.shape_cast %2 : vector<1x1x72x32xf32> to vector<72x32xf32>
    %4 = arith.maximumf %1, %3 : vector<72x32xf32>
    %c0_6 = arith.constant 0 : index
    %c0_7 = arith.constant 0 : index
    %c1_8 = arith.constant 1 : index
    %c0_9 = arith.constant 0 : index
    %5 = vector.load %arg1[%c0_6, %c0_7, %c1_8, %c0_9] : memref<1x4x82x32xf32, #tpu.memory_space<vmem>>, vector<1x1x72x32xf32>
    %6 = vector.shape_cast %5 : vector<1x1x72x32xf32> to vector<72x32xf32>
    %7 = arith.maximumf %4, %6 : vector<72x32xf32>
    %c0_10 = arith.constant 0 : index
    %c2 = arith.constant 2 : index
    %c0_11 = arith.constant 0 : index
    %c0_12 = arith.constant 0 : index
    %8 = vector.load %arg1[%c0_10, %c2, %c0_11, %c0_12] : memref<1x4x82x32xf32, #tpu.memory_space<vmem>>, vector<1x1x72x32xf32>
    %9 = vector.shape_cast %8 : vector<1x1x72x32xf32> to vector<72x32xf32>
    %10 = arith.maximumf %7, %9 : vector<72x32xf32>
    %c0_13 = arith.constant 0 : index
    %c3 = arith.constant 3 : index
    %c0_14 = arith.constant 0 : index
    %c0_15 = arith.constant 0 : index
    %11 = vector.load %arg1[%c0_13, %c3, %c0_14, %c0_15] : memref<1x4x82x32xf32, #tpu.memory_space<vmem>>, vector<1x1x72x32xf32>
    %12 = vector.shape_cast %11 : vector<1x1x72x32xf32> to vector<72x32xf32>
    %13 = arith.maximumf %10, %12 : vector<72x32xf32>
    %c0_16 = arith.constant 0 : index
    %c2_17 = arith.constant 2 : index
    %c1_18 = arith.constant 1 : index
    %c0_19 = arith.constant 0 : index
    %14 = vector.load %arg1[%c0_16, %c2_17, %c1_18, %c0_19] : memref<1x4x82x32xf32, #tpu.memory_space<vmem>>, vector<1x1x72x32xf32>
    %15 = vector.shape_cast %14 : vector<1x1x72x32xf32> to vector<72x32xf32>
    %16 = arith.maximumf %13, %15 : vector<72x32xf32>
    %c0_20 = arith.constant 0 : index
    %c0_21 = arith.constant 0 : index
    %c9 = arith.constant 9 : index
    %c0_22 = arith.constant 0 : index
    %17 = vector.load %arg1[%c0_20, %c0_21, %c9, %c0_22] : memref<1x4x82x32xf32, #tpu.memory_space<vmem>>, vector<1x1x72x32xf32>
    %18 = vector.shape_cast %17 : vector<1x1x72x32xf32> to vector<72x32xf32>
    %19 = arith.maximumf %16, %18 : vector<72x32xf32>
    %c0_23 = arith.constant 0 : index
    %c1_24 = arith.constant 1 : index
    %c9_25 = arith.constant 9 : index
    %c0_26 = arith.constant 0 : index
    %20 = vector.load %arg1[%c0_23, %c1_24, %c9_25, %c0_26] : memref<1x4x82x32xf32, #tpu.memory_space<vmem>>, vector<1x1x72x32xf32>
    %21 = vector.shape_cast %20 : vector<1x1x72x32xf32> to vector<72x32xf32>
    %22 = arith.maximumf %19, %21 : vector<72x32xf32>
    %c0_27 = arith.constant 0 : index
    %c0_28 = arith.constant 0 : index
    %c10 = arith.constant 10 : index
    %c0_29 = arith.constant 0 : index
    %23 = vector.load %arg1[%c0_27, %c0_28, %c10, %c0_29] : memref<1x4x82x32xf32, #tpu.memory_space<vmem>>, vector<1x1x72x32xf32>
    %24 = vector.shape_cast %23 : vector<1x1x72x32xf32> to vector<72x32xf32>
    %25 = arith.maximumf %22, %24 : vector<72x32xf32>
    %c0_30 = arith.constant 0 : index
    %c0_31 = arith.constant 0 : index
    %c0_32 = arith.constant 0 : index
    %26 = vector.load %arg2[%c0_30, %c0_31, %c0_32] : memref<1x72x32xf32, #tpu.memory_space<vmem>>, vector<1x72x32xf32>
    %27 = vector.shape_cast %26 : vector<1x72x32xf32> to vector<72x32xf32>
    %28 = vector.shape_cast %25 : vector<72x32xf32> to vector<1x72x32xf32>
    tpu.vector_store %arg2[%c0_30, %c0_31, %c0_32], %28 {strides = array<i32>} : memref<1x72x32xf32, #tpu.memory_space<vmem>>, vector<1x72x32xf32>,
    return
  }
  func.func @transform_0(%arg0: i32) -> (i32, i32, i32, i32) {
    %c0_i32 = arith.constant 0 : i32
    %c0_i32_0 = arith.constant 0 : i32
    %c0_i32_1 = arith.constant 0 : i32
    %c0_i32_2 = arith.constant 0 : i32
    return %arg0, %c0_i32, %c0_i32_0, %c0_i32_1 : i32, i32, i32, i32
  }
  func.func @transform_1(%arg0: i32) -> (i32, i32, i32) {
    %c0_i32 = arith.constant 0 : i32
    %c0_i32_0 = arith.constant 0 : i32
    %c0_i32_1 = arith.constant 0 : i32
    return %arg0, %c0_i32, %c0_i32_0 : i32, i32, i32
  }
}

</mosaic_0001>

<bundles_post_ra>
// kernel: inception_b_forward.6
= control target key start
LH: loop header
LB: loop body
LE: loop exit
PB: predicated region body
PF: predicated region fallthrough
CT: control target
= control target key end

     0   :  { %s1142_s12 = smov 0   ;;  %s1372_s0 = inlined_call_operand.vmem [shape: bf16[2,1,289,32], index: 0, kind: input, shape index: {}]   ;;  %s1373_s1 = inlined_call_operand.vmem [shape: bf16[1,32,64], index: 1, kind: input, shape index: {}]   ;;  %s1374_s2 = inlined_call_operand.vmem [shape: f32[1,64], index: 2, kind: input, shape index: {}]   ;;  %s1375_s3 = inlined_call_operand.vmem [shape: bf16[2,289,64], index: 3, kind: output, shape index: {}]  }
   0x1 LB: > { %s851_s13 = sadd.s32 4294967295, %s1118_s12   ;;  %p855_p0 = scmp.ge.s32.totalorder %s1118_s12, 1  ;;  %s1118_s12 = sphi %s1142_s12, %s13_s12  }
   0x2   : > { %p137_p1 = scmp.lt.s32.totalorder %s1118_s12, 3 }
   0x4   : > { %p138_p2 = pnand %p855_p0, %p137_p1 }
   0x5   : > { %v1091_v0 = vld [vmem:[%s1373_s1] sm:$0xff] (!%p138_p2)   ;;  %v1120_v1 = vmov (!%p138_p2), 0.0   ;;  %v1092_v2 = vld [vmem:[%s1373_s1 + $0x8] sm:$0xff] (!%p138_p2)   ;;  %p161_p3 = scmp.lt.s32.totalorder (!%p138_p2), %s851_s13, 1  ;;  %vm1121_vm0 = vmmov (!%p138_p2), 0   ;;  %vm325_vm1 = vcmask (!%p138_p2), 261120  }
   0x6   : > { %141 = sbr.rel (%p138_p2) target bundleno = 311 (0x137), region = 32  ;;  %996 = vmatprep.subr.bf16.mxu0 (!%p138_p2), %v1120_v1  ;;  %1076 = vmatprep.subr.bf16.mxu1 (!%p138_p2), %v1120_v1  ;;  %v1249_v22 = vld [vmem:[%s1374_s2] ss:$0 sm:$0xff] (!%p138_p2)  ;;  %vm753_vm2 = vcmask (!%p138_p2), 519168   ;;  %vm790_vm3 = vcmask (!%p138_p2), 516096  }
   0x7   : > { %997 = vmatpush3.bf16.msra.mxu0 (!%p138_p2), %v1091_v0  ;;  %1078 = vmatpush3.bf16.msra.mxu1 (!%p138_p2), %v1091_v0  ;;  %vm791_vm4 = vsmask.f32 (!%p138_p2), 256 }
   0x8   : > { %998 = vmatprep.subr.bf16.mxu0 (!%p138_p2), %v1120_v1  ;;  %1000 = vmatprep.mubr.msk.bf16.mxu0 (!%p138_p2), %vm1121_vm0, %v1120_v1  ;;  %vm792_vm5 = vmand (!%p138_p2), %vm790_vm3, %vm791_vm4 }
   0x9   : > { %1077 = vmatprep.subr.bf16.mxu1 (!%p138_p2), %v1120_v1  ;;  %1040 = vmatprep.mubr.msk.bf16.mxu1 (!%p138_p2), %vm1121_vm0, %v1120_v1 }
   0xb   : > { %999 = vmatpush3.bf16.msra.mxu0 (!%p138_p2), %v1092_v2  ;;  %1079 = vmatpush3.bf16.msra.mxu1 (!%p138_p2), %v1092_v2 }
   0xd   : > { %s1377_s13 = smov (!%p161_p3, %s851_s13), 1 }
   0xe   : > { %s1080_s18 = smul.u32 148, %s1377_s13 }
  0x10   : > { %s1172_s21 = scalar_lea.vmem %s1372_s0, %s1080_s18  ;;  %s1259_s26 = scalar_lea.vmem %s1375_s3, %s1080_s18 }
  0x11   : > { %v1093_v3 = vld [vmem:[%s1172_s21] sm:$0xff]   ;;  %v1094_v4 = vld [vmem:[%s1172_s21 + $0x50] sm:$0xff]   ;;  %v1095_v5 = vld [vmem:[%s1172_s21 + $0x8] sm:$0xff]  }
  0x12   : > { %1001 = vmatmul.mubr.msk.bf16.vlgmr.msra.gmra.mrb[0].mxu0 %vm325_vm1, %v1093_v3  ;;  %1041 = vmatmul.mubr.msk.bf16.vlgmr.msra.gmra.mrb[0].mxu1 %vm325_vm1, %v1094_v4  ;;  %v1096_v6 = vld [vmem:[%s1172_s21 + $0x58] sm:$0xff]   ;;  %v1097_v7 = vld [vmem:[%s1172_s21 + $0x10] sm:$0xff]   ;;  %v1098_v8 = vld [vmem:[%s1172_s21 + $0x60] sm:$0xff]  }
  0x13   : > { %1004 = vmatprep.mubr.msk.bf16.mxu0 %vm1121_vm0, %v1120_v1  ;;  %1044 = vmatprep.mubr.msk.bf16.mxu1 %vm1121_vm0, %v1120_v1  ;;  %v1099_v9 = vld [vmem:[%s1172_s21 + $0x18] sm:$0xff]   ;;  %v1100_v10 = vld [vmem:[%s1172_s21 + $0x68] sm:$0xff]   ;;  %v1101_v11 = vld [vmem:[%s1172_s21 + $0x20] sm:$0xff]  }
  0x14   : > { %v1102_v12 = vld [vmem:[%s1172_s21 + $0x70] sm:$0xff]   ;;  %v1103_v13 = vld [vmem:[%s1172_s21 + $0x28] sm:$0xff]   ;;  %v1104_v14 = vld [vmem:[%s1172_s21 + $0x78] sm:$0xff]  }
  0x15   : > { %v1105_v15 = vld [vmem:[%s1172_s21 + $0x30] sm:$0xff]   ;;  %v1106_v16 = vld [vmem:[%s1172_s21 + $0x80] sm:$0xff]   ;;  %v1107_v17 = vld [vmem:[%s1172_s21 + $0x38] sm:$0xff]  }
  0x16   : > { %v1108_v18 = vld [vmem:[%s1172_s21 + $0x88] sm:$0xff]   ;;  %v1109_v19 = vld [vmem:[%s1172_s21 + $0x40] sm:$0xff]   ;;  %v1110_v20 = vld [vmem:[%s1172_s21 + $0x90] ss:$0 sps:$4 sm:$0x11]  }
  0x17   : > { %v1111_v21 = vld [vmem:[%s1172_s21 + $0x48] sm:$0xff]  }
  0x1a   : > { %1005 = vmatmul.mubr.msk.bf16.gmra.mrb[4].mxu0 %vm325_vm1, %v1095_v5  ;;  %1045 = vmatmul.mubr.msk.bf16.gmra.mrb[4].mxu1 %vm325_vm1, %v1096_v6 }
  0x1b   : > { %1008 = vmatprep.mubr.msk.bf16.mxu0 %vm1121_vm0, %v1120_v1  ;;  %1048 = vmatprep.mubr.msk.bf16.mxu1 %vm1121_vm0, %v1120_v1 }
  0x22   : > { %1009 = vmatmul.mubr.msk.bf16.gmra.mrb[8].mxu0 %vm325_vm1, %v1097_v7  ;;  %1049 = vmatmul.mubr.msk.bf16.gmra.mrb[8].mxu1 %vm325_vm1, %v1098_v8 }
  0x23   : > { %1012 = vmatprep.mubr.msk.bf16.mxu0 %vm1121_vm0, %v1120_v1  ;;  %1052 = vmatprep.mubr.msk.bf16.mxu1 %vm1121_vm0, %v1120_v1 }
  0x2a   : > { %1013 = vmatmul.mubr.msk.bf16.gmra.mrb[12].mxu0 %vm325_vm1, %v1099_v9  ;;  %1053 = vmatmul.mubr.msk.bf16.gmra.mrb[12].mxu1 %vm325_vm1, %v1100_v10 }
  0x2b   : > { %1016 = vmatprep.mubr.msk.bf16.mxu0 %vm1121_vm0, %v1120_v1  ;;  %1056 = vmatprep.mubr.msk.bf16.mxu1 %vm1121_vm0, %v1120_v1 }
  0x32   : > { %1017 = vmatmul.mubr.msk.bf16.gmra.mrb[16].mxu0 %vm325_vm1, %v1101_v11  ;;  %1057 = vmatmul.mubr.msk.bf16.gmra.mrb[16].mxu1 %vm325_vm1, %v1102_v12 }
  0x33   : > { %1020 = vmatprep.mubr.msk.bf16.mxu0 %vm1121_vm0, %v1120_v1  ;;  %1060 = vmatprep.mubr.msk.bf16.mxu1 %vm1121_vm0, %v1120_v1 }
  0x3a   : > { %1021 = vmatmul.mubr.msk.bf16.gmra.mrb[20].mxu0 %vm325_vm1, %v1103_v13  ;;  %1061 = vmatmul.mubr.msk.bf16.gmra.mrb[20].mxu1 %vm325_vm1, %v1104_v14 }
  0x3b   : > { %1024 = vmatprep.mubr.msk.bf16.mxu0 %vm1121_vm0, %v1120_v1  ;;  %1064 = vmatprep.mubr.msk.bf16.mxu1 %vm1121_vm0, %v1120_v1 }
  0x42   : > { %1025 = vmatmul.mubr.msk.bf16.gmra.mrb[24].mxu0 %vm325_vm1, %v1105_v15  ;;  %1065 = vmatmul.mubr.msk.bf16.gmra.mrb[24].mxu1 %vm325_vm1, %v1106_v16 }
  0x43   : > { %1028 = vmatprep.mubr.msk.bf16.mxu0 %vm1121_vm0, %v1120_v1  ;;  %1068 = vmatprep.mubr.msk.bf16.mxu1 %vm1121_vm0, %v1120_v1 }
  0x4a   : > { %1029 = vmatmul.mubr.msk.bf16.gmra.mrb[28].mxu0 %vm325_vm1, %v1107_v17  ;;  %1069 = vmatmul.mubr.msk.bf16.gmra.mrb[28].mxu1 %vm325_vm1, %v1108_v18 }
  0x4b   : > { %1032 = vmatprep.mubr.msk.bf16.mxu0 %vm1121_vm0, %v1120_v1  ;;  %1072 = vmatprep.mubr.msk.bf16.mxu1 %vm1121_vm0, %v1120_v1 }
  0x52   : > { %1033 = vmatmul.mubr.msk.bf16.gmra.mrb[32].mxu0 %vm325_vm1, %v1109_v19  ;;  %1073 = vmatmul.mubr.msk.bf16.gmra.mrb[32].mxu1 %vm325_vm1, %v1110_v20 }
  0x53   : > { %1036 = vmatprep.mubr.msk.bf16.mxu0 %vm1121_vm0, %v1120_v1 }
  0x5a   : > { %1037 = vmatmul.mubr.msk.bf16.gmra.mrb[36].mxu0 %vm325_vm1, %v1111_v21 }
  0xe5   : > { %v417_v23 = vpop.f32.mrb[0].mxu0  ;;  %v497_v26 = vpop.f32.mrb[0].mxu1 }
  0xe6   : > { %v418_v24 = vadd.f32 %v1249_v22, %v417_v23  ;;  %v1002_v25 = vpop.f32.mrb[1].mxu0  ;;  %v498_v28 = vadd.f32 %v1249_v22, %v497_v26  ;;  %v1042_v29 = vpop.f32.mrb[1].mxu1 }
  0xe7   : > { %v420_v27 = vpop.f32.mrb[2].mxu0  ;;  %v500_v33 = vpop.f32.mrb[2].mxu1 }
  0xe8   : > { %v567_v30 = vmax.f32 %v418_v24, 0.0  ;;  %v421_v31 = vadd.f32 %v1249_v22, %v420_v27  ;;  %v1003_v32 = vpop.f32.mrb[3].mxu0  ;;  %v587_v34 = vmax.f32 %v498_v28, 0.0  ;;  %v501_v35 = vadd.f32 %v1249_v22, %v500_v33  ;;  %v1043_v36 = vpop.f32.mrb[3].mxu1 }
  0xea   : > { %v938_v37 = vpack.c.bf16 %v567_v30, %v567_v30  ;;  %v568_v38 = vmax.f32 %v421_v31, 0.0  ;;  %v958_v39 = vpack.c.bf16 %v587_v34, %v587_v34  ;;  %v588_v40 = vmax.f32 %v501_v35, 0.0 }
  0xec   : > { %754 = vst.msk [vmem:[%s1259_s26] sm:$0xf] %vm753_vm2, %v938_v37  ;;  %v939_v41 = vpack.c.bf16 %v568_v38, %v568_v38  ;;  %774 = vst.msk [vmem:[%s1259_s26 + $0x50] sm:$0xf] %vm753_vm2, %v958_v39  ;;  %v959_v43 = vpack.c.bf16 %v588_v40, %v588_v40 }
  0xed   : > { %v425_v42 = vpop.f32.mrb[4].mxu0  ;;  %v505_v46 = vpop.f32.mrb[4].mxu1 }
  0xee   : > { %755 = vst.msk [vmem:[%s1259_s26 + $0x4] sm:$0xf] %vm753_vm2, %v939_v41  ;;  %v426_v44 = vadd.f32 %v1249_v22, %v425_v42  ;;  %v1006_v45 = vpop.f32.mrb[5].mxu0  ;;  %775 = vst.msk [vmem:[%s1259_s26 + $0x54] sm:$0xf] %vm753_vm2, %v959_v43  ;;  %v506_v48 = vadd.f32 %v1249_v22, %v505_v46  ;;  %v1046_v49 = vpop.f32.mrb[5].mxu1 }
  0xef   : > { %v428_v47 = vpop.f32.mrb[6].mxu0  ;;  %v508_v53 = vpop.f32.mrb[6].mxu1 }
  0xf0   : > { %v569_v50 = vmax.f32 %v426_v44, 0.0  ;;  %v429_v51 = vadd.f32 %v1249_v22, %v428_v47  ;;  %v1007_v52 = vpop.f32.mrb[7].mxu0  ;;  %v589_v54 = vmax.f32 %v506_v48, 0.0  ;;  %v509_v55 = vadd.f32 %v1249_v22, %v508_v53  ;;  %v1047_v56 = vpop.f32.mrb[7].mxu1 }
  0xf2   : > { %v940_v57 = vpack.c.bf16 %v569_v50, %v569_v50  ;;  %v570_v58 = vmax.f32 %v429_v51, 0.0  ;;  %v960_v59 = vpack.c.bf16 %v589_v54, %v589_v54  ;;  %v590_v60 = vmax.f32 %v509_v55, 0.0 }
  0xf4   : > { %756 = vst.msk [vmem:[%s1259_s26 + $0x8] sm:$0xf] %vm753_vm2, %v940_v57  ;;  %v941_v61 = vpack.c.bf16 %v570_v58, %v570_v58  ;;  %776 = vst.msk [vmem:[%s1259_s26 + $0x58] sm:$0xf] %vm753_vm2, %v960_v59  ;;  %v961_v63 = vpack.c.bf16 %v590_v60, %v590_v60 }
  0xf5   : > { %v433_v62 = vpop.f32.mrb[8].mxu0  ;;  %v513_v2 = vpop.f32.mrb[8].mxu1 }
  0xf6   : > { %757 = vst.msk [vmem:[%s1259_s26 + $0xc] sm:$0xf] %vm753_vm2, %v941_v61  ;;  %v434_v0 = vadd.f32 %v1249_v22, %v433_v62  ;;  %v1010_v1 = vpop.f32.mrb[9].mxu0  ;;  %777 = vst.msk [vmem:[%s1259_s26 + $0x5c] sm:$0xf] %vm753_vm2, %v961_v63  ;;  %v514_v4 = vadd.f32 %v1249_v22, %v513_v2  ;;  %v1050_v5 = vpop.f32.mrb[9].mxu1 }
  0xf7   : > { %v436_v3 = vpop.f32.mrb[10].mxu0  ;;  %v516_v9 = vpop.f32.mrb[10].mxu1 }
  0xf8   : > { %v571_v6 = vmax.f32 %v434_v0, 0.0  ;;  %v437_v7 = vadd.f32 %v1249_v22, %v436_v3  ;;  %v1011_v8 = vpop.f32.mrb[11].mxu0  ;;  %v591_v10 = vmax.f32 %v514_v4, 0.0  ;;  %v517_v11 = vadd.f32 %v1249_v22, %v516_v9  ;;  %v1051_v12 = vpop.f32.mrb[11].mxu1 }
  0xfa   : > { %v942_v13 = vpack.c.bf16 %v571_v6, %v571_v6  ;;  %v572_v14 = vmax.f32 %v437_v7, 0.0  ;;  %v962_v15 = vpack.c.bf16 %v591_v10, %v591_v10  ;;  %v592_v16 = vmax.f32 %v517_v11, 0.0 }
  0xfc   : > { %758 = vst.msk [vmem:[%s1259_s26 + $0x10] sm:$0xf] %vm753_vm2, %v942_v13  ;;  %v943_v17 = vpack.c.bf16 %v572_v14, %v572_v14  ;;  %778 = vst.msk [vmem:[%s1259_s26 + $0x60] sm:$0xf] %vm753_vm2, %v962_v15  ;;  %v963_v19 = vpack.c.bf16 %v592_v16, %v592_v16 }
  0xfd   : > { %v441_v18 = vpop.f32.mrb[12].mxu0  ;;  %v521_v23 = vpop.f32.mrb[12].mxu1 }
  0xfe   : > { %759 = vst.msk [vmem:[%s1259_s26 + $0x14] sm:$0xf] %vm753_vm2, %v943_v17  ;;  %v442_v20 = vadd.f32 %v1249_v22, %v441_v18  ;;  %v1014_v21 = vpop.f32.mrb[13].mxu0  ;;  %779 = vst.msk [vmem:[%s1259_s26 + $0x64] sm:$0xf] %vm753_vm2, %v963_v19  ;;  %v522_v25 = vadd.f32 %v1249_v22, %v521_v23  ;;  %v1054_v26 = vpop.f32.mrb[13].mxu1 }
  0xff   : > { %v444_v24 = vpop.f32.mrb[14].mxu0  ;;  %v524_v30 = vpop.f32.mrb[14].mxu1 }
 0x100   : > { %v573_v27 = vmax.f32 %v442_v20, 0.0  ;;  %v445_v28 = vadd.f32 %v1249_v22, %v444_v24  ;;  %v1015_v29 = vpop.f32.mrb[15].mxu0  ;;  %v593_v31 = vmax.f32 %v522_v25, 0.0  ;;  %v525_v32 = vadd.f32 %v1249_v22, %v524_v30  ;;  %v1055_v33 = vpop.f32.mrb[15].mxu1 }
 0x102   : > { %v944_v34 = vpack.c.bf16 %v573_v27, %v573_v27  ;;  %v574_v35 = vmax.f32 %v445_v28, 0.0  ;;  %v964_v36 = vpack.c.bf16 %v593_v31, %v593_v31  ;;  %v594_v37 = vmax.f32 %v525_v32, 0.0 }
 0x104   : > { %760 = vst.msk [vmem:[%s1259_s26 + $0x18] sm:$0xf] %vm753_vm2, %v944_v34  ;;  %v945_v38 = vpack.c.bf16 %v574_v35, %v574_v35  ;;  %780 = vst.msk [vmem:[%s1259_s26 + $0x68] sm:$0xf] %vm753_vm2, %v964_v36  ;;  %v965_v40 = vpack.c.bf16 %v594_v37, %v594_v37 }
 0x105   : > { %v449_v39 = vpop.f32.mrb[16].mxu0  ;;  %v529_v43 = vpop.f32.mrb[16].mxu1 }
 0x106   : > { %761 = vst.msk [vmem:[%s1259_s26 + $0x1c] sm:$0xf] %vm753_vm2, %v945_v38  ;;  %v450_v41 = vadd.f32 %v1249_v22, %v449_v39  ;;  %v1018_v42 = vpop.f32.mrb[17].mxu0  ;;  %781 = vst.msk [vmem:[%s1259_s26 + $0x6c] sm:$0xf] %vm753_vm2, %v965_v40  ;;  %v530_v45 = vadd.f32 %v1249_v22, %v529_v43  ;;  %v1058_v46 = vpop.f32.mrb[17].mxu1 }
 0x107   : > { %v452_v44 = vpop.f32.mrb[18].mxu0  ;;  %v532_v50 = vpop.f32.mrb[18].mxu1 }
 0x108   : > { %v575_v47 = vmax.f32 %v450_v41, 0.0  ;;  %v453_v48 = vadd.f32 %v1249_v22, %v452_v44  ;;  %v1019_v49 = vpop.f32.mrb[19].mxu0  ;;  %v595_v51 = vmax.f32 %v530_v45, 0.0  ;;  %v533_v52 = vadd.f32 %v1249_v22, %v532_v50  ;;  %v1059_v53 = vpop.f32.mrb[19].mxu1 }
 0x10a   : > { %v946_v54 = vpack.c.bf16 %v575_v47, %v575_v47  ;;  %v576_v55 = vmax.f32 %v453_v48, 0.0  ;;  %v966_v56 = vpack.c.bf16 %v595_v51, %v595_v51  ;;  %v596_v57 = vmax.f32 %v533_v52, 0.0 }
 0x10c   : > { %762 = vst.msk [vmem:[%s1259_s26 + $0x20] sm:$0xf] %vm753_vm2, %v946_v54  ;;  %v947_v58 = vpack.c.bf16 %v576_v55, %v576_v55  ;;  %782 = vst.msk [vmem:[%s1259_s26 + $0x70] sm:$0xf] %vm753_vm2, %v966_v56  ;;  %v967_v60 = vpack.c.bf16 %v596_v57, %v596_v57 }
 0x10d   : > { %v457_v59 = vpop.f32.mrb[20].mxu0  ;;  %v537_v63 = vpop.f32.mrb[20].mxu1 }
 0x10e   : > { %763 = vst.msk [vmem:[%s1259_s26 + $0x24] sm:$0xf] %vm753_vm2, %v947_v58  ;;  %v458_v61 = vadd.f32 %v1249_v22, %v457_v59  ;;  %v1022_v62 = vpop.f32.mrb[21].mxu0  ;;  %783 = vst.msk [vmem:[%s1259_s26 + $0x74] sm:$0xf] %vm753_vm2, %v967_v60  ;;  %v538_v1 = vadd.f32 %v1249_v22, %v537_v63  ;;  %v1062_v2 = vpop.f32.mrb[21].mxu1 }
 0x10f   : > { %v460_v0 = vpop.f32.mrb[22].mxu0  ;;  %v540_v6 = vpop.f32.mrb[22].mxu1 }
 0x110   : > { %v577_v3 = vmax.f32 %v458_v61, 0.0  ;;  %v461_v4 = vadd.f32 %v1249_v22, %v460_v0  ;;  %v1023_v5 = vpop.f32.mrb[23].mxu0  ;;  %v597_v7 = vmax.f32 %v538_v1, 0.0  ;;  %v541_v8 = vadd.f32 %v1249_v22, %v540_v6  ;;  %v1063_v9 = vpop.f32.mrb[23].mxu1 }
 0x112   : > { %v948_v10 = vpack.c.bf16 %v577_v3, %v577_v3  ;;  %v578_v11 = vmax.f32 %v461_v4, 0.0  ;;  %v968_v12 = vpack.c.bf16 %v597_v7, %v597_v7  ;;  %v598_v13 = vmax.f32 %v541_v8, 0.0  ;;  %v793_v8 = vld [vmem:[%s1259_s26 + $0x90] sm:$0x1] }
 0x114   : > { %764 = vst.msk [vmem:[%s1259_s26 + $0x28] sm:$0xf] %vm753_vm2, %v948_v10  ;;  %v949_v14 = vpack.c.bf16 %v578_v11, %v578_v11  ;;  %784 = vst.msk [vmem:[%s1259_s26 + $0x78] sm:$0xf] %vm753_vm2, %v968_v12  ;;  %v969_v16 = vpack.c.bf16 %v598_v13, %v598_v13 }
 0x115   : > { %v465_v15 = vpop.f32.mrb[24].mxu0  ;;  %v545_v19 = vpop.f32.mrb[24].mxu1 }
 0x116   : > { %765 = vst.msk [vmem:[%s1259_s26 + $0x2c] sm:$0xf] %vm753_vm2, %v949_v14  ;;  %v466_v17 = vadd.f32 %v1249_v22, %v465_v15  ;;  %v1026_v18 = vpop.f32.mrb[25].mxu0  ;;  %785 = vst.msk [vmem:[%s1259_s26 + $0x7c] sm:$0xf] %vm753_vm2, %v969_v16  ;;  %v546_v21 = vadd.f32 %v1249_v22, %v545_v19  ;;  %v1066_v23 = vpop.f32.mrb[25].mxu1 }
 0x117   : > { %v468_v20 = vpop.f32.mrb[26].mxu0  ;;  %v548_v27 = vpop.f32.mrb[26].mxu1 }
 0x118   : > { %v579_v24 = vmax.f32 %v466_v17, 0.0  ;;  %v469_v25 = vadd.f32 %v1249_v22, %v468_v20  ;;  %v1027_v26 = vpop.f32.mrb[27].mxu0  ;;  %v599_v28 = vmax.f32 %v546_v21, 0.0  ;;  %v549_v29 = vadd.f32 %v1249_v22, %v548_v27  ;;  %v1067_v30 = vpop.f32.mrb[27].mxu1 }
 0x11a   : > { %v950_v31 = vpack.c.bf16 %v579_v24, %v579_v24  ;;  %v580_v32 = vmax.f32 %v469_v25, 0.0  ;;  %v970_v33 = vpack.c.bf16 %v599_v28, %v599_v28  ;;  %v600_v34 = vmax.f32 %v549_v29, 0.0 }
 0x11c   : > { %766 = vst.msk [vmem:[%s1259_s26 + $0x30] sm:$0xf] %vm753_vm2, %v950_v31  ;;  %v951_v35 = vpack.c.bf16 %v580_v32, %v580_v32  ;;  %786 = vst.msk [vmem:[%s1259_s26 + $0x80] sm:$0xf] %vm753_vm2, %v970_v33  ;;  %v971_v37 = vpack.c.bf16 %v600_v34, %v600_v34 }
 0x11d   : > { %v473_v36 = vpop.f32.mrb[28].mxu0  ;;  %v553_v40 = vpop.f32.mrb[28].mxu1 }
 0x11e   : > { %767 = vst.msk [vmem:[%s1259_s26 + $0x34] sm:$0xf] %vm753_vm2, %v951_v35  ;;  %v474_v38 = vadd.f32 %v1249_v22, %v473_v36  ;;  %v1030_v39 = vpop.f32.mrb[29].mxu0  ;;  %787 = vst.msk [vmem:[%s1259_s26 + $0x84] sm:$0xf] %vm753_vm2, %v971_v37  ;;  %v554_v42 = vadd.f32 %v1249_v22, %v553_v40  ;;  %v1070_v43 = vpop.f32.mrb[29].mxu1 }
 0x11f   : > { %v476_v41 = vpop.f32.mrb[30].mxu0  ;;  %v556_v47 = vpop.f32.mrb[30].mxu1 }
 0x120   : > { %v581_v44 = vmax.f32 %v474_v38, 0.0  ;;  %v477_v45 = vadd.f32 %v1249_v22, %v476_v41  ;;  %v1031_v46 = vpop.f32.mrb[31].mxu0  ;;  %v601_v48 = vmax.f32 %v554_v42, 0.0  ;;  %v557_v49 = vadd.f32 %v1249_v22, %v556_v47  ;;  %v1071_v50 = vpop.f32.mrb[31].mxu1 }
 0x122   : > { %v952_v51 = vpack.c.bf16 %v581_v44, %v581_v44  ;;  %v582_v52 = vmax.f32 %v477_v45, 0.0  ;;  %v972_v53 = vpack.c.bf16 %v601_v48, %v601_v48  ;;  %v602_v54 = vmax.f32 %v557_v49, 0.0 }
 0x124   : > { %768 = vst.msk [vmem:[%s1259_s26 + $0x38] sm:$0xf] %vm753_vm2, %v952_v51  ;;  %v953_v55 = vpack.c.bf16 %v582_v52, %v582_v52  ;;  %788 = vst.msk [vmem:[%s1259_s26 + $0x88] sm:$0xf] %vm753_vm2, %v972_v53  ;;  %v973_v57 = vpack.c.bf16 %v602_v54, %v602_v54 }
 0x125   : > { %v481_v56 = vpop.f32.mrb[32].mxu0  ;;  %v561_v60 = vpop.f32.mrb[32].mxu1 }
 0x126   : > { %769 = vst.msk [vmem:[%s1259_s26 + $0x3c] sm:$0xf] %vm753_vm2, %v953_v55  ;;  %v482_v58 = vadd.f32 %v1249_v22, %v481_v56  ;;  %v1034_v59 = vpop.f32.mrb[33].mxu0  ;;  %789 = vst.msk [vmem:[%s1259_s26 + $0x8c] sm:$0xf] %vm753_vm2, %v973_v57  ;;  %v562_v62 = vadd.f32 %v1249_v22, %v561_v60  ;;  %v1074_v63 = vpop.f32.mrb[33].mxu1 }
 0x127   : > { %v484_v61 = vpop.f32.mrb[34].mxu0  ;;  %v564_v3 = vpop.f32.mrb[34].mxu1 }
 0x128   : > { %v583_v0 = vmax.f32 %v482_v58, 0.0  ;;  %v485_v1 = vadd.f32 %v1249_v22, %v484_v61  ;;  %v1035_v2 = vpop.f32.mrb[35].mxu0  ;;  %v603_v4 = vmax.f32 %v562_v62, 0.0  ;;  %v1075_v5 = vpop.f32.mrb[35].mxu1 }
 0x12a   : > { %v954_v6 = vpack.c.bf16 %v583_v0, %v583_v0  ;;  %v584_v7 = vmax.f32 %v485_v1, 0.0  ;;  %v974_v9 = vpack.c.bf16 %v603_v4, %v603_v4 }
 0x12c   : > { %770 = vst.msk [vmem:[%s1259_s26 + $0x40] sm:$0xf] %vm753_vm2, %v954_v6  ;;  %v955_v10 = vpack.c.bf16 %v584_v7, %v584_v7  ;;  %v794_v11 = vsel %vm792_vm5, %v974_v9, %v793_v8 }
 0x12d   : > { %v489_v12 = vpop.f32.mrb[36].mxu0  ;;  %795 = vst [vmem:[%s1259_s26 + $0x90] sm:$0x1] %v794_v11 }
 0x12e   : > { %771 = vst.msk [vmem:[%s1259_s26 + $0x44] sm:$0xf] %vm753_vm2, %v955_v10  ;;  %v490_v13 = vadd.f32 %v1249_v22, %v489_v12  ;;  %v1038_v14 = vpop.f32.mrb[37].mxu0 }
 0x12f   : > { %v492_v15 = vpop.f32.mrb[38].mxu0 }
 0x130   : > { %v585_v16 = vmax.f32 %v490_v13, 0.0  ;;  %v493_v17 = vadd.f32 %v1249_v22, %v492_v15  ;;  %v1039_v18 = vpop.f32.mrb[39].mxu0 }
 0x132   : > { %v956_v19 = vpack.c.bf16 %v585_v16, %v585_v16  ;;  %v586_v20 = vmax.f32 %v493_v17, 0.0 }
 0x134   : > { %772 = vst.msk [vmem:[%s1259_s26 + $0x48] sm:$0xf] %vm753_vm2, %v956_v19  ;;  %v957_v21 = vpack.c.bf16 %v586_v20, %v586_v20 }
 0x136   : > { %773 = vst.msk [vmem:[%s1259_s26 + $0x4c] sm:$0xf] %vm753_vm2, %v957_v21 }
 0x137 PF: > { %s13_s12 = sadd.s32 1, %s1118_s12  }
 0x138   : > { %p10_p4 = scmp.ge.s32.totalorder %s13_s12, 4  }
 0x13a   :  { %12 = sbr.rel (!%p10_p4) target bundleno = 1 (0x1), region = 62 }

// kernel: inception_b_forward.7
= control target key start
LH: loop header
LB: loop body
LE: loop exit
PB: predicated region body
PF: predicated region fallthrough
CT: control target
= control target key end

     0   :  { %s6395_s12 = smov 0   ;;  %s8803_s0 = inlined_call_operand.vmem [shape: bf16[2,1,363,64], index: 0, kind: input, shape index: {}]   ;;  %s8804_s1 = inlined_call_operand.vmem [shape: bf16[9,64,96], index: 1, kind: input, shape index: {}]   ;;  %s8805_s2 = inlined_call_operand.vmem [shape: f32[1,96], index: 2, kind: input, shape index: {}]   ;;  %s8806_s3 = inlined_call_operand.vmem [shape: bf16[2,323,96], index: 3, kind: output, shape index: {}]  }
   0x1 LB: > { %s4699_s13 = sadd.s32 4294967295, %s6371_s12   ;;  %p4703_p0 = scmp.ge.s32.totalorder %s6371_s12, 1  ;;  %s6371_s12 = sphi %s6395_s12, %s13_s12  }
   0x2   : > { %p137_p1 = scmp.lt.s32.totalorder %s6371_s12, 3 }
   0x4   : > { %p138_p2 = pnand %p4703_p0, %p137_p1 }
   0x6   : > { %141 = sbr.rel (%p138_p2) target bundleno = 1004 (0x3ec), region = 32 }
   0xd   : > { %v6241_v0 = vld [vmem:[%s8804_s1 + $0x20] sm:$0xff]   ;;  %v8835_v1 = vmov 0.0   ;;  %v6242_v2 = vld [vmem:[%s8804_s1 + $0x28] sm:$0xff]   ;;  %p161_p3 = scmp.lt.s32.totalorder %s4699_s13, 1  ;;  %vm6374_vm0 = vmmov 0   ;;  %v6243_v3 = vld [vmem:[%s8804_s1 + $0x30] sm:$0xff]  }
   0xe   : > { %5393 = vmatprep.subr.bf16.mxu0 %v8835_v1  ;;  %6221 = vmatprep.subr.bf16.mxu1 %v8835_v1  ;;  %v6244_v4 = vld [vmem:[%s8804_s1 + $0x38] sm:$0xff]   ;;  %vm333_vm1 = vsmask.f32 7424  ;;  %vm525_vm2 = vcmask 523264   ;;  %v6249_v21 = vld [vmem:[%s8804_s1 + $0x40] sm:$0xff]   ;;  %v6255_v32 = vld [vmem:[%s8804_s1 + $0x48] sm:$0xff]  }
   0xf   : > { %5394 = vmatpush3.bf16.msra.mxu0 %v6241_v0  ;;  %6225 = vmatpush3.bf16.msra.mxu1 %v6241_v0  ;;  %s9220_s13 = smov (!%p161_p3, %s4699_s13), 1  ;;  %v6250_v29 = vld [vmem:[%s8804_s1] sm:$0xff]   ;;  %v6258_v37 = vld [vmem:[%s8804_s1 + $0x8] sm:$0xff]   ;;  %v6263_v47 = vld [vmem:[%s8804_s1 + $0x50] sm:$0xff]   ;;  %vm1072_vm3 = vcmask 1046528   ;;  %vm2129_vm5 = vcmask 1045504  }
  0x10   : > { %5395 = vmatprep.subr.bf16.mxu0 %v8835_v1  ;;  %6222 = vmatprep.subr.bf16.mxu1 %v8835_v1  ;;  %s6229_s20 = smul.u32 184, %s9220_s13  ;;  %v6264_v48 = vld [vmem:[%s8804_s1 + $0x10] sm:$0xff]   ;;  %vm1595_vm4 = vsmask.f32 6400  ;;  %vm2508_vm6 = vsmask.f32 5376 }
  0x11   : > { %5401 = vmatprep.mubr.msk.bf16.mxu0 %vm6374_vm0, %v8835_v1  ;;  %5445 = vmatprep.mubr.msk.bf16.mxu1 %vm6374_vm0, %v8835_v1  ;;  %vm3086_vm7 = vcmask 1044480   ;;  %vm3465_vm8 = vsmask.f32 4352  ;;  %s6230_s18 = smul.u32 164, %s9220_s13  ;;  %vm4597_vm9 = vcmask 781312   ;;  %vm4638_vm10 = vcmask 779264  }
  0x12   : > { %s6431_s25 = scalar_lea.vmem %s8803_s0, %s6229_s20  ;;  %vm4639_vm11 = vsmask.f32 1280 }
  0x13   : > { %5396 = vmatpush3.bf16.msra.mxu0 %v6242_v2  ;;  %6226 = vmatpush3.bf16.msra.mxu1 %v6242_v2  ;;  %v172_v5 = vld [vmem:[%s6431_s25] sm:$0xf]  ;;  %v6435_v6 = vld [vmem:[%s6431_s25 + $0x4] sm:$0xf]  ;;  %v6441_v8 = vld [vmem:[%s6431_s25 + $0x8] sm:$0xff]   ;;  %s8640_s21 = scalar_lea.vmem %s8806_s3, %s6230_s18 }
  0x14   : > { %5397 = vmatprep.subr.bf16.mxu0 %v8835_v1  ;;  %6223 = vmatprep.subr.bf16.mxu1 %v8835_v1  ;;  %v6438_v7 = vcombine.low %v172_v5, %v6435_v6  ;;  %v342_v11 = vshll.u32 %v6441_v8, 16  ;;  %v6449_v12 = vld [vmem:[%s6431_s25 + $0x58] sm:$0xff]   ;;  %v6452_v13 = vld [vmem:[%s6431_s25 + $0x60] sm:$0xff]   ;;  %v6455_v14 = vld [vmem:[%s6431_s25 + $0x10] sm:$0xff]   ;;  %v346_v22 = vshrl.u32 %v6441_v8, 16 }
  0x15   : > { %v6458_v15 = vld [vmem:[%s6431_s25 + $0x68] sm:$0xff]   ;;  %v422_v18 = vshll.u32 %v6449_v12, 16  ;;  %v426_v19 = vshrl.u32 %v6449_v12, 16  ;;  %v430_v20 = vshll.u32 %v6452_v13, 16  ;;  %v350_v25 = vshll.u32 %v6455_v14, 16  ;;  %v6487_v36 = vld [vmem:[%s6431_s25 + $0x18] sm:$0xff]   ;;  %vm4640_vm12 = vmand %vm4638_vm10, %vm4639_vm11 }
  0x16   : > { %v335_v9 = vshrl.u32 %v6438_v7, 16  ;;  %v337_v10 = vshll.u32 %v6438_v7, 16  ;;  %v344_v17 = vrot.slane %v342_v11, 1  ;;  %v434_v30 = vshrl.u32 %v6452_v13, 16  ;;  %v6497_v40 = vld [vmem:[%s6431_s25 + $0x70] sm:$0xff]   ;;  %v6518_v51 = vld [vmem:[%s6431_s25 + $0x20] sm:$0xff]  }
  0x17   : > { %5398 = vmatpush3.bf16.msra.mxu0 %v6243_v3  ;;  %6227 = vmatpush3.bf16.msra.mxu1 %v6243_v3  ;;  %v6469_v24 = vrot.slane %v422_v18, 1  ;;  %v432_v26 = vrot.slane %v430_v20, 1  ;;  %v438_v31 = vshll.u32 %v6458_v15, 16  ;;  %v352_v35 = vrot.slane %v350_v25, 1  ;;  %v6522_v52 = vld [vmem:[%s6431_s25 + $0x78] sm:$0xff]   ;;  %v6533_v59 = vld [vmem:[%s6431_s25 + $0x28] sm:$0xff]  }
  0x18   : > { %5399 = vmatprep.subr.bf16.mxu0 %v8835_v1  ;;  %6224 = vmatprep.subr.bf16.mxu1 %v8835_v1  ;;  %v339_v16 = vrot.slane %v337_v10, 1  ;;  %v348_v34 = vor.u32 %v346_v22, %v344_v17  ;;  %v354_v42 = vshrl.u32 %v6455_v14, 16  ;;  %v358_v43 = vshll.u32 %v6487_v36, 16  ;;  %v6538_v62 = vld [vmem:[%s6431_s25 + $0x80] sm:$0xff]   ;;  %v6542_v63 = vld [vmem:[%s6431_s25 + $0x30] sm:$0xff]   ;;  %v6545_v0 = vld [vmem:[%s6431_s25 + $0x88] sm:$0xff]  }
  0x19   : > { %v428_v28 = vor.u32 %v426_v19, %v6469_v24  ;;  %v436_v38 = vor.u32 %v434_v30, %v432_v26  ;;  %v440_v39 = vrot.slane %v438_v31, 1  ;;  %v442_v45 = vshrl.u32 %v6458_v15, 16  ;;  %v6272_v10 = vld [vmem:[%s8804_s1 + $0x58] sm:$0xff]   ;;  %v6558_v11 = vld [vmem:[%s6431_s25 + $0x50] sm:$0xff]  }
  0x1a   : > { %v340_v23 = vor.u32 %v339_v16, %v335_v9  ;;  %v353_v41 = vsel %vm333_vm1, %v348_v34, %v352_v35  ;;  %v446_v46 = vshll.u32 %v6497_v40, 16  ;;  %v356_v49 = vor.u32 %v354_v42, %v352_v35  ;;  %v6564_v18 = vld [vmem:[%s6431_s25 + $0x38] sm:$0xff]  }
  0x1b   : > { %5400 = vmatpush3.bf16.msra.mxu0 %v6244_v4  ;;  %6228 = vmatpush3.bf16.msra.mxu1 %v6244_v4  ;;  %v433_v33 = vsel %vm333_vm1, %v428_v28, %v432_v26  ;;  %v441_v44 = vsel %vm333_vm1, %v436_v38, %v440_v39  ;;  %v360_v50 = vrot.slane %v358_v43, 1  ;;  %v444_v53 = vor.u32 %v442_v45, %v440_v39  ;;  %v6271_v4 = vld [vmem:[%s8804_s1 + $0x18] sm:$0xff]  }
  0x1c   : > { %5577 = vmatprep.subr.bf16.mxu0 %v8835_v1  ;;  %5485 = vmatprep.subr.bf16.mxu1 %v8835_v1  ;;  %v345_v27 = vsel %vm333_vm1, %v340_v23, %v344_v17  ;;  %v448_v54 = vrot.slane %v446_v46, 1  ;;  %v362_v56 = vshrl.u32 %v6487_v36, 16  ;;  %v366_v57 = vshll.u32 %v6518_v51, 16  ;;  %v6598_v46 = vld [vmem:[%s6431_s25 + $0x40] sm:$0xff]  }
  0x1d   : > { %v361_v55 = vsel %vm333_vm1, %v356_v49, %v360_v50  ;;  %v454_v58 = vshll.u32 %v6522_v52, 16  ;;  %v450_v61 = vshrl.u32 %v6497_v40, 16  ;;  %v374_v9 = vshll.u32 %v6533_v59, 16 }
  0x1e   : > { %5402 = vmatmul.mubr.msk.bf16.vlgmr.msra.gmra.mrb[0].mxu0 %vm525_vm2, %v345_v27  ;;  %5446 = vmatmul.mubr.msk.bf16.vlgmr.msra.gmra.mrb[0].mxu1 %vm525_vm2, %v433_v33  ;;  %v449_v60 = vsel %vm333_vm1, %v444_v53, %v448_v54  ;;  %v364_v2 = vor.u32 %v362_v56, %v360_v50  ;;  %v368_v3 = vrot.slane %v366_v57, 1  ;;  %v462_v17 = vshll.u32 %v6538_v62, 16 }
  0x1f   : > { %5578 = vmatpush3.bf16.msra.mxu0 %v6249_v21  ;;  %5405 = vmatprep.mubr.msk.bf16.mxu0 %vm6374_vm0, %v8835_v1  ;;  %v456_v5 = vrot.slane %v454_v58, 1  ;;  %v452_v16 = vor.u32 %v450_v61, %v448_v54  ;;  %v382_v19 = vshll.u32 %v6542_v63, 16  ;;  %v414_v20 = vshll.u32 %v6558_v11, 16  ;;  %v6611_v54 = vld [vmem:[%s6431_s25 + $0x98] sm:$0xff]   ;;  %v6621_v61 = vld [vmem:[%s6431_s25 + $0x48] sm:$0xff]  }
  0x20   : > { %5579 = vmatprep.subr.bf16.mxu0 %v8835_v1  ;;  %5449 = vmatprep.mubr.msk.bf16.mxu1 %vm6374_vm0, %v8835_v1  ;;  %v418_v21 = vshrl.u32 %v6558_v11, 16  ;;  %v369_v22 = vsel %vm333_vm1, %v364_v2, %v368_v3  ;;  %v370_v23 = vshrl.u32 %v6518_v51, 16  ;;  %v458_v25 = vshrl.u32 %v6522_v52, 16 }
  0x21   : > { %5486 = vmatpush3.bf16.msra.mxu1 %v6250_v29  ;;  %v470_v26 = vshll.u32 %v6545_v0, 16  ;;  %v376_v27 = vrot.slane %v374_v9, 1  ;;  %v6575_v28 = vrot.slane %v414_v20, 1  ;;  %v457_v29 = vsel %vm333_vm1, %v452_v16, %v456_v5 }
  0x22   : > { %5487 = vmatprep.subr.bf16.mxu1 %v8835_v1  ;;  %v464_v30 = vrot.slane %v462_v17, 1  ;;  %v378_v31 = vshrl.u32 %v6533_v59, 16  ;;  %v384_v33 = vrot.slane %v382_v19, 1  ;;  %v466_v34 = vshrl.u32 %v6538_v62, 16 }
  0x23   : > { %5580 = vmatpush3.bf16.msra.mxu0 %v6255_v32  ;;  %v390_v32 = vshll.u32 %v6564_v18, 16  ;;  %v420_v35 = vor.u32 %v418_v21, %v6575_v28  ;;  %v472_v38 = vrot.slane %v470_v26, 1  ;;  %v386_v39 = vshrl.u32 %v6542_v63, 16  ;;  %v6635_v21 = vld [vmem:[%s6431_s25 + $0xa0] ss:$0 sps:$4 sm:$0x33]  }
  0x24   : > { %5581 = vmatprep.subr.bf16.mxu0 %v8835_v1  ;;  %v474_v42 = vshrl.u32 %v6545_v0, 16  ;;  %v398_v50 = vshll.u32 %v6598_v46, 16  ;;  %v468_v53 = vor.u32 %v466_v34, %v464_v30  ;;  %v394_v57 = vshrl.u32 %v6564_v18, 16 }
  0x25   : > { %5488 = vmatpush3.bf16.msra.mxu1 %v6258_v37  ;;  %v372_v37 = vor.u32 %v370_v23, %v368_v3  ;;  %v6593_v43 = vsel %vm333_vm1, %v420_v35, %v6469_v24  ;;  %v392_v45 = vrot.slane %v390_v32, 1  ;;  %v380_v24 = vor.u32 %v378_v31, %v376_v27 }
  0x26   : > { %5406 = vmatmul.mubr.msk.bf16.gmra.mrb[4].mxu0 %vm525_vm2, %v353_v41  ;;  %5489 = vmatprep.subr.bf16.mxu1 %v8835_v1  ;;  %v6588_v41 = vld [vmem:[%s6431_s25 + $0x90] sm:$0xff]   ;;  %v473_v56 = vsel %vm333_vm1, %v468_v53, %v472_v38  ;;  %v400_v3 = vrot.slane %v398_v50, 1  ;;  %v476_v9 = vor.u32 %v474_v42, %v472_v38  ;;  %v406_v19 = vshll.u32 %v6621_v61, 16  ;;  %v6281_v53 = vld [vmem:[%s8804_s1 + $0x78] sm:$0xff]  }
  0x27   : > { %5409 = vmatprep.mubr.msk.bf16.mxu0 %vm6374_vm0, %v8835_v1  ;;  %5582 = vmatpush3.bf16.msra.mxu0 %v6263_v47  ;;  %v377_v47 = vsel %vm333_vm1, %v372_v37, %v376_v27  ;;  %v478_v49 = vshll.u32 %v6588_v41, 16  ;;  %v482_v58 = vshrl.u32 %v6588_v41, 16  ;;  %v396_v20 = vor.u32 %v394_v57, %v392_v45  ;;  %v6282_v57 = vld [vmem:[%s8804_s1 + $0x98] sm:$0xff]  }
  0x28   : > { %5450 = vmatmul.mubr.msk.bf16.gmra.mrb[4].mxu1 %vm525_vm2, %v441_v44  ;;  %5583 = vmatprep.subr.bf16.mxu0 %v8835_v1  ;;  %v460_v44 = vor.u32 %v458_v25, %v456_v5  ;;  %v402_v5 = vshrl.u32 %v6598_v46, 16  ;;  %v490_v26 = vshrl.u32 %v6611_v54, 16  ;;  %v494_v27 = vshll.u32 %v6635_v21, 16 }
  0x29   : > { %5453 = vmatprep.mubr.msk.bf16.mxu1 %vm6374_vm0, %v8835_v1  ;;  %5490 = vmatpush3.bf16.msra.mxu1 %v6264_v48  ;;  %v480_v2 = vrot.slane %v478_v49, 1  ;;  %v401_v23 = vsel %vm333_vm1, %v396_v20, %v400_v3  ;;  %v410_v34 = vshrl.u32 %v6621_v61, 16  ;;  %v498_v38 = vshrl.u32 %v6635_v21, 16  ;;  %v6276_v49 = vld [vmem:[%s8804_s1 + $0x80] sm:$0xff]  }
  0x2a   : > { %5491 = vmatprep.subr.bf16.mxu1 %v8835_v1  ;;  %v465_v48 = vsel %vm333_vm1, %v460_v44, %v464_v30  ;;  %v408_v30 = vrot.slane %v406_v19, 1  ;;  %v496_v32 = vrot.slane %v494_v27, 1  ;;  %v1055_v44 = vld [vmem:[%s6431_s25] sm:$0xe]  ;;  %v1076_v50 = vrot.slane %v6455_v14, 1  ;;  %v6858_v27 = vld [vmem:[%s6431_s25 + $0x70] sm:$0xff]  }
  0x2b   : > { %5584 = vmatpush3.bf16.msra.mxu0 %v6272_v10  ;;  %v481_v16 = vsel %vm333_vm1, %v476_v9, %v480_v2  ;;  %v1090_v9 = vrot.slane %v6621_v61, 1  ;;  %v1098_v19 = vrot.slane %v6458_v15, 1  ;;  %v1100_v20 = vrot.slane %v6497_v40, 1 }
  0x2c   : > { %5761 = vmatprep.subr.bf16.mxu0 %v8835_v1  ;;  %v412_v37 = vor.u32 %v410_v34, %v408_v30  ;;  %v500_v42 = vor.u32 %v498_v38, %v496_v32  ;;  %v1108_v38 = vrot.slane %v6588_v41, 1 }
  0x2d   : > { %5492 = vmatpush3.bf16.msra.mxu1 %v6271_v4  ;;  %v486_v4 = vshll.u32 %v6611_v54, 16 }
  0x2e   : > { %5410 = vmatmul.mubr.msk.bf16.gmra.mrb[8].mxu0 %vm525_vm2, %v361_v55  ;;  %5669 = vmatprep.subr.bf16.mxu1 %v8835_v1  ;;  %v385_v55 = vsel %vm333_vm1, %v380_v24, %v384_v33  ;;  %v6278_v24 = vld [vmem:[%s8804_s1 + $0x88] sm:$0xff]  }
  0x2f   : > { %5413 = vmatprep.mubr.msk.bf16.mxu0 %vm6374_vm0, %v8835_v1  ;;  %v488_v17 = vrot.slane %v486_v4, 1  ;;  %v1086_v4 = vrot.slane %v6564_v18, 1 }
  0x30   : > { %5454 = vmatmul.mubr.msk.bf16.gmra.mrb[8].mxu1 %vm525_vm2, %v449_v60  ;;  %v388_v60 = vor.u32 %v386_v39, %v384_v33  ;;  %v417_v39 = vsel %vm333_vm1, %v412_v37, %v6575_v28  ;;  %v8825_v37 = vshll.u32 %v6858_v27, 16 }
  0x31   : > { %5457 = vmatprep.mubr.msk.bf16.mxu1 %vm6374_vm0, %v8835_v1  ;;  %v492_v31 = vor.u32 %v490_v26, %v488_v17 }
  0x32   : > { %v393_v10 = vsel %vm333_vm1, %v388_v60, %v392_v45  ;;  %v4793_v45 = vcombine.low %v1055_v44, %v6435_v6  ;;  %v6277_v6 = vld [vmem:[%s8804_s1 + $0x68] sm:$0xff]   ;;  %v1080_v60 = vrot.slane %v6518_v51, 1 }
  0x33   : > { %v497_v35 = vsel %vm333_vm1, %v492_v31, %v496_v32 }
  0x34   : > { %v1073_v28 = vrot.slane %v4793_v45, 1 }
  0x36   : > { %5414 = vmatmul.mubr.msk.bf16.gmra.mrb[12].mxu0 %vm525_vm2, %v369_v22  ;;  %v484_v22 = vor.u32 %v482_v58, %v480_v2  ;;  %v1082_v2 = vrot.slane %v6533_v59, 1 }
  0x37   : > { %5417 = vmatprep.mubr.msk.bf16.mxu0 %vm6374_vm0, %v8835_v1 }
  0x38   : > { %5458 = vmatmul.mubr.msk.bf16.gmra.mrb[12].mxu1 %vm525_vm2, %v457_v29  ;;  %v489_v25 = vsel %vm333_vm1, %v484_v22, %v488_v17  ;;  %v404_v29 = vor.u32 %v402_v5, %v400_v3  ;;  %v1084_v3 = vrot.slane %v6542_v63, 1  ;;  %v1088_v5 = vrot.slane %v6598_v46, 1 }
  0x39   : > { %5461 = vmatprep.mubr.msk.bf16.mxu1 %vm6374_vm0, %v8835_v1  ;;  %v1096_v17 = vrot.slane %v6452_v13, 1  ;;  %v1102_v22 = vrot.slane %v6522_v52, 1 }
  0x3a   : > { %v409_v33 = vsel %vm333_vm1, %v404_v29, %v408_v30 }
  0x3e   : > { %5418 = vmatmul.mubr.msk.bf16.gmra.mrb[16].mxu0 %vm525_vm2, %v377_v47  ;;  %v6274_v47 = vld [vmem:[%s8804_s1 + $0x60] sm:$0xff]  }
  0x3f   : > { %5421 = vmatprep.mubr.msk.bf16.mxu0 %vm6374_vm0, %v8835_v1 }
  0x40   : > { %5462 = vmatmul.mubr.msk.bf16.gmra.mrb[16].mxu1 %vm525_vm2, %v465_v48  ;;  %v1074_v48 = vrot.slane %v6441_v8, 1 }
  0x41   : > { %5465 = vmatprep.mubr.msk.bf16.mxu1 %vm6374_vm0, %v8835_v1 }
  0x46   : > { %5422 = vmatmul.mubr.msk.bf16.gmra.mrb[20].mxu0 %vm525_vm2, %v385_v55  ;;  %v1077_v55 = vsel %vm1072_vm3, %v1074_v48, %v1076_v50 }
  0x47   : > { %5425 = vmatprep.mubr.msk.bf16.mxu0 %vm6374_vm0, %v8835_v1 }
  0x48   : > { %5466 = vmatmul.mubr.msk.bf16.gmra.mrb[20].mxu1 %vm525_vm2, %v473_v56  ;;  %v6280_v56 = vld [vmem:[%s8804_s1 + $0x90] sm:$0xff]  }
  0x49   : > { %5469 = vmatprep.mubr.msk.bf16.mxu1 %vm6374_vm0, %v8835_v1 }
  0x4e   : > { %5426 = vmatmul.mubr.msk.bf16.gmra.mrb[24].mxu0 %vm525_vm2, %v393_v10  ;;  %v1092_v10 = vrot.slane %v6558_v11, 1 }
  0x4f   : > { %5429 = vmatprep.mubr.msk.bf16.mxu0 %vm6374_vm0, %v8835_v1 }
  0x50   : > { %5470 = vmatmul.mubr.msk.bf16.gmra.mrb[24].mxu1 %vm525_vm2, %v481_v16  ;;  %v1094_v16 = vrot.slane %v6449_v12, 1 }
  0x51   : > { %5473 = vmatprep.mubr.msk.bf16.mxu1 %vm6374_vm0, %v8835_v1 }
  0x56   : > { %5430 = vmatmul.mubr.msk.bf16.gmra.mrb[28].mxu0 %vm525_vm2, %v401_v23  ;;  %v1104_v23 = vrot.slane %v6538_v62, 1 }
  0x57   : > { %5433 = vmatprep.mubr.msk.bf16.mxu0 %vm6374_vm0, %v8835_v1 }
  0x58   : > { %5474 = vmatmul.mubr.msk.bf16.gmra.mrb[28].mxu1 %vm525_vm2, %v489_v25  ;;  %v1106_v25 = vrot.slane %v6545_v0, 1 }
  0x59   : > { %5477 = vmatprep.mubr.msk.bf16.mxu1 %vm6374_vm0, %v8835_v1 }
  0x5a   : > { %v1107_v31 = vsel %vm1072_vm3, %v1104_v23, %v1106_v25 }
  0x5e   : > { %5434 = vmatmul.mubr.msk.bf16.gmra.mrb[32].mxu0 %vm525_vm2, %v409_v33 }
  0x5f   : > { %5437 = vmatprep.mubr.msk.bf16.mxu0 %vm6374_vm0, %v8835_v1 }
  0x60   : > { %5478 = vmatmul.mubr.msk.bf16.gmra.mrb[32].mxu1 %vm525_vm2, %v497_v35  ;;  %v8826_v35 = vshrl.u32 %v6858_v27, 16 }
  0x61   : > { %5481 = vmatprep.mubr.msk.bf16.mxu1 %vm6374_vm0, %v8835_v1 }
  0x66   : > { %5438 = vmatmul.mubr.msk.bf16.gmra.mrb[36].mxu0 %vm525_vm2, %v417_v39  ;;  %v2565_v39 = vrot.slane %v8826_v35, 2 }
  0x67   : > { %5441 = vmatprep.mubr.msk.bf16.mxu0 %vm6374_vm0, %v8835_v1 }
  0x68   : > { %5482 = vmatmul.mubr.msk.bf16.gmra.mrb[36].mxu1 %vm525_vm2, %v500_v42  ;;  %v2566_v42 = vrot.slane %v8825_v37, 3 }
  0x69   : > { %5493 = vmatprep.mubr.msk.bf16.mxu1 %vm6374_vm0, %v8835_v1 }
  0x6e   : > { %5442 = vmatmul.mubr.msk.bf16.gmra.mrb[40].mxu0 %vm525_vm2, %v6593_v43  ;;  %v1075_v43 = vsel %vm1072_vm3, %v1073_v28, %v1074_v48  ;;  %v6886_v28 = vld [vmem:[%s6431_s25 + $0x78] sm:$0xff]  }
  0x6f   : > { %5585 = vmatprep.mubr.msk.bf16.mxu0 %vm6374_vm0, %v8835_v1 }
  0x70   : > { %5494 = vmatmul.mubr.msk.bf16.vlgmr.msra.gmra.mrb[40].mxu1 %vm525_vm2, %v6438_v7  ;;  %v6279_v7 = vld [vmem:[%s8804_s1 + $0x70] sm:$0xff]  }
  0x71   : > { %5497 = vmatprep.mubr.msk.bf16.mxu1 %vm6374_vm0, %v8835_v1  ;;  %5670 = vmatpush3.bf16.msra.mxu1 %v6274_v47  ;;  %v6883_v47 = vor.u32 %v2566_v42, %v2565_v39 }
  0x72   : > { %5671 = vmatprep.subr.bf16.mxu1 %v8835_v1 }
  0x75   : > { %5672 = vmatpush3.bf16.msra.mxu1 %v6277_v6 }
  0x76   : > { %5586 = vmatmul.mubr.msk.bf16.vlgmr.msra.gmra.mrb[44].mxu0 %vm525_vm2, %v1075_v43  ;;  %5673 = vmatprep.subr.bf16.mxu1 %v8835_v1 }
  0x77   : > { %5762 = vmatpush3.bf16.msra.mxu0 %v6276_v49  ;;  %5589 = vmatprep.mubr.msk.bf16.mxu0 %vm6374_vm0, %v8835_v1 }
  0x78   : > { %5498 = vmatmul.mubr.msk.bf16.gmra.mrb[44].mxu1 %vm525_vm2, %v6441_v8  ;;  %5763 = vmatprep.subr.bf16.mxu0 %v8835_v1  ;;  %v1078_v8 = vrot.slane %v6487_v36, 1 }
  0x79   : > { %5501 = vmatprep.mubr.msk.bf16.mxu1 %vm6374_vm0, %v8835_v1  ;;  %5674 = vmatpush3.bf16.msra.mxu1 %v6279_v7 }
  0x7a   : > { %5675 = vmatprep.subr.bf16.mxu1 %v8835_v1  ;;  %v1079_v58 = vsel %vm1072_vm3, %v1076_v50, %v1078_v8 }
  0x7b   : > { %5764 = vmatpush3.bf16.msra.mxu0 %v6278_v24  ;;  %v8822_v24 = vshrl.u32 %v6886_v28, 16 }
  0x7c   : > { %5765 = vmatprep.subr.bf16.mxu0 %v8835_v1 }
  0x7d   : > { %5676 = vmatpush3.bf16.msra.mxu1 %v6281_v53  ;;  %v8821_v53 = vshll.u32 %v6886_v28, 16 }
  0x7e   : > { %5590 = vmatmul.mubr.msk.bf16.gmra.mrb[48].mxu0 %vm525_vm2, %v1077_v55  ;;  %5853 = vmatprep.subr.bf16.mxu1 %v8835_v1  ;;  %v1110_v55 = vrot.slane %v6611_v54, 1 }
  0x7f   : > { %5593 = vmatprep.mubr.msk.bf16.mxu0 %vm6374_vm0, %v8835_v1  ;;  %5766 = vmatpush3.bf16.msra.mxu0 %v6280_v56  ;;  %v2569_v56 = vrot.slane %v8822_v24, 2 }
  0x80   : > { %5502 = vmatmul.mubr.msk.bf16.gmra.mrb[48].mxu1 %vm525_vm2, %v6455_v14  ;;  %5767 = vmatprep.subr.bf16.mxu0 %v8835_v1  ;;  %v1081_v14 = vsel %vm1072_vm3, %v1078_v8, %v1080_v60  ;;  %v2570_v8 = vrot.slane %v8821_v53, 3 }
  0x81   : > { %5505 = vmatprep.mubr.msk.bf16.mxu1 %vm6374_vm0, %v8835_v1 }
  0x83   : > { %5768 = vmatpush3.bf16.msra.mxu0 %v6282_v57 }
  0x84   : > { %5945 = vmatprep.subr.bf16.mxu0 %v8835_v1 }
  0x86   : > { %5594 = vmatmul.mubr.msk.bf16.gmra.mrb[52].mxu0 %vm525_vm2, %v1079_v58 }
  0x87   : > { %5597 = vmatprep.mubr.msk.bf16.mxu0 %vm6374_vm0, %v8835_v1 }
  0x88   : > { %5506 = vmatmul.mubr.msk.bf16.gmra.mrb[52].mxu1 %vm525_vm2, %v6487_v36  ;;  %v1083_v36 = vsel %vm1072_vm3, %v1080_v60, %v1082_v2  ;;  %v1442_v60 = vld [vmem:[%s6431_s25 + $0x8] sm:$0xe] }
  0x89   : > { %5509 = vmatprep.mubr.msk.bf16.mxu1 %vm6374_vm0, %v8835_v1 }
  0x8e   : > { %5598 = vmatmul.mubr.msk.bf16.gmra.mrb[56].mxu0 %vm525_vm2, %v1081_v14  ;;  %v1443_v14 = vld [vmem:[%s6431_s25 + $0xc] sm:$0xf] }
  0x8f   : > { %5601 = vmatprep.mubr.msk.bf16.mxu0 %vm6374_vm0, %v8835_v1 }
  0x90   : > { %5510 = vmatmul.mubr.msk.bf16.gmra.mrb[56].mxu1 %vm525_vm2, %v6518_v51  ;;  %v1085_v51 = vsel %vm1072_vm3, %v1082_v2, %v1084_v3  ;;  %v6913_v2 = vor.u32 %v2570_v8, %v2569_v56 }
  0x91   : > { %5513 = vmatprep.mubr.msk.bf16.mxu1 %vm6374_vm0, %v8835_v1 }
  0x96   : > { %5602 = vmatmul.mubr.msk.bf16.gmra.mrb[60].mxu0 %vm525_vm2, %v1083_v36  ;;  %v6916_v36 = vld [vmem:[%s6431_s25 + $0x80] sm:$0xff]  }
  0x97   : > { %5605 = vmatprep.mubr.msk.bf16.mxu0 %vm6374_vm0, %v8835_v1 }
  0x98   : > { %5514 = vmatmul.mubr.msk.bf16.gmra.mrb[60].mxu1 %vm525_vm2, %v6533_v59  ;;  %v1087_v59 = vsel %vm1072_vm3, %v1084_v3, %v1086_v4 }
  0x99   : > { %5517 = vmatprep.mubr.msk.bf16.mxu1 %vm6374_vm0, %v8835_v1 }
  0x9e   : > { %5606 = vmatmul.mubr.msk.bf16.gmra.mrb[64].mxu0 %vm525_vm2, %v1085_v51  ;;  %v1111_v51 = vsel %vm1072_vm3, %v1108_v38, %v1110_v55 }
  0x9f   : > { %5609 = vmatprep.mubr.msk.bf16.mxu0 %vm6374_vm0, %v8835_v1 }
  0xa0   : > { %5518 = vmatmul.mubr.msk.bf16.gmra.mrb[64].mxu1 %vm525_vm2, %v6542_v63  ;;  %v1089_v63 = vsel %vm1072_vm3, %v1086_v4, %v1088_v5  ;;  %v6924_v4 = vld [vmem:[%s6431_s25 + $0xa0] ss:$0 sps:$4 sm:$0x77]  }
  0xa1   : > { %5521 = vmatprep.mubr.msk.bf16.mxu1 %vm6374_vm0, %v8835_v1 }
  0xa6   : > { %5610 = vmatmul.mubr.msk.bf16.gmra.mrb[68].mxu0 %vm525_vm2, %v1087_v59 }
  0xa7   : > { %5613 = vmatprep.mubr.msk.bf16.mxu0 %vm6374_vm0, %v8835_v1 }
  0xa8   : > { %5522 = vmatmul.mubr.msk.bf16.gmra.mrb[68].mxu1 %vm525_vm2, %v6564_v18  ;;  %v1091_v18 = vsel %vm1072_vm3, %v1088_v5, %v1090_v9 }
  0xa9   : > { %5525 = vmatprep.mubr.msk.bf16.mxu1 %vm6374_vm0, %v8835_v1 }
  0xae   : > { %5614 = vmatmul.mubr.msk.bf16.gmra.mrb[72].mxu0 %vm525_vm2, %v1089_v63 }
  0xaf   : > { %5617 = vmatprep.mubr.msk.bf16.mxu0 %vm6374_vm0, %v8835_v1 }
  0xb0   : > { %5526 = vmatmul.mubr.msk.bf16.gmra.mrb[72].mxu1 %vm525_vm2, %v6598_v46  ;;  %v1093_v46 = vsel %vm1072_vm3, %v1090_v9, %v1092_v10  ;;  %v4828_v9 = vcombine.low %v1442_v60, %v1443_v14 }
  0xb1   : > { %5529 = vmatprep.mubr.msk.bf16.mxu1 %vm6374_vm0, %v8835_v1 }
  0xb6   : > { %5618 = vmatmul.mubr.msk.bf16.gmra.mrb[76].mxu0 %vm525_vm2, %v1091_v18  ;;  %v6929_v18 = vld [vmem:[%s6431_s25 + $0x10] sm:$0xff]  }
  0xb7   : > { %5621 = vmatprep.mubr.msk.bf16.mxu0 %vm6374_vm0, %v8835_v1 }
  0xb8   : > { %5530 = vmatmul.mubr.msk.bf16.gmra.mrb[76].mxu1 %vm525_vm2, %v6621_v61  ;;  %v1095_v61 = vsel %vm1072_vm3, %v1092_v10, %v1094_v16 }
  0xb9   : > { %5533 = vmatprep.mubr.msk.bf16.mxu1 %vm6374_vm0, %v8835_v1 }
  0xbe   : > { %5622 = vmatmul.mubr.msk.bf16.gmra.mrb[80].mxu0 %vm525_vm2, %v1093_v46  ;;  %v8820_v46 = vshrl.u32 %v6916_v36, 16 }
  0xbf   : > { %5625 = vmatprep.mubr.msk.bf16.mxu0 %vm6374_vm0, %v8835_v1 }
  0xc0   : > { %5534 = vmatmul.mubr.msk.bf16.gmra.mrb[80].mxu1 %vm525_vm2, %v6558_v11  ;;  %v1097_v11 = vsel %vm1072_vm3, %v1094_v16, %v1096_v17  ;;  %v8819_v16 = vshll.u32 %v6916_v36, 16 }
  0xc1   : > { %5537 = vmatprep.mubr.msk.bf16.mxu1 %vm6374_vm0, %v8835_v1 }
  0xc6   : > { %5626 = vmatmul.mubr.msk.bf16.gmra.mrb[84].mxu0 %vm525_vm2, %v1095_v61  ;;  %v1112_v61 = vrot.slane %v6924_v4, 1 }
  0xc7   : > { %5629 = vmatprep.mubr.msk.bf16.mxu0 %vm6374_vm0, %v8835_v1 }
  0xc8   : > { %5538 = vmatmul.mubr.msk.bf16.gmra.mrb[84].mxu1 %vm525_vm2, %v6449_v12  ;;  %v1099_v12 = vsel %vm1072_vm3, %v1096_v17, %v1098_v19  ;;  %v2573_v17 = vrot.slane %v8820_v46, 2 }
  0xc9   : > { %5541 = vmatprep.mubr.msk.bf16.mxu1 %vm6374_vm0, %v8835_v1 }
  0xce   : > { %5630 = vmatmul.mubr.msk.bf16.gmra.mrb[88].mxu0 %vm525_vm2, %v1097_v11  ;;  %v2574_v11 = vrot.slane %v8819_v16, 3 }
  0xcf   : > { %5633 = vmatprep.mubr.msk.bf16.mxu0 %vm6374_vm0, %v8835_v1 }
  0xd0   : > { %5542 = vmatmul.mubr.msk.bf16.gmra.mrb[88].mxu1 %vm525_vm2, %v6452_v13  ;;  %v1101_v13 = vsel %vm1072_vm3, %v1098_v19, %v1100_v20 }
  0xd1   : > { %5545 = vmatprep.mubr.msk.bf16.mxu1 %vm6374_vm0, %v8835_v1 }
  0xd6   : > { %5634 = vmatmul.mubr.msk.bf16.gmra.mrb[92].mxu0 %vm525_vm2, %v1099_v12  ;;  %v1597_v12 = vshrl.u32 %v4828_v9, 16 }
  0xd7   : > { %5637 = vmatprep.mubr.msk.bf16.mxu0 %vm6374_vm0, %v8835_v1 }
  0xd8   : > { %5546 = vmatmul.mubr.msk.bf16.gmra.mrb[92].mxu1 %vm525_vm2, %v6458_v15  ;;  %v1103_v15 = vsel %vm1072_vm3, %v1100_v20, %v1102_v22  ;;  %v1600_v20 = vshll.u32 %v4828_v9, 16 }
  0xd9   : > { %5549 = vmatprep.mubr.msk.bf16.mxu1 %vm6374_vm0, %v8835_v1 }
  0xde   : > { %5638 = vmatmul.mubr.msk.bf16.gmra.mrb[96].mxu0 %vm525_vm2, %v1101_v13  ;;  %v8810_v13 = vshrl.u32 %v6929_v18, 16 }
  0xdf   : > { %5641 = vmatprep.mubr.msk.bf16.mxu0 %vm6374_vm0, %v8835_v1 }
  0xe0   : > { %5550 = vmatmul.mubr.msk.bf16.gmra.mrb[96].mxu1 %vm525_vm2, %v6497_v40  ;;  %v1105_v40 = vsel %vm1072_vm3, %v1102_v22, %v1104_v23  ;;  %v8809_v22 = vshll.u32 %v6929_v18, 16  ;;  %v6952_v23 = vld [vmem:[%s6431_s25 + $0x88] sm:$0xff]   ;;  %v1607_v39 = vrot.slane %v8810_v13, 1 }
  0xe1   : > { %5553 = vmatprep.mubr.msk.bf16.mxu1 %vm6374_vm0, %v8835_v1 }
  0xe2   : > { %v1610_v42 = vrot.slane %v8809_v22, 2 }
  0xe4   : > { %v1611_v60 = vor.u32 %v1610_v42, %v1607_v39 }
  0xe6   : > { %5642 = vmatmul.mubr.msk.bf16.gmra.mrb[100].mxu0 %vm525_vm2, %v1103_v15 }
  0xe7   : > { %5645 = vmatprep.mubr.msk.bf16.mxu0 %vm6374_vm0, %v8835_v1 }
  0xe8   : > { %5554 = vmatmul.mubr.msk.bf16.gmra.mrb[100].mxu1 %vm525_vm2, %v6522_v52 }
  0xe9   : > { %5557 = vmatprep.mubr.msk.bf16.mxu1 %vm6374_vm0, %v8835_v1 }
  0xee   : > { %5646 = vmatmul.mubr.msk.bf16.gmra.mrb[104].mxu0 %vm525_vm2, %v1105_v40 }
  0xef   : > { %5649 = vmatprep.mubr.msk.bf16.mxu0 %vm6374_vm0, %v8835_v1 }
  0xf0   : > { %5558 = vmatmul.mubr.msk.bf16.gmra.mrb[104].mxu1 %vm525_vm2, %v6538_v62 }
  0xf1   : > { %v6853_v26 = vpop.f32.mrb[0].mxu0  ;;  %5561 = vmatprep.mubr.msk.bf16.mxu1 %vm6374_vm0, %v8835_v1  ;;  %v6862_v30 = vpop.f32.mrb[0].mxu1 }
  0xf2   : > { %v5403_v52 = vpop.f32.mrb[1].mxu0  ;;  %v5447_v33 = vpop.f32.mrb[1].mxu1 }
  0xf3   : > { %v6860_v29 = vpop.f32.mrb[2].mxu0  ;;  %v6865_v34 = vpop.f32.mrb[2].mxu1  ;;  %v1113_v52 = vsel %vm1072_vm3, %v1110_v55, %v1112_v61 }
  0xf4   : > { %v5404_v32 = vpop.f32.mrb[3].mxu0  ;;  %v5448_v62 = vpop.f32.mrb[3].mxu1 }
  0xf5   : > { %v1599_v62 = vrot.slane %v1597_v12, 1 }
  0xf6   : > { %5650 = vmatmul.mubr.msk.bf16.gmra.mrb[108].mxu0 %vm525_vm2, %v1107_v31 }
  0xf7   : > { %5653 = vmatprep.mubr.msk.bf16.mxu0 %vm6374_vm0, %v8835_v1 }
  0xf8   : > { %5562 = vmatmul.mubr.msk.bf16.gmra.mrb[108].mxu1 %vm525_vm2, %v6545_v0  ;;  %v1109_v0 = vsel %vm1072_vm3, %v1106_v25, %v1108_v38  ;;  %v1602_v38 = vrot.slane %v1600_v20, 2 }
  0xf9   : > { %v6879_v44 = vpop.f32.mrb[4].mxu0  ;;  %5565 = vmatprep.mubr.msk.bf16.mxu1 %vm6374_vm0, %v8835_v1 }
  0xfa   : > { %v5407_v45 = vpop.f32.mrb[5].mxu0 }
  0xfb   : > { %v6888_v48 = vpop.f32.mrb[6].mxu0  ;;  %v6890_v6 = vpop.f32.mrb[4].mxu1  ;;  %v6966_v45 = vld [vmem:[%s6431_s25 + $0x18] sm:$0xff]  }
  0xfc   : > { %v5408_v43 = vpop.f32.mrb[7].mxu0  ;;  %v5451_v49 = vpop.f32.mrb[5].mxu1  ;;  %8919 = vst [vmem:[#allocation2_spill] sm:$0xff] %v6966_v45  ;;  %v8807_v4 = vshll.u32 %v6966_v45, 16 }
  0xfd   : > { %v6893_v7 = vpop.f32.mrb[6].mxu1  ;;  %v8816_v43 = vshrl.u32 %v6952_v23, 16  ;;  %v8815_v49 = vshll.u32 %v6952_v23, 16 }
  0xfe   : > { %5654 = vmatmul.mubr.msk.bf16.gmra.mrb[112].mxu0 %vm525_vm2, %v1109_v0  ;;  %v5452_v50 = vpop.f32.mrb[7].mxu1 }
  0xff   : > { %5657 = vmatprep.mubr.msk.bf16.mxu0 %vm6374_vm0, %v8835_v1  ;;  %v2112_v50 = vld [vmem:[%s6431_s25 + $0x8] sm:$0xc]  ;;  %v2577_v55 = vrot.slane %v8816_v43, 2  ;;  %v2578_v56 = vrot.slane %v8815_v49, 3 }
 0x100   : > { %5566 = vmatmul.mubr.msk.bf16.gmra.mrb[112].mxu1 %vm525_vm2, %v6588_v41 }
 0x101   : > { %v6907_v57 = vpop.f32.mrb[8].mxu0  ;;  %5569 = vmatprep.mubr.msk.bf16.mxu1 %vm6374_vm0, %v8835_v1 }
 0x102   : > { %v5411_v58 = vpop.f32.mrb[9].mxu0 }
 0x103   : > { %v6918_v41 = vpop.f32.mrb[10].mxu0  ;;  %v6920_v3 = vpop.f32.mrb[8].mxu1  ;;  %v1603_v58 = vor.u32 %v1602_v38, %v1599_v62  ;;  %v7008_v62 = vld [vmem:[%s6431_s25 + $0x20] sm:$0xff]  }
 0x104   : > { %v5412_v59 = vpop.f32.mrb[11].mxu0  ;;  %v5455_v5 = vpop.f32.mrb[9].mxu1  ;;  %8923 = vst [vmem:[#allocation6_spill] sm:$0xff] %v7008_v62 }
 0x105   : > { %v6926_v63 = vpop.f32.mrb[10].mxu1  ;;  %v6986_v59 = vor.u32 %v2578_v56, %v2577_v55  ;;  %v6989_v5 = vld [vmem:[%s6431_s25 + $0x90] sm:$0xff]   ;;  %v1612_v20 = vsel %vm1595_vm4, %v1603_v58, %v1611_v60  ;;  %v8813_v58 = vshrl.u32 %v7008_v62, 16 }
 0x106   : > { %5658 = vmatmul.mubr.msk.bf16.gmra.mrb[116].mxu0 %vm525_vm2, %v1111_v51  ;;  %v5456_v10 = vpop.f32.mrb[11].mxu1  ;;  %v8808_v51 = vshrl.u32 %v6966_v45, 16  ;;  %v8814_v38 = vshrl.u32 %v6989_v5, 16  ;;  %v8811_v39 = vshll.u32 %v6989_v5, 16 }
 0x107   : > { %5661 = vmatprep.mubr.msk.bf16.mxu0 %vm6374_vm0, %v8835_v1  ;;  %8920 = vst [vmem:[#allocation3_spill] sm:$0xff] %v6986_v59 }
 0x108   : > { %5570 = vmatmul.mubr.msk.bf16.gmra.mrb[116].mxu1 %vm525_vm2, %v6611_v54  ;;  %v6949_v54 = vor.u32 %v2574_v11, %v2573_v17  ;;  %v6995_v17 = vcombine.low %v2112_v50, %v1443_v14  ;;  %v2581_v50 = vrot.slane %v8814_v38, 2 }
 0x109   : > { %v6943_v19 = vpop.f32.mrb[12].mxu0  ;;  %5573 = vmatprep.mubr.msk.bf16.mxu1 %vm6374_vm0, %v8835_v1 }
 0x10a   : > { %v5415_v15 = vpop.f32.mrb[13].mxu0  ;;  %v2130_v42 = vrot.slane %v6995_v17, 2 }
 0x10b   : > { %v6954_v40 = vpop.f32.mrb[14].mxu0  ;;  %v6956_v25 = vpop.f32.mrb[12].mxu1 }
 0x10c   : > { %v5416_v31 = vpop.f32.mrb[15].mxu0  ;;  %v5459_v32 = vpop.f32.mrb[13].mxu1 }
 0x10d   : > { %v6959_v33 = vpop.f32.mrb[14].mxu1  ;;  %v1616_v31 = vrot.slane %v8808_v51, 1  ;;  %v1619_v32 = vrot.slane %v8807_v4, 2 }
 0x10e   : > { %5662 = vmatmul.mubr.msk.bf16.gmra.mrb[120].mxu0 %vm525_vm2, %v1113_v52  ;;  %v5460_v0 = vpop.f32.mrb[15].mxu1  ;;  %v6286_v52 = vld [vmem:[%s8804_s1 + $0xa0] sm:$0xff]  }
 0x10f   : > { %5665 = vmatprep.mubr.msk.bf16.mxu0 %vm6374_vm0, %v8835_v1  ;;  %v2131_v0 = vrot.slane %v6929_v18, 2  ;;  %v1620_v56 = vor.u32 %v1619_v32, %v1616_v31  ;;  %v6289_v32 = vld [vmem:[%s8804_s1 + $0xc0] sm:$0xff]  }
 0x110   : > { %5574 = vmatmul.mubr.msk.bf16.gmra.mrb[120].mxu1 %vm525_vm2, %v6635_v21 }
 0x111   : > { %v6980_v8 = vpop.f32.mrb[16].mxu0  ;;  %5677 = vmatprep.mubr.msk.bf16.mxu1 %vm6374_vm0, %v8835_v1  ;;  %v2132_v31 = vsel %vm2129_vm5, %v2130_v42, %v2131_v0  ;;  %v6302_v42 = vld [vmem:[%s8804_s1 + $0xb0] sm:$0xff]  }
 0x112   : > { %v5419_v21 = vpop.f32.mrb[17].mxu0 }
 0x113   : > { %v6991_v9 = vpop.f32.mrb[18].mxu0  ;;  %v6993_v10 = vpop.f32.mrb[16].mxu1  ;;  %v8812_v21 = vshll.u32 %v7008_v62, 16 }
 0x114   : > { %8921 = vst [vmem:[#allocation4_spill] sm:$0xff] %v6993_v10  ;;  %v5420_v11 = vpop.f32.mrb[19].mxu0  ;;  %v5463_v12 = vpop.f32.mrb[17].mxu1 }
 0x115   : > { %v6998_v15 = vpop.f32.mrb[18].mxu1  ;;  %v6295_v11 = vld [vmem:[%s8804_s1 + $0xa8] sm:$0xff]  }
 0x116   : > { %8922 = vst [vmem:[#allocation5_spill] sm:$0xff] %v6998_v15  ;;  %5666 = vmatmul.mubr.msk.bf16.gmra.mrb[124].mxu0 %vm525_vm2, %v1112_v61  ;;  %v5464_v14 = vpop.f32.mrb[19].mxu1  ;;  %v2582_v61 = vrot.slane %v8811_v39, 3  ;;  %v7053_v39 = vld [vmem:[%s6431_s25 + $0x28] sm:$0xff]  }
 0x117   : > { %5769 = vmatprep.mubr.msk.bf16.mxu0 %vm6374_vm0, %v8835_v1  ;;  %v7035_v14 = vld [vmem:[%s6431_s25 + $0x98] sm:$0xff]   ;;  %8927 = vst [vmem:[#allocation10_spill] sm:$0xff] %v7053_v39  ;;  %v8824_v38 = vshrl.u32 %v7053_v39, 16  ;;  %v8823_v49 = vshll.u32 %v7053_v39, 16 }
 0x118   : > { %5678 = vmatmul.mubr.msk.bf16.vlgmr.msra.gmra.mrb[124].mxu1 %vm525_vm2, %v1612_v20  ;;  %v7032_v20 = vor.u32 %v2582_v61, %v2581_v50  ;;  %v1625_v50 = vrot.slane %v8813_v58, 1  ;;  %v1628_v61 = vrot.slane %v8812_v21, 2  ;;  %v2133_v21 = vrot.slane %v6966_v45, 2 }
 0x119   : > { %v7022_v55 = vpop.f32.mrb[20].mxu0  ;;  %5681 = vmatprep.mubr.msk.bf16.mxu1 %vm6374_vm0, %v8835_v1  ;;  %5854 = vmatpush3.bf16.msra.mxu1 %v6286_v52  ;;  %v1634_v53 = vrot.slane %v8824_v38, 1  ;;  %v1637_v24 = vrot.slane %v8823_v49, 2  ;;  %v6310_v49 = vld [vmem:[%s8804_s1 + $0xd8] sm:$0xff]  }
 0x11a   : > { %v5423_v12 = vpop.f32.mrb[21].mxu0  ;;  %5855 = vmatprep.subr.bf16.mxu1 %v8835_v1  ;;  %8924 = vst [vmem:[#allocation7_spill] sm:$0xff] %v7032_v20  ;;  %v1629_v58 = vor.u32 %v1628_v61, %v1625_v50  ;;  %v2134_v61 = vsel %vm2129_vm5, %v2131_v0, %v2133_v21  ;;  %v7106_v0 = vld [vmem:[%s6431_s25 + $0x30] sm:$0xff]  }
 0x11b   : > { %v7037_v4 = vpop.f32.mrb[22].mxu0  ;;  %v7039_v52 = vpop.f32.mrb[20].mxu1  ;;  %v1621_v12 = vsel %vm1595_vm4, %v1611_v60, %v1620_v56  ;;  %v8818_v60 = vshrl.u32 %v7035_v14, 16  ;;  %8931 = vst [vmem:[#allocation14_spill] sm:$0xff] %v7106_v0  ;;  %v8831_v38 = vshrl.u32 %v7106_v0, 16  ;;  %v8830_v37 = vshll.u32 %v7106_v0, 16 }
 0x11c   : > { %8925 = vst [vmem:[#allocation8_spill] sm:$0xff] %v7039_v52  ;;  %v5424_v51 = vpop.f32.mrb[23].mxu0  ;;  %v5467_v22 = vpop.f32.mrb[21].mxu1 }
 0x11d   : > { %v7046_v13 = vpop.f32.mrb[22].mxu1  ;;  %5856 = vmatpush3.bf16.msra.mxu1 %v6295_v11  ;;  %v8817_v51 = vshll.u32 %v7035_v14, 16  ;;  %v6296_v11 = vld [vmem:[%s8804_s1 + $0xc8] sm:$0xff]  }
 0x11e   : > { %8926 = vst [vmem:[#allocation9_spill] sm:$0xff] %v7046_v13  ;;  %5770 = vmatmul.mubr.msk.bf16.vlgmr.msra.gmra.mrb[128].mxu0 %vm525_vm2, %v2132_v31  ;;  %v5468_v22 = vpop.f32.mrb[23].mxu1  ;;  %5857 = vmatprep.subr.bf16.mxu1 %v8835_v1  ;;  %v2585_v31 = vrot.slane %v8818_v60, 2  ;;  %v7087_v60 = vld [vmem:[%s6431_s25 + $0xa0] sm:$0xff]  }
 0x11f   : > { %5946 = vmatpush3.bf16.msra.mxu0 %v6289_v32  ;;  %5773 = vmatprep.mubr.msk.bf16.mxu0 %vm6374_vm0, %v8835_v1  ;;  %v2586_v32 = vrot.slane %v8817_v51, 3 }
 0x120   : > { %5682 = vmatmul.mubr.msk.bf16.gmra.mrb[128].mxu1 %vm525_vm2, %v1621_v12  ;;  %5947 = vmatprep.subr.bf16.mxu0 %v8835_v1  ;;  %v6309_v12 = vld [vmem:[%s8804_s1 + $0xb8] sm:$0xff]  }
 0x121   : > { %v7074_v22 = vpop.f32.mrb[24].mxu0  ;;  %5685 = vmatprep.mubr.msk.bf16.mxu1 %vm6374_vm0, %v8835_v1  ;;  %5858 = vmatpush3.bf16.msra.mxu1 %v6302_v42  ;;  %v7084_v51 = vor.u32 %v2586_v32, %v2585_v31  ;;  %v6303_v42 = vld [vmem:[%s8804_s1 + $0xd0] sm:$0xff]   ;;  %v1630_v31 = vsel %vm1595_vm4, %v1620_v56, %v1629_v58  ;;  %v2135_v56 = vrot.slane %v7008_v62, 2 }
 0x122   : > { %v5427_v43 = vpop.f32.mrb[25].mxu0  ;;  %5859 = vmatprep.subr.bf16.mxu1 %v8835_v1 }
 0x123   : > { %8928 = vst [vmem:[#allocation11_spill] sm:$0xff] %v7084_v51  ;;  %v7089_v16 = vpop.f32.mrb[26].mxu0  ;;  %v7091_v50 = vpop.f32.mrb[24].mxu1  ;;  %5948 = vmatpush3.bf16.msra.mxu0 %v6296_v11 }
 0x124   : > { %8929 = vst [vmem:[#allocation12_spill] sm:$0xff] %v7091_v50  ;;  %v5428_v46 = vpop.f32.mrb[27].mxu0  ;;  %v5471_v43 = vpop.f32.mrb[25].mxu1  ;;  %5949 = vmatprep.subr.bf16.mxu0 %v8835_v1 }
 0x125   : > { %v7099_v32 = vpop.f32.mrb[26].mxu1  ;;  %5860 = vmatpush3.bf16.msra.mxu1 %v6309_v12  ;;  %v8827_v46 = vshrl.u32 %v7087_v60, 16  ;;  %v8828_v43 = vshll.u32 %v7087_v60, 16 }
 0x126   : > { %8930 = vst [vmem:[#allocation13_spill] sm:$0xff] %v7099_v32  ;;  %5774 = vmatmul.mubr.msk.bf16.gmra.mrb[132].mxu0 %vm525_vm2, %v2134_v61  ;;  %v5472_v11 = vpop.f32.mrb[27].mxu1  ;;  %6037 = vmatprep.subr.bf16.mxu1 %v8835_v1 }
 0x127   : > { %5777 = vmatprep.mubr.msk.bf16.mxu0 %vm6374_vm0, %v8835_v1  ;;  %5950 = vmatpush3.bf16.msra.mxu0 %v6303_v42  ;;  %v2589_v12 = vrot.slane %v8827_v46, 2  ;;  %v2590_v61 = vrot.slane %v8828_v43, 3  ;;  %v1638_v42 = vor.u32 %v1637_v24, %v1634_v53  ;;  %v2136_v43 = vsel %vm2129_vm5, %v2133_v21, %v2135_v56 }
 0x128   : > { %5686 = vmatmul.mubr.msk.bf16.gmra.mrb[132].mxu1 %vm525_vm2, %v1630_v31  ;;  %5951 = vmatprep.subr.bf16.mxu0 %v8835_v1 }
 0x129   : > { %v7124_v11 = vpop.f32.mrb[28].mxu0  ;;  %5689 = vmatprep.mubr.msk.bf16.mxu1 %vm6374_vm0, %v8835_v1  ;;  %v7130_v35 = vor.u32 %v2590_v61, %v2589_v12  ;;  %v1639_v24 = vsel %vm1595_vm4, %v1629_v58, %v1638_v42  ;;  %v1646_v12 = vrot.slane %v8830_v37, 2  ;;  %v7146_v61 = vld [vmem:[%s6431_s25 + $0x38] sm:$0xff]  }
 0x12a   : > { %v5431_v31 = vpop.f32.mrb[29].mxu0  ;;  %8935 = vst [vmem:[#allocation18_spill] sm:$0xff] %v7146_v61  ;;  %v8837_v37 = vshll.u32 %v7146_v61, 16 }
 0x12b   : > { %8932 = vst [vmem:[#allocation15_spill] sm:$0xff] %v7130_v35  ;;  %v7132_v32 = vpop.f32.mrb[30].mxu0  ;;  %v7134_v46 = vpop.f32.mrb[28].mxu1  ;;  %5952 = vmatpush3.bf16.msra.mxu0 %v6310_v49  ;;  %v1643_v31 = vrot.slane %v8831_v38, 1  ;;  %v2137_v49 = vrot.slane %v7053_v39, 2 }
 0x12c   : > { %8933 = vst [vmem:[#allocation16_spill] sm:$0xff] %v7134_v46  ;;  %v5432_v50 = vpop.f32.mrb[31].mxu0  ;;  %v5475_v51 = vpop.f32.mrb[29].mxu1  ;;  %6129 = vmatprep.subr.bf16.mxu0 %v8835_v1 }
 0x12d   : > { %v7139_v53 = vpop.f32.mrb[30].mxu1  ;;  %v1647_v51 = vor.u32 %v1646_v12, %v1643_v31  ;;  %v8838_v50 = vshrl.u32 %v7146_v61, 16  ;;  %v1655_v12 = vrot.slane %v8837_v37, 2 }
 0x12e   : > { %8934 = vst [vmem:[#allocation17_spill] sm:$0xff] %v7139_v53  ;;  %5778 = vmatmul.mubr.msk.bf16.gmra.mrb[136].mxu0 %vm525_vm2, %v2136_v43  ;;  %v5476_v21 = vpop.f32.mrb[31].mxu1  ;;  %v2138_v53 = vsel %vm2129_vm5, %v2135_v56, %v2137_v49 }
 0x12f   : > { %5781 = vmatprep.mubr.msk.bf16.mxu0 %vm6374_vm0, %v8835_v1  ;;  %v1648_v35 = vsel %vm1595_vm4, %v1638_v42, %v1647_v51  ;;  %v1652_v31 = vrot.slane %v8838_v50, 1 }
 0x130   : > { %5690 = vmatmul.mubr.msk.bf16.gmra.mrb[136].mxu1 %vm525_vm2, %v1639_v24 }
 0x131   : > { %v7153_v58 = vpop.f32.mrb[32].mxu0  ;;  %5693 = vmatprep.mubr.msk.bf16.mxu1 %vm6374_vm0, %v8835_v1  ;;  %v7172_v1 = vld [vmem:[%s6431_s25 + $0x40] sm:$0xff]   ;;  %v1656_v42 = vor.u32 %v1655_v12, %v1652_v31  ;;  %v7196_v12 = vld [vmem:[%s6431_s25 + $0x48] sm:$0xff]  }
 0x132   : > { %v5435_v43 = vpop.f32.mrb[33].mxu0  ;;  %8938 = vst [vmem:[#allocation21_spill] sm:$0xff] %v7172_v1  ;;  %v8843_v37 = vshll.u32 %v7172_v1, 16  ;;  %8941 = vst [vmem:[#allocation23_spill] sm:$0xff] %v7196_v12 }
 0x133   : > { %v7159_v21 = vpop.f32.mrb[34].mxu0  ;;  %v7161_v38 = vpop.f32.mrb[32].mxu1  ;;  %v1657_v13 = vsel %vm1595_vm4, %v1647_v51, %v1656_v42  ;;  %v8851_v51 = vshrl.u32 %v7196_v12, 16 }
 0x134   : > { %8936 = vst [vmem:[#allocation19_spill] sm:$0xff] %v7161_v38  ;;  %v5436_v46 = vpop.f32.mrb[35].mxu0  ;;  %v5479_v24 = vpop.f32.mrb[33].mxu1  ;;  %v8939_v38 = vmov 0.0   ;;  %v1664_v31 = vrot.slane %v8843_v37, 2 }
 0x135   : > { %v7165_v39 = vpop.f32.mrb[34].mxu1  ;;  %v2139_v46 = vrot.slane %v7106_v0, 2  ;;  %v8844_v24 = vshrl.u32 %v7172_v1, 16 }
 0x136   : > { %8937 = vst [vmem:[#allocation20_spill] sm:$0xff] %v7165_v39  ;;  %5782 = vmatmul.mubr.msk.bf16.gmra.mrb[140].mxu0 %vm525_vm2, %v2138_v53  ;;  %v5480_v43 = vpop.f32.mrb[35].mxu1 }
 0x137   : > { %5785 = vmatprep.mubr.msk.bf16.mxu0 %vm6374_vm0, %v8939_v38  ;;  %v2140_v39 = vsel %vm2129_vm5, %v2137_v49, %v2139_v46  ;;  %v1661_v52 = vrot.slane %v8844_v24, 1 }
 0x138   : > { %5694 = vmatmul.mubr.msk.bf16.gmra.mrb[140].mxu1 %vm525_vm2, %v1648_v35 }
 0x139   : > { %v7179_v56 = vpop.f32.mrb[36].mxu0  ;;  %5697 = vmatprep.mubr.msk.bf16.mxu1 %vm6374_vm0, %v8939_v38 }
 0x13a   : > { %v5439_v53 = vpop.f32.mrb[37].mxu0 }
 0x13b   : > { %v7185_v43 = vpop.f32.mrb[38].mxu0  ;;  %v7187_v50 = vpop.f32.mrb[36].mxu1 }
 0x13c   : > { %8940 = vst [vmem:[#allocation22_spill] sm:$0xff] %v7187_v50  ;;  %v5440_v0 = vpop.f32.mrb[39].mxu0  ;;  %v5483_v35 = vpop.f32.mrb[37].mxu1 }
 0x13d   : > { %v786_v62 = vpop.f32.mrb[38].mxu1  ;;  %v2141_v0 = vrot.slane %v7146_v61, 2  ;;  %v8850_v35 = vshll.u32 %v7196_v12, 16 }
 0x13e   : > { %5786 = vmatmul.mubr.msk.bf16.gmra.mrb[144].mxu0 %vm525_vm2, %v2140_v39  ;;  %v5484_v53 = vpop.f32.mrb[39].mxu1  ;;  %v1665_v62 = vor.u32 %v1664_v31, %v1661_v52  ;;  %v1670_v52 = vrot.slane %v8851_v51, 1 }
 0x13f   : > { %5789 = vmatprep.mubr.msk.bf16.mxu0 %vm6374_vm0, %v8939_v38  ;;  %v2142_v24 = vsel %vm2129_vm5, %v2139_v46, %v2141_v0  ;;  %v1673_v31 = vrot.slane %v8850_v35, 2 }
 0x140   : > { %5698 = vmatmul.mubr.msk.bf16.gmra.mrb[144].mxu1 %vm525_vm2, %v1657_v13  ;;  %v1666_v15 = vsel %vm1595_vm4, %v1656_v42, %v1665_v62 }
 0x141   : > { %v7203_v49 = vpop.f32.mrb[40].mxu0  ;;  %5701 = vmatprep.mubr.msk.bf16.mxu1 %vm6374_vm0, %v8939_v38 }
 0x142   : > { %v5443_v39 = vpop.f32.mrb[41].mxu0 }
 0x143   : > { %v889_v53 = vpop.f32.mrb[40].mxu1  ;;  %v7209_v37 = vpop.f32.mrb[42].mxu0  ;;  %v7219_v39 = vld [vmem:[%s6431_s25 + $0x50] sm:$0xff]  }
 0x144   : > { %v890_v13 = vadd.f32 %v889_v53, %v6853_v26  ;;  %v5495_v50 = vpop.f32.mrb[41].mxu1  ;;  %v5444_v61 = vpop.f32.mrb[43].mxu0  ;;  %8942 = vst [vmem:[#allocation24_spill] sm:$0xff] %v7219_v39  ;;  %v2143_v26 = vrot.slane %v7172_v1, 2  ;;  %v1674_v53 = vor.u32 %v1673_v31, %v1670_v52 }
 0x145   : > { %v892_v20 = vpop.f32.mrb[42].mxu1  ;;  %v7228_v61 = vld [vmem:[%s6431_s25 + $0x14] sm:$0xf]  ;;  %v7231_v50 = vld [vmem:[%s6431_s25 + $0x18] sm:$0xf] }
 0x146   : > { %v893_v45 = vadd.f32 %v892_v20, %v6860_v29  ;;  %5790 = vmatmul.mubr.msk.bf16.gmra.mrb[148].mxu0 %vm525_vm2, %v2142_v24  ;;  %v5496_v46 = vpop.f32.mrb[43].mxu1  ;;  %8943 = vst [vmem:[#allocation25_spill] sm:$0xff] %v7228_v61  ;;  %8944 = vst [vmem:[#allocation26_spill] sm:$0xff] %v7231_v50  ;;  %v2144_v51 = vsel %vm2129_vm5, %v2141_v0, %v2143_v26  ;;  %v1675_v20 = vsel %vm1595_vm4, %v1665_v62, %v1674_v53  ;;  %v7251_v0 = vld [vmem:[%s6431_s25 + $0x58] sm:$0xff]   ;;  %v7262_v62 = vld [vmem:[%s6431_s25 + $0x20] sm:$0xf] }
 0x147   : > { %5793 = vmatprep.mubr.msk.bf16.mxu0 %vm6374_vm0, %v8939_v38  ;;  %v8946_v24 = vshrl.u32 %v7219_v39, 16  ;;  %v8947_v50 = vshll.u32 %v7219_v39, 16  ;;  %8948 = vst [vmem:[#allocation28_spill] sm:$0xff] %v7251_v0  ;;  %8950 = vst [vmem:[#allocation30_spill] sm:$0xff] %v7262_v62 }
 0x148   : > { %5702 = vmatmul.mubr.msk.bf16.gmra.mrb[148].mxu1 %vm525_vm2, %v1666_v15 }
 0x149   : > { %v1235_v42 = vpop.f32.mrb[44].mxu0  ;;  %5705 = vmatprep.mubr.msk.bf16.mxu1 %vm6374_vm0, %v8939_v38  ;;  %v1682_v61 = vrot.slane %v8947_v50, 2 }
 0x14a   : > { %v5587_v46 = vpop.f32.mrb[45].mxu0  ;;  %v7240_v1 = vadd.f32 %v1235_v42, %v890_v13 }
 0x14b   : > { %v897_v35 = vpop.f32.mrb[44].mxu1  ;;  %v1238_v15 = vpop.f32.mrb[46].mxu0  ;;  %v1679_v46 = vrot.slane %v8946_v24, 1 }
 0x14c   : > { %v898_v10 = vadd.f32 %v897_v35, %v6879_v44  ;;  %v5499_v52 = vpop.f32.mrb[45].mxu1  ;;  %v5588_v31 = vpop.f32.mrb[47].mxu0  ;;  %v7243_v29 = vadd.f32 %v1238_v15, %v893_v45  ;;  %v2145_v45 = vrot.slane %v7196_v12, 2  ;;  %v7259_v35 = vld [vmem:[%s6431_s25 + $0x1c] sm:$0xf] }
 0x14d   : > { %v900_v59 = vpop.f32.mrb[46].mxu1  ;;  %8949 = vst [vmem:[#allocation29_spill] sm:$0xff] %v7259_v35 }
 0x14e   : > { %8945 = vst [vmem:[#allocation27_spill] sm:$0xff] %v7243_v29  ;;  %v901_v13 = vadd.f32 %v900_v59, %v6888_v48  ;;  %5794 = vmatmul.mubr.msk.bf16.gmra.mrb[152].mxu0 %vm525_vm2, %v2144_v51  ;;  %v5500_v44 = vpop.f32.mrb[47].mxu1  ;;  %v1683_v48 = vor.u32 %v1682_v61, %v1679_v46  ;;  %v8862_v59 = vshrl.u32 %v7251_v0, 16  ;;  %v8861_v51 = vshll.u32 %v7251_v0, 16 }
 0x14f   : > { %5797 = vmatprep.mubr.msk.bf16.mxu0 %vm6374_vm0, %v8939_v38 }
 0x150   : > { %5706 = vmatmul.mubr.msk.bf16.gmra.mrb[152].mxu1 %vm525_vm2, %v1675_v20  ;;  %v2146_v20 = vsel %vm2129_vm5, %v2143_v26, %v2145_v45  ;;  %v1684_v46 = vsel %vm1595_vm4, %v1674_v53, %v1683_v48  ;;  %v7294_v53 = vld [vmem:[%s6431_s25 + $0x28] sm:$0xf] }
 0x151   : > { %v1243_v42 = vpop.f32.mrb[48].mxu0  ;;  %5709 = vmatprep.mubr.msk.bf16.mxu1 %vm6374_vm0, %v8939_v38  ;;  %8955 = vst [vmem:[#allocation35_spill] sm:$0xff] %v7294_v53 }
 0x152   : > { %v5591_v24 = vpop.f32.mrb[49].mxu0  ;;  %v7271_v15 = vadd.f32 %v1243_v42, %v898_v10  ;;  %v1691_v10 = vrot.slane %v8861_v51, 2  ;;  %v7283_v42 = vld [vmem:[%s6431_s25 + $0x60] sm:$0xff]  }
 0x153   : > { %v905_v52 = vpop.f32.mrb[48].mxu1  ;;  %v1246_v31 = vpop.f32.mrb[50].mxu0  ;;  %v1688_v24 = vrot.slane %v8862_v59, 1  ;;  %8953 = vst [vmem:[#allocation33_spill] sm:$0xff] %v7283_v42 }
 0x154   : > { %8951 = vst [vmem:[#allocation31_spill] sm:$0xff] %v7271_v15  ;;  %v906_v44 = vadd.f32 %v905_v52, %v6907_v57  ;;  %v5503_v50 = vpop.f32.mrb[49].mxu1  ;;  %v5592_v29 = vpop.f32.mrb[51].mxu0  ;;  %v7275_v12 = vadd.f32 %v1246_v31, %v901_v13  ;;  %v7291_v13 = vld [vmem:[%s6431_s25 + $0x24] sm:$0xf]  ;;  %v8866_v31 = vshrl.u32 %v7283_v42, 16 }
 0x155   : > { %v908_v61 = vpop.f32.mrb[50].mxu1  ;;  %v2147_v29 = vrot.slane %v7219_v39, 2  ;;  %8954 = vst [vmem:[#allocation34_spill] sm:$0xff] %v7291_v13 }
 0x156   : > { %8952 = vst [vmem:[#allocation32_spill] sm:$0xff] %v7275_v12  ;;  %v909_v26 = vadd.f32 %v908_v61, %v6918_v41  ;;  %5798 = vmatmul.mubr.msk.bf16.gmra.mrb[156].mxu0 %vm525_vm2, %v2146_v20  ;;  %v5504_v57 = vpop.f32.mrb[51].mxu1  ;;  %v1692_v41 = vor.u32 %v1691_v10, %v1688_v24  ;;  %v8865_v20 = vshll.u32 %v7283_v42, 16 }
 0x157   : > { %5801 = vmatprep.mubr.msk.bf16.mxu0 %vm6374_vm0, %v8939_v38 }
 0x158   : > { %5710 = vmatmul.mubr.msk.bf16.gmra.mrb[156].mxu1 %vm525_vm2, %v1684_v46  ;;  %v2148_v46 = vsel %vm2129_vm5, %v2145_v45, %v2147_v29  ;;  %v1693_v10 = vsel %vm1595_vm4, %v1683_v48, %v1692_v41  ;;  %v7326_v48 = vld [vmem:[%s6431_s25 + $0x30] sm:$0xf] }
 0x159   : > { %v1251_v52 = vpop.f32.mrb[52].mxu0  ;;  %5713 = vmatprep.mubr.msk.bf16.mxu1 %vm6374_vm0, %v8939_v38  ;;  %8960 = vst [vmem:[#allocation40_spill] sm:$0xff] %v7326_v48 }
 0x15a   : > { %v5595_v61 = vpop.f32.mrb[53].mxu0  ;;  %v7303_v57 = vadd.f32 %v1251_v52, %v906_v44  ;;  %v1700_v44 = vrot.slane %v8865_v20, 2  ;;  %v7315_v52 = vld [vmem:[%s6431_s25 + $0x68] sm:$0xff]  }
 0x15b   : > { %v913_v51 = vpop.f32.mrb[52].mxu1  ;;  %v1254_v59 = vpop.f32.mrb[54].mxu0  ;;  %v1697_v61 = vrot.slane %v8866_v31, 1  ;;  %8958 = vst [vmem:[#allocation38_spill] sm:$0xff] %v7315_v52 }
 0x15c   : > { %8956 = vst [vmem:[#allocation36_spill] sm:$0xff] %v7303_v57  ;;  %v914_v50 = vadd.f32 %v913_v51, %v6943_v19  ;;  %v5507_v12 = vpop.f32.mrb[53].mxu1  ;;  %v5596_v39 = vpop.f32.mrb[55].mxu0  ;;  %v7307_v15 = vadd.f32 %v1254_v59, %v909_v26  ;;  %v8870_v26 = vshrl.u32 %v7315_v52, 16 }
 0x15d   : > { %v916_v24 = vpop.f32.mrb[54].mxu1  ;;  %v2149_v12 = vrot.slane %v7251_v0, 2  ;;  %v7323_v39 = vld [vmem:[%s6431_s25 + $0x2c] sm:$0xf] }
 0x15e   : > { %8957 = vst [vmem:[#allocation37_spill] sm:$0xff] %v7307_v15  ;;  %v917_v45 = vadd.f32 %v916_v24, %v6954_v40  ;;  %5802 = vmatmul.mubr.msk.bf16.gmra.mrb[160].mxu0 %vm525_vm2, %v2148_v46  ;;  %v5508_v19 = vpop.f32.mrb[55].mxu1  ;;  %8959 = vst [vmem:[#allocation39_spill] sm:$0xff] %v7323_v39  ;;  %v1701_v40 = vor.u32 %v1700_v44, %v1697_v61  ;;  %v8869_v46 = vshll.u32 %v7315_v52, 16 }
 0x15f   : > { %5805 = vmatprep.mubr.msk.bf16.mxu0 %vm6374_vm0, %v8939_v38 }
 0x160   : > { %5714 = vmatmul.mubr.msk.bf16.gmra.mrb[160].mxu1 %vm525_vm2, %v1693_v10  ;;  %v2150_v10 = vsel %vm2129_vm5, %v2147_v29, %v2149_v12  ;;  %v1702_v44 = vsel %vm1595_vm4, %v1692_v41, %v1701_v40 }
 0x161   : > { %v1259_v51 = vpop.f32.mrb[56].mxu0  ;;  %5717 = vmatprep.mubr.msk.bf16.mxu1 %vm6374_vm0, %v8939_v38 }
 0x162   : > { %v5599_v24 = vpop.f32.mrb[57].mxu0  ;;  %v7335_v19 = vadd.f32 %v1259_v51, %v914_v50  ;;  %v1709_v50 = vrot.slane %v8869_v46, 2 }
 0x163   : > { %v921_v20 = vpop.f32.mrb[56].mxu1  ;;  %v1262_v31 = vpop.f32.mrb[58].mxu0  ;;  %v1706_v24 = vrot.slane %v8870_v26, 1 }
 0x164   : > { %v922_v59 = vadd.f32 %v921_v20, %v6980_v8  ;;  %v5511_v15 = vpop.f32.mrb[57].mxu1  ;;  %v5600_v0 = vpop.f32.mrb[59].mxu0  ;;  %v7339_v57 = vadd.f32 %v1262_v31, %v917_v45  ;;  %v2151_v8 = vrot.slane %v7283_v42, 2 }
 0x165   : > { %v924_v61 = vpop.f32.mrb[58].mxu1  ;;  %v7352_v0 = vld [vmem:[%s6431_s25 + $0x34] sm:$0xf]  ;;  %v7355_v15 = vld [vmem:[%s6431_s25 + $0x38] sm:$0xf] }
 0x166   : > { %8961 = vst [vmem:[#allocation41_spill] sm:$0xff] %v7339_v57  ;;  %v925_v51 = vadd.f32 %v924_v61, %v6991_v9  ;;  %5806 = vmatmul.mubr.msk.bf16.gmra.mrb[164].mxu0 %vm525_vm2, %v2150_v10  ;;  %v5512_v29 = vpop.f32.mrb[59].mxu1  ;;  %8962 = vst [vmem:[#allocation42_spill] sm:$0xff] %v7352_v0  ;;  %v1710_v9 = vor.u32 %v1709_v50, %v1706_v24  ;;  %v8965_v24 = vshrl.u32 %v6858_v27, 16 }
 0x167   : > { %5809 = vmatprep.mubr.msk.bf16.mxu0 %vm6374_vm0, %v8939_v38  ;;  %8963 = vst [vmem:[#allocation43_spill] sm:$0xff] %v7355_v15  ;;  %v2152_v29 = vsel %vm2129_vm5, %v2149_v12, %v2151_v8 }
 0x168   : > { %5718 = vmatmul.mubr.msk.bf16.gmra.mrb[164].mxu1 %vm525_vm2, %v1702_v44  ;;  %v1711_v42 = vsel %vm1595_vm4, %v1701_v40, %v1710_v9  ;;  %v1715_v50 = vrot.slane %v8965_v24, 1 }
 0x169   : > { %v1267_v31 = vpop.f32.mrb[60].mxu0  ;;  %5721 = vmatprep.mubr.msk.bf16.mxu1 %vm6374_vm0, %v8939_v38 }
 0x16a   : > { %v5603_v20 = vpop.f32.mrb[61].mxu0  ;;  %v7362_v45 = vadd.f32 %v1267_v31, %v922_v59  ;;  %v8966_v59 = vshll.u32 %v6858_v27, 16 }
 0x16b   : > { %v929_v10 = vpop.f32.mrb[60].mxu1  ;;  %v1270_v61 = vpop.f32.mrb[62].mxu0 }
 0x16c   : > { %v930_v46 = vadd.f32 %v929_v10, %v7022_v55  ;;  %v5515_v44 = vpop.f32.mrb[61].mxu1  ;;  %v5604_v26 = vpop.f32.mrb[63].mxu0  ;;  %v7366_v57 = vadd.f32 %v1270_v61, %v925_v51  ;;  %v1718_v31 = vrot.slane %v8966_v59, 2  ;;  %v2153_v55 = vrot.slane %v7315_v52, 2  ;;  %v7382_v51 = vld [vmem:[%s6431_s25 + $0x40] sm:$0xf] }
 0x16d   : > { %v932_v41 = vpop.f32.mrb[62].mxu1  ;;  %v7379_v26 = vld [vmem:[%s6431_s25 + $0x3c] sm:$0xf]  ;;  %8968 = vst [vmem:[#allocation46_spill] sm:$0xff] %v7382_v51 }
 0x16e   : > { %8964 = vst [vmem:[#allocation44_spill] sm:$0xff] %v7366_v57  ;;  %v933_v20 = vadd.f32 %v932_v41, %v7037_v4  ;;  %5810 = vmatmul.mubr.msk.bf16.gmra.mrb[168].mxu0 %vm525_vm2, %v2152_v29  ;;  %v5516_v12 = vpop.f32.mrb[63].mxu1  ;;  %8967 = vst [vmem:[#allocation45_spill] sm:$0xff] %v7379_v26  ;;  %v1719_v4 = vor.u32 %v1718_v31, %v1715_v50  ;;  %v2154_v24 = vsel %vm2129_vm5, %v2151_v8, %v2153_v55 }
 0x16f   : > { %5813 = vmatprep.mubr.msk.bf16.mxu0 %vm6374_vm0, %v8939_v38  ;;  %v8971_v50 = vshrl.u32 %v6886_v28, 16 }
 0x170   : > { %5722 = vmatmul.mubr.msk.bf16.gmra.mrb[168].mxu1 %vm525_vm2, %v1711_v42  ;;  %v1720_v52 = vsel %vm1595_vm4, %v1710_v9, %v1719_v4 }
 0x171   : > { %v1275_v10 = vpop.f32.mrb[64].mxu0  ;;  %5725 = vmatprep.mubr.msk.bf16.mxu1 %vm6374_vm0, %v8939_v38  ;;  %v1724_v31 = vrot.slane %v8971_v50, 1 }
 0x172   : > { %v5607_v41 = vpop.f32.mrb[65].mxu0  ;;  %v7389_v61 = vadd.f32 %v1275_v10, %v930_v46  ;;  %v8972_v46 = vshll.u32 %v6886_v28, 16 }
 0x173   : > { %v937_v29 = vpop.f32.mrb[64].mxu1  ;;  %v1278_v44 = vpop.f32.mrb[66].mxu0 }
 0x174   : > { %8969 = vst [vmem:[#allocation47_spill] sm:$0xff] %v7389_v61  ;;  %v938_v59 = vadd.f32 %v937_v29, %v7074_v22  ;;  %v5519_v42 = vpop.f32.mrb[65].mxu1  ;;  %v5608_v12 = vpop.f32.mrb[67].mxu0  ;;  %v7393_v57 = vadd.f32 %v1278_v44, %v933_v20  ;;  %v1727_v10 = vrot.slane %v8972_v46, 2  ;;  %v2155_v22 = vrot.slane %v6858_v27, 2 }
 0x175   : > { %v940_v40 = vpop.f32.mrb[66].mxu1  ;;  %v7406_v20 = vld [vmem:[%s6431_s25 + $0x44] sm:$0xf]  ;;  %v7409_v29 = vld [vmem:[%s6431_s25 + $0x48] sm:$0xf] }
 0x176   : > { %8970 = vst [vmem:[#allocation48_spill] sm:$0xff] %v7393_v57  ;;  %v941_v41 = vadd.f32 %v940_v40, %v7089_v16  ;;  %5814 = vmatmul.mubr.msk.bf16.gmra.mrb[172].mxu0 %vm525_vm2, %v2154_v24  ;;  %v5520_v8 = vpop.f32.mrb[67].mxu1  ;;  %8973 = vst [vmem:[#allocation49_spill] sm:$0xff] %v7406_v20  ;;  %v1728_v16 = vor.u32 %v1727_v10, %v1724_v31  ;;  %v2156_v12 = vsel %vm2129_vm5, %v2153_v55, %v2155_v22 }
 0x177   : > { %5817 = vmatprep.mubr.msk.bf16.mxu0 %vm6374_vm0, %v8939_v38  ;;  %8974 = vst [vmem:[#allocation50_spill] sm:$0xff] %v7409_v29  ;;  %v8977_v31 = vshrl.u32 %v6916_v36, 16 }
 0x178   : > { %5726 = vmatmul.mubr.msk.bf16.gmra.mrb[172].mxu1 %vm525_vm2, %v1720_v52  ;;  %v1729_v57 = vsel %vm1595_vm4, %v1719_v4, %v1728_v16 }
 0x179   : > { %v1283_v44 = vpop.f32.mrb[68].mxu0  ;;  %5729 = vmatprep.mubr.msk.bf16.mxu1 %vm6374_vm0, %v8939_v38  ;;  %v1733_v10 = vrot.slane %v8977_v31, 1 }
 0x17a   : > { %v5611_v40 = vpop.f32.mrb[69].mxu0  ;;  %v7416_v24 = vadd.f32 %v1283_v44, %v938_v59  ;;  %v8978_v59 = vshll.u32 %v6916_v36, 16 }
 0x17b   : > { %v945_v42 = vpop.f32.mrb[68].mxu1  ;;  %v1286_v27 = vpop.f32.mrb[70].mxu0 }
 0x17c   : > { %8975 = vst [vmem:[#allocation51_spill] sm:$0xff] %v7416_v24  ;;  %v946_v50 = vadd.f32 %v945_v42, %v7124_v11  ;;  %v5523_v52 = vpop.f32.mrb[69].mxu1  ;;  %v5612_v46 = vpop.f32.mrb[71].mxu0  ;;  %v7420_v8 = vadd.f32 %v1286_v27, %v941_v41  ;;  %v1736_v44 = vrot.slane %v8978_v59, 2  ;;  %v2157_v11 = vrot.slane %v6886_v28, 2 }
 0x17d   : > { %v948_v9 = vpop.f32.mrb[70].mxu1  ;;  %v7433_v41 = vld [vmem:[%s6431_s25 + $0x4c] sm:$0xf]  ;;  %v7436_v42 = vld [vmem:[%s6431_s25 + $0x50] sm:$0xf] }
 0x17e   : > { %8976 = vst [vmem:[#allocation52_spill] sm:$0xff] %v7420_v8  ;;  %v949_v40 = vadd.f32 %v948_v9, %v7132_v32  ;;  %5818 = vmatmul.mubr.msk.bf16.gmra.mrb[176].mxu0 %vm525_vm2, %v2156_v12  ;;  %v5524_v55 = vpop.f32.mrb[71].mxu1  ;;  %8979 = vst [vmem:[#allocation53_spill] sm:$0xff] %v7433_v41  ;;  %v1737_v32 = vor.u32 %v1736_v44, %v1733_v10  ;;  %v2158_v46 = vsel %vm2129_vm5, %v2155_v22, %v2157_v11 }
 0x17f   : > { %5821 = vmatprep.mubr.msk.bf16.mxu0 %vm6374_vm0, %v8939_v38  ;;  %8980 = vst [vmem:[#allocation54_spill] sm:$0xff] %v7436_v42  ;;  %v8983_v10 = vshrl.u32 %v6952_v23, 16 }
 0x180   : > { %5730 = vmatmul.mubr.msk.bf16.gmra.mrb[176].mxu1 %vm525_vm2, %v1729_v57  ;;  %v1738_v8 = vsel %vm1595_vm4, %v1728_v16, %v1737_v32 }
 0x181   : > { %v1291_v27 = vpop.f32.mrb[72].mxu0  ;;  %5733 = vmatprep.mubr.msk.bf16.mxu1 %vm6374_vm0, %v8939_v38  ;;  %v1742_v44 = vrot.slane %v8983_v10, 1 }
 0x182   : > { %v5615_v9 = vpop.f32.mrb[73].mxu0  ;;  %v7443_v12 = vadd.f32 %v1291_v27, %v946_v50  ;;  %v8984_v50 = vshll.u32 %v6952_v23, 16 }
 0x183   : > { %v953_v52 = vpop.f32.mrb[72].mxu1  ;;  %v1294_v28 = vpop.f32.mrb[74].mxu0 }
 0x184   : > { %8981 = vst [vmem:[#allocation55_spill] sm:$0xff] %v7443_v12  ;;  %v954_v31 = vadd.f32 %v953_v52, %v7153_v58  ;;  %v5527_v57 = vpop.f32.mrb[73].mxu1  ;;  %v5616_v59 = vpop.f32.mrb[75].mxu0  ;;  %v7447_v55 = vadd.f32 %v1294_v28, %v949_v40  ;;  %v1745_v27 = vrot.slane %v8984_v50, 2  ;;  %v2159_v58 = vrot.slane %v6916_v36, 2 }
 0x185   : > { %v956_v4 = vpop.f32.mrb[74].mxu1  ;;  %v7460_v40 = vld [vmem:[%s6431_s25 + $0x54] sm:$0xf]  ;;  %v7463_v52 = vld [vmem:[%s6431_s25 + $0x58] sm:$0xf] }
 0x186   : > { %8982 = vst [vmem:[#allocation56_spill] sm:$0xff] %v7447_v55  ;;  %v957_v9 = vadd.f32 %v956_v4, %v7159_v21  ;;  %5822 = vmatmul.mubr.msk.bf16.gmra.mrb[180].mxu0 %vm525_vm2, %v2158_v46  ;;  %v5528_v22 = vpop.f32.mrb[75].mxu1  ;;  %8985 = vst [vmem:[#allocation57_spill] sm:$0xff] %v7460_v40  ;;  %v1746_v21 = vor.u32 %v1745_v27, %v1742_v44  ;;  %v2160_v59 = vsel %vm2129_vm5, %v2157_v11, %v2159_v58 }
 0x187   : > { %5825 = vmatprep.mubr.msk.bf16.mxu0 %vm6374_vm0, %v8939_v38  ;;  %8986 = vst [vmem:[#allocation58_spill] sm:$0xff] %v7463_v52  ;;  %v8989_v44 = vshrl.u32 %v6989_v5, 16 }
 0x188   : > { %5734 = vmatmul.mubr.msk.bf16.gmra.mrb[180].mxu1 %vm525_vm2, %v1738_v8  ;;  %v1747_v55 = vsel %vm1595_vm4, %v1737_v32, %v1746_v21 }
 0x189   : > { %v1299_v28 = vpop.f32.mrb[76].mxu0  ;;  %5737 = vmatprep.mubr.msk.bf16.mxu1 %vm6374_vm0, %v8939_v38  ;;  %v1751_v27 = vrot.slane %v8989_v44, 1 }
 0x18a   : > { %v5619_v4 = vpop.f32.mrb[77].mxu0  ;;  %v7470_v46 = vadd.f32 %v1299_v28, %v954_v31  ;;  %v8990_v31 = vshll.u32 %v6989_v5, 16 }
 0x18b   : > { %v961_v57 = vpop.f32.mrb[76].mxu1  ;;  %v1302_v36 = vpop.f32.mrb[78].mxu0 }
 0x18c   : > { %8987 = vst [vmem:[#allocation59_spill] sm:$0xff] %v7470_v46  ;;  %v962_v10 = vadd.f32 %v961_v57, %v7179_v56  ;;  %v5531_v8 = vpop.f32.mrb[77].mxu1  ;;  %v5620_v50 = vpop.f32.mrb[79].mxu0  ;;  %v7474_v22 = vadd.f32 %v1302_v36, %v957_v9  ;;  %v1754_v28 = vrot.slane %v8990_v31, 2  ;;  %v2161_v56 = vrot.slane %v6952_v23, 2 }
 0x18d   : > { %v964_v16 = vpop.f32.mrb[78].mxu1  ;;  %v7487_v9 = vld [vmem:[%s6431_s25 + $0x5c] sm:$0xf]  ;;  %v7490_v57 = vld [vmem:[%s6431_s25 + $0x60] sm:$0xf] }
 0x18e   : > { %8988 = vst [vmem:[#allocation60_spill] sm:$0xff] %v7474_v22  ;;  %v965_v4 = vadd.f32 %v964_v16, %v7185_v43  ;;  %5826 = vmatmul.mubr.msk.bf16.gmra.mrb[184].mxu0 %vm525_vm2, %v2160_v59  ;;  %v5532_v11 = vpop.f32.mrb[79].mxu1  ;;  %8991 = vst [vmem:[#allocation61_spill] sm:$0xff] %v7487_v9  ;;  %v1755_v43 = vor.u32 %v1754_v28, %v1751_v27  ;;  %v2162_v50 = vsel %vm2129_vm5, %v2159_v58, %v2161_v56 }
 0x18f   : > { %5829 = vmatprep.mubr.msk.bf16.mxu0 %vm6374_vm0, %v8939_v38  ;;  %8992 = vst [vmem:[#allocation62_spill] sm:$0xff] %v7490_v57  ;;  %v8995_v28 = vshrl.u32 %v7035_v14, 16 }
 0x190   : > { %5738 = vmatmul.mubr.msk.bf16.gmra.mrb[184].mxu1 %vm525_vm2, %v1747_v55 }
 0x191   : > { %v1307_v36 = vpop.f32.mrb[80].mxu0  ;;  %5741 = vmatprep.mubr.msk.bf16.mxu1 %vm6374_vm0, %v8939_v38 }
 0x192   : > { %v5623_v16 = vpop.f32.mrb[81].mxu0  ;;  %v7497_v59 = vadd.f32 %v1307_v36, %v962_v10  ;;  %v1756_v10 = vsel %vm1595_vm4, %v1746_v21, %v1755_v43  ;;  %v1760_v36 = vrot.slane %v8995_v28, 1  ;;  %v7517_v21 = vld [vmem:[%s6431_s25 + $0x68] sm:$0xf]  ;;  %v7537_v28 = vld [vmem:[%s6431_s25 + $0x7c] sm:$0xf] }
 0x193   : > { %v969_v8 = vpop.f32.mrb[80].mxu1  ;;  %v1310_v23 = vpop.f32.mrb[82].mxu0  ;;  %v8996_v16 = vshll.u32 %v7035_v14, 16  ;;  %8998 = vst [vmem:[#allocation66_spill] sm:$0xff] %v7517_v21  ;;  %9003 = vst [vmem:[#allocation71_spill] sm:$0xff] %v7537_v28 }
 0x194   : > { %8993 = vst [vmem:[#allocation63_spill] sm:$0xff] %v7497_v59  ;;  %v970_v55 = vadd.f32 %v969_v8, %v7203_v49  ;;  %v5535_v44 = vpop.f32.mrb[81].mxu1  ;;  %v5624_v31 = vpop.f32.mrb[83].mxu0  ;;  %v7501_v11 = vadd.f32 %v1310_v23, %v965_v4  ;;  %v2163_v4 = vrot.slane %v6989_v5, 2  ;;  %v7514_v8 = vld [vmem:[%s6431_s25 + $0x64] sm:$0xf] }
 0x195   : > { %v972_v27 = vpop.f32.mrb[82].mxu1  ;;  %v1763_v32 = vrot.slane %v8996_v16, 2  ;;  %8997 = vst [vmem:[#allocation65_spill] sm:$0xff] %v7514_v8  ;;  %v7520_v23 = vld [vmem:[%s6431_s25 + $0x6c] sm:$0xf]  ;;  %v9008_v5 = vshll.u32 %v7087_v60, 16 }
 0x196   : > { %8994 = vst [vmem:[#allocation64_spill] sm:$0xff] %v7501_v11  ;;  %v973_v58 = vadd.f32 %v972_v27, %v7209_v37  ;;  %5830 = vmatmul.mubr.msk.bf16.gmra.mrb[188].mxu0 %vm525_vm2, %v2162_v50  ;;  %v5536_v49 = vpop.f32.mrb[83].mxu1  ;;  %8999 = vst [vmem:[#allocation67_spill] sm:$0xff] %v7520_v23  ;;  %v7524_v44 = vld [vmem:[%s6431_s25 + $0x70] sm:$0xf] }
 0x197   : > { %5833 = vmatprep.mubr.msk.bf16.mxu0 %vm6374_vm0, %v8939_v38  ;;  %9000 = vst [vmem:[#allocation68_spill] sm:$0xff] %v7524_v44  ;;  %v7527_v37 = vld [vmem:[%s6431_s25 + $0x74] sm:$0xf]  ;;  %v7530_v50 = vld [vmem:[%s6431_s25 + $0x78] sm:$0xf]  ;;  %v1764_v27 = vor.u32 %v1763_v32, %v1760_v36  ;;  %v2164_v32 = vsel %vm2129_vm5, %v2161_v56, %v2163_v4 }
 0x198   : > { %5742 = vmatmul.mubr.msk.bf16.gmra.mrb[188].mxu1 %vm525_vm2, %v1756_v10  ;;  %9001 = vst [vmem:[#allocation69_spill] sm:$0xff] %v7527_v37  ;;  %9002 = vst [vmem:[#allocation70_spill] sm:$0xff] %v7530_v50  ;;  %v7540_v16 = vld [vmem:[%s6431_s25 + $0x80] sm:$0xf] }
 0x199   : > { %v1315_v31 = vpop.f32.mrb[84].mxu0  ;;  %5745 = vmatprep.mubr.msk.bf16.mxu1 %vm6374_vm0, %v8939_v38  ;;  %9004 = vst [vmem:[#allocation72_spill] sm:$0xff] %v7540_v16  ;;  %v1765_v44 = vsel %vm1595_vm4, %v1755_v43, %v1764_v27 }
 0x19a   : > { %v5627_v11 = vpop.f32.mrb[85].mxu0  ;;  %v7548_v59 = vadd.f32 %v1315_v31, %v970_v55  ;;  %v1772_v55 = vrot.slane %v9008_v5, 2  ;;  %v6313_v31 = vld [vmem:[%s6431_s25 + $0xa8] ss:$0 sps:$4 sm:$0x77]  }
 0x19b   : > { %v977_v22 = vpop.f32.mrb[84].mxu1  ;;  %v1318_v46 = vpop.f32.mrb[86].mxu0  ;;  %v9007_v11 = vshrl.u32 %v7087_v60, 16 }
 0x19c   : > { %9005 = vst [vmem:[#allocation73_spill] sm:$0xff] %v7548_v59  ;;  %v978_v36 = vadd.f32 %v977_v22, %v6862_v30  ;;  %v5539_v12 = vpop.f32.mrb[85].mxu1  ;;  %v5628_v24 = vpop.f32.mrb[87].mxu0  ;;  %v7552_v61 = vadd.f32 %v1318_v46, %v973_v58  ;;  %v2165_v30 = vrot.slane %v7035_v14, 2  ;;  %v1776_v46 = vshrl.u32 %v6313_v31, 16 }
 0x19d   : > { %v980_v10 = vpop.f32.mrb[86].mxu1  ;;  %v1769_v49 = vrot.slane %v9007_v11, 1  ;;  %v1779_v22 = vshll.u32 %v6313_v31, 16 }
 0x19e   : > { %9006 = vst [vmem:[#allocation74_spill] sm:$0xff] %v7552_v61  ;;  %v981_v59 = vadd.f32 %v980_v10, %v6865_v34  ;;  %5834 = vmatmul.mubr.msk.bf16.gmra.mrb[192].mxu0 %vm525_vm2, %v2164_v32  ;;  %v5540_v56 = vpop.f32.mrb[87].mxu1  ;;  %v2166_v10 = vsel %vm2129_vm5, %v2163_v4, %v2165_v30  ;;  %v1778_v16 = vrot.slane %v1776_v46, 1 }
 0x19f   : > { %5837 = vmatprep.mubr.msk.bf16.mxu0 %vm6374_vm0, %v8939_v38  ;;  %v1773_v12 = vor.u32 %v1772_v55, %v1769_v49  ;;  %v1781_v49 = vrot.slane %v1779_v22, 2 }
 0x1a0   : > { %5746 = vmatmul.mubr.msk.bf16.gmra.mrb[192].mxu1 %vm525_vm2, %v1765_v44 }
 0x1a1   : > { %v1323_v24 = vpop.f32.mrb[88].mxu0  ;;  %5749 = vmatprep.mubr.msk.bf16.mxu1 %vm6374_vm0, %v8939_v38  ;;  %v1774_v61 = vsel %vm1595_vm4, %v1764_v27, %v1773_v12 }
 0x1a2   : > { %v5631_v43 = vpop.f32.mrb[89].mxu0  ;;  %v7568_v58 = vadd.f32 %v1323_v24, %v978_v36 }
 0x1a3   : > { %v985_v34 = vpop.f32.mrb[88].mxu1  ;;  %v1326_v5 = vpop.f32.mrb[90].mxu0  ;;  %v7592_v43 = vld [vmem:[%s6431_s25 + $0xa8] ss:$0 sps:$4 sm:$0xff]  }
 0x1a4   : > { %9009 = vst [vmem:[#allocation75_spill] sm:$0xff] %v7568_v58  ;;  %v986_v32 = vadd.f32 %v985_v34, %v6890_v6  ;;  %v5543_v11 = vpop.f32.mrb[89].mxu1  ;;  %v5632_v14 = vpop.f32.mrb[91].mxu0  ;;  %v7572_v56 = vadd.f32 %v1326_v5, %v981_v59  ;;  %v7580_v6 = vsel %vm2508_vm6, %v6883_v47, %v6913_v2  ;;  %v2167_v59 = vrot.slane %v7087_v60, 2  ;;  %v9070_v58 = vld [vmem:[#allocation20_spill] sm:$0xff] }
 0x1a5   : > { %v988_v44 = vpop.f32.mrb[90].mxu1 }
 0x1a6   : > { %9010 = vst [vmem:[#allocation76_spill] sm:$0xff] %v7572_v56  ;;  %v989_v36 = vadd.f32 %v988_v44, %v6893_v7  ;;  %5838 = vmatmul.mubr.msk.bf16.gmra.mrb[196].mxu0 %vm525_vm2, %v2166_v10  ;;  %v5544_v55 = vpop.f32.mrb[91].mxu1  ;;  %v1782_v7 = vor.u32 %v1781_v49, %v1778_v16  ;;  %v2168_v22 = vsel %vm2129_vm5, %v2165_v30, %v2167_v59 }
 0x1a7   : > { %5841 = vmatprep.mubr.msk.bf16.mxu0 %vm6374_vm0, %v8939_v38  ;;  %v7603_v30 = vsel %vm2508_vm6, %v6913_v2, %v6949_v54 }
 0x1a8   : > { %5750 = vmatmul.mubr.msk.bf16.gmra.mrb[196].mxu1 %vm525_vm2, %v1774_v61  ;;  %v1783_v11 = vsel %vm1595_vm4, %v1773_v12, %v1782_v7  ;;  %v2513_v12 = vshll.u32 %v6995_v17, 16 }
 0x1a9   : > { %v1331_v4 = vpop.f32.mrb[92].mxu0  ;;  %5753 = vmatprep.mubr.msk.bf16.mxu1 %vm6374_vm0, %v8939_v38 }
 0x1aa   : > { %v5635_v27 = vpop.f32.mrb[93].mxu0  ;;  %v7588_v31 = vadd.f32 %v1331_v4, %v986_v32 }
 0x1ab   : > { %v993_v24 = vpop.f32.mrb[92].mxu1  ;;  %v1334_v46 = vpop.f32.mrb[94].mxu0 }
 0x1ac   : > { %9011 = vst [vmem:[#allocation77_spill] sm:$0xff] %v7588_v31  ;;  %v994_v34 = vadd.f32 %v993_v24, %v6920_v3  ;;  %v5547_v5 = vpop.f32.mrb[93].mxu1  ;;  %v5636_v60 = vpop.f32.mrb[95].mxu0  ;;  %v7595_v10 = vadd.f32 %v1334_v46, %v989_v36  ;;  %v2169_v3 = vrot.slane %v7592_v43, 2 }
 0x1ad   : > { %v996_v61 = vpop.f32.mrb[94].mxu1  ;;  %v2515_v60 = vrot.slane %v2513_v12, 3 }
 0x1ae   : > { %9012 = vst [vmem:[#allocation78_spill] sm:$0xff] %v7595_v10  ;;  %v997_v16 = vadd.f32 %v996_v61, %v6926_v63  ;;  %5842 = vmatmul.mubr.msk.bf16.gmra.mrb[200].mxu0 %vm525_vm2, %v2168_v22  ;;  %v5548_v32 = vpop.f32.mrb[95].mxu1  ;;  %v2510_v63 = vshrl.u32 %v6995_v17, 16  ;;  %v2170_v55 = vsel %vm2129_vm5, %v2167_v59, %v2169_v3  ;;  %v9015_v17 = vshrl.u32 %v6929_v18, 16 }
 0x1af   : > { %5845 = vmatprep.mubr.msk.bf16.mxu0 %vm6374_vm0, %v8939_v38  ;;  %v9016_v61 = vshll.u32 %v6929_v18, 16  ;;  %v2930_v18 = vld [vmem:[%s6431_s25 + $0x10] sm:$0x8] }
 0x1b0   : > { %5754 = vmatmul.mubr.msk.bf16.gmra.mrb[200].mxu1 %vm525_vm2, %v1783_v11  ;;  %v2512_v5 = vrot.slane %v2510_v63, 2  ;;  %v7636_v63 = vld [vmem:[%s6431_s25 + $0x88] sm:$0xf] }
 0x1b1   : > { %v1339_v14 = vpop.f32.mrb[96].mxu0  ;;  %5757 = vmatprep.mubr.msk.bf16.mxu1 %vm6374_vm0, %v8939_v38  ;;  %v2518_v11 = vrot.slane %v9016_v61, 3  ;;  %v9022_v61 = vld [vmem:[#allocation4_spill] sm:$0xff] }
 0x1b2   : > { %v5639_v44 = vpop.f32.mrb[97].mxu0  ;;  %v7613_v49 = vadd.f32 %v1339_v14, %v994_v34  ;;  %v2517_v34 = vrot.slane %v9015_v17, 2 }
 0x1b3   : > { %v1001_v2 = vpop.f32.mrb[96].mxu1  ;;  %v1342_v36 = vpop.f32.mrb[98].mxu0  ;;  %v2516_v44 = vor.u32 %v2515_v60, %v2512_v5 }
 0x1b4   : > { %9013 = vst [vmem:[#allocation79_spill] sm:$0xff] %v7613_v49  ;;  %v1002_v4 = vadd.f32 %v1001_v2, %v6956_v25  ;;  %v5551_v27 = vpop.f32.mrb[97].mxu1  ;;  %v5640_v24 = vpop.f32.mrb[99].mxu0  ;;  %v7617_v46 = vadd.f32 %v1342_v36, %v997_v16  ;;  %v9017_v25 = vld [vmem:[#allocation3_spill] sm:$0xff]  ;;  %v7633_v16 = vld [vmem:[%s6431_s25 + $0x84] sm:$0xf] }
 0x1b5   : > { %v1004_v22 = vpop.f32.mrb[98].mxu1  ;;  %v7628_v14 = vsel %vm2508_vm6, %v6949_v54, %v9017_v25  ;;  %9018 = vst [vmem:[#allocation3_spill] sm:$0xff] %v7633_v16  ;;  %v2519_v54 = vor.u32 %v2518_v11, %v2517_v34  ;;  %v9020_v24 = vld [vmem:[#allocation25_spill] sm:$0xff]  ;;  %v6315_v34 = vld [vmem:[%s8804_s1 + $0xe0] sm:$0xff]  }
 0x1b6   : > { %9014 = vst [vmem:[#allocation80_spill] sm:$0xff] %v7617_v46  ;;  %v1005_v32 = vadd.f32 %v1004_v22, %v6959_v33  ;;  %5846 = vmatmul.mubr.msk.bf16.gmra.mrb[204].mxu0 %vm525_vm2, %v2170_v55  ;;  %v5552_v59 = vpop.f32.mrb[99].mxu1  ;;  %v7647_v22 = vcombine.low %v2930_v18, %v9020_v24  ;;  %v9024_v11 = vld [vmem:[#allocation2_spill] sm:$0xff] }
 0x1b7   : > { %5849 = vmatprep.mubr.msk.bf16.mxu0 %vm6374_vm0, %v8939_v38  ;;  %v9025_v18 = vshrl.u32 %v9024_v11, 16 }
 0x1b8   : > { %5758 = vmatmul.mubr.msk.bf16.gmra.mrb[204].mxu1 %vm525_vm2, %v1782_v7  ;;  %v9021_v7 = vld [vmem:[#allocation26_spill] sm:$0xff] }
 0x1b9   : > { %v1347_v12 = vpop.f32.mrb[100].mxu0  ;;  %5861 = vmatprep.mubr.msk.bf16.mxu1 %vm6374_vm0, %v8939_v38  ;;  %v7651_v17 = vcombine.low %v9021_v7, %v7259_v35 }
 0x1ba   : > { %v5643_v2 = vpop.f32.mrb[101].mxu0  ;;  %v7644_v36 = vadd.f32 %v1347_v12, %v1002_v4  ;;  %v2520_v4 = vsel %vm2508_vm6, %v2516_v44, %v2519_v54  ;;  %v2521_v12 = vrot.slane %v9025_v18, 2  ;;  %v3087_v44 = vrot.slane %v7647_v22, 3  ;;  %v7676_v18 = vld [vmem:[%s6431_s25 + $0x8c] sm:$0xf] }
 0x1bb   : > { %v1009_v55 = vpop.f32.mrb[100].mxu1  ;;  %v1350_v27 = vpop.f32.mrb[102].mxu0  ;;  %v9026_v2 = vshll.u32 %v9024_v11, 16  ;;  %9029 = vst [vmem:[#allocation2_spill] sm:$0xff] %v7676_v18  ;;  %v7679_v11 = vld [vmem:[%s6431_s25 + $0x90] sm:$0xf] }
 0x1bc   : > { %9019 = vst [vmem:[#allocation81_spill] sm:$0xff] %v7644_v36  ;;  %v1010_v59 = vadd.f32 %v1009_v55, %v9022_v61  ;;  %v5555_v33 = vpop.f32.mrb[101].mxu1  ;;  %v5644_v46 = vpop.f32.mrb[103].mxu0  ;;  %v7654_v5 = vadd.f32 %v1350_v27, %v1005_v32  ;;  %v9027_v55 = vld [vmem:[#allocation5_spill] sm:$0xff]  ;;  %v9028_v32 = vld [vmem:[#allocation7_spill] sm:$0xff]  ;;  %v3088_v27 = vrot.slane %v7651_v17, 3 }
 0x1bd   : > { %v1012_v60 = vpop.f32.mrb[102].mxu1  ;;  %v2522_v35 = vrot.slane %v9026_v2, 3  ;;  %v7669_v33 = vsel %vm2508_vm6, %v9017_v25, %v9028_v32  ;;  %9030 = vst [vmem:[#allocation5_spill] sm:$0xff] %v7679_v11  ;;  %v6330_v2 = vld [vmem:[%s8804_s1 + $0xe8] sm:$0xff]  }
 0x1be   : > { %9023 = vst [vmem:[#allocation4_spill] sm:$0xff] %v7654_v5  ;;  %v1013_v61 = vadd.f32 %v1012_v60, %v9027_v55  ;;  %5850 = vmatmul.mubr.msk.bf16.gmra.mrb[208].mxu0 %vm525_vm2, %v2169_v3  ;;  %v5556_v46 = vpop.f32.mrb[103].mxu1  ;;  %v3089_v24 = vsel %vm3086_vm7, %v3087_v44, %v3088_v27  ;;  %v6319_v3 = vld [vmem:[%s8804_s1 + $0x100] sm:$0xff]  }
 0x1bf   : > { %5953 = vmatprep.mubr.msk.bf16.mxu0 %vm6374_vm0, %v8939_v38  ;;  %v2523_v25 = vor.u32 %v2522_v35, %v2521_v12  ;;  %v7698_v35 = vcombine.low %v7262_v62, %v7291_v13  ;;  %v9034_v44 = vld [vmem:[#allocation6_spill] sm:$0xff] }
 0x1c0   : > { %5862 = vmatmul.mubr.msk.bf16.vlgmr.msra.gmra.mrb[208].mxu1 %vm525_vm2, %v2520_v4  ;;  %v9036_v10 = vshll.u32 %v9034_v44, 16 }
 0x1c1   : > { %v1355_v60 = vpop.f32.mrb[104].mxu0  ;;  %5865 = vmatprep.mubr.msk.bf16.mxu1 %vm6374_vm0, %v8939_v38  ;;  %6038 = vmatpush3.bf16.msra.mxu1 %v6315_v34  ;;  %v9032_v34 = vld [vmem:[#allocation8_spill] sm:$0xff] }
 0x1c2   : > { %v5647_v55 = vpop.f32.mrb[105].mxu0  ;;  %6039 = vmatprep.subr.bf16.mxu1 %v8939_v38  ;;  %v7690_v46 = vadd.f32 %v1355_v60, %v1010_v59  ;;  %v2524_v60 = vsel %vm2508_vm6, %v2519_v54, %v2523_v25  ;;  %v2526_v31 = vrot.slane %v9036_v10, 3  ;;  %v3090_v10 = vrot.slane %v7698_v35, 3 }
 0x1c3   : > { %v1017_v4 = vpop.f32.mrb[104].mxu1  ;;  %v1358_v7 = vpop.f32.mrb[106].mxu0 }
 0x1c4   : > { %9031 = vst [vmem:[#allocation7_spill] sm:$0xff] %v7690_v46  ;;  %v1018_v12 = vadd.f32 %v1017_v4, %v9032_v34  ;;  %v5559_v5 = vpop.f32.mrb[105].mxu1  ;;  %v5648_v55 = vpop.f32.mrb[107].mxu0  ;;  %v7701_v36 = vadd.f32 %v1358_v7, %v1013_v61  ;;  %v9035_v46 = vshrl.u32 %v9034_v44, 16  ;;  %v6347_v4 = vld [vmem:[%s8804_s1 + $0xf0] sm:$0xff]   ;;  %v9038_v61 = vld [vmem:[#allocation11_spill] sm:$0xff]  ;;  %v3091_v62 = vsel %vm3086_vm7, %v3088_v27, %v3090_v10 }
 0x1c5   : > { %v1020_v59 = vpop.f32.mrb[106].mxu1  ;;  %6040 = vmatpush3.bf16.msra.mxu1 %v6330_v2  ;;  %v9037_v5 = vld [vmem:[#allocation9_spill] sm:$0xff]  ;;  %v7717_v54 = vsel %vm2508_vm6, %v9028_v32, %v9038_v61  ;;  %v6331_v2 = vld [vmem:[%s8804_s1 + $0x108] sm:$0xff]   ;;  %v2594_v44 = vshrl.u32 %v7592_v43, 16 }
 0x1c6   : > { %9033 = vst [vmem:[#allocation8_spill] sm:$0xff] %v7701_v36  ;;  %v2525_v49 = vrot.slane %v9035_v46, 2  ;;  %v1021_v34 = vadd.f32 %v1020_v59, %v9037_v5  ;;  %5954 = vmatmul.mubr.msk.bf16.vlgmr.msra.gmra.mrb[212].mxu0 %vm525_vm2, %v3089_v24  ;;  %v5560_v7 = vpop.f32.mrb[107].mxu1  ;;  %6041 = vmatprep.subr.bf16.mxu1 %v8939_v38  ;;  %9039 = vst [vmem:[#allocation6_spill] sm:$0xff] %v7717_v54  ;;  %v7726_v46 = vld [vmem:[%s6431_s25 + $0x94] sm:$0xf] }
 0x1c7   : > { %6130 = vmatpush3.bf16.msra.mxu0 %v6319_v3  ;;  %5957 = vmatprep.mubr.msk.bf16.mxu0 %vm6374_vm0, %v8939_v38  ;;  %9040 = vst [vmem:[#allocation9_spill] sm:$0xff] %v7726_v46  ;;  %v7729_v24 = vld [vmem:[%s6431_s25 + $0x98] sm:$0xf]  ;;  %v2597_v5 = vshll.u32 %v7592_v43, 16  ;;  %v2596_v56 = vrot.slane %v2594_v44, 2 }
 0x1c8   : > { %9041 = vst [vmem:[#allocation11_spill] sm:$0xff] %v7729_v24  ;;  %5866 = vmatmul.mubr.msk.bf16.gmra.mrb[212].mxu1 %vm525_vm2, %v2524_v60  ;;  %6131 = vmatprep.subr.bf16.mxu0 %v8939_v38  ;;  %v2527_v55 = vor.u32 %v2526_v31, %v2525_v49  ;;  %v6354_v59 = vld [vmem:[%s8804_s1 + $0xf8] sm:$0xff]   ;;  %v7748_v31 = vcombine.low %v7294_v53, %v7323_v39  ;;  %v6348_v49 = vld [vmem:[%s8804_s1 + $0x110] sm:$0xff]   ;;  %v9045_v39 = vld [vmem:[#allocation10_spill] sm:$0xff] }
 0x1c9   : > { %v1363_v3 = vpop.f32.mrb[108].mxu0  ;;  %5869 = vmatprep.mubr.msk.bf16.mxu1 %vm6374_vm0, %v8939_v38  ;;  %6042 = vmatpush3.bf16.msra.mxu1 %v6347_v4  ;;  %v9043_v4 = vld [vmem:[#allocation12_spill] sm:$0xff]  ;;  %v9046_v53 = vshrl.u32 %v9045_v39, 16 }
 0x1ca   : > { %v5651_v60 = vpop.f32.mrb[109].mxu0  ;;  %6043 = vmatprep.subr.bf16.mxu1 %v8939_v38  ;;  %v7743_v7 = vadd.f32 %v1363_v3, %v1018_v12  ;;  %v2528_v27 = vsel %vm2508_vm6, %v2523_v25, %v2527_v55  ;;  %v7776_v25 = vld [vmem:[%s6431_s25 + $0x9c] sm:$0xf] }
 0x1cb   : > { %v1025_v32 = vpop.f32.mrb[108].mxu1  ;;  %v1366_v13 = vpop.f32.mrb[110].mxu0  ;;  %6132 = vmatpush3.bf16.msra.mxu0 %v6331_v2  ;;  %v2529_v2 = vrot.slane %v9046_v53, 2  ;;  %v3092_v53 = vrot.slane %v7748_v31, 3 }
 0x1cc   : > { %9042 = vst [vmem:[#allocation82_spill] sm:$0xff] %v7743_v7  ;;  %v1026_v43 = vadd.f32 %v1025_v32, %v9043_v4  ;;  %v5563_v60 = vpop.f32.mrb[109].mxu1  ;;  %v5652_v36 = vpop.f32.mrb[111].mxu0  ;;  %6133 = vmatprep.subr.bf16.mxu0 %v8939_v38  ;;  %v7755_v12 = vadd.f32 %v1366_v13, %v1021_v34  ;;  %v9047_v7 = vshll.u32 %v9045_v39, 16  ;;  %v2599_v32 = vrot.slane %v2597_v5, 3  ;;  %v9048_v4 = vld [vmem:[#allocation13_spill] sm:$0xff] }
 0x1cd   : > { %v1028_v3 = vpop.f32.mrb[110].mxu1  ;;  %6044 = vmatpush3.bf16.msra.mxu1 %v6354_v59  ;;  %v9049_v34 = vld [vmem:[#allocation15_spill] sm:$0xff]  ;;  %v6355_v39 = vld [vmem:[%s8804_s1 + $0x118] sm:$0xff]   ;;  %9051 = vst [vmem:[#allocation13_spill] sm:$0xff] %v7776_v25  ;;  %v7779_v59 = vld [vmem:[%s6431_s25 + $0xa0] sm:$0xf] }
 0x1ce   : > { %9044 = vst [vmem:[#allocation12_spill] sm:$0xff] %v7755_v12  ;;  %v2530_v54 = vrot.slane %v9047_v7, 3  ;;  %v1029_v36 = vadd.f32 %v1028_v3, %v9048_v4  ;;  %5958 = vmatmul.mubr.msk.bf16.gmra.mrb[216].mxu0 %vm525_vm2, %v3091_v62  ;;  %v5564_v13 = vpop.f32.mrb[111].mxu1  ;;  %v7767_v60 = vsel %vm2508_vm6, %v9038_v61, %v9049_v34  ;;  %9052 = vst [vmem:[#allocation15_spill] sm:$0xff] %v7779_v59  ;;  %v9055_v62 = vld [vmem:[#allocation16_spill] sm:$0xff] }
 0x1cf   : > { %9050 = vst [vmem:[#allocation10_spill] sm:$0xff] %v7767_v60  ;;  %5961 = vmatprep.mubr.msk.bf16.mxu0 %vm6374_vm0, %v8939_v38  ;;  %6134 = vmatpush3.bf16.msra.mxu0 %v6348_v49  ;;  %v7787_v5 = vor.u32 %v2599_v32, %v2596_v56  ;;  %v3093_v13 = vsel %vm3086_vm7, %v3090_v10, %v3092_v53  ;;  %v9057_v32 = vld [vmem:[#allocation14_spill] sm:$0xff] }
 0x1d0   : > { %5870 = vmatmul.mubr.msk.bf16.gmra.mrb[216].mxu1 %vm525_vm2, %v2528_v27  ;;  %6135 = vmatprep.subr.bf16.mxu0 %v8939_v38  ;;  %v2531_v44 = vor.u32 %v2530_v54, %v2529_v2  ;;  %v7794_v27 = vcombine.low %v7326_v48, %v7352_v0  ;;  %v9059_v10 = vshll.u32 %v9057_v32, 16  ;;  %v9060_v0 = vld [vmem:[#allocation17_spill] sm:$0xff] }
 0x1d1   : > { %v1371_v61 = vpop.f32.mrb[112].mxu0  ;;  %5873 = vmatprep.mubr.msk.bf16.mxu1 %vm6374_vm0, %v8939_v38  ;;  %9053 = vst [vmem:[#allocation83_spill] sm:$0xff] %v7787_v5 }
 0x1d2   : > { %v5655_v7 = vpop.f32.mrb[113].mxu0  ;;  %v7789_v49 = vadd.f32 %v1371_v61, %v1026_v43  ;;  %v2532_v43 = vsel %vm2508_vm6, %v2527_v55, %v2531_v44  ;;  %v9058_v61 = vshrl.u32 %v9057_v32, 16  ;;  %v3094_v55 = vrot.slane %v7794_v27, 3 }
 0x1d3   : > { %v1033_v3 = vpop.f32.mrb[112].mxu1  ;;  %v1374_v4 = vpop.f32.mrb[114].mxu0  ;;  %6136 = vmatpush3.bf16.msra.mxu0 %v6355_v39 }
 0x1d4   : > { %9054 = vst [vmem:[#allocation84_spill] sm:$0xff] %v7789_v49  ;;  %v1034_v12 = vadd.f32 %v1033_v3, %v9055_v62  ;;  %v5567_v60 = vpop.f32.mrb[113].mxu1  ;;  %v5656_v54 = vpop.f32.mrb[115].mxu0  ;;  %v7797_v56 = vadd.f32 %v1374_v4, %v1029_v36  ;;  %v2533_v7 = vrot.slane %v9058_v61, 2  ;;  %v2534_v49 = vrot.slane %v9059_v10, 3 }
 0x1d5   : > { %v1036_v2 = vpop.f32.mrb[114].mxu1  ;;  %v7809_v60 = vsel %vm2508_vm6, %v9049_v34, %v7787_v5  ;;  %v7815_v36 = vld [vmem:[%s6431_s25 + $0xa4] sm:$0xf]  ;;  %v7818_v62 = vld [vmem:[%s6431_s25 + $0xa8] sm:$0xf]  ;;  %v3467_v4 = vshrl.u32 %v7647_v22, 16 }
 0x1d6   : > { %9056 = vst [vmem:[#allocation16_spill] sm:$0xff] %v7797_v56  ;;  %v1037_v48 = vadd.f32 %v1036_v2, %v9060_v0  ;;  %5962 = vmatmul.mubr.msk.bf16.gmra.mrb[220].mxu0 %vm525_vm2, %v3093_v13  ;;  %v5568_v39 = vpop.f32.mrb[115].mxu1  ;;  %9061 = vst [vmem:[#allocation14_spill] sm:$0xff] %v7809_v60  ;;  %v2535_v34 = vor.u32 %v2534_v49, %v2533_v7  ;;  %v3470_v13 = vshll.u32 %v7647_v22, 16  ;;  %v3475_v54 = vshrl.u32 %v7651_v17, 16  ;;  %v9065_v49 = vld [vmem:[#allocation19_spill] sm:$0xff] }
 0x1d7   : > { %5965 = vmatprep.mubr.msk.bf16.mxu0 %vm6374_vm0, %v8939_v38  ;;  %9062 = vst [vmem:[#allocation17_spill] sm:$0xff] %v7815_v36  ;;  %9063 = vst [vmem:[#allocation85_spill] sm:$0xff] %v7818_v62  ;;  %v3478_v61 = vshll.u32 %v7651_v17, 16  ;;  %v3095_v39 = vsel %vm3086_vm7, %v3092_v53, %v3094_v55  ;;  %v7834_v0 = vcombine.low %v7355_v15, %v7379_v26  ;;  %v9067_v17 = vld [vmem:[#allocation18_spill] sm:$0xff]  ;;  %v3469_v62 = vrot.slane %v3467_v4, 3 }
 0x1d8   : > { %5874 = vmatmul.mubr.msk.bf16.gmra.mrb[220].mxu1 %vm525_vm2, %v2532_v43  ;;  %v9069_v53 = vshll.u32 %v9067_v17, 16  ;;  %v3472_v26 = vrot.slane %v3470_v13, 4  ;;  %v3477_v15 = vrot.slane %v3475_v54, 3  ;;  %v3484_v54 = vshrl.u32 %v7698_v35, 16  ;;  %v9073_v4 = vld [vmem:[#allocation22_spill] sm:$0xff] }
 0x1d9   : > { %v1379_v3 = vpop.f32.mrb[116].mxu0  ;;  %5877 = vmatprep.mubr.msk.bf16.mxu1 %vm6374_vm0, %v8939_v38 }
 0x1da   : > { %v5659_v2 = vpop.f32.mrb[117].mxu0  ;;  %v7828_v32 = vadd.f32 %v1379_v3, %v1034_v12  ;;  %v2536_v3 = vsel %vm2508_vm6, %v2531_v44, %v2535_v34  ;;  %v2538_v60 = vrot.slane %v9069_v53, 3  ;;  %v7850_v44 = vld [vmem:[%s6431_s25 + $0xac] sm:$0xf] }
 0x1db   : > { %v1041_v43 = vpop.f32.mrb[116].mxu1  ;;  %v1382_v10 = vpop.f32.mrb[118].mxu0  ;;  %v9068_v2 = vshrl.u32 %v9067_v17, 16  ;;  %9071 = vst [vmem:[#allocation18_spill] sm:$0xff] %v7850_v44 }
 0x1dc   : > { %9064 = vst [vmem:[#allocation86_spill] sm:$0xff] %v7828_v32  ;;  %v1042_v7 = vadd.f32 %v1041_v43, %v9065_v49  ;;  %v5571_v56 = vpop.f32.mrb[117].mxu1  ;;  %v5660_v22 = vpop.f32.mrb[119].mxu0  ;;  %v7837_v5 = vadd.f32 %v1382_v10, %v1037_v48  ;;  %v3480_v49 = vrot.slane %v3478_v61, 4  ;;  %v3096_v48 = vrot.slane %v7834_v0, 3 }
 0x1dd   : > { %v1044_v12 = vpop.f32.mrb[118].mxu1  ;;  %v2537_v32 = vrot.slane %v9068_v2, 2  ;;  %v7853_v10 = vld [vmem:[%s6431_s25 + $0xb0] sm:$0xf]  ;;  %v3487_v61 = vshll.u32 %v7698_v35, 16 }
 0x1de   : > { %9066 = vst [vmem:[#allocation19_spill] sm:$0xff] %v7837_v5  ;;  %v1045_v43 = vadd.f32 %v1044_v12, %v9070_v58  ;;  %5966 = vmatmul.mubr.msk.bf16.gmra.mrb[224].mxu0 %vm525_vm2, %v3095_v39  ;;  %v5572_v56 = vpop.f32.mrb[119].mxu1  ;;  %9072 = vst [vmem:[#allocation20_spill] sm:$0xff] %v7853_v10  ;;  %v3473_v12 = vor.u32 %v3472_v26, %v3469_v62  ;;  %v3481_v17 = vor.u32 %v3480_v49, %v3477_v15 }
 0x1df   : > { %5969 = vmatprep.mubr.msk.bf16.mxu0 %vm6374_vm0, %v8939_v38  ;;  %v2539_v58 = vor.u32 %v2538_v60, %v2537_v32  ;;  %v7867_v56 = vcombine.low %v7382_v51, %v7406_v20 }
 0x1e0   : > { %5878 = vmatmul.mubr.msk.bf16.gmra.mrb[224].mxu1 %vm525_vm2, %v2536_v3  ;;  %v3097_v3 = vsel %vm3086_vm7, %v3094_v55, %v3096_v48  ;;  %v3486_v55 = vrot.slane %v3484_v54, 3 }
 0x1e1   : > { %v1387_v13 = vpop.f32.mrb[120].mxu0  ;;  %5881 = vmatprep.mubr.msk.bf16.mxu1 %vm6374_vm0, %v8939_v38  ;;  %v2540_v35 = vsel %vm2508_vm6, %v2535_v34, %v2539_v58  ;;  %v7882_v34 = vsel %vm3465_vm8, %v3473_v12, %v3481_v17 }
 0x1e2   : > { %v5663_v39 = vpop.f32.mrb[121].mxu0  ;;  %v7862_v22 = vadd.f32 %v1387_v13, %v1042_v7  ;;  %v9074_v13 = vld [vmem:[#allocation21_spill] sm:$0xff] }
 0x1e3   : > { %v1049_v2 = vpop.f32.mrb[120].mxu1  ;;  %v1390_v53 = vpop.f32.mrb[122].mxu0  ;;  %v9075_v26 = vshrl.u32 %v9074_v13, 16  ;;  %v9076_v62 = vshll.u32 %v9074_v13, 16  ;;  %v3489_v39 = vrot.slane %v3487_v61, 4 }
 0x1e4   : > { %v1050_v5 = vadd.f32 %v1049_v2, %v9073_v4  ;;  %v5664_v60 = vpop.f32.mrb[123].mxu0  ;;  %v5575_v32 = vpop.f32.mrb[121].mxu1  ;;  %v7870_v10 = vadd.f32 %v1390_v53, %v1045_v43  ;;  %v3098_v43 = vrot.slane %v7867_v56, 3  ;;  %v3493_v2 = vshrl.u32 %v7748_v31, 16 }
 0x1e5   : > { %v1052_v7 = vpop.f32.mrb[122].mxu1  ;;  %v2541_v15 = vrot.slane %v9075_v26, 2  ;;  %v2542_v49 = vrot.slane %v9076_v62, 3  ;;  %v3490_v61 = vor.u32 %v3489_v39, %v3486_v55 }
 0x1e6   : > { %5970 = vmatmul.mubr.msk.bf16.gmra.mrb[228].mxu0 %vm525_vm2, %v3097_v3  ;;  %v5576_v20 = vpop.f32.mrb[123].mxu1  ;;  %v3099_v12 = vsel %vm3086_vm7, %v3096_v48, %v3098_v43  ;;  %v9080_v48 = vld [vmem:[#allocation27_spill] sm:$0xff] }
 0x1e7   : > { %5973 = vmatprep.mubr.msk.bf16.mxu0 %vm6374_vm0, %v8939_v38  ;;  %v2543_v54 = vor.u32 %v2542_v49, %v2541_v15  ;;  %v3496_v20 = vshll.u32 %v7748_v31, 16  ;;  %v9077_v49 = vld [vmem:[#allocation23_spill] sm:$0xff] }
 0x1e8   : > { %5882 = vmatmul.mubr.msk.bf16.gmra.mrb[228].mxu1 %vm525_vm2, %v2540_v35  ;;  %v7894_v35 = vcombine.low %v7409_v29, %v7433_v41  ;;  %v9078_v31 = vshrl.u32 %v9077_v49, 16  ;;  %v9079_v55 = vshll.u32 %v9077_v49, 16 }
 0x1e9   : > { %v1395_v4 = vpop.f32.mrb[124].mxu0  ;;  %5885 = vmatprep.mubr.msk.bf16.mxu1 %vm6374_vm0, %v8939_v38  ;;  %v2544_v62 = vsel %vm2508_vm6, %v2539_v58, %v2543_v54 }
 0x1ea   : > { %v7889_v53 = vadd.f32 %v1395_v4, %v1050_v5  ;;  %v5667_v3 = vpop.f32.mrb[125].mxu0  ;;  %v2545_v5 = vrot.slane %v9078_v31, 2  ;;  %v2546_v39 = vrot.slane %v9079_v55, 3  ;;  %v3495_v4 = vrot.slane %v3493_v2, 3  ;;  %v9082_v31 = vld [vmem:[#allocation31_spill] sm:$0xff] }
 0x1eb   : > { %v1905_v60 = vpop.f32.mrb[124].mxu1  ;;  %v1398_v32 = vpop.f32.mrb[126].mxu0  ;;  %v3498_v3 = vrot.slane %v3496_v20, 4  ;;  %v3100_v58 = vrot.slane %v7894_v35, 3 }
 0x1ec   : > { %v2071_v7 = vadd.f32 %v1905_v60, %v7240_v1  ;;  %v5679_v13 = vpop.f32.mrb[125].mxu1  ;;  %v5668_v26 = vpop.f32.mrb[127].mxu0  ;;  %v7905_v1 = vsel %vm3465_vm8, %v3481_v17, %v3490_v61  ;;  %v2547_v2 = vor.u32 %v2546_v39, %v2545_v5 }
 0x1ed   : > { %v1908_v15 = vpop.f32.mrb[126].mxu1  ;;  %v3499_v20 = vor.u32 %v3498_v3, %v3495_v4  ;;  %v3502_v13 = vshrl.u32 %v7794_v27, 16  ;;  %v3101_v49 = vsel %vm3086_vm7, %v3098_v43, %v3100_v58 }
 0x1ee   : > { %v2072_v32 = vadd.f32 %v1908_v15, %v9080_v48  ;;  %5974 = vmatmul.mubr.msk.bf16.gmra.mrb[232].mxu0 %vm525_vm2, %v3099_v12  ;;  %v5680_v41 = vpop.f32.mrb[127].mxu1 }
 0x1ef   : > { %5977 = vmatprep.mubr.msk.bf16.mxu0 %vm6374_vm0, %v8939_v38  ;;  %v3505_v41 = vshll.u32 %v7794_v27, 16  ;;  %v2548_v27 = vsel %vm2508_vm6, %v2543_v54, %v2547_v2  ;;  %v3504_v43 = vrot.slane %v3502_v13, 3 }
 0x1f0   : > { %5886 = vmatmul.mubr.msk.bf16.gmra.mrb[232].mxu1 %vm525_vm2, %v2544_v62  ;;  %v7920_v62 = vcombine.low %v7436_v42, %v7460_v40 }
 0x1f1   : > { %v2292_v60 = vpop.f32.mrb[128].mxu0  ;;  %5889 = vmatprep.mubr.msk.bf16.mxu1 %vm6374_vm0, %v8939_v38  ;;  %v3507_v51 = vrot.slane %v3505_v41, 4 }
 0x1f2   : > { %v7915_v12 = vadd.f32 %v2292_v60, %v2071_v7  ;;  %v5771_v17 = vpop.f32.mrb[129].mxu0  ;;  %v9083_v7 = vld [vmem:[#allocation24_spill] sm:$0xff]  ;;  %v3102_v54 = vrot.slane %v7920_v62, 3 }
 0x1f3   : > { %v1913_v26 = vpop.f32.mrb[128].mxu1  ;;  %v2295_v15 = vpop.f32.mrb[130].mxu0  ;;  %v9084_v3 = vshrl.u32 %v9083_v7, 16  ;;  %v9085_v17 = vshll.u32 %v9083_v7, 16  ;;  %v3508_v41 = vor.u32 %v3507_v51, %v3504_v43  ;;  %v9088_v7 = vld [vmem:[#allocation36_spill] sm:$0xff] }
 0x1f4   : > { %9081 = vst [vmem:[#allocation22_spill] sm:$0xff] %v7915_v12  ;;  %v2073_v55 = vadd.f32 %v1913_v26, %v9082_v31  ;;  %v5683_v48 = vpop.f32.mrb[129].mxu1  ;;  %v7923_v5 = vadd.f32 %v2295_v15, %v2072_v32  ;;  %v5772_v39 = vpop.f32.mrb[131].mxu0  ;;  %v9086_v12 = vld [vmem:[#allocation32_spill] sm:$0xff]  ;;  %v7933_v32 = vsel %vm3465_vm8, %v3490_v61, %v3499_v20 }
 0x1f5   : > { %v1916_v4 = vpop.f32.mrb[130].mxu1  ;;  %v2549_v60 = vrot.slane %v9084_v3, 2  ;;  %v2550_v29 = vrot.slane %v9085_v17, 3 }
 0x1f6   : > { %v2074_v40 = vadd.f32 %v1916_v4, %v9086_v12  ;;  %5978 = vmatmul.mubr.msk.bf16.gmra.mrb[236].mxu0 %vm525_vm2, %v3101_v49  ;;  %v5684_v26 = vpop.f32.mrb[131].mxu1  ;;  %v3511_v12 = vshrl.u32 %v7834_v0, 16  ;;  %v3514_v49 = vshll.u32 %v7834_v0, 16  ;;  %v3103_v4 = vsel %vm3086_vm7, %v3100_v58, %v3102_v54 }
 0x1f7   : > { %5981 = vmatprep.mubr.msk.bf16.mxu0 %vm6374_vm0, %v8939_v38  ;;  %v2551_v13 = vor.u32 %v2550_v29, %v2549_v60 }
 0x1f8   : > { %5890 = vmatmul.mubr.msk.bf16.gmra.mrb[236].mxu1 %vm525_vm2, %v2548_v27  ;;  %v7948_v27 = vcombine.low %v7463_v52, %v7487_v9  ;;  %v3513_v58 = vrot.slane %v3511_v12, 3  ;;  %v3516_v42 = vrot.slane %v3514_v49, 4  ;;  %v9096_v52 = vld [vmem:[#allocation41_spill] sm:$0xff] }
 0x1f9   : > { %v2300_v15 = vpop.f32.mrb[132].mxu0  ;;  %5893 = vmatprep.mubr.msk.bf16.mxu1 %vm6374_vm0, %v8939_v38  ;;  %v2552_v0 = vsel %vm2508_vm6, %v2547_v2, %v2551_v13 }
 0x1fa   : > { %v7943_v31 = vadd.f32 %v2300_v15, %v2073_v55  ;;  %v5775_v61 = vpop.f32.mrb[133].mxu0  ;;  %v9089_v55 = vld [vmem:[#allocation28_spill] sm:$0xff]  ;;  %v3104_v2 = vrot.slane %v7948_v27, 3 }
 0x1fb   : > { %v1921_v48 = vpop.f32.mrb[132].mxu1  ;;  %v2303_v39 = vpop.f32.mrb[134].mxu0  ;;  %v9090_v43 = vshrl.u32 %v9089_v55, 16  ;;  %v9091_v15 = vshll.u32 %v9089_v55, 16  ;;  %v7976_v55 = vcombine.low %v7490_v57, %v7514_v8 }
 0x1fc   : > { %9087 = vst [vmem:[#allocation21_spill] sm:$0xff] %v7943_v31  ;;  %v2075_v3 = vadd.f32 %v1921_v48, %v9088_v7  ;;  %v5687_v17 = vpop.f32.mrb[133].mxu1  ;;  %v7951_v29 = vadd.f32 %v2303_v39, %v2074_v40  ;;  %v5776_v51 = vpop.f32.mrb[135].mxu0  ;;  %v9092_v31 = vld [vmem:[#allocation37_spill] sm:$0xff]  ;;  %v7961_v40 = vsel %vm3465_vm8, %v3499_v20, %v3508_v41  ;;  %v3520_v39 = vshrl.u32 %v7867_v56, 16 }
 0x1fd   : > { %v1924_v60 = vpop.f32.mrb[134].mxu1  ;;  %v2553_v26 = vrot.slane %v9090_v43, 2  ;;  %v2554_v61 = vrot.slane %v9091_v15, 3  ;;  %v3523_v7 = vshll.u32 %v7867_v56, 16 }
 0x1fe   : > { %v2076_v9 = vadd.f32 %v1924_v60, %v9092_v31  ;;  %5982 = vmatmul.mubr.msk.bf16.gmra.mrb[240].mxu0 %vm525_vm2, %v3103_v4  ;;  %v5688_v48 = vpop.f32.mrb[135].mxu1  ;;  %v3517_v31 = vor.u32 %v3516_v42, %v3513_v58  ;;  %v3105_v60 = vsel %vm3086_vm7, %v3102_v54, %v3104_v2  ;;  %v3522_v56 = vrot.slane %v3520_v39, 3 }
 0x1ff   : > { %5985 = vmatprep.mubr.msk.bf16.mxu0 %vm6374_vm0, %v8939_v38  ;;  %v2555_v49 = vor.u32 %v2554_v61, %v2553_v26  ;;  %v3525_v43 = vrot.slane %v3523_v7, 4  ;;  %v9093_v61 = vld [vmem:[#allocation33_spill] sm:$0xff] }
 0x200   : > { %5894 = vmatmul.mubr.msk.bf16.gmra.mrb[240].mxu1 %vm525_vm2, %v2552_v0  ;;  %v9094_v58 = vshrl.u32 %v9093_v61, 16  ;;  %v9095_v54 = vshll.u32 %v9093_v61, 16 }
 0x201   : > { %v2308_v12 = vpop.f32.mrb[136].mxu0  ;;  %5897 = vmatprep.mubr.msk.bf16.mxu1 %vm6374_vm0, %v8939_v38 }
 0x202   : > { %v7971_v4 = vadd.f32 %v2308_v12, %v2075_v3  ;;  %v5779_v20 = vpop.f32.mrb[137].mxu0  ;;  %v2556_v3 = vsel %vm2508_vm6, %v2551_v13, %v2555_v49  ;;  %v2557_v12 = vrot.slane %v9094_v58, 2  ;;  %v3526_v13 = vor.u32 %v3525_v43, %v3522_v56 }
 0x203   : > { %v1929_v17 = vpop.f32.mrb[136].mxu1  ;;  %v2311_v51 = vpop.f32.mrb[138].mxu0  ;;  %v2558_v20 = vrot.slane %v9095_v54, 3  ;;  %v8004_v56 = vcombine.low %v7517_v21, %v7520_v23  ;;  %v9097_v54 = vld [vmem:[#allocation38_spill] sm:$0xff]  ;;  %v9100_v21 = vld [vmem:[#allocation44_spill] sm:$0xff] }
 0x204   : > { %v2077_v0 = vadd.f32 %v1929_v17, %v7335_v19  ;;  %v5691_v15 = vpop.f32.mrb[137].mxu1  ;;  %v7979_v48 = vadd.f32 %v2311_v51, %v2076_v9  ;;  %v5780_v26 = vpop.f32.mrb[139].mxu0  ;;  %v7989_v19 = vsel %vm3465_vm8, %v3508_v41, %v3517_v31  ;;  %v3106_v9 = vrot.slane %v7976_v55, 3 }
 0x205   : > { %v1932_v42 = vpop.f32.mrb[138].mxu1  ;;  %v2559_v17 = vor.u32 %v2558_v20, %v2557_v12  ;;  %v3532_v51 = vshll.u32 %v7894_v35, 16  ;;  %v8010_v12 = vsel %vm3465_vm8, %v3517_v31, %v3526_v13  ;;  %v9098_v20 = vshrl.u32 %v9097_v54, 16 }
 0x206   : > { %v2078_v8 = vadd.f32 %v1932_v42, %v9096_v52  ;;  %5986 = vmatmul.mubr.msk.bf16.gmra.mrb[244].mxu0 %vm525_vm2, %v3105_v60  ;;  %v5692_v39 = vpop.f32.mrb[139].mxu1  ;;  %v3529_v52 = vshrl.u32 %v7894_v35, 16  ;;  %v3107_v42 = vsel %vm3086_vm7, %v3104_v2, %v3106_v9  ;;  %v9099_v2 = vshll.u32 %v9097_v54, 16 }
 0x207   : > { %5989 = vmatprep.mubr.msk.bf16.mxu0 %vm6374_vm0, %v8939_v38  ;;  %v2561_v39 = vrot.slane %v9098_v20, 2  ;;  %v3534_v23 = vrot.slane %v3532_v51, 4  ;;  %v3108_v31 = vrot.slane %v8004_v56, 3  ;;  %v9102_v20 = vld [vmem:[#allocation47_spill] sm:$0xff] }
 0x208   : > { %5898 = vmatmul.mubr.msk.bf16.gmra.mrb[244].mxu1 %vm525_vm2, %v2556_v3 }
 0x209   : > { %v2316_v7 = vpop.f32.mrb[140].mxu0  ;;  %5901 = vmatprep.mubr.msk.bf16.mxu1 %vm6374_vm0, %v8939_v38 }
 0x20a   : > { %v7999_v60 = vadd.f32 %v2316_v7, %v2077_v0  ;;  %v5783_v41 = vpop.f32.mrb[141].mxu0  ;;  %v2560_v0 = vsel %vm2508_vm6, %v2555_v49, %v2559_v17  ;;  %v2562_v7 = vrot.slane %v9099_v2, 3 }
 0x20b   : > { %v1937_v15 = vpop.f32.mrb[140].mxu1  ;;  %v2319_v26 = vpop.f32.mrb[142].mxu0  ;;  %v3531_v41 = vrot.slane %v3529_v52, 3  ;;  %v3538_v52 = vshrl.u32 %v7920_v62, 16 }
 0x20c   : > { %v2079_v43 = vadd.f32 %v1937_v15, %v7362_v45  ;;  %v5695_v3 = vpop.f32.mrb[141].mxu1  ;;  %v8007_v61 = vadd.f32 %v2319_v26, %v2078_v8  ;;  %v5784_v58 = vpop.f32.mrb[143].mxu0  ;;  %v2563_v15 = vor.u32 %v2562_v7, %v2561_v39 }
 0x20d   : > { %v1940_v35 = vpop.f32.mrb[142].mxu1  ;;  %v3535_v26 = vor.u32 %v3534_v23, %v3531_v41 }
 0x20e   : > { %v2080_v45 = vadd.f32 %v1940_v35, %v9100_v21  ;;  %5990 = vmatmul.mubr.msk.bf16.gmra.mrb[248].mxu0 %vm525_vm2, %v3107_v42  ;;  %v5696_v8 = vpop.f32.mrb[143].mxu1  ;;  %v3541_v21 = vshll.u32 %v7920_v62, 16  ;;  %v9101_v35 = vld [vmem:[#allocation68_spill] sm:$0xff]  ;;  %v2564_v62 = vsel %vm2508_vm6, %v2559_v17, %v2563_v15 }
 0x20f   : > { %5993 = vmatprep.mubr.msk.bf16.mxu0 %vm6374_vm0, %v8939_v38  ;;  %v8031_v54 = vcombine.low %v9101_v35, %v7527_v37  ;;  %v8041_v37 = vsel %vm3465_vm8, %v3526_v13, %v3535_v26 }
 0x210   : > { %5902 = vmatmul.mubr.msk.bf16.gmra.mrb[248].mxu1 %vm525_vm2, %v2560_v0  ;;  %v3109_v0 = vsel %vm3086_vm7, %v3106_v9, %v3108_v31  ;;  %v3543_v41 = vrot.slane %v3541_v21, 4  ;;  %v3550_v21 = vshll.u32 %v7948_v27, 16 }
 0x211   : > { %v2324_v49 = vpop.f32.mrb[144].mxu0  ;;  %5905 = vmatprep.mubr.msk.bf16.mxu1 %vm6374_vm0, %v8939_v38  ;;  %v3110_v9 = vrot.slane %v8031_v54, 3 }
 0x212   : > { %v8027_v51 = vadd.f32 %v2324_v49, %v2079_v43  ;;  %v5787_v42 = vpop.f32.mrb[145].mxu0  ;;  %v3540_v43 = vrot.slane %v3538_v52, 3  ;;  %v9103_v49 = vld [vmem:[#allocation48_spill] sm:$0xff]  ;;  %v3547_v52 = vshrl.u32 %v7948_v27, 16  ;;  %v2568_v27 = vsel %vm2508_vm6, %v2563_v15, %v6883_v47 }
 0x213   : > { %v1945_v3 = vpop.f32.mrb[144].mxu1  ;;  %v2327_v58 = vpop.f32.mrb[146].mxu0  ;;  %v3556_v15 = vshrl.u32 %v7976_v55, 16 }
 0x214   : > { %v2081_v2 = vadd.f32 %v1945_v3, %v9102_v20  ;;  %v5699_v8 = vpop.f32.mrb[145].mxu1  ;;  %v8035_v39 = vadd.f32 %v2327_v58, %v2080_v45  ;;  %v5788_v23 = vpop.f32.mrb[147].mxu0  ;;  %v3544_v17 = vor.u32 %v3543_v41, %v3540_v43  ;;  %v8055_v3 = vcombine.low %v7530_v50, %v7537_v28 }
 0x215   : > { %v1948_v7 = vpop.f32.mrb[146].mxu1  ;;  %v3111_v58 = vsel %vm3086_vm7, %v3108_v31, %v3110_v9  ;;  %v9104_v8 = vld [vmem:[#allocation51_spill] sm:$0xff]  ;;  %v3549_v41 = vrot.slane %v3547_v52, 3  ;;  %v3559_v52 = vshll.u32 %v7976_v55, 16  ;;  %v3558_v50 = vrot.slane %v3556_v15, 3 }
 0x216   : > { %v2082_v42 = vadd.f32 %v1948_v7, %v9103_v49  ;;  %5994 = vmatmul.mubr.msk.bf16.gmra.mrb[252].mxu0 %vm525_vm2, %v3109_v0  ;;  %v5700_v57 = vpop.f32.mrb[147].mxu1  ;;  %v3552_v49 = vrot.slane %v3550_v21, 4  ;;  %v8066_v31 = vsel %vm3465_vm8, %v3535_v26, %v3544_v17 }
 0x217   : > { %5997 = vmatprep.mubr.msk.bf16.mxu0 %vm6374_vm0, %v8939_v38  ;;  %v3561_v55 = vrot.slane %v3559_v52, 4  ;;  %v3565_v52 = vshrl.u32 %v8004_v56, 16 }
 0x218   : > { %5906 = vmatmul.mubr.msk.bf16.gmra.mrb[252].mxu1 %vm525_vm2, %v2564_v62  ;;  %v3553_v47 = vor.u32 %v3552_v49, %v3549_v41 }
 0x219   : > { %v2332_v45 = vpop.f32.mrb[148].mxu0  ;;  %5909 = vmatprep.mubr.msk.bf16.mxu1 %vm6374_vm0, %v8939_v38  ;;  %v3562_v15 = vor.u32 %v3561_v55, %v3558_v50 }
 0x21a   : > { %v8051_v57 = vadd.f32 %v2332_v45, %v2081_v2  ;;  %v5791_v13 = vpop.f32.mrb[149].mxu0  ;;  %v9105_v45 = vld [vmem:[#allocation52_spill] sm:$0xff] }
 0x21b   : > { %v1953_v0 = vpop.f32.mrb[148].mxu1  ;;  %v2335_v20 = vpop.f32.mrb[150].mxu0 }
 0x21c   : > { %v2083_v23 = vadd.f32 %v1953_v0, %v9104_v8  ;;  %v5703_v7 = vpop.f32.mrb[149].mxu1  ;;  %v8059_v62 = vadd.f32 %v2335_v20, %v2082_v42  ;;  %v5792_v43 = vpop.f32.mrb[151].mxu0  ;;  %v3112_v42 = vrot.slane %v8055_v3, 3  ;;  %v9106_v8 = vld [vmem:[#allocation72_spill] sm:$0xff] }
 0x21d   : > { %v1956_v2 = vpop.f32.mrb[150].mxu1  ;;  %v8081_v7 = vcombine.low %v9106_v8, %v7633_v16  ;;  %v9107_v43 = vld [vmem:[#allocation55_spill] sm:$0xff]  ;;  %v3567_v8 = vrot.slane %v3565_v52, 3 }
 0x21e   : > { %v2084_v13 = vadd.f32 %v1956_v2, %v9105_v45  ;;  %5998 = vmatmul.mubr.msk.bf16.gmra.mrb[0].mxu0 %vm525_vm2, %v3111_v58  ;;  %v5704_v28 = vpop.f32.mrb[151].mxu1  ;;  %v3113_v20 = vsel %vm3086_vm7, %v3110_v9, %v3112_v42  ;;  %v8089_v9 = vsel %vm3465_vm8, %v3544_v17, %v3553_v47 }
 0x21f   : > { %6001 = vmatprep.mubr.msk.bf16.mxu0 %vm6374_vm0, %v8939_v38 }
 0x220   : > { %5910 = vmatmul.mubr.msk.bf16.gmra.mrb[0].mxu1 %vm525_vm2, %v2568_v27 }
 0x221   : > { %v2340_v0 = vpop.f32.mrb[152].mxu0  ;;  %5913 = vmatprep.mubr.msk.bf16.mxu1 %vm6374_vm0, %v8939_v38 }
 0x222   : > { %v8076_v28 = vadd.f32 %v2340_v0, %v2083_v23  ;;  %v5795_v26 = vpop.f32.mrb[153].mxu0  ;;  %v9108_v23 = vld [vmem:[#allocation56_spill] sm:$0xff] }
 0x223   : > { %v1961_v21 = vpop.f32.mrb[152].mxu1  ;;  %v2343_v58 = vpop.f32.mrb[154].mxu0 }
 0x224   : > { %v2085_v27 = vadd.f32 %v1961_v21, %v9107_v43  ;;  %v5707_v2 = vpop.f32.mrb[153].mxu1  ;;  %v8084_v45 = vadd.f32 %v2343_v58, %v2084_v13  ;;  %v5796_v41 = vpop.f32.mrb[155].mxu0  ;;  %v3114_v21 = vrot.slane %v8081_v7, 3  ;;  %v3568_v58 = vshll.u32 %v8004_v56, 16 }
 0x225   : > { %v1964_v49 = vpop.f32.mrb[154].mxu1 }
 0x226   : > { %v2086_v0 = vadd.f32 %v1964_v49, %v9108_v23  ;;  %6002 = vmatmul.mubr.msk.bf16.gmra.mrb[4].mxu0 %vm525_vm2, %v3113_v20  ;;  %v5708_v26 = vpop.f32.mrb[155].mxu1  ;;  %v3115_v41 = vsel %vm3086_vm7, %v3112_v42, %v3114_v21  ;;  %v8105_v49 = vcombine.low %v7636_v63, %v7676_v18  ;;  %v3570_v56 = vrot.slane %v3568_v58, 4 }
 0x227   : > { %6005 = vmatprep.mubr.msk.bf16.mxu0 %vm6374_vm0, %v8939_v38  ;;  %v8113_v42 = vsel %vm3465_vm8, %v3553_v47, %v3562_v15  ;;  %v3574_v18 = vshrl.u32 %v8031_v54, 16 }
 0x228   : > { %5914 = vmatmul.mubr.msk.bf16.gmra.mrb[4].mxu1 %vm525_vm2, %v7580_v6  ;;  %v9109_v6 = vld [vmem:[#allocation59_spill] sm:$0xff]  ;;  %v3571_v52 = vor.u32 %v3570_v56, %v3567_v8  ;;  %v3577_v8 = vshll.u32 %v8031_v54, 16  ;;  %v9112_v56 = vld [vmem:[#allocation64_spill] sm:$0xff] }
 0x229   : > { %v2348_v13 = vpop.f32.mrb[156].mxu0  ;;  %5917 = vmatprep.mubr.msk.bf16.mxu1 %vm6374_vm0, %v8939_v38 }
 0x22a   : > { %v8100_v20 = vadd.f32 %v2348_v13, %v2085_v27  ;;  %v5799_v17 = vpop.f32.mrb[157].mxu0  ;;  %v9110_v27 = vld [vmem:[#allocation60_spill] sm:$0xff] }
 0x22b   : > { %v1969_v43 = vpop.f32.mrb[156].mxu1  ;;  %v2351_v2 = vpop.f32.mrb[158].mxu0 }
 0x22c   : > { %v2087_v23 = vadd.f32 %v1969_v43, %v9109_v6  ;;  %v5711_v26 = vpop.f32.mrb[157].mxu1  ;;  %v8108_v16 = vadd.f32 %v2351_v2, %v2086_v0  ;;  %v5800_v50 = vpop.f32.mrb[159].mxu0  ;;  %v3116_v43 = vrot.slane %v8105_v49, 3 }
 0x22d   : > { %v1972_v55 = vpop.f32.mrb[158].mxu1  ;;  %v8127_v26 = vcombine.low %v7679_v11, %v7726_v46  ;;  %v9111_v50 = vld [vmem:[#allocation63_spill] sm:$0xff] }
 0x22e   : > { %v2088_v13 = vadd.f32 %v1972_v55, %v9110_v27  ;;  %6006 = vmatmul.mubr.msk.bf16.gmra.mrb[8].mxu0 %vm525_vm2, %v3115_v41  ;;  %v5712_v17 = vpop.f32.mrb[159].mxu1  ;;  %v3117_v47 = vsel %vm3086_vm7, %v3114_v21, %v3116_v43 }
 0x22f   : > { %6009 = vmatprep.mubr.msk.bf16.mxu0 %vm6374_vm0, %v8939_v38 }
 0x230   : > { %5918 = vmatmul.mubr.msk.bf16.gmra.mrb[8].mxu1 %vm525_vm2, %v7603_v30 }
 0x231   : > { %v2356_v0 = vpop.f32.mrb[160].mxu0  ;;  %5921 = vmatprep.mubr.msk.bf16.mxu1 %vm6374_vm0, %v8939_v38 }
 0x232   : > { %v8122_v58 = vadd.f32 %v2356_v0, %v2087_v23  ;;  %v5803_v2 = vpop.f32.mrb[161].mxu0 }
 0x233   : > { %v1977_v41 = vpop.f32.mrb[160].mxu1  ;;  %v2359_v6 = vpop.f32.mrb[162].mxu0  ;;  %v8137_v2 = vsel %vm3465_vm8, %v3562_v15, %v3571_v52 }
 0x234   : > { %v2089_v55 = vadd.f32 %v1977_v41, %v9111_v50  ;;  %v5715_v27 = vpop.f32.mrb[161].mxu1  ;;  %v8130_v30 = vadd.f32 %v2359_v6, %v2088_v13  ;;  %v5804_v17 = vpop.f32.mrb[163].mxu0  ;;  %v3118_v13 = vrot.slane %v8127_v26, 3  ;;  %v3576_v41 = vrot.slane %v3574_v18, 3 }
 0x235   : > { %v1980_v23 = vpop.f32.mrb[162].mxu1  ;;  %v3579_v6 = vrot.slane %v3577_v8, 4 }
 0x236   : > { %v2090_v0 = vadd.f32 %v1980_v23, %v9112_v56  ;;  %6010 = vmatmul.mubr.msk.bf16.gmra.mrb[12].mxu0 %vm525_vm2, %v3117_v47  ;;  %v5716_v21 = vpop.f32.mrb[163].mxu1  ;;  %v3119_v17 = vsel %vm3086_vm7, %v3116_v43, %v3118_v13  ;;  %v8151_v23 = vcombine.low %v7729_v24, %v7776_v25  ;;  %v9113_v56 = vld [vmem:[#allocation73_spill] sm:$0xff]  ;;  %v9118_v25 = vld [vmem:[#allocation76_spill] sm:$0xff] }
 0x237   : > { %6013 = vmatprep.mubr.msk.bf16.mxu0 %vm6374_vm0, %v8939_v38  ;;  %v8156_v11 = vor.u32 %v3579_v6, %v3576_v41 }
 0x238   : > { %5922 = vmatmul.mubr.msk.bf16.gmra.mrb[12].mxu1 %vm525_vm2, %v7628_v14  ;;  %v3120_v43 = vrot.slane %v8151_v23, 3 }
 0x239   : > { %v2364_v54 = vpop.f32.mrb[164].mxu0  ;;  %5925 = vmatprep.mubr.msk.bf16.mxu1 %vm6374_vm0, %v8939_v38 }
 0x23a   : > { %v8146_v50 = vadd.f32 %v2364_v54, %v2089_v55  ;;  %v5807_v47 = vpop.f32.mrb[165].mxu0  ;;  %v9114_v55 = vld [vmem:[#allocation74_spill] sm:$0xff] }
 0x23b   : > { %v1985_v27 = vpop.f32.mrb[164].mxu1  ;;  %v2367_v15 = vpop.f32.mrb[166].mxu0 }
 0x23c   : > { %v2091_v21 = vadd.f32 %v1985_v27, %v9113_v56  ;;  %v5719_v14 = vpop.f32.mrb[165].mxu1  ;;  %v8154_v18 = vadd.f32 %v2367_v15, %v2090_v0  ;;  %v5808_v8 = vpop.f32.mrb[167].mxu0  ;;  %v8165_v27 = vsel %vm3465_vm8, %v3571_v52, %v8156_v11  ;;  %v8176_v56 = vcombine.low %v7779_v59, %v7815_v36  ;;  %v9116_v52 = vld [vmem:[#allocation75_spill] sm:$0xff] }
 0x23d   : > { %v1988_v46 = vpop.f32.mrb[166].mxu1 }
 0x23e   : > { %v2092_v54 = vadd.f32 %v1988_v46, %v9114_v55  ;;  %6014 = vmatmul.mubr.msk.bf16.gmra.mrb[16].mxu0 %vm525_vm2, %v3119_v17  ;;  %v5720_v47 = vpop.f32.mrb[167].mxu1  ;;  %v3121_v17 = vsel %vm3086_vm7, %v3118_v13, %v3120_v43  ;;  %v3122_v13 = vrot.slane %v8176_v56, 3 }
 0x23f   : > { %6017 = vmatprep.mubr.msk.bf16.mxu0 %vm6374_vm0, %v8939_v38 }
 0x240   : > { %5926 = vmatmul.mubr.msk.bf16.gmra.mrb[16].mxu1 %vm525_vm2, %v7669_v33 }
 0x241   : > { %v2372_v0 = vpop.f32.mrb[168].mxu0  ;;  %5929 = vmatprep.mubr.msk.bf16.mxu1 %vm6374_vm0, %v8939_v38 }
 0x242   : > { %v8171_v46 = vadd.f32 %v2372_v0, %v2091_v21  ;;  %v5811_v41 = vpop.f32.mrb[169].mxu0  ;;  %v9119_v0 = vld [vmem:[#allocation6_spill] sm:$0xff] }
 0x243   : > { %v1993_v6 = vpop.f32.mrb[168].mxu1  ;;  %v2375_v15 = vpop.f32.mrb[170].mxu0 }
 0x244   : > { %9115 = vst [vmem:[#allocation23_spill] sm:$0xff] %v8171_v46  ;;  %v2093_v14 = vadd.f32 %v1993_v6, %v9116_v52  ;;  %v5723_v8 = vpop.f32.mrb[169].mxu1  ;;  %v8179_v55 = vadd.f32 %v2375_v15, %v2092_v54  ;;  %v5812_v33 = vpop.f32.mrb[171].mxu0  ;;  %v9121_v52 = vld [vmem:[#allocation85_spill] sm:$0xff] }
 0x245   : > { %v1996_v47 = vpop.f32.mrb[170].mxu1  ;;  %v8195_v8 = vcombine.low %v9121_v52, %v7850_v44  ;;  %v9123_v33 = vld [vmem:[#allocation77_spill] sm:$0xff]  ;;  %v2971_v44 = vld [vmem:[%s6431_s25 + $0xb4] sm:$0x1] }
 0x246   : > { %9117 = vst [vmem:[#allocation27_spill] sm:$0xff] %v8179_v55  ;;  %v2094_v24 = vadd.f32 %v1996_v47, %v9118_v25  ;;  %6018 = vmatmul.mubr.msk.bf16.gmra.mrb[20].mxu0 %vm525_vm2, %v3121_v17  ;;  %v5724_v21 = vpop.f32.mrb[171].mxu1  ;;  %v3123_v17 = vsel %vm3086_vm7, %v3120_v43, %v3122_v13  ;;  %v9125_v55 = vld [vmem:[#allocation78_spill] sm:$0xff] }
 0x247   : > { %6021 = vmatprep.mubr.msk.bf16.mxu0 %vm6374_vm0, %v8939_v38  ;;  %9122 = vst [vmem:[#allocation24_spill] sm:$0xff] %v8195_v8  ;;  %v3124_v43 = vrot.slane %v8195_v8, 3  ;;  %v9130_v8 = vld [vmem:[#allocation80_spill] sm:$0xff] }
 0x248   : > { %5930 = vmatmul.mubr.msk.bf16.gmra.mrb[20].mxu1 %vm525_vm2, %v9119_v0 }
 0x249   : > { %v2380_v41 = vpop.f32.mrb[172].mxu0  ;;  %5933 = vmatprep.mubr.msk.bf16.mxu1 %vm6374_vm0, %v8939_v38 }
 0x24a   : > { %v8190_v54 = vadd.f32 %v2380_v41, %v2093_v14  ;;  %v5815_v6 = vpop.f32.mrb[173].mxu0 }
 0x24b   : > { %v2001_v25 = vpop.f32.mrb[172].mxu1  ;;  %v2383_v15 = vpop.f32.mrb[174].mxu0  ;;  %v9126_v6 = vld [vmem:[#allocation10_spill] sm:$0xff] }
 0x24c   : > { %9120 = vst [vmem:[#allocation31_spill] sm:$0xff] %v8190_v54  ;;  %v2095_v47 = vadd.f32 %v2001_v25, %v9123_v33  ;;  %v5727_v21 = vpop.f32.mrb[173].mxu1  ;;  %v8198_v0 = vadd.f32 %v2383_v15, %v2094_v24  ;;  %v5816_v36 = vpop.f32.mrb[175].mxu0  ;;  %v3125_v15 = vsel %vm3086_vm7, %v3122_v13, %v3124_v43 }
 0x24d   : > { %v2004_v59 = vpop.f32.mrb[174].mxu1  ;;  %v9128_v21 = vld [vmem:[#allocation79_spill] sm:$0xff] }
 0x24e   : > { %9124 = vst [vmem:[#allocation32_spill] sm:$0xff] %v8198_v0  ;;  %v2096_v14 = vadd.f32 %v2004_v59, %v9125_v55  ;;  %6022 = vmatmul.mubr.msk.bf16.gmra.mrb[24].mxu0 %vm525_vm2, %v3123_v17  ;;  %v5728_v41 = vpop.f32.mrb[175].mxu1  ;;  %v9127_v17 = vld [vmem:[#allocation20_spill] sm:$0xff] }
 0x24f   : > { %6025 = vmatprep.mubr.msk.bf16.mxu0 %vm6374_vm0, %v8939_v38  ;;  %v8214_v33 = vcombine.low %v9127_v17, %v2971_v44  ;;  %v9134_v17 = vld [vmem:[#allocation4_spill] sm:$0xff] }
 0x250   : > { %5934 = vmatmul.mubr.msk.bf16.gmra.mrb[24].mxu1 %vm525_vm2, %v9126_v6 }
 0x251   : > { %v2388_v25 = vpop.f32.mrb[176].mxu0  ;;  %5937 = vmatprep.mubr.msk.bf16.mxu1 %vm6374_vm0, %v8939_v38  ;;  %v3126_v13 = vrot.slane %v8214_v33, 3 }
 0x252   : > { %v8210_v24 = vadd.f32 %v2388_v25, %v2095_v47  ;;  %v5819_v36 = vpop.f32.mrb[177].mxu0  ;;  %v9131_v25 = vld [vmem:[#allocation14_spill] sm:$0xff] }
 0x253   : > { %v2009_v59 = vpop.f32.mrb[176].mxu1  ;;  %v2391_v55 = vpop.f32.mrb[178].mxu0 }
 0x254   : > { %v2097_v41 = vadd.f32 %v2009_v59, %v9128_v21  ;;  %v5731_v52 = vpop.f32.mrb[177].mxu1  ;;  %v8217_v0 = vadd.f32 %v2391_v55, %v2096_v14  ;;  %v5820_v6 = vpop.f32.mrb[179].mxu0  ;;  %v9132_v59 = vld [vmem:[#allocation81_spill] sm:$0xff] }
 0x255   : > { %v2012_v54 = vpop.f32.mrb[178].mxu1 }
 0x256   : > { %9129 = vst [vmem:[#allocation36_spill] sm:$0xff] %v8217_v0  ;;  %v2098_v46 = vadd.f32 %v2012_v54, %v9130_v8  ;;  %6026 = vmatmul.mubr.msk.bf16.gmra.mrb[28].mxu0 %vm525_vm2, %v3125_v15  ;;  %v5732_v47 = vpop.f32.mrb[179].mxu1  ;;  %v3127_v8 = vsel %vm3086_vm7, %v3124_v43, %v3126_v13 }
 0x257   : > { %6029 = vmatprep.mubr.msk.bf16.mxu0 %vm6374_vm0, %v8939_v38 }
 0x258   : > { %5938 = vmatmul.mubr.msk.bf16.gmra.mrb[28].mxu1 %vm525_vm2, %v9131_v25 }
 0x259   : > { %v2396_v44 = vpop.f32.mrb[180].mxu0  ;;  %5941 = vmatprep.mubr.msk.bf16.mxu1 %vm6374_vm0, %v8939_v38 }
 0x25a   : > { %v8228_v52 = vadd.f32 %v2396_v44, %v2097_v41  ;;  %v5823_v14 = vpop.f32.mrb[181].mxu0  ;;  %v9135_v41 = vld [vmem:[#allocation83_spill] sm:$0xff] }
 0x25b   : > { %v2017_v36 = vpop.f32.mrb[180].mxu1  ;;  %v2399_v54 = vpop.f32.mrb[182].mxu0 }
 0x25c   : > { %v2099_v55 = vadd.f32 %v2017_v36, %v9132_v59  ;;  %v5735_v15 = vpop.f32.mrb[181].mxu1  ;;  %v8232_v21 = vadd.f32 %v2399_v54, %v2098_v46  ;;  %v5824_v6 = vpop.f32.mrb[183].mxu0  ;;  %v9137_v54 = vld [vmem:[#allocation7_spill] sm:$0xff] }
 0x25d   : > { %v2020_v47 = vpop.f32.mrb[182].mxu1  ;;  %v9139_v6 = vld [vmem:[#allocation8_spill] sm:$0xff] }
 0x25e   : > { %9133 = vst [vmem:[#allocation28_spill] sm:$0xff] %v8232_v21  ;;  %v2100_v25 = vadd.f32 %v2020_v47, %v9134_v17  ;;  %6030 = vmatmul.mubr.msk.bf16.gmra.mrb[32].mxu0 %vm525_vm2, %v3127_v8  ;;  %v5736_v0 = vpop.f32.mrb[183].mxu1 }
 0x25f   : > { %6033 = vmatprep.mubr.msk.bf16.mxu0 %vm6374_vm0, %v8939_v38 }
 0x260   : > { %5942 = vmatmul.mubr.msk.bf16.gmra.mrb[32].mxu1 %vm525_vm2, %v9135_v41 }
 0x261   : > { %v2404_v44 = vpop.f32.mrb[184].mxu0  ;;  %6045 = vmatprep.mubr.msk.bf16.mxu1 %vm6374_vm0, %v8939_v38 }
 0x262   : > { %v8242_v43 = vadd.f32 %v2404_v44, %v2099_v55  ;;  %v5827_v46 = vpop.f32.mrb[185].mxu0 }
 0x263   : > { %v2025_v14 = vpop.f32.mrb[184].mxu1  ;;  %v2407_v36 = vpop.f32.mrb[186].mxu0 }
 0x264   : > { %9136 = vst [vmem:[#allocation37_spill] sm:$0xff] %v8242_v43  ;;  %v2101_v17 = vadd.f32 %v2025_v14, %v9137_v54  ;;  %v5739_v59 = vpop.f32.mrb[185].mxu1  ;;  %v8245_v8 = vadd.f32 %v2407_v36, %v2100_v25  ;;  %v5828_v0 = vpop.f32.mrb[187].mxu0  ;;  %v9140_v36 = vld [vmem:[#allocation82_spill] sm:$0xff] }
 0x265   : > { %v2028_v15 = vpop.f32.mrb[186].mxu1 }
 0x266   : > { %9138 = vst [vmem:[#allocation33_spill] sm:$0xff] %v8245_v8  ;;  %v2102_v47 = vadd.f32 %v2028_v15, %v9139_v6  ;;  %6034 = vmatmul.mubr.msk.bf16.gmra.mrb[36].mxu0 %vm525_vm2, %v3126_v13  ;;  %v5740_v41 = vpop.f32.mrb[187].mxu1  ;;  %v9142_v6 = vld [vmem:[#allocation12_spill] sm:$0xff]  ;;  %v9143_v8 = vld [vmem:[#allocation25_spill] sm:$0xff] }
 0x267   : > { %6137 = vmatprep.mubr.msk.bf16.mxu0 %vm6374_vm0, %v8939_v38 }
 0x268   : > { %6046 = vmatmul.mubr.msk.bf16.vlgmr.msra.gmra.mrb[36].mxu1 %vm525_vm2, %v7882_v34  ;;  %v9144_v34 = vld [vmem:[#allocation26_spill] sm:$0xff] }
 0x269   : > { %v2412_v55 = vpop.f32.mrb[188].mxu0  ;;  %6049 = vmatprep.mubr.msk.bf16.mxu1 %vm6374_vm0, %v8939_v38  ;;  %v9145_v43 = vcombine.low %v9143_v8, %v9144_v34 }
 0x26a   : > { %v8255_v44 = vadd.f32 %v2412_v55, %v2101_v17  ;;  %v5831_v25 = vpop.f32.mrb[189].mxu0 }
 0x26b   : > { %v2033_v46 = vpop.f32.mrb[188].mxu1  ;;  %v2415_v14 = vpop.f32.mrb[190].mxu0 }
 0x26c   : > { %v2103_v54 = vadd.f32 %v2033_v46, %v9140_v36  ;;  %v5743_v59 = vpop.f32.mrb[189].mxu1  ;;  %v8258_v13 = vadd.f32 %v2415_v14, %v2102_v47  ;;  %v5832_v0 = vpop.f32.mrb[191].mxu0  ;;  %v9146_v14 = vld [vmem:[#allocation84_spill] sm:$0xff] }
 0x26d   : > { %v2036_v15 = vpop.f32.mrb[190].mxu1  ;;  %v9148_v0 = vld [vmem:[#allocation16_spill] sm:$0xff] }
 0x26e   : > { %9141 = vst [vmem:[#allocation41_spill] sm:$0xff] %v8258_v13  ;;  %v2104_v41 = vadd.f32 %v2036_v15, %v9142_v6  ;;  %6138 = vmatmul.mubr.msk.bf16.vlgmr.msra.gmra.mrb[40].mxu0 %vm525_vm2, %v9145_v43  ;;  %v5744_v21 = vpop.f32.mrb[191].mxu1  ;;  %v9149_v6 = vld [vmem:[#allocation29_spill] sm:$0xff] }
 0x26f   : > { %6141 = vmatprep.mubr.msk.bf16.mxu0 %vm6374_vm0, %v8939_v38 }
 0x270   : > { %6050 = vmatmul.mubr.msk.bf16.gmra.mrb[40].mxu1 %vm525_vm2, %v7905_v1  ;;  %v9150_v1 = vld [vmem:[#allocation30_spill] sm:$0xff] }
 0x271   : > { %v2420_v17 = vpop.f32.mrb[192].mxu0  ;;  %6053 = vmatprep.mubr.msk.bf16.mxu1 %vm6374_vm0, %v8939_v38  ;;  %v9151_v34 = vcombine.low %v9149_v6, %v9150_v1  ;;  %v9154_v1 = vld [vmem:[#allocation34_spill] sm:$0xff] }
 0x272   : > { %v8271_v47 = vadd.f32 %v2420_v17, %v2103_v54  ;;  %v5835_v55 = vpop.f32.mrb[193].mxu0 }
 0x273   : > { %v2041_v25 = vpop.f32.mrb[192].mxu1  ;;  %v2423_v46 = vpop.f32.mrb[194].mxu0 }
 0x274   : > { %v2105_v8 = vadd.f32 %v2041_v25, %v9146_v14  ;;  %v5747_v36 = vpop.f32.mrb[193].mxu1  ;;  %v8274_v43 = vadd.f32 %v2423_v46, %v2104_v41  ;;  %v5836_v21 = vpop.f32.mrb[195].mxu0  ;;  %v9152_v46 = vld [vmem:[#allocation86_spill] sm:$0xff] }
 0x275   : > { %v2044_v59 = vpop.f32.mrb[194].mxu1 }
 0x276   : > { %9147 = vst [vmem:[#allocation38_spill] sm:$0xff] %v8274_v43  ;;  %v2106_v15 = vadd.f32 %v2044_v59, %v9148_v0  ;;  %6142 = vmatmul.mubr.msk.bf16.gmra.mrb[44].mxu0 %vm525_vm2, %v9151_v34  ;;  %v5748_v13 = vpop.f32.mrb[195].mxu1  ;;  %v9153_v0 = vld [vmem:[#allocation19_spill] sm:$0xff] }
 0x277   : > { %6145 = vmatprep.mubr.msk.bf16.mxu0 %vm6374_vm0, %v8939_v38 }
 0x278   : > { %6054 = vmatmul.mubr.msk.bf16.gmra.mrb[44].mxu1 %vm525_vm2, %v7933_v32  ;;  %v9155_v32 = vld [vmem:[#allocation35_spill] sm:$0xff] }
 0x279   : > { %v2428_v54 = vpop.f32.mrb[196].mxu0  ;;  %6057 = vmatprep.mubr.msk.bf16.mxu1 %vm6374_vm0, %v8939_v38  ;;  %v9156_v34 = vcombine.low %v9154_v1, %v9155_v32 }
 0x27a   : > { %v8287_v41 = vadd.f32 %v2428_v54, %v2105_v8  ;;  %v5839_v17 = vpop.f32.mrb[197].mxu0 }
 0x27b   : > { %v2049_v55 = vpop.f32.mrb[196].mxu1  ;;  %v2431_v25 = vpop.f32.mrb[198].mxu0 }
 0x27c   : > { %v2107_v14 = vadd.f32 %v2049_v55, %v9152_v46  ;;  %v5751_v36 = vpop.f32.mrb[197].mxu1  ;;  %v8290_v21 = vadd.f32 %v2431_v25, %v2106_v15  ;;  %v5840_v13 = vpop.f32.mrb[199].mxu0 }
 0x27d   : > { %v2052_v59 = vpop.f32.mrb[198].mxu1 }
 0x27e   : > { %v2108_v6 = vadd.f32 %v2052_v59, %v9153_v0  ;;  %6146 = vmatmul.mubr.msk.bf16.gmra.mrb[48].mxu0 %vm525_vm2, %v9156_v34  ;;  %v5752_v43 = vpop.f32.mrb[199].mxu1  ;;  %v9157_v0 = vld [vmem:[#allocation39_spill] sm:$0xff] }
 0x27f   : > { %6149 = vmatprep.mubr.msk.bf16.mxu0 %vm6374_vm0, %v8939_v38 }
 0x280   : > { %6058 = vmatmul.mubr.msk.bf16.gmra.mrb[48].mxu1 %vm525_vm2, %v7961_v40  ;;  %v9158_v40 = vld [vmem:[#allocation40_spill] sm:$0xff] }
 0x281   : > { %v2436_v8 = vpop.f32.mrb[200].mxu0  ;;  %6061 = vmatprep.mubr.msk.bf16.mxu1 %vm6374_vm0, %v8939_v38  ;;  %v9159_v1 = vcombine.low %v9157_v0, %v9158_v40 }
 0x282   : > { %v8303_v15 = vadd.f32 %v2436_v8, %v2107_v14  ;;  %v5843_v54 = vpop.f32.mrb[201].mxu0 }
 0x283   : > { %v2057_v17 = vpop.f32.mrb[200].mxu1  ;;  %v2439_v55 = vpop.f32.mrb[202].mxu0 }
 0x284   : > { %v2109_v25 = vadd.f32 %v2057_v17, %v7862_v22  ;;  %v5755_v46 = vpop.f32.mrb[201].mxu1  ;;  %v8306_v36 = vadd.f32 %v2439_v55, %v2108_v6  ;;  %v5844_v43 = vpop.f32.mrb[203].mxu0 }
 0x285   : > { %v2060_v13 = vpop.f32.mrb[202].mxu1  ;;  %v9160_v43 = vld [vmem:[#allocation42_spill] sm:$0xff] }
 0x286   : > { %v2110_v59 = vadd.f32 %v2060_v13, %v7870_v10  ;;  %6150 = vmatmul.mubr.msk.bf16.gmra.mrb[52].mxu0 %vm525_vm2, %v9159_v1  ;;  %v5756_v32 = vpop.f32.mrb[203].mxu1  ;;  %v9161_v13 = vld [vmem:[#allocation43_spill] sm:$0xff] }
 0x287   : > { %6153 = vmatprep.mubr.msk.bf16.mxu0 %vm6374_vm0, %v8939_v38  ;;  %v9162_v0 = vcombine.low %v9160_v43, %v9161_v13  ;;  %v9163_v32 = vld [vmem:[#allocation22_spill] sm:$0xff] }
 0x288   : > { %6062 = vmatmul.mubr.msk.bf16.gmra.mrb[52].mxu1 %vm525_vm2, %v7989_v19 }
 0x289   : > { %v2444_v22 = vpop.f32.mrb[204].mxu0  ;;  %6065 = vmatprep.mubr.msk.bf16.mxu1 %vm6374_vm0, %v8939_v38 }
 0x28a   : > { %v8319_v14 = vadd.f32 %v2444_v22, %v2109_v25  ;;  %v5847_v6 = vpop.f32.mrb[205].mxu0 }
 0x28b   : > { %v2065_v10 = vpop.f32.mrb[204].mxu1  ;;  %v2447_v34 = vpop.f32.mrb[206].mxu0 }
 0x28c   : > { %v2111_v8 = vadd.f32 %v2065_v10, %v7889_v53  ;;  %v8322_v54 = vadd.f32 %v2447_v34, %v2110_v59  ;;  %v5848_v17 = vpop.f32.mrb[207].mxu0  ;;  %v5759_v55 = vpop.f32.mrb[205].mxu1 }
 0x28d   : > { %v2068_v46 = vpop.f32.mrb[206].mxu1  ;;  %v9164_v55 = vld [vmem:[#allocation45_spill] sm:$0xff] }
 0x28e   : > { %6154 = vmatmul.mubr.msk.bf16.gmra.mrb[56].mxu0 %vm525_vm2, %v9162_v0  ;;  %v5760_v19 = vpop.f32.mrb[207].mxu1  ;;  %v9165_v46 = vld [vmem:[#allocation46_spill] sm:$0xff] }
 0x28f   : > { %6157 = vmatprep.mubr.msk.bf16.mxu0 %vm6374_vm0, %v8939_v38  ;;  %v9166_v43 = vcombine.low %v9164_v55, %v9165_v46 }
 0x290   : > { %6066 = vmatmul.mubr.msk.bf16.gmra.mrb[56].mxu1 %vm525_vm2, %v8010_v12 }
 0x291   : > { %v2452_v25 = vpop.f32.mrb[208].mxu0  ;;  %6069 = vmatprep.mubr.msk.bf16.mxu1 %vm6374_vm0, %v8939_v38 }
 0x292   : > { %v8334_v53 = vadd.f32 %v2452_v25, %v2111_v8  ;;  %v5851_v59 = vpop.f32.mrb[209].mxu0  ;;  %v9167_v25 = vld [vmem:[#allocation21_spill] sm:$0xff] }
 0x293   : > { %v2723_v40 = vpop.f32.mrb[208].mxu1  ;;  %v2455_v1 = vpop.f32.mrb[210].mxu0 }
 0x294   : > { %v2889_v22 = vadd.f32 %v2723_v40, %v9163_v32  ;;  %v5863_v6 = vpop.f32.mrb[209].mxu1  ;;  %v5852_v10 = vpop.f32.mrb[211].mxu0 }
 0x295   : > { %v2726_v34 = vpop.f32.mrb[210].mxu1 }
 0x296   : > { %v2890_v17 = vadd.f32 %v2726_v34, %v7923_v5  ;;  %6158 = vmatmul.mubr.msk.bf16.gmra.mrb[60].mxu0 %vm525_vm2, %v9166_v43  ;;  %v5864_v12 = vpop.f32.mrb[211].mxu1  ;;  %v9168_v34 = vld [vmem:[#allocation49_spill] sm:$0xff] }
 0x297   : > { %6161 = vmatprep.mubr.msk.bf16.mxu0 %vm6374_vm0, %v8939_v38 }
 0x298   : > { %6070 = vmatmul.mubr.msk.bf16.gmra.mrb[60].mxu1 %vm525_vm2, %v8041_v37  ;;  %v9169_v37 = vld [vmem:[#allocation50_spill] sm:$0xff] }
 0x299   : > { %v3249_v8 = vpop.f32.mrb[212].mxu0  ;;  %6073 = vmatprep.mubr.msk.bf16.mxu1 %vm6374_vm0, %v8939_v38  ;;  %v9170_v55 = vcombine.low %v9168_v34, %v9169_v37 }
 0x29a   : > { %v8348_v13 = vadd.f32 %v3249_v8, %v2889_v22  ;;  %v5955_v0 = vpop.f32.mrb[213].mxu0 }
 0x29b   : > { %v2731_v5 = vpop.f32.mrb[212].mxu1  ;;  %v3252_v19 = vpop.f32.mrb[214].mxu0 }
 0x29c   : > { %v2891_v59 = vadd.f32 %v2731_v5, %v9167_v25  ;;  %v5867_v40 = vpop.f32.mrb[213].mxu1  ;;  %v8351_v1 = vadd.f32 %v3252_v19, %v2890_v17  ;;  %v5956_v32 = vpop.f32.mrb[215].mxu0 }
 0x29d   : > { %v2734_v6 = vpop.f32.mrb[214].mxu1  ;;  %v9171_v32 = vld [vmem:[#allocation53_spill] sm:$0xff] }
 0x29e   : > { %v2892_v10 = vadd.f32 %v2734_v6, %v7951_v29  ;;  %6162 = vmatmul.mubr.msk.bf16.gmra.mrb[64].mxu0 %vm525_vm2, %v9170_v55  ;;  %v5868_v46 = vpop.f32.mrb[215].mxu1 }
 0x29f   : > { %6165 = vmatprep.mubr.msk.bf16.mxu0 %vm6374_vm0, %v8939_v38 }
 0x2a0   : > { %6074 = vmatmul.mubr.msk.bf16.gmra.mrb[64].mxu1 %vm525_vm2, %v8066_v31  ;;  %v9172_v31 = vld [vmem:[#allocation54_spill] sm:$0xff] }
 0x2a1   : > { %v3257_v22 = vpop.f32.mrb[216].mxu0  ;;  %6077 = vmatprep.mubr.msk.bf16.mxu1 %vm6374_vm0, %v8939_v38  ;;  %v9173_v6 = vcombine.low %v9171_v32, %v9172_v31 }
 0x2a2   : > { %v8364_v17 = vadd.f32 %v3257_v22, %v2891_v59  ;;  %v5959_v43 = vpop.f32.mrb[217].mxu0 }
 0x2a3   : > { %v2739_v29 = vpop.f32.mrb[216].mxu1  ;;  %v3260_v12 = vpop.f32.mrb[218].mxu0 }
 0x2a4   : > { %v2893_v8 = vadd.f32 %v2739_v29, %v7971_v4  ;;  %v5871_v0 = vpop.f32.mrb[217].mxu1  ;;  %v8367_v5 = vadd.f32 %v3260_v12, %v2892_v10  ;;  %v5960_v19 = vpop.f32.mrb[219].mxu0 }
 0x2a5   : > { %v2742_v25 = vpop.f32.mrb[218].mxu1  ;;  %v9174_v0 = vld [vmem:[#allocation57_spill] sm:$0xff] }
 0x2a6   : > { %v2894_v40 = vadd.f32 %v2742_v25, %v7979_v48  ;;  %6166 = vmatmul.mubr.msk.bf16.gmra.mrb[68].mxu0 %vm525_vm2, %v9173_v6  ;;  %v5872_v34 = vpop.f32.mrb[219].mxu1 }
 0x2a7   : > { %6169 = vmatprep.mubr.msk.bf16.mxu0 %vm6374_vm0, %v8939_v38 }
 0x2a8   : > { %6078 = vmatmul.mubr.msk.bf16.gmra.mrb[68].mxu1 %vm525_vm2, %v8089_v9  ;;  %v9175_v9 = vld [vmem:[#allocation58_spill] sm:$0xff] }
 0x2a9   : > { %v3265_v4 = vpop.f32.mrb[220].mxu0  ;;  %6081 = vmatprep.mubr.msk.bf16.mxu1 %vm6374_vm0, %v8939_v38  ;;  %v9176_v19 = vcombine.low %v9174_v0, %v9175_v9 }
 0x2aa   : > { %v8380_v59 = vadd.f32 %v3265_v4, %v2893_v8  ;;  %v5963_v10 = vpop.f32.mrb[221].mxu0 }
 0x2ab   : > { %v2747_v48 = vpop.f32.mrb[220].mxu1  ;;  %v3268_v37 = vpop.f32.mrb[222].mxu0 }
 0x2ac   : > { %v2895_v55 = vadd.f32 %v2747_v48, %v7999_v60  ;;  %v5875_v46 = vpop.f32.mrb[221].mxu1  ;;  %v8383_v22 = vadd.f32 %v3268_v37, %v2894_v40  ;;  %v5964_v43 = vpop.f32.mrb[223].mxu0  ;;  %v9177_v37 = vld [vmem:[#allocation61_spill] sm:$0xff] }
 0x2ad   : > { %v2750_v29 = vpop.f32.mrb[222].mxu1 }
 0x2ae   : > { %v2896_v12 = vadd.f32 %v2750_v29, %v8007_v61  ;;  %6170 = vmatmul.mubr.msk.bf16.gmra.mrb[72].mxu0 %vm525_vm2, %v9176_v19  ;;  %v5876_v25 = vpop.f32.mrb[223].mxu1 }
 0x2af   : > { %6173 = vmatprep.mubr.msk.bf16.mxu0 %vm6374_vm0, %v8939_v38 }
 0x2b0   : > { %6082 = vmatmul.mubr.msk.bf16.gmra.mrb[72].mxu1 %vm525_vm2, %v8113_v42  ;;  %v9178_v42 = vld [vmem:[#allocation62_spill] sm:$0xff] }
 0x2b1   : > { %v3273_v60 = vpop.f32.mrb[224].mxu0  ;;  %6085 = vmatprep.mubr.msk.bf16.mxu1 %vm6374_vm0, %v8939_v38  ;;  %v9179_v46 = vcombine.low %v9177_v37, %v9178_v42 }
 0x2b2   : > { %v8396_v8 = vadd.f32 %v3273_v60, %v2895_v55  ;;  %v5967_v40 = vpop.f32.mrb[225].mxu0  ;;  %v3583_v55 = vshrl.u32 %v8055_v3, 16 }
 0x2b3   : > { %v2755_v61 = vpop.f32.mrb[224].mxu1  ;;  %v3276_v32 = vpop.f32.mrb[226].mxu0 }
 0x2b4   : > { %v2897_v31 = vadd.f32 %v2755_v61, %v8027_v51  ;;  %v5879_v6 = vpop.f32.mrb[225].mxu1  ;;  %v8399_v34 = vadd.f32 %v3276_v32, %v2896_v12  ;;  %v5968_v4 = vpop.f32.mrb[227].mxu0  ;;  %v3585_v61 = vrot.slane %v3583_v55, 3 }
 0x2b5   : > { %v2758_v10 = vpop.f32.mrb[226].mxu1  ;;  %v9180_v4 = vld [vmem:[#allocation65_spill] sm:$0xff] }
 0x2b6   : > { %v2898_v48 = vadd.f32 %v2758_v10, %v8035_v39  ;;  %6174 = vmatmul.mubr.msk.bf16.gmra.mrb[76].mxu0 %vm525_vm2, %v9179_v46  ;;  %v5880_v43 = vpop.f32.mrb[227].mxu1  ;;  %v3586_v39 = vshll.u32 %v8055_v3, 16  ;;  %v9181_v10 = vld [vmem:[#allocation66_spill] sm:$0xff] }
 0x2b7   : > { %6177 = vmatprep.mubr.msk.bf16.mxu0 %vm6374_vm0, %v8939_v38  ;;  %v9182_v37 = vcombine.low %v9180_v4, %v9181_v10 }
 0x2b8   : > { %6086 = vmatmul.mubr.msk.bf16.gmra.mrb[76].mxu1 %vm525_vm2, %v8137_v2  ;;  %v3588_v32 = vrot.slane %v3586_v39, 4 }
 0x2b9   : > { %v3281_v51 = vpop.f32.mrb[228].mxu0  ;;  %6089 = vmatprep.mubr.msk.bf16.mxu1 %vm6374_vm0, %v8939_v38 }
 0x2ba   : > { %v8414_v29 = vadd.f32 %v3281_v51, %v2897_v31  ;;  %v5971_v12 = vpop.f32.mrb[229].mxu0  ;;  %v3589_v31 = vor.u32 %v3588_v32, %v3585_v61  ;;  %v3601_v32 = vshrl.u32 %v8105_v49, 16 }
 0x2bb   : > { %v2763_v0 = vpop.f32.mrb[228].mxu1  ;;  %v3284_v9 = vpop.f32.mrb[230].mxu0 }
 0x2bc   : > { %v2899_v19 = vadd.f32 %v2763_v0, %v8051_v57  ;;  %v5883_v25 = vpop.f32.mrb[229].mxu1  ;;  %v8417_v60 = vadd.f32 %v3284_v9, %v2898_v48  ;;  %v5972_v40 = vpop.f32.mrb[231].mxu0  ;;  %v3592_v48 = vshrl.u32 %v8081_v7, 16  ;;  %v3590_v9 = vsel %vm3465_vm8, %v8156_v11, %v3589_v31 }
 0x2bd   : > { %v2766_v2 = vpop.f32.mrb[230].mxu1 }
 0x2be   : > { %v2900_v6 = vadd.f32 %v2766_v2, %v8059_v62  ;;  %6178 = vmatmul.mubr.msk.bf16.gmra.mrb[80].mxu0 %vm525_vm2, %v9182_v37  ;;  %v5884_v3 = vpop.f32.mrb[231].mxu1  ;;  %v3595_v62 = vshll.u32 %v8081_v7, 16  ;;  %v3594_v25 = vrot.slane %v3592_v48, 3  ;;  %v9183_v7 = vld [vmem:[#allocation67_spill] sm:$0xff] }
 0x2bf   : > { %6181 = vmatprep.mubr.msk.bf16.mxu0 %vm6374_vm0, %v8939_v38 }
 0x2c0   : > { %6090 = vmatmul.mubr.msk.bf16.gmra.mrb[80].mxu1 %vm525_vm2, %v8165_v27  ;;  %v3597_v40 = vrot.slane %v3595_v62, 4 }
 0x2c1   : > { %v3289_v57 = vpop.f32.mrb[232].mxu0  ;;  %6093 = vmatprep.mubr.msk.bf16.mxu1 %vm6374_vm0, %v8939_v38 }
 0x2c2   : > { %v8432_v42 = vadd.f32 %v3289_v57, %v2899_v19  ;;  %v5975_v46 = vpop.f32.mrb[233].mxu0  ;;  %v9184_v19 = vcombine.low %v9183_v7, %v9101_v35  ;;  %v3598_v11 = vor.u32 %v3597_v40, %v3594_v25 }
 0x2c3   : > { %v2771_v43 = vpop.f32.mrb[232].mxu1  ;;  %v3292_v51 = vpop.f32.mrb[234].mxu0 }
 0x2c4   : > { %v2901_v55 = vadd.f32 %v2771_v43, %v8076_v28  ;;  %v5887_v39 = vpop.f32.mrb[233].mxu1  ;;  %v8435_v12 = vadd.f32 %v3292_v51, %v2900_v6  ;;  %v5976_v27 = vpop.f32.mrb[235].mxu0  ;;  %v3599_v46 = vsel %vm3465_vm8, %v3589_v31, %v3598_v11  ;;  %v3603_v43 = vrot.slane %v3601_v32, 3 }
 0x2c5   : > { %v2774_v0 = vpop.f32.mrb[234].mxu1  ;;  %v9185_v27 = vld [vmem:[#allocation69_spill] sm:$0xff] }
 0x2c6   : > { %v2902_v2 = vadd.f32 %v2774_v0, %v8084_v45  ;;  %6182 = vmatmul.mubr.msk.bf16.gmra.mrb[84].mxu0 %vm525_vm2, %v9184_v19  ;;  %v5888_v61 = vpop.f32.mrb[235].mxu1  ;;  %v3604_v45 = vshll.u32 %v8105_v49, 16  ;;  %v9186_v49 = vld [vmem:[#allocation70_spill] sm:$0xff] }
 0x2c7   : > { %6185 = vmatprep.mubr.msk.bf16.mxu0 %vm6374_vm0, %v8939_v38 }
 0x2c8   : > { %6094 = vmatmul.mubr.msk.bf16.gmra.mrb[84].mxu1 %vm525_vm2, %v3590_v9  ;;  %v3606_v51 = vrot.slane %v3604_v45, 4  ;;  %v3610_v9 = vshrl.u32 %v8127_v26, 16 }
 0x2c9   : > { %v3297_v28 = vpop.f32.mrb[236].mxu0  ;;  %6097 = vmatprep.mubr.msk.bf16.mxu1 %vm6374_vm0, %v8939_v38 }
 0x2ca   : > { %v8451_v6 = vadd.f32 %v3297_v28, %v2901_v55  ;;  %v5979_v35 = vpop.f32.mrb[237].mxu0  ;;  %v9187_v55 = vcombine.low %v9185_v27, %v9186_v49  ;;  %v3607_v31 = vor.u32 %v3606_v51, %v3603_v43 }
 0x2cb   : > { %v2779_v4 = vpop.f32.mrb[236].mxu1  ;;  %v3300_v10 = vpop.f32.mrb[238].mxu0 }
 0x2cc   : > { %v2903_v37 = vadd.f32 %v2779_v4, %v8100_v20  ;;  %v5891_v3 = vpop.f32.mrb[237].mxu1  ;;  %v8454_v57 = vadd.f32 %v3300_v10, %v2902_v2  ;;  %v5980_v48 = vpop.f32.mrb[239].mxu0  ;;  %v3608_v35 = vsel %vm3465_vm8, %v3598_v11, %v3607_v31  ;;  %v3612_v4 = vrot.slane %v3610_v9, 3 }
 0x2cd   : > { %v2782_v62 = vpop.f32.mrb[238].mxu1  ;;  %v9188_v48 = vld [vmem:[#allocation71_spill] sm:$0xff] }
 0x2ce   : > { %v2904_v39 = vadd.f32 %v2782_v62, %v8108_v16  ;;  %6186 = vmatmul.mubr.msk.bf16.gmra.mrb[88].mxu0 %vm525_vm2, %v9187_v55  ;;  %v5892_v0 = vpop.f32.mrb[239].mxu1  ;;  %v3613_v16 = vshll.u32 %v8127_v26, 16  ;;  %v9189_v26 = vld [vmem:[#allocation72_spill] sm:$0xff] }
 0x2cf   : > { %6189 = vmatprep.mubr.msk.bf16.mxu0 %vm6374_vm0, %v8939_v38 }
 0x2d0   : > { %6098 = vmatmul.mubr.msk.bf16.gmra.mrb[88].mxu1 %vm525_vm2, %v3599_v46  ;;  %v3615_v10 = vrot.slane %v3613_v16, 4  ;;  %v3619_v46 = vshrl.u32 %v8151_v23, 16 }
 0x2d1   : > { %v3305_v20 = vpop.f32.mrb[240].mxu0  ;;  %6101 = vmatprep.mubr.msk.bf16.mxu1 %vm6374_vm0, %v8939_v38 }
 0x2d2   : > { %v8469_v25 = vadd.f32 %v3305_v20, %v2903_v37  ;;  %v5983_v40 = vpop.f32.mrb[241].mxu0  ;;  %v9190_v37 = vcombine.low %v9188_v48, %v9189_v26  ;;  %v3616_v11 = vor.u32 %v3615_v10, %v3612_v4  ;;  %v9193_v10 = vld [vmem:[#allocation23_spill] sm:$0xff] }
 0x2d3   : > { %v2787_v2 = vpop.f32.mrb[240].mxu1  ;;  %v3308_v7 = vpop.f32.mrb[242].mxu0  ;;  %v3621_v40 = vrot.slane %v3619_v46, 3 }
 0x2d4   : > { %v2905_v19 = vadd.f32 %v2787_v2, %v8122_v58  ;;  %v5895_v61 = vpop.f32.mrb[241].mxu1  ;;  %v8472_v28 = vadd.f32 %v3308_v7, %v2904_v39  ;;  %v5984_v32 = vpop.f32.mrb[243].mxu0  ;;  %v3617_v16 = vsel %vm3465_vm8, %v3607_v31, %v3616_v11 }
 0x2d5   : > { %v2790_v45 = vpop.f32.mrb[242].mxu1  ;;  %v9191_v61 = vld [vmem:[#allocation3_spill] sm:$0xff]  ;;  %v3628_v32 = vshrl.u32 %v8176_v56, 16 }
 0x2d6   : > { %v2906_v3 = vadd.f32 %v2790_v45, %v8130_v30  ;;  %6190 = vmatmul.mubr.msk.bf16.gmra.mrb[92].mxu0 %vm525_vm2, %v9190_v37  ;;  %v5896_v62 = vpop.f32.mrb[243].mxu1  ;;  %v3622_v30 = vshll.u32 %v8151_v23, 16  ;;  %v9192_v23 = vcombine.low %v9191_v61, %v7636_v63 }
 0x2d7   : > { %6193 = vmatprep.mubr.msk.bf16.mxu0 %vm6374_vm0, %v8939_v38  ;;  %v3630_v46 = vrot.slane %v3628_v32, 3 }
 0x2d8   : > { %6102 = vmatmul.mubr.msk.bf16.gmra.mrb[92].mxu1 %vm525_vm2, %v3608_v35  ;;  %v3624_v2 = vrot.slane %v3622_v30, 4 }
 0x2d9   : > { %v3313_v58 = vpop.f32.mrb[244].mxu0  ;;  %6105 = vmatprep.mubr.msk.bf16.mxu1 %vm6374_vm0, %v8939_v38 }
 0x2da   : > { %v8487_v43 = vadd.f32 %v3313_v58, %v2905_v19  ;;  %v5987_v51 = vpop.f32.mrb[245].mxu0  ;;  %v3625_v31 = vor.u32 %v3624_v2, %v3621_v40 }
 0x2db   : > { %v2795_v39 = vpop.f32.mrb[244].mxu1  ;;  %v3316_v27 = vpop.f32.mrb[246].mxu0  ;;  %v9194_v51 = vld [vmem:[#allocation27_spill] sm:$0xff] }
 0x2dc   : > { %v2907_v49 = vadd.f32 %v2795_v39, %v8146_v50  ;;  %v5899_v55 = vpop.f32.mrb[245].mxu1  ;;  %v8490_v0 = vadd.f32 %v3316_v27, %v2906_v3  ;;  %v5988_v20 = vpop.f32.mrb[247].mxu0  ;;  %v3626_v58 = vsel %vm3465_vm8, %v3616_v11, %v3625_v31  ;;  %v9195_v27 = vld [vmem:[#allocation2_spill] sm:$0xff] }
 0x2dd   : > { %v2798_v9 = vpop.f32.mrb[246].mxu1 }
 0x2de   : > { %v2908_v7 = vadd.f32 %v2798_v9, %v8154_v18  ;;  %6194 = vmatmul.mubr.msk.bf16.gmra.mrb[96].mxu0 %vm525_vm2, %v9192_v23  ;;  %v5900_v19 = vpop.f32.mrb[247].mxu1  ;;  %v3631_v18 = vshll.u32 %v8176_v56, 16  ;;  %v9196_v56 = vld [vmem:[#allocation5_spill] sm:$0xff]  ;;  %v9198_v9 = vld [vmem:[#allocation24_spill] sm:$0xff] }
 0x2df   : > { %6197 = vmatprep.mubr.msk.bf16.mxu0 %vm6374_vm0, %v8939_v38  ;;  %v3640_v40 = vshll.u32 %v9198_v9, 16  ;;  %v9199_v19 = vld [vmem:[#allocation31_spill] sm:$0xff] }
 0x2e0   : > { %6106 = vmatmul.mubr.msk.bf16.gmra.mrb[96].mxu1 %vm525_vm2, %v3617_v16  ;;  %v3633_v30 = vrot.slane %v3631_v18, 4  ;;  %v3637_v16 = vshrl.u32 %v9198_v9, 16 }
 0x2e1   : > { %v3321_v50 = vpop.f32.mrb[248].mxu0  ;;  %6109 = vmatprep.mubr.msk.bf16.mxu1 %vm6374_vm0, %v8939_v38 }
 0x2e2   : > { %v8505_v45 = vadd.f32 %v3321_v50, %v2907_v49  ;;  %v5991_v63 = vpop.f32.mrb[249].mxu0  ;;  %v9197_v49 = vcombine.low %v9195_v27, %v9196_v56  ;;  %v3634_v11 = vor.u32 %v3633_v30, %v3630_v46  ;;  %v9202_v46 = vld [vmem:[#allocation11_spill] sm:$0xff]  ;;  %v3649_v27 = vshll.u32 %v8214_v33, 16 }
 0x2e3   : > { %v2803_v35 = vpop.f32.mrb[248].mxu1  ;;  %v3324_v4 = vpop.f32.mrb[250].mxu0 }
 0x2e4   : > { %v2909_v3 = vadd.f32 %v2803_v35, %v9193_v10  ;;  %v5903_v48 = vpop.f32.mrb[249].mxu1  ;;  %v8508_v26 = vadd.f32 %v3324_v4, %v2908_v7  ;;  %v5992_v37 = vpop.f32.mrb[251].mxu0  ;;  %v3635_v4 = vsel %vm3465_vm8, %v3625_v31, %v3634_v11  ;;  %v3639_v10 = vrot.slane %v3637_v16, 3 }
 0x2e5   : > { %v2806_v62 = vpop.f32.mrb[250].mxu1  ;;  %v3642_v48 = vrot.slane %v3640_v40, 4  ;;  %v9200_v37 = vld [vmem:[#allocation32_spill] sm:$0xff] }
 0x2e6   : > { %v2910_v39 = vadd.f32 %v2806_v62, %v9194_v51  ;;  %6198 = vmatmul.mubr.msk.bf16.gmra.mrb[100].mxu0 %vm525_vm2, %v9197_v49  ;;  %v5904_v55 = vpop.f32.mrb[251].mxu1 }
 0x2e7   : > { %6201 = vmatprep.mubr.msk.bf16.mxu0 %vm6374_vm0, %v8939_v38  ;;  %v3643_v31 = vor.u32 %v3642_v48, %v3639_v10 }
 0x2e8   : > { %6110 = vmatmul.mubr.msk.bf16.gmra.mrb[100].mxu1 %vm525_vm2, %v3626_v58  ;;  %v9201_v58 = vld [vmem:[#allocation9_spill] sm:$0xff] }
 0x2e9   : > { %v3329_v20 = vpop.f32.mrb[252].mxu0  ;;  %6113 = vmatprep.mubr.msk.bf16.mxu1 %vm6374_vm0, %v8939_v38 }
 0x2ea   : > { %v8523_v2 = vadd.f32 %v3329_v20, %v2909_v3  ;;  %v5995_v7 = vpop.f32.mrb[253].mxu0  ;;  %v9203_v3 = vcombine.low %v9201_v58, %v9202_v46 }
 0x2eb   : > { %v2811_v61 = vpop.f32.mrb[252].mxu1  ;;  %v3332_v23 = vpop.f32.mrb[254].mxu0 }
 0x2ec   : > { %v2911_v50 = vadd.f32 %v2811_v61, %v9199_v19  ;;  %v5907_v32 = vpop.f32.mrb[253].mxu1  ;;  %v8526_v18 = vadd.f32 %v3332_v23, %v2910_v39  ;;  %v5996_v63 = vpop.f32.mrb[255].mxu0  ;;  %v3646_v39 = vshrl.u32 %v8214_v33, 16  ;;  %v3644_v23 = vsel %vm3465_vm8, %v3634_v11, %v3643_v31  ;;  %v9206_v33 = vld [vmem:[#allocation15_spill] sm:$0xff] }
 0x2ed   : > { %v2814_v35 = vpop.f32.mrb[254].mxu1  ;;  %v3651_v32 = vrot.slane %v3649_v27, 4  ;;  %v9204_v63 = vld [vmem:[#allocation36_spill] sm:$0xff] }
 0x2ee   : > { %v2912_v62 = vadd.f32 %v2814_v35, %v9200_v37  ;;  %6202 = vmatmul.mubr.msk.bf16.gmra.mrb[104].mxu0 %vm525_vm2, %v9203_v3  ;;  %v5908_v30 = vpop.f32.mrb[255].mxu1  ;;  %v3648_v19 = vrot.slane %v3646_v39, 3 }
 0x2ef   : > { %6205 = vmatprep.mubr.msk.bf16.mxu0 %vm6374_vm0, %v8939_v38 }
 0x2f0   : > { %6114 = vmatmul.mubr.msk.bf16.gmra.mrb[104].mxu1 %vm525_vm2, %v3635_v4  ;;  %v9205_v4 = vld [vmem:[#allocation13_spill] sm:$0xff]  ;;  %v3652_v11 = vor.u32 %v3651_v32, %v3648_v19 }
 0x2f1   : > { %v3337_v51 = vpop.f32.mrb[0].mxu0  ;;  %6117 = vmatprep.mubr.msk.bf16.mxu1 %vm6374_vm0, %v8939_v38  ;;  %v9212_v32 = vld [vmem:[#allocation37_spill] sm:$0xff] }
 0x2f2   : > { %v8541_v56 = vadd.f32 %v3337_v51, %v2911_v50  ;;  %v5999_v49 = vpop.f32.mrb[1].mxu0  ;;  %v9207_v50 = vcombine.low %v9205_v4, %v9206_v33  ;;  %v3653_v27 = vsel %vm3465_vm8, %v3643_v31, %v3652_v11 }
 0x2f3   : > { %v2819_v55 = vpop.f32.mrb[0].mxu1  ;;  %v3340_v20 = vpop.f32.mrb[2].mxu0  ;;  %v9208_v49 = vld [vmem:[#allocation28_spill] sm:$0xff] }
 0x2f4   : > { %v2913_v9 = vadd.f32 %v2819_v55, %v8210_v24  ;;  %v5911_v16 = vpop.f32.mrb[1].mxu1  ;;  %v8544_v40 = vadd.f32 %v3340_v20, %v2912_v62  ;;  %v6000_v7 = vpop.f32.mrb[3].mxu0  ;;  %v9209_v20 = vld [vmem:[#allocation17_spill] sm:$0xff] }
 0x2f5   : > { %v2822_v61 = vpop.f32.mrb[2].mxu1  ;;  %v9210_v16 = vld [vmem:[#allocation85_spill] sm:$0xff] }
 0x2f6   : > { %v2914_v35 = vadd.f32 %v2822_v61, %v9204_v63  ;;  %6206 = vmatmul.mubr.msk.bf16.gmra.mrb[108].mxu0 %vm525_vm2, %v9207_v50  ;;  %v5912_v10 = vpop.f32.mrb[3].mxu1  ;;  %v9211_v7 = vcombine.low %v9209_v20, %v9210_v16 }
 0x2f7   : > { %6209 = vmatprep.mubr.msk.bf16.mxu0 %vm6374_vm0, %v8939_v38  ;;  %v9213_v10 = vld [vmem:[#allocation33_spill] sm:$0xff] }
 0x2f8   : > { %6118 = vmatmul.mubr.msk.bf16.gmra.mrb[108].mxu1 %vm525_vm2, %v3644_v23 }
 0x2f9   : > { %v3345_v24 = vpop.f32.mrb[4].mxu0  ;;  %6121 = vmatprep.mubr.msk.bf16.mxu1 %vm6374_vm0, %v8939_v38 }
 0x2fa   : > { %v8557_v48 = vadd.f32 %v3345_v24, %v2913_v9  ;;  %v6003_v37 = vpop.f32.mrb[5].mxu0 }
 0x2fb   : > { %v2827_v62 = vpop.f32.mrb[4].mxu1  ;;  %v3348_v58 = vpop.f32.mrb[6].mxu0  ;;  %v9214_v37 = vld [vmem:[#allocation18_spill] sm:$0xff] }
 0x2fc   : > { %v2915_v46 = vadd.f32 %v2827_v62, %v8228_v52  ;;  %v5915_v3 = vpop.f32.mrb[5].mxu1  ;;  %v8560_v30 = vadd.f32 %v3348_v58, %v2914_v35  ;;  %v6004_v51 = vpop.f32.mrb[7].mxu0  ;;  %v9215_v62 = vld [vmem:[#allocation20_spill] sm:$0xff] }
 0x2fd   : > { %v2830_v39 = vpop.f32.mrb[6].mxu1  ;;  %v9216_v58 = vcombine.low %v9214_v37, %v9215_v62  ;;  %v9218_v37 = vld [vmem:[#allocation38_spill] sm:$0xff] }
 0x2fe   : > { %v2916_v55 = vadd.f32 %v2830_v39, %v9208_v49  ;;  %6210 = vmatmul.mubr.msk.bf16.gmra.mrb[112].mxu0 %vm525_vm2, %v9211_v7  ;;  %v5916_v9 = vpop.f32.mrb[7].mxu1 }
 0x2ff   : > { %6213 = vmatprep.mubr.msk.bf16.mxu0 %vm6374_vm0, %v8939_v38 }
 0x300   : > { %6122 = vmatmul.mubr.msk.bf16.gmra.mrb[112].mxu1 %vm525_vm2, %v3653_v27  ;;  %v6364_v27 = vld [vmem:[%s6431_s25 + $0xb4] ss:$0 sps:$4 sm:$0x33]  }
 0x301   : > { %v3353_v52 = vpop.f32.mrb[8].mxu0  ;;  %6125 = vmatprep.mubr.msk.bf16.mxu1 %vm6374_vm0, %v8939_v38 }
 0x302   : > { %v8573_v61 = vadd.f32 %v3353_v52, %v2915_v46  ;;  %v6007_v31 = vpop.f32.mrb[9].mxu0 }
 0x303   : > { %v2835_v23 = vpop.f32.mrb[8].mxu1  ;;  %v3356_v19 = vpop.f32.mrb[10].mxu0  ;;  %v9217_v31 = vld [vmem:[#allocation41_spill] sm:$0xff] }
 0x304   : > { %v2917_v63 = vadd.f32 %v2835_v23, %v9212_v32  ;;  %v5919_v35 = vpop.f32.mrb[9].mxu1  ;;  %v8576_v4 = vadd.f32 %v3356_v19, %v2916_v55  ;;  %v6008_v33 = vpop.f32.mrb[11].mxu0 }
 0x305   : > { %v2838_v50 = vpop.f32.mrb[10].mxu1 }
 0x306   : > { %v2918_v24 = vadd.f32 %v2838_v50, %v9213_v10  ;;  %6214 = vmatmul.mubr.msk.bf16.gmra.mrb[116].mxu0 %vm525_vm2, %v9216_v58  ;;  %v5920_v46 = vpop.f32.mrb[11].mxu1 }
 0x307   : > { %6217 = vmatprep.mubr.msk.bf16.mxu0 %vm6374_vm0, %v8939_v38 }
 0x308   : > { %6126 = vmatmul.mubr.msk.bf16.gmra.mrb[116].mxu1 %vm525_vm2, %v3652_v11 }
 0x309   : > { %v3361_v3 = vpop.f32.mrb[12].mxu0 }
 0x30a   : > { %v8586_v51 = vadd.f32 %v3361_v3, %v2917_v63  ;;  %v6011_v39 = vpop.f32.mrb[13].mxu0 }
 0x30b   : > { %v2843_v49 = vpop.f32.mrb[12].mxu1  ;;  %v3364_v55 = vpop.f32.mrb[14].mxu0 }
 0x30c   : > { %v2919_v20 = vadd.f32 %v2843_v49, %v8255_v44  ;;  %v5923_v16 = vpop.f32.mrb[13].mxu1  ;;  %v8590_v7 = vadd.f32 %v3364_v55, %v2918_v24  ;;  %v6012_v9 = vpop.f32.mrb[15].mxu0 }
 0x30d   : > { %v2846_v52 = vpop.f32.mrb[14].mxu1 }
 0x30e   : > { %v2920_v23 = vadd.f32 %v2846_v52, %v9217_v31  ;;  %6218 = vmatmul.mubr.msk.bf16.gmra.mrb[120].mxu0 %vm525_vm2, %v6364_v27  ;;  %v5924_v38 = vpop.f32.mrb[15].mxu1 }
 0x311   : > { %v3369_v11 = vpop.f32.mrb[16].mxu0 }
 0x312   : > { %v8594_v19 = vadd.f32 %v3369_v11, %v2919_v20  ;;  %v6015_v32 = vpop.f32.mrb[17].mxu0 }
 0x313   : > { %v2851_v63 = vpop.f32.mrb[16].mxu1  ;;  %v3372_v35 = vpop.f32.mrb[18].mxu0 }
 0x314   : > { %v2921_v33 = vadd.f32 %v2851_v63, %v8271_v47  ;;  %v5927_v50 = vpop.f32.mrb[17].mxu1  ;;  %v8597_v44 = vadd.f32 %v3372_v35, %v2920_v23  ;;  %v6016_v10 = vpop.f32.mrb[19].mxu0 }
 0x315   : > { %v2854_v24 = vpop.f32.mrb[18].mxu1 }
 0x316   : > { %v2922_v62 = vadd.f32 %v2854_v24, %v9218_v37  ;;  %v5928_v58 = vpop.f32.mrb[19].mxu1 }
 0x319   : > { %v3377_v46 = vpop.f32.mrb[20].mxu0 }
 0x31a   : > { %v8600_v3 = vadd.f32 %v3377_v46, %v2921_v33  ;;  %v6019_v39 = vpop.f32.mrb[21].mxu0 }
 0x31b   : > { %v2859_v27 = vpop.f32.mrb[20].mxu1  ;;  %v3380_v49 = vpop.f32.mrb[22].mxu0 }
 0x31c   : > { %v2923_v55 = vadd.f32 %v2859_v27, %v8287_v41  ;;  %v5931_v20 = vpop.f32.mrb[21].mxu1  ;;  %v8603_v16 = vadd.f32 %v3380_v49, %v2922_v62  ;;  %v6020_v47 = vpop.f32.mrb[23].mxu0 }
 0x31d   : > { %v2862_v9 = vpop.f32.mrb[22].mxu1 }
 0x31e   : > { %v2924_v52 = vadd.f32 %v2862_v9, %v8290_v21  ;;  %v5932_v31 = vpop.f32.mrb[23].mxu1 }
 0x321   : > { %v3385_v23 = vpop.f32.mrb[24].mxu0 }
 0x322   : > { %v8606_v38 = vadd.f32 %v3385_v23, %v2923_v55  ;;  %v6023_v11 = vpop.f32.mrb[25].mxu0 }
 0x323   : > { %v2867_v32 = vpop.f32.mrb[24].mxu1  ;;  %v3388_v63 = vpop.f32.mrb[26].mxu0 }
 0x324   : > { %v2925_v35 = vadd.f32 %v2867_v32, %v8303_v15  ;;  %v5935_v33 = vpop.f32.mrb[25].mxu1  ;;  %v8609_v50 = vadd.f32 %v3388_v63, %v2924_v52  ;;  %v6024_v41 = vpop.f32.mrb[27].mxu0 }
 0x325   : > { %v2870_v10 = vpop.f32.mrb[26].mxu1 }
 0x326   : > { %v2926_v24 = vadd.f32 %v2870_v10, %v8306_v36  ;;  %v5936_v37 = vpop.f32.mrb[27].mxu1 }
 0x329   : > { %v3393_v62 = vpop.f32.mrb[28].mxu0 }
 0x32a   : > { %v8612_v58 = vadd.f32 %v3393_v62, %v2925_v35  ;;  %v6027_v21 = vpop.f32.mrb[29].mxu0 }
 0x32b   : > { %v2875_v46 = vpop.f32.mrb[28].mxu1  ;;  %v3396_v39 = vpop.f32.mrb[30].mxu0 }
 0x32c   : > { %v2927_v27 = vadd.f32 %v2875_v46, %v8319_v14  ;;  %v5939_v49 = vpop.f32.mrb[29].mxu1  ;;  %v8615_v55 = vadd.f32 %v3396_v39, %v2926_v24  ;;  %v6028_v15 = vpop.f32.mrb[31].mxu0 }
 0x32d   : > { %v2878_v20 = vpop.f32.mrb[30].mxu1 }
 0x32e   : > { %v2928_v47 = vadd.f32 %v2878_v20, %v8322_v54  ;;  %v5940_v9 = vpop.f32.mrb[31].mxu1  ;;  %v8630_v20 = vld [vmem:[%s8805_s2] ss:$0 sm:$0xff] }
 0x331   : > { %v3401_v52 = vpop.f32.mrb[32].mxu0 }
 0x332   : > { %v8618_v31 = vadd.f32 %v3401_v52, %v2927_v27  ;;  %v6031_v36 = vpop.f32.mrb[33].mxu0 }
 0x333   : > { %v2883_v23 = vpop.f32.mrb[32].mxu1  ;;  %v3404_v11 = vpop.f32.mrb[34].mxu0 }
 0x334   : > { %v2929_v32 = vadd.f32 %v2883_v23, %v8334_v53  ;;  %v8621_v63 = vadd.f32 %v3404_v11, %v2928_v47  ;;  %v6032_v35 = vpop.f32.mrb[35].mxu0  ;;  %v5943_v14 = vpop.f32.mrb[33].mxu1 }
 0x335   : > { %v2886_v33 = vpop.f32.mrb[34].mxu1 }
 0x336   : > { %v5944_v41 = vpop.f32.mrb[35].mxu1 }
 0x339   : > { %v3409_v10 = vpop.f32.mrb[36].mxu0 }
 0x33a   : > { %v8623_v24 = vadd.f32 %v3409_v10, %v2929_v32  ;;  %v6035_v54 = vpop.f32.mrb[37].mxu0 }
 0x33b   : > { %v3775_v37 = vpop.f32.mrb[36].mxu1  ;;  %v3412_v62 = vpop.f32.mrb[38].mxu0 }
 0x33c   : > { %v3941_v21 = vadd.f32 %v3775_v37, %v8348_v13  ;;  %v6047_v46 = vpop.f32.mrb[37].mxu1  ;;  %v6036_v39 = vpop.f32.mrb[39].mxu0 }
 0x33d   : > { %v3778_v27 = vpop.f32.mrb[38].mxu1 }
 0x33e   : > { %v3942_v53 = vadd.f32 %v3778_v27, %v8351_v1  ;;  %v6048_v49 = vpop.f32.mrb[39].mxu1 }
 0x341   : > { %v4136_v15 = vpop.f32.mrb[40].mxu0 }
 0x342   : > { %v4302_v47 = vadd.f32 %v4136_v15, %v3941_v21  ;;  %v6139_v9 = vpop.f32.mrb[41].mxu0 }
 0x343   : > { %v3783_v52 = vpop.f32.mrb[40].mxu1  ;;  %v4139_v36 = vpop.f32.mrb[42].mxu0 }
 0x344   : > { %v3943_v23 = vadd.f32 %v3783_v52, %v8364_v17  ;;  %v4350_v13 = vadd.f32 %v8630_v20, %v4302_v47  ;;  %v6051_v11 = vpop.f32.mrb[41].mxu1  ;;  %v4303_v32 = vadd.f32 %v4139_v36, %v3942_v53  ;;  %v6140_v35 = vpop.f32.mrb[43].mxu0 }
 0x345   : > { %v3786_v1 = vpop.f32.mrb[42].mxu1 }
 0x346   : > { %v4391_v14 = vmax.f32 %v4350_v13, 0.0  ;;  %v3944_v33 = vadd.f32 %v3786_v1, %v8367_v5  ;;  %v4351_v41 = vadd.f32 %v8630_v20, %v4303_v32  ;;  %v6052_v10 = vpop.f32.mrb[43].mxu1 }
 0x348   : > { %v5127_v17 = vpack.c.bf16 %v4391_v14, %v4391_v14  ;;  %v4392_v54 = vmax.f32 %v4351_v41, 0.0 }
 0x349   : > { %v4144_v37 = vpop.f32.mrb[44].mxu0 }
 0x34a   : > { %4598 = vst.msk [vmem:[%s8640_s21] sm:$0xf] %vm4597_vm9, %v5127_v17  ;;  %v5128_v62 = vpack.c.bf16 %v4392_v54, %v4392_v54  ;;  %v4304_v21 = vadd.f32 %v4144_v37, %v3943_v23  ;;  %v6143_v46 = vpop.f32.mrb[45].mxu0 }
 0x34b   : > { %v3791_v5 = vpop.f32.mrb[44].mxu1  ;;  %v4147_v39 = vpop.f32.mrb[46].mxu0 }
 0x34c   : > { %4599 = vst.msk [vmem:[%s8640_s21 + $0x4] sm:$0xf] %vm4597_vm9, %v5128_v62  ;;  %v3945_v27 = vadd.f32 %v3791_v5, %v8380_v59  ;;  %v4352_v53 = vadd.f32 %v8630_v20, %v4304_v21  ;;  %v6055_v49 = vpop.f32.mrb[45].mxu1  ;;  %v4305_v15 = vadd.f32 %v4147_v39, %v3944_v33  ;;  %v6144_v47 = vpop.f32.mrb[47].mxu0 }
 0x34d   : > { %v3794_v9 = vpop.f32.mrb[46].mxu1 }
 0x34e   : > { %v4393_v52 = vmax.f32 %v4352_v53, 0.0  ;;  %v3946_v36 = vadd.f32 %v3794_v9, %v8383_v22  ;;  %v4353_v23 = vadd.f32 %v8630_v20, %v4305_v15  ;;  %v6056_v13 = vpop.f32.mrb[47].mxu1 }
 0x350   : > { %v5129_v11 = vpack.c.bf16 %v4393_v52, %v4393_v52  ;;  %v4394_v32 = vmax.f32 %v4353_v23, 0.0 }
 0x351   : > { %v4152_v35 = vpop.f32.mrb[48].mxu0 }
 0x352   : > { %4600 = vst.msk [vmem:[%s8640_s21 + $0x8] sm:$0xf] %vm4597_vm9, %v5129_v11  ;;  %v5130_v1 = vpack.c.bf16 %v4394_v32, %v4394_v32  ;;  %v4306_v59 = vadd.f32 %v4152_v35, %v3945_v27  ;;  %v6147_v14 = vpop.f32.mrb[49].mxu0 }
 0x353   : > { %v3799_v41 = vpop.f32.mrb[48].mxu1  ;;  %v4155_v33 = vpop.f32.mrb[50].mxu0 }
 0x354   : > { %4601 = vst.msk [vmem:[%s8640_s21 + $0xc] sm:$0xf] %vm4597_vm9, %v5130_v1  ;;  %v3947_v10 = vadd.f32 %v3799_v41, %v8396_v8  ;;  %v4354_v22 = vadd.f32 %v8630_v20, %v4306_v59  ;;  %v6059_v17 = vpop.f32.mrb[49].mxu1  ;;  %v4307_v54 = vadd.f32 %v4155_v33, %v3946_v36  ;;  %v6148_v37 = vpop.f32.mrb[51].mxu0 }
 0x355   : > { %v3802_v62 = vpop.f32.mrb[50].mxu1 }
 0x356   : > { %v4395_v21 = vmax.f32 %v4354_v22, 0.0  ;;  %v3948_v46 = vadd.f32 %v3802_v62, %v8399_v34  ;;  %v4355_v5 = vadd.f32 %v8630_v20, %v4307_v54  ;;  %v6060_v39 = vpop.f32.mrb[51].mxu1 }
 0x358   : > { %v5131_v27 = vpack.c.bf16 %v4395_v21, %v4395_v21  ;;  %v4396_v53 = vmax.f32 %v4355_v5, 0.0 }
 0x359   : > { %v4160_v49 = vpop.f32.mrb[52].mxu0 }
 0x35a   : > { %4602 = vst.msk [vmem:[%s8640_s21 + $0x10] sm:$0xf] %vm4597_vm9, %v5131_v27  ;;  %v5132_v15 = vpack.c.bf16 %v4396_v53, %v4396_v53  ;;  %v4308_v8 = vadd.f32 %v4160_v49, %v3947_v10  ;;  %v6151_v47 = vpop.f32.mrb[53].mxu0 }
 0x35b   : > { %v3807_v9 = vpop.f32.mrb[52].mxu1  ;;  %v4163_v52 = vpop.f32.mrb[54].mxu0 }
 0x35c   : > { %4603 = vst.msk [vmem:[%s8640_s21 + $0x14] sm:$0xf] %vm4597_vm9, %v5132_v15  ;;  %v3949_v36 = vadd.f32 %v3807_v9, %v8414_v29  ;;  %v4356_v34 = vadd.f32 %v8630_v20, %v4308_v8  ;;  %v6063_v23 = vpop.f32.mrb[53].mxu1  ;;  %v4309_v13 = vadd.f32 %v4163_v52, %v3948_v46  ;;  %v6152_v11 = vpop.f32.mrb[55].mxu0 }
 0x35d   : > { %v3810_v32 = vpop.f32.mrb[54].mxu1 }
 0x35e   : > { %v4397_v35 = vmax.f32 %v4356_v34, 0.0  ;;  %v3950_v1 = vadd.f32 %v3810_v32, %v8417_v60  ;;  %v4357_v59 = vadd.f32 %v8630_v20, %v4309_v13  ;;  %v6064_v14 = vpop.f32.mrb[55].mxu1 }
 0x360   : > { %v5133_v41 = vpack.c.bf16 %v4397_v35, %v4397_v35  ;;  %v4398_v33 = vmax.f32 %v4357_v59, 0.0 }
 0x361   : > { %v4168_v10 = vpop.f32.mrb[56].mxu0 }
 0x362   : > { %4604 = vst.msk [vmem:[%s8640_s21 + $0x18] sm:$0xf] %vm4597_vm9, %v5133_v41  ;;  %v5134_v22 = vpack.c.bf16 %v4398_v33, %v4398_v33  ;;  %v4310_v29 = vadd.f32 %v4168_v10, %v3949_v36  ;;  %v6155_v17 = vpop.f32.mrb[57].mxu0 }
 0x363   : > { %v3815_v54 = vpop.f32.mrb[56].mxu1  ;;  %v4171_v37 = vpop.f32.mrb[58].mxu0 }
 0x364   : > { %4605 = vst.msk [vmem:[%s8640_s21 + $0x1c] sm:$0xf] %vm4597_vm9, %v5134_v22  ;;  %v3951_v62 = vadd.f32 %v3815_v54, %v8432_v42  ;;  %v4358_v60 = vadd.f32 %v8630_v20, %v4310_v29  ;;  %v6067_v21 = vpop.f32.mrb[57].mxu1  ;;  %v4311_v46 = vadd.f32 %v4171_v37, %v3950_v1  ;;  %v6156_v5 = vpop.f32.mrb[59].mxu0 }
 0x365   : > { %v3818_v39 = vpop.f32.mrb[58].mxu1 }
 0x366   : > { %v4399_v27 = vmax.f32 %v4358_v60, 0.0  ;;  %v3952_v53 = vadd.f32 %v3818_v39, %v8435_v12  ;;  %v4359_v49 = vadd.f32 %v8630_v20, %v4311_v46  ;;  %v6068_v15 = vpop.f32.mrb[59].mxu1 }
 0x368   : > { %v5135_v8 = vpack.c.bf16 %v4399_v27, %v4399_v27  ;;  %v4400_v47 = vmax.f32 %v4359_v49, 0.0 }
 0x369   : > { %v4176_v9 = vpop.f32.mrb[60].mxu0 }
 0x36a   : > { %4606 = vst.msk [vmem:[%s8640_s21 + $0x20] sm:$0xf] %vm4597_vm9, %v5135_v8  ;;  %v5136_v52 = vpack.c.bf16 %v4400_v47, %v4400_v47  ;;  %v4312_v42 = vadd.f32 %v4176_v9, %v3951_v62  ;;  %v6159_v36 = vpop.f32.mrb[61].mxu0 }
 0x36b   : > { %v3823_v34 = vpop.f32.mrb[60].mxu1  ;;  %v4179_v23 = vpop.f32.mrb[62].mxu0 }
 0x36c   : > { %4607 = vst.msk [vmem:[%s8640_s21 + $0x24] sm:$0xf] %vm4597_vm9, %v5136_v52  ;;  %v3953_v13 = vadd.f32 %v3823_v34, %v8451_v6  ;;  %v4360_v12 = vadd.f32 %v8630_v20, %v4312_v42  ;;  %v6071_v11 = vpop.f32.mrb[61].mxu1  ;;  %v4313_v32 = vadd.f32 %v4179_v23, %v3952_v53  ;;  %v6160_v35 = vpop.f32.mrb[63].mxu0 }
 0x36d   : > { %v3826_v1 = vpop.f32.mrb[62].mxu1 }
 0x36e   : > { %v4401_v59 = vmax.f32 %v4360_v12, 0.0  ;;  %v3954_v14 = vadd.f32 %v3826_v1, %v8454_v57  ;;  %v4361_v41 = vadd.f32 %v8630_v20, %v4313_v32  ;;  %v6072_v33 = vpop.f32.mrb[63].mxu1 }
 0x370   : > { %v5137_v10 = vpack.c.bf16 %v4401_v59, %v4401_v59  ;;  %v4402_v22 = vmax.f32 %v4361_v41, 0.0 }
 0x371   : > { %v4184_v29 = vpop.f32.mrb[64].mxu0 }
 0x372   : > { %4608 = vst.msk [vmem:[%s8640_s21 + $0x28] sm:$0xf] %vm4597_vm9, %v5137_v10  ;;  %v5138_v17 = vpack.c.bf16 %v4402_v22, %v4402_v22  ;;  %v4314_v6 = vadd.f32 %v4184_v29, %v3953_v13  ;;  %v6163_v54 = vpop.f32.mrb[65].mxu0 }
 0x373   : > { %v3831_v37 = vpop.f32.mrb[64].mxu1  ;;  %v4187_v62 = vpop.f32.mrb[66].mxu0 }
 0x374   : > { %4609 = vst.msk [vmem:[%s8640_s21 + $0x2c] sm:$0xf] %vm4597_vm9, %v5138_v17  ;;  %v3955_v60 = vadd.f32 %v3831_v37, %v8469_v25  ;;  %v4362_v57 = vadd.f32 %v8630_v20, %v4314_v6  ;;  %v6075_v21 = vpop.f32.mrb[65].mxu1  ;;  %v4315_v46 = vadd.f32 %v4187_v62, %v3954_v14  ;;  %v6164_v5 = vpop.f32.mrb[67].mxu0 }
 0x375   : > { %v3834_v39 = vpop.f32.mrb[66].mxu1 }
 0x376   : > { %v4403_v27 = vmax.f32 %v4362_v57, 0.0  ;;  %v3956_v53 = vadd.f32 %v3834_v39, %v8472_v28  ;;  %v4363_v49 = vadd.f32 %v8630_v20, %v4315_v46  ;;  %v6076_v15 = vpop.f32.mrb[67].mxu1 }
 0x378   : > { %v5139_v8 = vpack.c.bf16 %v4403_v27, %v4403_v27  ;;  %v4404_v47 = vmax.f32 %v4363_v49, 0.0 }
 0x379   : > { %v4192_v9 = vpop.f32.mrb[68].mxu0 }
 0x37a   : > { %4610 = vst.msk [vmem:[%s8640_s21 + $0x30] sm:$0xf] %vm4597_vm9, %v5139_v8  ;;  %v5140_v52 = vpack.c.bf16 %v4404_v47, %v4404_v47  ;;  %v4316_v25 = vadd.f32 %v4192_v9, %v3955_v60  ;;  %v6167_v42 = vpop.f32.mrb[69].mxu0 }
 0x37b   : > { %v3839_v36 = vpop.f32.mrb[68].mxu1  ;;  %v4195_v34 = vpop.f32.mrb[70].mxu0 }
 0x37c   : > { %4611 = vst.msk [vmem:[%s8640_s21 + $0x34] sm:$0xf] %vm4597_vm9, %v5140_v52  ;;  %v3957_v23 = vadd.f32 %v3839_v36, %v8487_v43  ;;  %v4364_v28 = vadd.f32 %v8630_v20, %v4316_v25  ;;  %v6079_v13 = vpop.f32.mrb[69].mxu1  ;;  %v4317_v12 = vadd.f32 %v4195_v34, %v3956_v53  ;;  %v6168_v11 = vpop.f32.mrb[71].mxu0 }
 0x37d   : > { %v3842_v32 = vpop.f32.mrb[70].mxu1 }
 0x37e   : > { %v4405_v35 = vmax.f32 %v4364_v28, 0.0  ;;  %v3958_v1 = vadd.f32 %v3842_v32, %v8490_v0  ;;  %v4365_v59 = vadd.f32 %v8630_v20, %v4317_v12  ;;  %v6080_v14 = vpop.f32.mrb[71].mxu1 }
 0x380   : > { %v5141_v41 = vpack.c.bf16 %v4405_v35, %v4405_v35  ;;  %v4406_v33 = vmax.f32 %v4365_v59, 0.0 }
 0x381   : > { %v4200_v10 = vpop.f32.mrb[72].mxu0 }
 0x382   : > { %4612 = vst.msk [vmem:[%s8640_s21 + $0x38] sm:$0xf] %vm4597_vm9, %v5141_v41  ;;  %v5142_v22 = vpack.c.bf16 %v4406_v33, %v4406_v33  ;;  %v4318_v43 = vadd.f32 %v4200_v10, %v3957_v23  ;;  %v6171_v29 = vpop.f32.mrb[73].mxu0 }
 0x383   : > { %v3847_v17 = vpop.f32.mrb[72].mxu1  ;;  %v4203_v6 = vpop.f32.mrb[74].mxu0 }
 0x384   : > { %4613 = vst.msk [vmem:[%s8640_s21 + $0x3c] sm:$0xf] %vm4597_vm9, %v5142_v22  ;;  %v3959_v54 = vadd.f32 %v3847_v17, %v8505_v45  ;;  %v4366_v0 = vadd.f32 %v8630_v20, %v4318_v43  ;;  %v6083_v37 = vpop.f32.mrb[73].mxu1  ;;  %v4319_v62 = vadd.f32 %v4203_v6, %v3958_v1  ;;  %v6172_v60 = vpop.f32.mrb[75].mxu0 }
 0x385   : > { %v3850_v57 = vpop.f32.mrb[74].mxu1 }
 0x386   : > { %v4407_v21 = vmax.f32 %v4366_v0, 0.0  ;;  %v3960_v46 = vadd.f32 %v3850_v57, %v8508_v26  ;;  %v4367_v5 = vadd.f32 %v8630_v20, %v4319_v62  ;;  %v6084_v39 = vpop.f32.mrb[75].mxu1 }
 0x388   : > { %v5143_v27 = vpack.c.bf16 %v4407_v21, %v4407_v21  ;;  %v4408_v53 = vmax.f32 %v4367_v5, 0.0 }
 0x389   : > { %v4208_v49 = vpop.f32.mrb[76].mxu0 }
 0x38a   : > { %4614 = vst.msk [vmem:[%s8640_s21 + $0x40] sm:$0xf] %vm4597_vm9, %v5143_v27  ;;  %v5144_v15 = vpack.c.bf16 %v4408_v53, %v4408_v53  ;;  %v4320_v45 = vadd.f32 %v4208_v49, %v3959_v54  ;;  %v6175_v8 = vpop.f32.mrb[77].mxu0 }
 0x38b   : > { %v3855_v47 = vpop.f32.mrb[76].mxu1  ;;  %v4211_v9 = vpop.f32.mrb[78].mxu0 }
 0x38c   : > { %4615 = vst.msk [vmem:[%s8640_s21 + $0x44] sm:$0xf] %vm4597_vm9, %v5144_v15  ;;  %v3961_v52 = vadd.f32 %v3855_v47, %v8523_v2  ;;  %v4368_v26 = vadd.f32 %v8630_v20, %v4320_v45  ;;  %v6087_v25 = vpop.f32.mrb[77].mxu1  ;;  %v4321_v42 = vadd.f32 %v4211_v9, %v3960_v46  ;;  %v6176_v36 = vpop.f32.mrb[79].mxu0 }
 0x38d   : > { %v3858_v34 = vpop.f32.mrb[78].mxu1 }
 0x38e   : > { %v4409_v23 = vmax.f32 %v4368_v26, 0.0  ;;  %v3962_v28 = vadd.f32 %v3858_v34, %v8526_v18  ;;  %v4369_v13 = vadd.f32 %v8630_v20, %v4321_v42  ;;  %v6088_v12 = vpop.f32.mrb[79].mxu1 }
 0x390   : > { %v5145_v11 = vpack.c.bf16 %v4409_v23, %v4409_v23  ;;  %v4410_v32 = vmax.f32 %v4369_v13, 0.0 }
 0x391   : > { %v4216_v35 = vpop.f32.mrb[80].mxu0 }
 0x392   : > { %4616 = vst.msk [vmem:[%s8640_s21 + $0x48] sm:$0xf] %vm4597_vm9, %v5145_v11  ;;  %v5146_v1 = vpack.c.bf16 %v4410_v32, %v4410_v32  ;;  %v4322_v2 = vadd.f32 %v4216_v35, %v3961_v52  ;;  %v6179_v59 = vpop.f32.mrb[81].mxu0 }
 0x393   : > { %v3863_v14 = vpop.f32.mrb[80].mxu1  ;;  %v4219_v41 = vpop.f32.mrb[82].mxu0 }
 0x394   : > { %4617 = vst.msk [vmem:[%s8640_s21 + $0x4c] sm:$0xf] %vm4597_vm9, %v5146_v1  ;;  %v3963_v33 = vadd.f32 %v3863_v14, %v8541_v56  ;;  %v4370_v18 = vadd.f32 %v8630_v20, %v4322_v2  ;;  %v6091_v10 = vpop.f32.mrb[81].mxu1  ;;  %v4323_v22 = vadd.f32 %v4219_v41, %v3962_v28  ;;  %v6180_v43 = vpop.f32.mrb[83].mxu0 }
 0x395   : > { %v3866_v29 = vpop.f32.mrb[82].mxu1 }
 0x396   : > { %v4411_v17 = vmax.f32 %v4370_v18, 0.0  ;;  %v3964_v6 = vadd.f32 %v3866_v29, %v8544_v40  ;;  %v4371_v54 = vadd.f32 %v8630_v20, %v4323_v22  ;;  %v6092_v0 = vpop.f32.mrb[83].mxu1 }
 0x398   : > { %v5147_v37 = vpack.c.bf16 %v4411_v17, %v4411_v17  ;;  %v4412_v62 = vmax.f32 %v4371_v54, 0.0 }
 0x399   : > { %v4224_v60 = vpop.f32.mrb[84].mxu0 }
 0x39a   : > { %4618 = vst.msk [vmem:[%s8640_s21 + $0x50] sm:$0xf] %vm4597_vm9, %v5147_v37  ;;  %v5148_v57 = vpack.c.bf16 %v4412_v62, %v4412_v62  ;;  %v4324_v56 = vadd.f32 %v4224_v60, %v3963_v33  ;;  %v6183_v21 = vpop.f32.mrb[85].mxu0 }
 0x39b   : > { %v3871_v46 = vpop.f32.mrb[84].mxu1  ;;  %v4227_v5 = vpop.f32.mrb[86].mxu0 }
 0x39c   : > { %4619 = vst.msk [vmem:[%s8640_s21 + $0x54] sm:$0xf] %vm4597_vm9, %v5148_v57  ;;  %v3965_v39 = vadd.f32 %v3871_v46, %v8557_v48  ;;  %v4372_v40 = vadd.f32 %v8630_v20, %v4324_v56  ;;  %v6095_v27 = vpop.f32.mrb[85].mxu1  ;;  %v4325_v53 = vadd.f32 %v4227_v5, %v3964_v6  ;;  %v6184_v49 = vpop.f32.mrb[87].mxu0 }
 0x39d   : > { %v3874_v15 = vpop.f32.mrb[86].mxu1 }
 0x39e   : > { %v4413_v45 = vmax.f32 %v4372_v40, 0.0  ;;  %v3966_v8 = vadd.f32 %v3874_v15, %v8560_v30  ;;  %v4373_v47 = vadd.f32 %v8630_v20, %v4325_v53  ;;  %v6096_v9 = vpop.f32.mrb[87].mxu1 }
 0x3a0   : > { %v5149_v52 = vpack.c.bf16 %v4413_v45, %v4413_v45  ;;  %v4414_v26 = vmax.f32 %v4373_v47, 0.0 }
 0x3a1   : > { %v4232_v25 = vpop.f32.mrb[88].mxu0 }
 0x3a2   : > { %4620 = vst.msk [vmem:[%s8640_s21 + $0x58] sm:$0xf] %vm4597_vm9, %v5149_v52  ;;  %v5150_v42 = vpack.c.bf16 %v4414_v26, %v4414_v26  ;;  %v4326_v48 = vadd.f32 %v4232_v25, %v3965_v39  ;;  %v6187_v36 = vpop.f32.mrb[89].mxu0 }
 0x3a3   : > { %v3879_v34 = vpop.f32.mrb[88].mxu1  ;;  %v4235_v23 = vpop.f32.mrb[90].mxu0 }
 0x3a4   : > { %4621 = vst.msk [vmem:[%s8640_s21 + $0x5c] sm:$0xf] %vm4597_vm9, %v5150_v42  ;;  %v3967_v28 = vadd.f32 %v3879_v34, %v8573_v61  ;;  %v4374_v30 = vadd.f32 %v8630_v20, %v4326_v48  ;;  %v6099_v13 = vpop.f32.mrb[89].mxu1  ;;  %v4327_v12 = vadd.f32 %v4235_v23, %v3966_v8  ;;  %v6188_v11 = vpop.f32.mrb[91].mxu0 }
 0x3a5   : > { %v3882_v32 = vpop.f32.mrb[90].mxu1 }
 0x3a6   : > { %v4415_v35 = vmax.f32 %v4374_v30, 0.0  ;;  %v3968_v1 = vadd.f32 %v3882_v32, %v8576_v4  ;;  %v4375_v2 = vadd.f32 %v8630_v20, %v4327_v12  ;;  %v6100_v59 = vpop.f32.mrb[91].mxu1 }
 0x3a8   : > { %v5151_v14 = vpack.c.bf16 %v4415_v35, %v4415_v35  ;;  %v4416_v41 = vmax.f32 %v4375_v2, 0.0 }
 0x3a9   : > { %v4240_v33 = vpop.f32.mrb[92].mxu0 }
 0x3aa   : > { %4622 = vst.msk [vmem:[%s8640_s21 + $0x60] sm:$0xf] %vm4597_vm9, %v5151_v14  ;;  %v5152_v18 = vpack.c.bf16 %v4416_v41, %v4416_v41  ;;  %v4328_v61 = vadd.f32 %v4240_v33, %v3967_v28  ;;  %v6191_v10 = vpop.f32.mrb[93].mxu0 }
 0x3ab   : > { %v3887_v22 = vpop.f32.mrb[92].mxu1  ;;  %v4243_v43 = vpop.f32.mrb[94].mxu0 }
 0x3ac   : > { %4623 = vst.msk [vmem:[%s8640_s21 + $0x64] sm:$0xf] %vm4597_vm9, %v5152_v18  ;;  %v3969_v29 = vadd.f32 %v3887_v22, %v8586_v51  ;;  %v4376_v4 = vadd.f32 %v8630_v20, %v4328_v61  ;;  %v6103_v17 = vpop.f32.mrb[93].mxu1  ;;  %v4329_v6 = vadd.f32 %v4243_v43, %v3968_v1  ;;  %v6192_v54 = vpop.f32.mrb[95].mxu0 }
 0x3ad   : > { %v3890_v0 = vpop.f32.mrb[94].mxu1 }
 0x3ae   : > { %v4417_v37 = vmax.f32 %v4376_v4, 0.0  ;;  %v3970_v62 = vadd.f32 %v3890_v0, %v8590_v7  ;;  %v4377_v60 = vadd.f32 %v8630_v20, %v4329_v6  ;;  %v6104_v57 = vpop.f32.mrb[95].mxu1 }
 0x3b0   : > { %v5153_v56 = vpack.c.bf16 %v4417_v37, %v4417_v37  ;;  %v4418_v21 = vmax.f32 %v4377_v60, 0.0 }
 0x3b1   : > { %v4248_v46 = vpop.f32.mrb[96].mxu0 }
 0x3b2   : > { %4624 = vst.msk [vmem:[%s8640_s21 + $0x68] sm:$0xf] %vm4597_vm9, %v5153_v56  ;;  %v5154_v5 = vpack.c.bf16 %v4418_v21, %v4418_v21  ;;  %v4330_v51 = vadd.f32 %v4248_v46, %v3969_v29  ;;  %v6195_v39 = vpop.f32.mrb[97].mxu0 }
 0x3b3   : > { %v3895_v40 = vpop.f32.mrb[96].mxu1  ;;  %v4251_v27 = vpop.f32.mrb[98].mxu0 }
 0x3b4   : > { %4625 = vst.msk [vmem:[%s8640_s21 + $0x6c] sm:$0xf] %vm4597_vm9, %v5154_v5  ;;  %v3971_v53 = vadd.f32 %v3895_v40, %v8594_v19  ;;  %v4378_v7 = vadd.f32 %v8630_v20, %v4330_v51  ;;  %v6107_v49 = vpop.f32.mrb[97].mxu1  ;;  %v4331_v15 = vadd.f32 %v4251_v27, %v3970_v62  ;;  %v6196_v45 = vpop.f32.mrb[99].mxu0 }
 0x3b5   : > { %v3898_v8 = vpop.f32.mrb[98].mxu1 }
 0x3b6   : > { %v4419_v47 = vmax.f32 %v4378_v7, 0.0  ;;  %v3972_v9 = vadd.f32 %v3898_v8, %v8597_v44  ;;  %v4379_v52 = vadd.f32 %v8630_v20, %v4331_v15  ;;  %v6108_v26 = vpop.f32.mrb[99].mxu1 }
 0x3b8   : > { %v5155_v25 = vpack.c.bf16 %v4419_v47, %v4419_v47  ;;  %v4420_v42 = vmax.f32 %v4379_v52, 0.0 }
 0x3b9   : > { %v4256_v48 = vpop.f32.mrb[100].mxu0 }
 0x3ba   : > { %4626 = vst.msk [vmem:[%s8640_s21 + $0x70] sm:$0xf] %vm4597_vm9, %v5155_v25  ;;  %v5156_v36 = vpack.c.bf16 %v4420_v42, %v4420_v42  ;;  %v4332_v19 = vadd.f32 %v4256_v48, %v3971_v53  ;;  %v6199_v34 = vpop.f32.mrb[101].mxu0 }
 0x3bb   : > { %v3903_v23 = vpop.f32.mrb[100].mxu1  ;;  %v4259_v28 = vpop.f32.mrb[102].mxu0 }
 0x3bc   : > { %4627 = vst.msk [vmem:[%s8640_s21 + $0x74] sm:$0xf] %vm4597_vm9, %v5156_v36  ;;  %v3973_v30 = vadd.f32 %v3903_v23, %v8600_v3  ;;  %v4380_v44 = vadd.f32 %v8630_v20, %v4332_v19  ;;  %v6111_v13 = vpop.f32.mrb[101].mxu1  ;;  %v4333_v12 = vadd.f32 %v4259_v28, %v3972_v9  ;;  %v6200_v11 = vpop.f32.mrb[103].mxu0 }
 0x3bd   : > { %v3906_v32 = vpop.f32.mrb[102].mxu1 }
 0x3be   : > { %v4421_v35 = vmax.f32 %v4380_v44, 0.0  ;;  %v3974_v1 = vadd.f32 %v3906_v32, %v8603_v16  ;;  %v4381_v2 = vadd.f32 %v8630_v20, %v4333_v12  ;;  %v6112_v59 = vpop.f32.mrb[103].mxu1 }
 0x3c0   : > { %v5157_v14 = vpack.c.bf16 %v4421_v35, %v4421_v35  ;;  %v4422_v41 = vmax.f32 %v4381_v2, 0.0 }
 0x3c1   : > { %v4264_v33 = vpop.f32.mrb[104].mxu0 }
 0x3c2   : > { %4628 = vst.msk [vmem:[%s8640_s21 + $0x78] sm:$0xf] %vm4597_vm9, %v5157_v14  ;;  %v5158_v18 = vpack.c.bf16 %v4422_v41, %v4422_v41  ;;  %v4334_v3 = vadd.f32 %v4264_v33, %v3973_v30  ;;  %v6203_v61 = vpop.f32.mrb[105].mxu0 }
 0x3c3   : > { %v3911_v10 = vpop.f32.mrb[104].mxu1  ;;  %v4267_v22 = vpop.f32.mrb[106].mxu0 }
 0x3c4   : > { %4629 = vst.msk [vmem:[%s8640_s21 + $0x7c] sm:$0xf] %vm4597_vm9, %v5158_v18  ;;  %v3975_v43 = vadd.f32 %v3911_v10, %v8606_v38  ;;  %v4382_v16 = vadd.f32 %v8630_v20, %v4334_v3  ;;  %v6115_v29 = vpop.f32.mrb[105].mxu1  ;;  %v4335_v4 = vadd.f32 %v4267_v22, %v3974_v1  ;;  %v6204_v17 = vpop.f32.mrb[107].mxu0 }
 0x3c5   : > { %v3914_v6 = vpop.f32.mrb[106].mxu1 }
 0x3c6   : > { %v4423_v54 = vmax.f32 %v4382_v16, 0.0  ;;  %v3976_v0 = vadd.f32 %v3914_v6, %v8609_v50  ;;  %v4383_v37 = vadd.f32 %v8630_v20, %v4335_v4  ;;  %v6116_v62 = vpop.f32.mrb[107].mxu1 }
 0x3c8   : > { %v5159_v60 = vpack.c.bf16 %v4423_v54, %v4423_v54  ;;  %v4424_v57 = vmax.f32 %v4383_v37, 0.0 }
 0x3c9   : > { %v4272_v56 = vpop.f32.mrb[108].mxu0 }
 0x3ca   : > { %4630 = vst.msk [vmem:[%s8640_s21 + $0x80] sm:$0xf] %vm4597_vm9, %v5159_v60  ;;  %v5160_v21 = vpack.c.bf16 %v4424_v57, %v4424_v57  ;;  %v4336_v38 = vadd.f32 %v4272_v56, %v3975_v43  ;;  %v6207_v46 = vpop.f32.mrb[109].mxu0  ;;  %v4641_v60 = vld [vmem:[%s8640_s21 + $0xa0] sm:$0x3] }
 0x3cb   : > { %v3919_v5 = vpop.f32.mrb[108].mxu1  ;;  %v4275_v51 = vpop.f32.mrb[110].mxu0 }
 0x3cc   : > { %4631 = vst.msk [vmem:[%s8640_s21 + $0x84] sm:$0xf] %vm4597_vm9, %v5160_v21  ;;  %v3977_v39 = vadd.f32 %v3919_v5, %v8612_v58  ;;  %v4384_v50 = vadd.f32 %v8630_v20, %v4336_v38  ;;  %v6119_v40 = vpop.f32.mrb[109].mxu1  ;;  %v4337_v27 = vadd.f32 %v4275_v51, %v3976_v0  ;;  %v6208_v53 = vpop.f32.mrb[111].mxu0 }
 0x3cd   : > { %v3922_v7 = vpop.f32.mrb[110].mxu1 }
 0x3ce   : > { %v4425_v49 = vmax.f32 %v4384_v50, 0.0  ;;  %v3978_v15 = vadd.f32 %v3922_v7, %v8615_v55  ;;  %v4385_v45 = vadd.f32 %v8630_v20, %v4337_v27  ;;  %v6120_v8 = vpop.f32.mrb[111].mxu1 }
 0x3d0   : > { %v5161_v47 = vpack.c.bf16 %v4425_v49, %v4425_v49  ;;  %v4426_v9 = vmax.f32 %v4385_v45, 0.0 }
 0x3d1   : > { %v4280_v52 = vpop.f32.mrb[112].mxu0 }
 0x3d2   : > { %4632 = vst.msk [vmem:[%s8640_s21 + $0x88] sm:$0xf] %vm4597_vm9, %v5161_v47  ;;  %v5162_v26 = vpack.c.bf16 %v4426_v9, %v4426_v9  ;;  %v4338_v58 = vadd.f32 %v4280_v52, %v3977_v39  ;;  %v6211_v25 = vpop.f32.mrb[113].mxu0 }
 0x3d3   : > { %v3927_v42 = vpop.f32.mrb[112].mxu1  ;;  %v4283_v48 = vpop.f32.mrb[114].mxu0 }
 0x3d4   : > { %4633 = vst.msk [vmem:[%s8640_s21 + $0x8c] sm:$0xf] %vm4597_vm9, %v5162_v26  ;;  %v3979_v36 = vadd.f32 %v3927_v42, %v8618_v31  ;;  %v4386_v55 = vadd.f32 %v8630_v20, %v4338_v58  ;;  %v6123_v19 = vpop.f32.mrb[113].mxu1  ;;  %v4339_v34 = vadd.f32 %v4283_v48, %v3978_v15  ;;  %v6212_v23 = vpop.f32.mrb[115].mxu0 }
 0x3d5   : > { %v3930_v28 = vpop.f32.mrb[114].mxu1 }
 0x3d6   : > { %v4427_v30 = vmax.f32 %v4386_v55, 0.0  ;;  %v3980_v44 = vadd.f32 %v3930_v28, %v8621_v63  ;;  %v4387_v13 = vadd.f32 %v8630_v20, %v4339_v34  ;;  %v6124_v12 = vpop.f32.mrb[115].mxu1 }
 0x3d8   : > { %v5163_v11 = vpack.c.bf16 %v4427_v30, %v4427_v30  ;;  %v4428_v32 = vmax.f32 %v4387_v13, 0.0 }
 0x3d9   : > { %v4288_v35 = vpop.f32.mrb[116].mxu0 }
 0x3da   : > { %4634 = vst.msk [vmem:[%s8640_s21 + $0x90] sm:$0xf] %vm4597_vm9, %v5163_v11  ;;  %v5164_v1 = vpack.c.bf16 %v4428_v32, %v4428_v32  ;;  %v4340_v31 = vadd.f32 %v4288_v35, %v3979_v36  ;;  %v6215_v2 = vpop.f32.mrb[117].mxu0 }
 0x3db   : > { %v3935_v59 = vpop.f32.mrb[116].mxu1  ;;  %v4291_v14 = vpop.f32.mrb[118].mxu0 }
 0x3dc   : > { %4635 = vst.msk [vmem:[%s8640_s21 + $0x94] sm:$0xf] %vm4597_vm9, %v5164_v1  ;;  %v3981_v41 = vadd.f32 %v3935_v59, %v8623_v24  ;;  %v4388_v63 = vadd.f32 %v8630_v20, %v4340_v31  ;;  %v4341_v33 = vadd.f32 %v4291_v14, %v3980_v44  ;;  %v6216_v18 = vpop.f32.mrb[119].mxu0  ;;  %v6127_v3 = vpop.f32.mrb[117].mxu1 }
 0x3dd   : > { %v3938_v61 = vpop.f32.mrb[118].mxu1 }
 0x3de   : > { %v4429_v10 = vmax.f32 %v4388_v63, 0.0  ;;  %v4389_v22 = vadd.f32 %v8630_v20, %v4341_v33  ;;  %v6128_v43 = vpop.f32.mrb[119].mxu1 }
 0x3e0   : > { %v5165_v16 = vpack.c.bf16 %v4429_v10, %v4429_v10  ;;  %v4430_v29 = vmax.f32 %v4389_v22, 0.0 }
 0x3e1   : > { %v4296_v4 = vpop.f32.mrb[120].mxu0 }
 0x3e2   : > { %4636 = vst.msk [vmem:[%s8640_s21 + $0x98] sm:$0xf] %vm4597_vm9, %v5165_v16  ;;  %v5166_v17 = vpack.c.bf16 %v4430_v29, %v4430_v29  ;;  %v4342_v24 = vadd.f32 %v4296_v4, %v3981_v41  ;;  %v6219_v6 = vpop.f32.mrb[121].mxu0 }
 0x3e3   : > { %v4299_v54 = vpop.f32.mrb[122].mxu0 }
 0x3e4   : > { %4637 = vst.msk [vmem:[%s8640_s21 + $0x9c] sm:$0xf] %vm4597_vm9, %v5166_v17  ;;  %v4390_v0 = vadd.f32 %v8630_v20, %v4342_v24  ;;  %v6220_v37 = vpop.f32.mrb[123].mxu0 }
 0x3e6   : > { %v4431_v62 = vmax.f32 %v4390_v0, 0.0 }
 0x3e8   : > { %v5167_v57 = vpack.c.bf16 %v4431_v62, %v4431_v62 }
 0x3ea   : > { %v4642_v56 = vsel %vm4640_vm12, %v5167_v57, %v4641_v60 }
 0x3eb   : > { %4643 = vst [vmem:[%s8640_s21 + $0xa0] sm:$0x3] %v4642_v56 }
 0x3ec PF: > { %s13_s12 = sadd.s32 1, %s6371_s12  }
 0x3ed   : > { %p10_p4 = scmp.ge.s32.totalorder %s13_s12, 4  }
 0x3ef   :  { %12 = sbr.rel (!%p10_p4) target bundleno = 1 (0x1), region = 70 }

// kernel: inception_b_forward.8
= control target key start
LH: loop header
LB: loop body
LE: loop exit
PB: predicated region body
PF: predicated region fallthrough
CT: control target
= control target key end

     0   :  { %s2819_s12 = smov 0   ;;  %s3337_s0 = inlined_call_operand.vmem [shape: bf16[2,4,82,96], index: 0, kind: input, shape index: {}]   ;;  %s3338_s1 = inlined_call_operand.vmem [shape: bf16[9,96,96], index: 1, kind: input, shape index: {}]   ;;  %s3339_s2 = inlined_call_operand.vmem [shape: f32[1,96], index: 2, kind: input, shape index: {}]   ;;  %s3340_s3 = inlined_call_operand.vmem [shape: f32[2,72,96], index: 3, kind: output, shape index: {}]  }
   0x1 LB: > { %s1990_s13 = sadd.s32 4294967295, %s2795_s12   ;;  %p1994_p0 = scmp.ge.s32.totalorder %s2795_s12, 1  ;;  %s2795_s12 = sphi %s2819_s12, %s13_s12  }
   0x2   : > { %p137_p1 = scmp.lt.s32.totalorder %s2795_s12, 3 }
   0x4   : > { %p138_p2 = pnand %p1994_p0, %p137_p1 }
   0x5   : > { %v2694_v0 = vld [vmem:[%s3338_s1 + $0x30] sm:$0xff] (!%p138_p2)   ;;  %v2797_v1 = vmov (!%p138_p2), 0.0   ;;  %v2695_v2 = vld [vmem:[%s3338_s1 + $0x38] sm:$0xff] (!%p138_p2)   ;;  %p161_p3 = scmp.lt.s32.totalorder (!%p138_p2), %s1990_s13, 1  ;;  %vm2798_vm0 = vmmov (!%p138_p2), 0   ;;  %v2696_v3 = vld [vmem:[%s3338_s1 + $0x40] sm:$0xff] (!%p138_p2)  }
   0x6   : > { %141 = sbr.rel (%p138_p2) target bundleno = 427 (0x1ab), region = 32  ;;  %2382 = vmatprep.subr.bf16.mxu0 (!%p138_p2), %v2797_v1  ;;  %2670 = vmatprep.subr.bf16.mxu1 (!%p138_p2), %v2797_v1  ;;  %v2697_v4 = vld [vmem:[%s3338_s1 + $0x48] sm:$0xff] (!%p138_p2)   ;;  %v2698_v5 = vld [vmem:[%s3338_s1 + $0x50] sm:$0xff] (!%p138_p2)   ;;  %v2699_v6 = vld [vmem:[%s3338_s1 + $0x58] sm:$0xff] (!%p138_p2)   ;;  %vm275_vm1 = vcmask (!%p138_p2), 785408   ;;  %vm1759_vm3 = vcmask (!%p138_p2), 1046528  }
   0x7   : > { %2383 = vmatpush3.bf16.msra.mxu0 (!%p138_p2), %v2694_v0  ;;  %2676 = vmatpush3.bf16.msra.mxu1 (!%p138_p2), %v2694_v0  ;;  %v2702_v8 = vld [vmem:[%s3338_s1] sm:$0xff] (!%p138_p2)   ;;  %v2704_v11 = vld [vmem:[%s3338_s1 + $0x8] sm:$0xff] (!%p138_p2)   ;;  %v2707_v14 = vld [vmem:[%s3338_s1 + $0x10] sm:$0xff] (!%p138_p2)   ;;  %vm557_vm2 = vsmask.f32 (!%p138_p2), 7424 }
   0x8   : > { %2384 = vmatprep.subr.bf16.mxu0 (!%p138_p2), %v2797_v1  ;;  %2671 = vmatprep.subr.bf16.mxu1 (!%p138_p2), %v2797_v1  ;;  %v2703_v10 = vld [vmem:[%s3338_s1 + $0x60] sm:$0xff] (!%p138_p2)   ;;  %v2705_v12 = vld [vmem:[%s3338_s1 + $0x68] sm:$0xff] (!%p138_p2)   ;;  %v2708_v15 = vld [vmem:[%s3338_s1 + $0x70] sm:$0xff] (!%p138_p2)  }
   0x9   : > { %2394 = vmatprep.mubr.msk.bf16.mxu0 (!%p138_p2), %vm2798_vm0, %v2797_v1  ;;  %2406 = vmatprep.mubr.msk.bf16.mxu1 (!%p138_p2), %vm2798_vm0, %v2797_v1  ;;  %v2709_v18 = vld [vmem:[%s3338_s1 + $0x18] sm:$0xff] (!%p138_p2)   ;;  %v2713_v23 = vld [vmem:[%s3338_s1 + $0x20] sm:$0xff] (!%p138_p2)   ;;  %v2715_v28 = vld [vmem:[%s3338_s1 + $0x28] sm:$0xff] (!%p138_p2)  }
   0xa   : > { %v2710_v19 = vld [vmem:[%s3338_s1 + $0x78] sm:$0xff] (!%p138_p2)   ;;  %v2714_v24 = vld [vmem:[%s3338_s1 + $0x80] sm:$0xff] (!%p138_p2)   ;;  %v2716_v29 = vld [vmem:[%s3338_s1 + $0x88] sm:$0xff] (!%p138_p2)  }
   0xb   : > { %2385 = vmatpush3.bf16.msra.mxu0 (!%p138_p2), %v2695_v2  ;;  %2677 = vmatpush3.bf16.msra.mxu1 (!%p138_p2), %v2695_v2  ;;  %v2720_v34 = vld [vmem:[%s3338_s1 + $0x90] sm:$0xff] (!%p138_p2)   ;;  %v2721_v35 = vld [vmem:[%s3338_s1 + $0xc0] sm:$0xff] (!%p138_p2)   ;;  %v2724_v39 = vld [vmem:[%s3338_s1 + $0x98] sm:$0xff] (!%p138_p2)  }
   0xc   : > { %2386 = vmatprep.subr.bf16.mxu0 (!%p138_p2), %v2797_v1  ;;  %2672 = vmatprep.subr.bf16.mxu1 (!%p138_p2), %v2797_v1  ;;  %v2725_v43 = vld [vmem:[%s3338_s1 + $0xc8] sm:$0xff] (!%p138_p2)   ;;  %v2726_v47 = vld [vmem:[%s3338_s1 + $0xa0] sm:$0xff] (!%p138_p2)   ;;  %v2729_v49 = vld [vmem:[%s3338_s1 + $0xd0] sm:$0xff] (!%p138_p2)  }
   0xd   : > { %s3342_s13 = smov (!%p161_p3, %s1990_s13), 1  ;;  %v2730_v51 = vld [vmem:[%s3338_s1 + $0xa8] sm:$0xff]   ;;  %v2731_v54 = vld [vmem:[%s3338_s1 + $0xd8] sm:$0xff]   ;;  %v2734_v59 = vld [vmem:[%s3338_s1 + $0xb0] sm:$0xff]  }
   0xe   : > { %s2682_s20 = smul.u32 176, %s3342_s13  ;;  %v2735_v60 = vld [vmem:[%s3338_s1 + $0xe0] sm:$0xff]   ;;  %v2737_v63 = vld [vmem:[%s3338_s1 + $0xb8] sm:$0xff]   ;;  %v2738_v0 = vld [vmem:[%s3338_s1 + $0xe8] sm:$0xff]  }
   0xf   : > { %2387 = vmatpush3.bf16.msra.mxu0 %v2696_v3  ;;  %2678 = vmatpush3.bf16.msra.mxu1 %v2696_v3 }
  0x10   : > { %s2852_s23 = scalar_lea.vmem %s3337_s0, %s2682_s20  ;;  %2388 = vmatprep.subr.bf16.mxu0 %v2797_v1  ;;  %2673 = vmatprep.subr.bf16.mxu1 %v2797_v1 }
  0x11   : > { %v2700_v7 = vld [vmem:[%s2852_s23 + $0x2c] sm:$0xff]   ;;  %v2701_v9 = vld [vmem:[%s2852_s23 + $0x44] sm:$0xff]   ;;  %v2706_v13 = vld [vmem:[%s2852_s23 + $0x34] sm:$0xff]  }
  0x12   : > { %v2711_v16 = vld [vmem:[%s2852_s23 + $0x4c] ss:$0 sps:$4 sm:$0xff]   ;;  %v2718_v17 = vld [vmem:[%s2852_s23] sm:$0xff]   ;;  %v2723_v32 = vld [vmem:[%s2852_s23 + $0x10] sm:$0xff]  }
  0x13   : > { %2389 = vmatpush3.bf16.msra.mxu0 %v2697_v4  ;;  %2679 = vmatpush3.bf16.msra.mxu1 %v2697_v4  ;;  %v2719_v20 = vld [vmem:[%s2852_s23 + $0x8] sm:$0xff]   ;;  %v561_v21 = vshll.u32 %v2718_v17, 16  ;;  %v2712_v22 = vld [vmem:[%s2852_s23 + $0x3c] sm:$0xff]   ;;  %v559_v25 = vshrl.u32 %v2718_v17, 16  ;;  %v574_v38 = vshll.u32 %v2723_v32, 16  ;;  %v578_v48 = vshrl.u32 %v2723_v32, 16 }
  0x14   : > { %2390 = vmatprep.subr.bf16.mxu0 %v2797_v1  ;;  %2674 = vmatprep.subr.bf16.mxu1 %v2797_v1  ;;  %v566_v27 = vshll.u32 %v2719_v20, 16  ;;  %v2717_v33 = vld [vmem:[%s2852_s23] sm:$0xff]   ;;  %v570_v37 = vshrl.u32 %v2719_v20, 16  ;;  %v2728_v40 = vld [vmem:[%s2852_s23 + $0x18] sm:$0xff]   ;;  %v2722_v44 = vld [vmem:[%s2852_s23 + $0x8] sm:$0xff]  }
  0x15   : > { %v563_v26 = vrot.slane %v561_v21, 1  ;;  %v576_v42 = vrot.slane %v574_v38, 1  ;;  %v582_v45 = vshll.u32 %v2728_v40, 16  ;;  %v2733_v53 = vld [vmem:[%s2852_s23 + $0x20] sm:$0x1f]   ;;  %v2727_v55 = vld [vmem:[%s2852_s23 + $0x10] sm:$0xff]  }
  0x16   : > { %v568_v31 = vrot.slane %v566_v27, 1  ;;  %v586_v56 = vshrl.u32 %v2728_v40, 16  ;;  %v590_v58 = vshll.u32 %v2733_v53, 16  ;;  %v2732_v2 = vld [vmem:[%s2852_s23 + $0x18] sm:$0xff]   ;;  %v594_v4 = vshrl.u32 %v2733_v53, 16  ;;  %v2751_v17 = vld [vmem:[%s3338_s1 + $0x108] sm:$0xff]  }
  0x17   : > { %2391 = vmatpush3.bf16.msra.mxu0 %v2698_v5  ;;  %2680 = vmatpush3.bf16.msra.mxu1 %v2698_v5  ;;  %v564_v30 = vor.u32 %v563_v26, %v559_v25  ;;  %v584_v50 = vrot.slane %v582_v45, 1  ;;  %v580_v52 = vor.u32 %v578_v48, %v576_v42  ;;  %v2736_v5 = vld [vmem:[%s2852_s23 + $0x20] ss:$0 sps:$4 sm:$0xff]   ;;  %v2749_v20 = vld [vmem:[%s2852_s23 + $0x94] sm:$0xff]   ;;  %v1304_v25 = vld [vmem:[%s2852_s23 + $0x4] sm:$0xf] }
  0x18   : > { %2392 = vmatprep.subr.bf16.mxu0 %v2797_v1  ;;  %2675 = vmatprep.subr.bf16.mxu1 %v2797_v1  ;;  %v572_v41 = vor.u32 %v570_v37, %v568_v31  ;;  %v592_v62 = vrot.slane %v590_v58, 1  ;;  %v2755_v21 = vld [vmem:[%s3338_s1 + $0x110] sm:$0xff]   ;;  %v3101_v26 = vld [vmem:[%s2852_s23 + $0x8] sm:$0xf] }
  0x19   : > { %v569_v36 = vsel %vm557_vm2, %v564_v30, %v568_v31  ;;  %v585_v57 = vsel %vm557_vm2, %v580_v52, %v584_v50  ;;  %v588_v61 = vor.u32 %v586_v56, %v584_v50  ;;  %v2753_v27 = vld [vmem:[%s2852_s23 + $0x70] sm:$0xff]   ;;  %v2202_v30 = vcombine.low %v1304_v25, %v3101_v26  ;;  %v2762_v31 = vld [vmem:[%s2852_s23 + $0x60] sm:$0xff]  }
  0x1a   : > { %v577_v46 = vsel %vm557_vm2, %v572_v41, %v576_v42  ;;  %v1141_v38 = vshll.u32 %v2762_v31, 16  ;;  %v3132_v48 = vld [vmem:[%s2852_s23 + $0x14] sm:$0xff]   ;;  %v2780_v25 = vld [vmem:[%s3338_s1 + $0x1a0] sm:$0xff]  }
  0x1b   : > { %2393 = vmatpush3.bf16.msra.mxu0 %v2699_v6  ;;  %2681 = vmatpush3.bf16.msra.mxu1 %v2699_v6  ;;  %v593_v3 = vsel %vm557_vm2, %v588_v61, %v592_v62  ;;  %v596_v6 = vor.u32 %v594_v4, %v592_v62  ;;  %v1353_v40 = vshrl.u32 %v2202_v30, 16  ;;  %v2765_v53 = vld [vmem:[%s3338_s1 + $0x150] sm:$0xff]   ;;  %v1368_v56 = vshll.u32 %v3132_v48, 16  ;;  %v2769_v62 = vld [vmem:[%s3338_s1 + $0x158] sm:$0xff]  }
  0x1c   : > { %2414 = vmatprep.subr.bf16.mxu1 %v2797_v1  ;;  %2446 = vmatprep.subr.bf16.mxu0 %v2797_v1  ;;  %v1143_v45 = vrot.slane %v1141_v38, 1 }
  0x1d   : > { %v1370_v61 = vrot.slane %v1368_v56, 1 }
  0x1e   : > { %2395 = vmatmul.mubr.msk.bf16.vlgmr.msra.gmra.mrb[0].mxu0 %vm275_vm1, %v2700_v7  ;;  %2407 = vmatmul.mubr.msk.bf16.vlgmr.msra.gmra.mrb[0].mxu1 %vm275_vm1, %v2701_v9  ;;  %v2739_v7 = vld [vmem:[%s2852_s23 + $0x58] sm:$0xff]   ;;  %v2741_v9 = vld [vmem:[%s3338_s1 + $0xf0] sm:$0xff]  }
  0x1f   : > { %2415 = vmatpush3.bf16.msra.mxu1 %v2702_v8  ;;  %2447 = vmatpush3.bf16.msra.mxu0 %v2703_v10  ;;  %v2740_v8 = vld [vmem:[%s2852_s23 + $0x84] sm:$0xff]  }
  0x20   : > { %2416 = vmatprep.subr.bf16.mxu1 %v2797_v1  ;;  %2448 = vmatprep.subr.bf16.mxu0 %v2797_v1  ;;  %v2742_v10 = vld [vmem:[%s3338_s1 + $0x120] sm:$0xff]  }
  0x21   : > { %2398 = vmatprep.mubr.msk.bf16.mxu0 %vm2798_vm0, %v2797_v1  ;;  %2410 = vmatprep.mubr.msk.bf16.mxu1 %vm2798_vm0, %v2797_v1 }
  0x23   : > { %2417 = vmatpush3.bf16.msra.mxu1 %v2704_v11  ;;  %2449 = vmatpush3.bf16.msra.mxu0 %v2705_v12  ;;  %v2745_v11 = vld [vmem:[%s3338_s1 + $0xf8] sm:$0xff]   ;;  %v2746_v12 = vld [vmem:[%s3338_s1 + $0x128] sm:$0xff]  }
  0x24   : > { %2418 = vmatprep.subr.bf16.mxu1 %v2797_v1  ;;  %2450 = vmatprep.subr.bf16.mxu0 %v2797_v1 }
  0x26   : > { %2399 = vmatmul.mubr.msk.bf16.gmra.mrb[4].mxu0 %vm275_vm1, %v2706_v13  ;;  %2411 = vmatmul.mubr.msk.bf16.gmra.mrb[4].mxu1 %vm275_vm1, %v2711_v16  ;;  %v2743_v13 = vld [vmem:[%s2852_s23 + $0x60] sm:$0xff]   ;;  %v2750_v16 = vld [vmem:[%s3338_s1 + $0x130] sm:$0xff]  }
  0x27   : > { %2419 = vmatpush3.bf16.msra.mxu1 %v2707_v14  ;;  %2451 = vmatpush3.bf16.msra.mxu0 %v2708_v15  ;;  %v2744_v14 = vld [vmem:[%s2852_s23 + $0x8c] sm:$0xff]   ;;  %v2747_v15 = vld [vmem:[%s3338_s1 + $0x100] sm:$0xff]  }
  0x28   : > { %2420 = vmatprep.subr.bf16.mxu1 %v2797_v1  ;;  %2452 = vmatprep.subr.bf16.mxu0 %v2797_v1 }
  0x29   : > { %2402 = vmatprep.mubr.msk.bf16.mxu0 %vm2798_vm0, %v2797_v1  ;;  %2426 = vmatprep.mubr.msk.bf16.mxu1 %vm2798_vm0, %v2797_v1 }
  0x2b   : > { %2421 = vmatpush3.bf16.msra.mxu1 %v2709_v18  ;;  %2453 = vmatpush3.bf16.msra.mxu0 %v2710_v19  ;;  %v2752_v18 = vld [vmem:[%s3338_s1 + $0x138] sm:$0xff]   ;;  %v2748_v19 = vld [vmem:[%s2852_s23 + $0x68] sm:$0xff]  }
  0x2c   : > { %2422 = vmatprep.subr.bf16.mxu1 %v2797_v1  ;;  %2454 = vmatprep.subr.bf16.mxu0 %v2797_v1 }
  0x2e   : > { %2403 = vmatmul.mubr.msk.bf16.gmra.mrb[8].mxu0 %vm275_vm1, %v2712_v22  ;;  %v2756_v22 = vld [vmem:[%s3338_s1 + $0x140] sm:$0xff]  }
  0x2f   : > { %2423 = vmatpush3.bf16.msra.mxu1 %v2713_v23  ;;  %2455 = vmatpush3.bf16.msra.mxu0 %v2714_v24  ;;  %v2759_v23 = vld [vmem:[%s3338_s1 + $0x118] sm:$0xff]   ;;  %v2760_v24 = vld [vmem:[%s3338_s1 + $0x148] sm:$0xff]  }
  0x30   : > { %2424 = vmatprep.subr.bf16.mxu1 %v2797_v1  ;;  %2456 = vmatprep.subr.bf16.mxu0 %v2797_v1 }
  0x31   : > { %2458 = vmatprep.mubr.msk.bf16.mxu0 %vm2798_vm0, %v2797_v1 }
  0x33   : > { %2425 = vmatpush3.bf16.msra.mxu1 %v2715_v28  ;;  %2457 = vmatpush3.bf16.msra.mxu0 %v2716_v29  ;;  %v2754_v28 = vld [vmem:[%s2852_s23 + $0x9c] sm:$0xff]  }
  0x34   : > { %2478 = vmatprep.subr.bf16.mxu1 %v2797_v1  ;;  %2510 = vmatprep.subr.bf16.mxu0 %v2797_v1  ;;  %v2761_v29 = vld [vmem:[%s2852_s23 + $0x58] sm:$0xff]  }
  0x35   : > { %v1136_v32 = vshll.u32 %v2761_v29, 16  ;;  %v1134_v37 = vshrl.u32 %v2761_v29, 16 }
  0x36   : > { %2427 = vmatmul.mubr.msk.bf16.vlgmr.msra.gmra.mrb[8].mxu1 %vm275_vm1, %v2717_v33  ;;  %2459 = vmatmul.mubr.msk.bf16.vlgmr.msra.gmra.mrb[12].mxu0 %vm275_vm1, %v569_v36  ;;  %v3119_v33 = vld [vmem:[%s2852_s23 + $0xc] sm:$0xff]   ;;  %v2758_v36 = vld [vmem:[%s2852_s23 + $0xa4] ss:$0 sps:$4 sm:$0xff]  }
  0x37   : > { %2479 = vmatpush3.bf16.msra.mxu1 %v2720_v34  ;;  %2511 = vmatpush3.bf16.msra.mxu0 %v2721_v35  ;;  %v1355_v34 = vshll.u32 %v2202_v30, 16  ;;  %v2757_v35 = vld [vmem:[%s2852_s23 + $0x78] ss:$0 sps:$4 sm:$0xff]   ;;  %v1360_v42 = vshll.u32 %v3119_v33, 16 }
  0x38   : > { %2430 = vmatprep.mubr.msk.bf16.mxu1 %vm2798_vm0, %v2797_v1  ;;  %2462 = vmatprep.mubr.msk.bf16.mxu0 %vm2798_vm0, %v2797_v1 }
  0x39   : > { %2480 = vmatprep.subr.bf16.mxu1 %v2797_v1  ;;  %2512 = vmatprep.subr.bf16.mxu0 %v2797_v1  ;;  %v1357_v41 = vrot.slane %v1355_v34, 1 }
  0x3b   : > { %2481 = vmatpush3.bf16.msra.mxu1 %v2724_v39  ;;  %2513 = vmatpush3.bf16.msra.mxu0 %v2725_v43  ;;  %v1138_v39 = vrot.slane %v1136_v32, 1  ;;  %v2767_v43 = vld [vmem:[%s2852_s23 + $0x68] sm:$0xff]  }
  0x3c   : > { %2482 = vmatprep.subr.bf16.mxu1 %v2797_v1  ;;  %2514 = vmatprep.subr.bf16.mxu0 %v2797_v1  ;;  %v1149_v50 = vshll.u32 %v2767_v43, 16  ;;  %v2782_v32 = vld [vmem:[%s3338_s1 + $0x1a8] sm:$0xff]  }
  0x3e   : > { %2431 = vmatmul.mubr.msk.bf16.gmra.mrb[12].mxu1 %vm275_vm1, %v2722_v44  ;;  %2463 = vmatmul.mubr.msk.bf16.gmra.mrb[16].mxu0 %vm275_vm1, %v577_v46  ;;  %v1139_v44 = vor.u32 %v1138_v39, %v1134_v37  ;;  %v1358_v46 = vor.u32 %v1357_v41, %v1353_v40  ;;  %v2784_v39 = vld [vmem:[%s2852_s23 + $0x38] sm:$0xff]   ;;  %v1742_v41 = vld [vmem:[%s2852_s23 + $0x4] sm:$0xe] }
  0x3f   : > { %2434 = vmatprep.mubr.msk.bf16.mxu1 %vm2798_vm0, %v2797_v1  ;;  %2466 = vmatprep.mubr.msk.bf16.mxu0 %vm2798_vm0, %v2797_v1 }
  0x40   : > { %2483 = vmatpush3.bf16.msra.mxu1 %v2726_v47  ;;  %2515 = vmatpush3.bf16.msra.mxu0 %v2729_v49  ;;  %v1362_v47 = vrot.slane %v1360_v42, 1  ;;  %v1145_v49 = vshrl.u32 %v2762_v31, 16  ;;  %v2781_v31 = vld [vmem:[%s3338_s1 + $0x178] sm:$0xff]  }
  0x41   : > { %2484 = vmatprep.subr.bf16.mxu1 %v2797_v1  ;;  %2516 = vmatprep.subr.bf16.mxu0 %v2797_v1 }
  0x42   : > { %v1363_v52 = vsel %vm557_vm2, %v1358_v46, %v1362_v47  ;;  %v1147_v58 = vor.u32 %v1145_v49, %v1143_v45  ;;  %v1579_v46 = vshll.u32 %v2784_v39, 16 }
  0x44   : > { %2485 = vmatpush3.bf16.msra.mxu1 %v2730_v51  ;;  %2517 = vmatpush3.bf16.msra.mxu0 %v2731_v54  ;;  %v1144_v51 = vsel %vm557_vm2, %v1139_v44, %v1143_v45  ;;  %v2766_v54 = vld [vmem:[%s3338_s1 + $0x180] sm:$0xff]  }
  0x45   : > { %2486 = vmatprep.subr.bf16.mxu1 %v2797_v1  ;;  %2518 = vmatprep.subr.bf16.mxu0 %v2797_v1 }
  0x46   : > { %2435 = vmatmul.mubr.msk.bf16.gmra.mrb[16].mxu1 %vm275_vm1, %v2727_v55  ;;  %2467 = vmatmul.mubr.msk.bf16.gmra.mrb[20].mxu0 %vm275_vm1, %v585_v57  ;;  %v1364_v55 = vshrl.u32 %v3119_v33, 16  ;;  %v2772_v57 = vld [vmem:[%s2852_s23 + $0x70] sm:$0xff]  }
  0x47   : > { %2438 = vmatprep.mubr.msk.bf16.mxu1 %vm2798_vm0, %v2797_v1  ;;  %2470 = vmatprep.mubr.msk.bf16.mxu0 %vm2798_vm0, %v2797_v1 }
  0x48   : > { %2487 = vmatpush3.bf16.msra.mxu1 %v2734_v59  ;;  %2519 = vmatpush3.bf16.msra.mxu0 %v2735_v60  ;;  %v1151_v59 = vrot.slane %v1149_v50, 1  ;;  %v1366_v60 = vor.u32 %v1364_v55, %v1362_v47  ;;  %v2268_v47 = vcombine.low %v1742_v41, %v3101_v26  ;;  %v1581_v50 = vrot.slane %v1579_v46, 1 }
  0x49   : > { %2488 = vmatprep.subr.bf16.mxu1 %v2797_v1  ;;  %2520 = vmatprep.subr.bf16.mxu0 %v2797_v1  ;;  %v1583_v55 = vshrl.u32 %v2784_v39, 16 }
  0x4a   : > { %v1152_v4 = vsel %vm557_vm2, %v1147_v58, %v1151_v59  ;;  %v1763_v58 = vrot.slane %v3132_v48, 1 }
  0x4c   : > { %2489 = vmatpush3.bf16.msra.mxu1 %v2737_v63  ;;  %2521 = vmatpush3.bf16.msra.mxu0 %v2738_v0  ;;  %v2770_v63 = vld [vmem:[%s3338_s1 + $0x188] sm:$0xff]   ;;  %v3154_v0 = vld [vmem:[%s2852_s23 + $0x1c] sm:$0xff]  }
  0x4d   : > { %2542 = vmatprep.subr.bf16.mxu1 %v2797_v1  ;;  %2574 = vmatprep.subr.bf16.mxu0 %v2797_v1 }
  0x4e   : > { %2439 = vmatmul.mubr.msk.bf16.gmra.mrb[20].mxu1 %vm275_vm1, %v2732_v2  ;;  %2471 = vmatmul.mubr.msk.bf16.gmra.mrb[24].mxu0 %vm275_vm1, %v593_v3  ;;  %v1153_v2 = vshrl.u32 %v2767_v43, 16  ;;  %v1157_v3 = vshll.u32 %v2772_v57, 16 }
  0x4f   : > { %2442 = vmatprep.mubr.msk.bf16.mxu1 %vm2798_vm0, %v2797_v1  ;;  %2474 = vmatprep.mubr.msk.bf16.mxu0 %vm2798_vm0, %v2797_v1 }
  0x56   : > { %2443 = vmatmul.mubr.msk.bf16.gmra.mrb[24].mxu1 %vm275_vm1, %v2736_v5  ;;  %2475 = vmatmul.mubr.msk.bf16.gmra.mrb[28].mxu0 %vm275_vm1, %v596_v6  ;;  %v1371_v5 = vsel %vm557_vm2, %v1366_v60, %v1370_v61  ;;  %v1372_v6 = vshrl.u32 %v3132_v48, 16  ;;  %v1765_v48 = vrot.slane %v3154_v0, 1 }
  0x57   : > { %2490 = vmatprep.mubr.msk.bf16.mxu1 %vm2798_vm0, %v2797_v1  ;;  %2522 = vmatprep.mubr.msk.bf16.mxu0 %vm2798_vm0, %v2797_v1 }
  0x5e   : > { %2491 = vmatmul.mubr.msk.bf16.vlgmr.msra.gmra.mrb[28].mxu1 %vm275_vm1, %v2739_v7  ;;  %2523 = vmatmul.mubr.msk.bf16.vlgmr.msra.gmra.mrb[32].mxu0 %vm275_vm1, %v2740_v8  ;;  %v1376_v7 = vshll.u32 %v3154_v0, 16  ;;  %v2771_v8 = vld [vmem:[%s3338_s1 + $0x160] sm:$0xff]  }
  0x5f   : > { %2543 = vmatpush3.bf16.msra.mxu1 %v2741_v9  ;;  %2575 = vmatpush3.bf16.msra.mxu0 %v2742_v10  ;;  %v2774_v9 = vld [vmem:[%s3338_s1 + $0x190] sm:$0xff]   ;;  %v1155_v10 = vor.u32 %v1153_v2, %v1151_v59  ;;  %v2787_v59 = vld [vmem:[%s2852_s23 + $0x48] sm:$0xff]  }
  0x60   : > { %2494 = vmatprep.mubr.msk.bf16.mxu1 %vm2798_vm0, %v2797_v1  ;;  %2526 = vmatprep.mubr.msk.bf16.mxu0 %vm2798_vm0, %v2797_v1 }
  0x61   : > { %2544 = vmatprep.subr.bf16.mxu1 %v2797_v1  ;;  %2576 = vmatprep.subr.bf16.mxu0 %v2797_v1 }
  0x63   : > { %2545 = vmatpush3.bf16.msra.mxu1 %v2745_v11  ;;  %2577 = vmatpush3.bf16.msra.mxu0 %v2746_v12  ;;  %v1159_v11 = vrot.slane %v1157_v3, 1  ;;  %v1374_v12 = vor.u32 %v1372_v6, %v1370_v61  ;;  %v1766_v6 = vsel %vm1759_vm3, %v1763_v58, %v1765_v48 }
  0x64   : > { %2546 = vmatprep.subr.bf16.mxu1 %v2797_v1  ;;  %2578 = vmatprep.subr.bf16.mxu0 %v2797_v1 }
  0x66   : > { %2495 = vmatmul.mubr.msk.bf16.gmra.mrb[32].mxu1 %vm275_vm1, %v2743_v13  ;;  %2527 = vmatmul.mubr.msk.bf16.gmra.mrb[36].mxu0 %vm275_vm1, %v2744_v14  ;;  %v1378_v13 = vrot.slane %v1376_v7, 1  ;;  %v2777_v14 = vld [vmem:[%s2852_s23 + $0x78] sm:$0x1f]   ;;  %v1599_v7 = vshrl.u32 %v2787_v59, 16 }
  0x67   : > { %2498 = vmatprep.mubr.msk.bf16.mxu1 %vm2798_vm0, %v2797_v1  ;;  %2530 = vmatprep.mubr.msk.bf16.mxu0 %vm2798_vm0, %v2797_v1  ;;  %v1169_v37 = vshrl.u32 %v2777_v14, 16 }
  0x68   : > { %2547 = vmatpush3.bf16.msra.mxu1 %v2747_v15  ;;  %2579 = vmatpush3.bf16.msra.mxu0 %v2750_v16  ;;  %v3182_v15 = vld [vmem:[%s2852_s23 + $0x24] sm:$0x1f]  }
  0x69   : > { %2548 = vmatprep.subr.bf16.mxu1 %v2797_v1  ;;  %2580 = vmatprep.subr.bf16.mxu0 %v2797_v1  ;;  %v2775_v16 = vld [vmem:[%s3338_s1 + $0x168] sm:$0xff]   ;;  %v1388_v38 = vshrl.u32 %v3182_v15, 16 }
  0x6c   : > { %2549 = vmatpush3.bf16.msra.mxu1 %v2751_v17  ;;  %2581 = vmatpush3.bf16.msra.mxu0 %v2752_v18  ;;  %v2776_v17 = vld [vmem:[%s3338_s1 + $0x198] sm:$0xff]   ;;  %v1160_v18 = vsel %vm557_vm2, %v1155_v10, %v1159_v11 }
  0x6d   : > { %2550 = vmatprep.subr.bf16.mxu1 %v2797_v1  ;;  %2582 = vmatprep.subr.bf16.mxu0 %v2797_v1 }
  0x6e   : > { %2499 = vmatmul.mubr.msk.bf16.gmra.mrb[36].mxu1 %vm275_vm1, %v2748_v19  ;;  %2531 = vmatmul.mubr.msk.bf16.gmra.mrb[40].mxu0 %vm275_vm1, %v2749_v20  ;;  %v1161_v19 = vshrl.u32 %v2772_v57, 16  ;;  %v1379_v20 = vsel %vm557_vm2, %v1374_v12, %v1378_v13 }
  0x6f   : > { %2502 = vmatprep.mubr.msk.bf16.mxu1 %vm2798_vm0, %v2797_v1  ;;  %2534 = vmatprep.mubr.msk.bf16.mxu0 %vm2798_vm0, %v2797_v1 }
  0x70   : > { %2551 = vmatpush3.bf16.msra.mxu1 %v2755_v21  ;;  %2583 = vmatpush3.bf16.msra.mxu0 %v2756_v22  ;;  %v1165_v21 = vshll.u32 %v2777_v14, 16  ;;  %v1380_v22 = vshrl.u32 %v3154_v0, 16  ;;  %v1767_v0 = vrot.slane %v3182_v15, 1 }
  0x71   : > { %2552 = vmatprep.subr.bf16.mxu1 %v2797_v1  ;;  %2584 = vmatprep.subr.bf16.mxu0 %v2797_v1 }
  0x72   : > { %v1382_v29 = vor.u32 %v1380_v22, %v1378_v13  ;;  %v1768_v12 = vsel %vm1759_vm3, %v1765_v48, %v1767_v0 }
  0x74   : > { %2553 = vmatpush3.bf16.msra.mxu1 %v2759_v23  ;;  %2585 = vmatpush3.bf16.msra.mxu0 %v2760_v24  ;;  %v1384_v23 = vshll.u32 %v3182_v15, 16  ;;  %v2779_v24 = vld [vmem:[%s3338_s1 + $0x170] sm:$0xff]  }
  0x75   : > { %2606 = vmatprep.subr.bf16.mxu1 %v2797_v1  ;;  %2638 = vmatprep.subr.bf16.mxu0 %v2797_v1 }
  0x76   : > { %2503 = vmatmul.mubr.msk.bf16.gmra.mrb[40].mxu1 %vm275_vm1, %v2753_v27  ;;  %2535 = vmatmul.mubr.msk.bf16.gmra.mrb[44].mxu0 %vm275_vm1, %v2754_v28  ;;  %v1163_v27 = vor.u32 %v1161_v19, %v1159_v11  ;;  %v1167_v28 = vrot.slane %v1165_v21, 1  ;;  %v1386_v30 = vrot.slane %v1384_v23, 1 }
  0x77   : > { %2506 = vmatprep.mubr.msk.bf16.mxu1 %vm2798_vm0, %v2797_v1  ;;  %2538 = vmatprep.mubr.msk.bf16.mxu0 %vm2798_vm0, %v2797_v1 }
  0x78   : > { %v1168_v34 = vsel %vm557_vm2, %v1163_v27, %v1167_v28  ;;  %v1171_v42 = vor.u32 %v1169_v37, %v1167_v28  ;;  %v1390_v43 = vor.u32 %v1388_v38, %v1386_v30 }
  0x7e   : > { %2507 = vmatmul.mubr.msk.bf16.gmra.mrb[44].mxu1 %vm275_vm1, %v2757_v35  ;;  %2539 = vmatmul.mubr.msk.bf16.gmra.mrb[48].mxu0 %vm275_vm1, %v2758_v36  ;;  %v1387_v35 = vsel %vm557_vm2, %v1382_v29, %v1386_v30  ;;  %v2783_v36 = vld [vmem:[%s2852_s23 + $0x30] sm:$0xff]  }
  0x7f   : > { %2554 = vmatprep.mubr.msk.bf16.mxu1 %vm2798_vm0, %v2797_v1  ;;  %2586 = vmatprep.mubr.msk.bf16.mxu0 %vm2798_vm0, %v2797_v1  ;;  %v1574_v40 = vshll.u32 %v2783_v36, 16  ;;  %v1572_v44 = vshrl.u32 %v2783_v36, 16 }
  0x81   : > { %v1576_v45 = vrot.slane %v1574_v40, 1 }
  0x83   : > { %v1577_v49 = vor.u32 %v1576_v45, %v1572_v44 }
  0x85   : > { %v1582_v26 = vsel %vm557_vm2, %v1577_v49, %v1581_v50 }
  0x86   : > { %2555 = vmatmul.mubr.msk.bf16.vlgmr.msra.gmra.mrb[48].mxu1 %vm275_vm1, %v1144_v51  ;;  %2587 = vmatmul.mubr.msk.bf16.vlgmr.msra.gmra.mrb[52].mxu0 %vm275_vm1, %v1363_v52  ;;  %v1760_v51 = vrot.slane %v2268_v47, 1  ;;  %v1761_v52 = vrot.slane %v3119_v33, 1  ;;  %v1585_v33 = vor.u32 %v1583_v55, %v1581_v50 }
  0x87   : > { %2607 = vmatpush3.bf16.msra.mxu1 %v2765_v53  ;;  %2639 = vmatpush3.bf16.msra.mxu0 %v2766_v54  ;;  %v2786_v53 = vld [vmem:[%s2852_s23 + $0x40] sm:$0xff]  }
  0x88   : > { %2558 = vmatprep.mubr.msk.bf16.mxu1 %vm2798_vm0, %v2797_v1  ;;  %2590 = vmatprep.mubr.msk.bf16.mxu0 %vm2798_vm0, %v2797_v1  ;;  %v1762_v54 = vsel %vm1759_vm3, %v1760_v51, %v1761_v52  ;;  %v1587_v56 = vshll.u32 %v2786_v53, 16  ;;  %v1764_v61 = vsel %vm1759_vm3, %v1761_v52, %v1763_v58 }
  0x89   : > { %2608 = vmatprep.subr.bf16.mxu1 %v2797_v1  ;;  %2640 = vmatprep.subr.bf16.mxu0 %v2797_v1 }
  0x8a   : > { %v1589_v57 = vrot.slane %v1587_v56, 1 }
  0x8b   : > { %2609 = vmatpush3.bf16.msra.mxu1 %v2769_v62  ;;  %2641 = vmatpush3.bf16.msra.mxu0 %v2770_v63  ;;  %v1591_v62 = vshrl.u32 %v2786_v53, 16  ;;  %v1595_v63 = vshll.u32 %v2787_v59, 16 }
  0x8c   : > { %2610 = vmatprep.subr.bf16.mxu1 %v2797_v1  ;;  %2642 = vmatprep.subr.bf16.mxu0 %v2797_v1  ;;  %v1590_v60 = vsel %vm557_vm2, %v1585_v33, %v1589_v57 }
  0x8d   : > { %v1593_v2 = vor.u32 %v1591_v62, %v1589_v57  ;;  %v1597_v3 = vrot.slane %v1595_v63, 1 }
  0x8e   : > { %2559 = vmatmul.mubr.msk.bf16.gmra.mrb[52].mxu1 %vm275_vm1, %v1152_v4  ;;  %2591 = vmatmul.mubr.msk.bf16.gmra.mrb[56].mxu0 %vm275_vm1, %v1371_v5  ;;  %v2788_v4 = vld [vmem:[%s2852_s23 + $0x50] sm:$0x1f]   ;;  %s2683_s23 = smul.u32 72, %s3342_s13 }
  0x8f   : > { %2562 = vmatprep.mubr.msk.bf16.mxu1 %vm2798_vm0, %v2797_v1  ;;  %2594 = vmatprep.mubr.msk.bf16.mxu0 %vm2798_vm0, %v2797_v1  ;;  %v1598_v5 = vsel %vm557_vm2, %v1593_v2, %v1597_v3  ;;  %v1607_v13 = vshrl.u32 %v2788_v4, 16 }
  0x90   : > { %2611 = vmatpush3.bf16.msra.mxu1 %v2771_v8  ;;  %2643 = vmatpush3.bf16.msra.mxu0 %v2774_v9  ;;  %v1603_v8 = vshll.u32 %v2788_v4, 16  ;;  %v1601_v9 = vor.u32 %v1599_v7, %v1597_v3  ;;  %s3300_s7 = scalar_lea.vmem %s3340_s3, %s2683_s23 }
  0x91   : > { %2612 = vmatprep.subr.bf16.mxu1 %v2797_v1  ;;  %2644 = vmatprep.subr.bf16.mxu0 %v2797_v1 }
  0x92   : > { %v1605_v10 = vrot.slane %v1603_v8, 1 }
  0x94   : > { %2613 = vmatpush3.bf16.msra.mxu1 %v2775_v16  ;;  %2645 = vmatpush3.bf16.msra.mxu0 %v2776_v17  ;;  %v1606_v11 = vsel %vm557_vm2, %v1601_v9, %v1605_v10  ;;  %v1609_v14 = vor.u32 %v1607_v13, %v1605_v10 }
  0x95   : > { %2614 = vmatprep.subr.bf16.mxu1 %v2797_v1  ;;  %2646 = vmatprep.subr.bf16.mxu0 %v2797_v1 }
  0x96   : > { %2563 = vmatmul.mubr.msk.bf16.gmra.mrb[56].mxu1 %vm275_vm1, %v1160_v18  ;;  %2595 = vmatmul.mubr.msk.bf16.gmra.mrb[60].mxu0 %vm275_vm1, %v1379_v20 }
  0x97   : > { %2566 = vmatprep.mubr.msk.bf16.mxu1 %vm2798_vm0, %v2797_v1  ;;  %2598 = vmatprep.mubr.msk.bf16.mxu0 %vm2798_vm0, %v2797_v1 }
  0x98   : > { %2615 = vmatpush3.bf16.msra.mxu1 %v2779_v24  ;;  %2647 = vmatpush3.bf16.msra.mxu0 %v2780_v25 }
  0x99   : > { %2616 = vmatprep.subr.bf16.mxu1 %v2797_v1  ;;  %2648 = vmatprep.subr.bf16.mxu0 %v2797_v1 }
  0x9c   : > { %2617 = vmatpush3.bf16.msra.mxu1 %v2781_v31  ;;  %2649 = vmatpush3.bf16.msra.mxu0 %v2782_v32 }
  0x9e   : > { %2567 = vmatmul.mubr.msk.bf16.gmra.mrb[60].mxu1 %vm275_vm1, %v1168_v34  ;;  %2599 = vmatmul.mubr.msk.bf16.gmra.mrb[64].mxu0 %vm275_vm1, %v1387_v35 }
  0x9f   : > { %2570 = vmatprep.mubr.msk.bf16.mxu1 %vm2798_vm0, %v2797_v1  ;;  %2602 = vmatprep.mubr.msk.bf16.mxu0 %vm2798_vm0, %v2797_v1 }
  0xa6   : > { %2571 = vmatmul.mubr.msk.bf16.gmra.mrb[64].mxu1 %vm275_vm1, %v1171_v42  ;;  %2603 = vmatmul.mubr.msk.bf16.gmra.mrb[68].mxu0 %vm275_vm1, %v1390_v43 }
  0xa7   : > { %2618 = vmatprep.mubr.msk.bf16.mxu1 %vm2798_vm0, %v2797_v1  ;;  %2650 = vmatprep.mubr.msk.bf16.mxu0 %vm2798_vm0, %v2797_v1 }
  0xae   : > { %2619 = vmatmul.mubr.msk.bf16.vlgmr.msra.gmra.mrb[68].mxu1 %vm275_vm1, %v1582_v26  ;;  %2651 = vmatmul.mubr.msk.bf16.vlgmr.msra.gmra.mrb[72].mxu0 %vm275_vm1, %v1762_v54 }
  0xaf   : > { %2622 = vmatprep.mubr.msk.bf16.mxu1 %vm2798_vm0, %v2797_v1  ;;  %2654 = vmatprep.mubr.msk.bf16.mxu0 %vm2798_vm0, %v2797_v1 }
  0xb6   : > { %2623 = vmatmul.mubr.msk.bf16.gmra.mrb[72].mxu1 %vm275_vm1, %v1590_v60  ;;  %2655 = vmatmul.mubr.msk.bf16.gmra.mrb[76].mxu0 %vm275_vm1, %v1764_v61 }
  0xb7   : > { %2626 = vmatprep.mubr.msk.bf16.mxu1 %vm2798_vm0, %v2797_v1  ;;  %2658 = vmatprep.mubr.msk.bf16.mxu0 %vm2798_vm0, %v2797_v1 }
  0xbe   : > { %2627 = vmatmul.mubr.msk.bf16.gmra.mrb[76].mxu1 %vm275_vm1, %v1598_v5  ;;  %2659 = vmatmul.mubr.msk.bf16.gmra.mrb[80].mxu0 %vm275_vm1, %v1766_v6 }
  0xbf   : > { %2630 = vmatprep.mubr.msk.bf16.mxu1 %vm2798_vm0, %v2797_v1  ;;  %2662 = vmatprep.mubr.msk.bf16.mxu0 %vm2798_vm0, %v2797_v1 }
  0xc6   : > { %2631 = vmatmul.mubr.msk.bf16.gmra.mrb[80].mxu1 %vm275_vm1, %v1606_v11  ;;  %2663 = vmatmul.mubr.msk.bf16.gmra.mrb[84].mxu0 %vm275_vm1, %v1768_v12 }
  0xc7   : > { %2634 = vmatprep.mubr.msk.bf16.mxu1 %vm2798_vm0, %v2797_v1  ;;  %2666 = vmatprep.mubr.msk.bf16.mxu0 %vm2798_vm0, %v2797_v1 }
  0xce   : > { %2635 = vmatmul.mubr.msk.bf16.gmra.mrb[84].mxu1 %vm275_vm1, %v1609_v14  ;;  %2667 = vmatmul.mubr.msk.bf16.gmra.mrb[88].mxu0 %vm275_vm1, %v1767_v0 }
  0xf1   : > { %v325_v15 = vpop.f32.mrb[0].mxu0  ;;  %v349_v16 = vpop.f32.mrb[0].mxu1 }
  0xf2   : > { %v2396_v17 = vpop.f32.mrb[1].mxu0  ;;  %v2408_v18 = vpop.f32.mrb[1].mxu1 }
  0xf3   : > { %v328_v19 = vpop.f32.mrb[2].mxu0  ;;  %v352_v20 = vpop.f32.mrb[2].mxu1 }
  0xf4   : > { %v2397_v21 = vpop.f32.mrb[3].mxu0  ;;  %v2409_v22 = vpop.f32.mrb[3].mxu1 }
  0xf9   : > { %v333_v23 = vpop.f32.mrb[4].mxu0  ;;  %v357_v24 = vpop.f32.mrb[4].mxu1 }
  0xfa   : > { %v2400_v25 = vpop.f32.mrb[5].mxu0  ;;  %v2412_v27 = vpop.f32.mrb[5].mxu1 }
  0xfb   : > { %v336_v28 = vpop.f32.mrb[6].mxu0  ;;  %v360_v29 = vpop.f32.mrb[6].mxu1 }
  0xfc   : > { %v2401_v1 = vpop.f32.mrb[7].mxu0  ;;  %v2413_v30 = vpop.f32.mrb[7].mxu1 }
 0x101   : > { %v341_v31 = vpop.f32.mrb[8].mxu0 }
 0x102   : > { %v2404_v32 = vpop.f32.mrb[9].mxu0 }
 0x103   : > { %v344_v34 = vpop.f32.mrb[10].mxu0 }
 0x104   : > { %v2405_v35 = vpop.f32.mrb[11].mxu0 }
 0x109   : > { %v471_v36 = vpop.f32.mrb[8].mxu1  ;;  %v682_v37 = vpop.f32.mrb[12].mxu0 }
 0x10a   : > { %v472_v38 = vadd.f32 %v471_v36, %v325_v15  ;;  %v2428_v39 = vpop.f32.mrb[9].mxu1  ;;  %v2460_v40 = vpop.f32.mrb[13].mxu0 }
 0x10b   : > { %v474_v41 = vpop.f32.mrb[10].mxu1  ;;  %v685_v42 = vpop.f32.mrb[14].mxu0 }
 0x10c   : > { %v720_v43 = vadd.f32 %v682_v37, %v472_v38  ;;  %v475_v44 = vadd.f32 %v474_v41, %v328_v19  ;;  %v2429_v45 = vpop.f32.mrb[11].mxu1  ;;  %v2461_v46 = vpop.f32.mrb[15].mxu0 }
 0x10e   : > { %v721_v47 = vadd.f32 %v685_v42, %v475_v44 }
 0x111   : > { %v479_v49 = vpop.f32.mrb[12].mxu1  ;;  %v690_v50 = vpop.f32.mrb[16].mxu0 }
 0x112   : > { %v480_v51 = vadd.f32 %v479_v49, %v333_v23  ;;  %v2432_v52 = vpop.f32.mrb[13].mxu1  ;;  %v2464_v53 = vpop.f32.mrb[17].mxu0 }
 0x113   : > { %v482_v26 = vpop.f32.mrb[14].mxu1  ;;  %v693_v54 = vpop.f32.mrb[18].mxu0 }
 0x114   : > { %v722_v55 = vadd.f32 %v690_v50, %v480_v51  ;;  %v483_v56 = vadd.f32 %v482_v26, %v336_v28  ;;  %v2433_v33 = vpop.f32.mrb[15].mxu1  ;;  %v2465_v57 = vpop.f32.mrb[19].mxu0 }
 0x116   : > { %v723_v58 = vadd.f32 %v693_v54, %v483_v56 }
 0x119   : > { %v487_v59 = vpop.f32.mrb[16].mxu1  ;;  %v698_v60 = vpop.f32.mrb[20].mxu0 }
 0x11a   : > { %v488_v61 = vadd.f32 %v487_v59, %v341_v31  ;;  %v2436_v62 = vpop.f32.mrb[17].mxu1  ;;  %v2468_v63 = vpop.f32.mrb[21].mxu0 }
 0x11b   : > { %v490_v2 = vpop.f32.mrb[18].mxu1  ;;  %v701_v3 = vpop.f32.mrb[22].mxu0 }
 0x11c   : > { %v724_v48 = vadd.f32 %v698_v60, %v488_v61  ;;  %v491_v4 = vadd.f32 %v490_v2, %v344_v34  ;;  %v2437_v5 = vpop.f32.mrb[19].mxu1  ;;  %v2469_v6 = vpop.f32.mrb[23].mxu0 }
 0x11e   : > { %v725_v7 = vadd.f32 %v701_v3, %v491_v4 }
 0x121   : > { %v495_v8 = vpop.f32.mrb[20].mxu1  ;;  %v706_v9 = vpop.f32.mrb[24].mxu0 }
 0x122   : > { %v496_v10 = vadd.f32 %v495_v8, %v349_v16  ;;  %v2440_v0 = vpop.f32.mrb[21].mxu1  ;;  %v2472_v11 = vpop.f32.mrb[25].mxu0 }
 0x123   : > { %v498_v12 = vpop.f32.mrb[22].mxu1  ;;  %v709_v13 = vpop.f32.mrb[26].mxu0 }
 0x124   : > { %v726_v14 = vadd.f32 %v706_v9, %v496_v10  ;;  %v499_v15 = vadd.f32 %v498_v12, %v352_v20  ;;  %v2441_v17 = vpop.f32.mrb[23].mxu1  ;;  %v2473_v18 = vpop.f32.mrb[27].mxu0 }
 0x126   : > { %v727_v19 = vadd.f32 %v709_v13, %v499_v15 }
 0x129   : > { %v503_v21 = vpop.f32.mrb[24].mxu1  ;;  %v714_v22 = vpop.f32.mrb[28].mxu0 }
 0x12a   : > { %v504_v23 = vadd.f32 %v503_v21, %v357_v24  ;;  %v2444_v25 = vpop.f32.mrb[25].mxu1  ;;  %v2476_v27 = vpop.f32.mrb[29].mxu0 }
 0x12b   : > { %v506_v28 = vpop.f32.mrb[26].mxu1  ;;  %v717_v29 = vpop.f32.mrb[30].mxu0 }
 0x12c   : > { %v728_v1 = vadd.f32 %v714_v22, %v504_v23  ;;  %v2445_v30 = vpop.f32.mrb[27].mxu1  ;;  %v2477_v31 = vpop.f32.mrb[31].mxu0 }
 0x131   : > { %v860_v16 = vpop.f32.mrb[28].mxu1  ;;  %v1038_v32 = vpop.f32.mrb[32].mxu0 }
 0x132   : > { %v898_v34 = vadd.f32 %v860_v16, %v720_v43  ;;  %v2492_v35 = vpop.f32.mrb[29].mxu1  ;;  %v2524_v36 = vpop.f32.mrb[33].mxu0 }
 0x133   : > { %v863_v37 = vpop.f32.mrb[30].mxu1  ;;  %v1041_v20 = vpop.f32.mrb[34].mxu0 }
 0x134   : > { %v1076_v38 = vadd.f32 %v1038_v32, %v898_v34  ;;  %v899_v39 = vadd.f32 %v863_v37, %v721_v47  ;;  %v2493_v40 = vpop.f32.mrb[31].mxu1  ;;  %v2525_v41 = vpop.f32.mrb[35].mxu0 }
 0x136   : > { %v1077_v42 = vadd.f32 %v1041_v20, %v899_v39 }
 0x139   : > { %v868_v24 = vpop.f32.mrb[32].mxu1  ;;  %v1046_v44 = vpop.f32.mrb[36].mxu0 }
 0x13a   : > { %v900_v45 = vadd.f32 %v868_v24, %v722_v55  ;;  %v2496_v46 = vpop.f32.mrb[33].mxu1  ;;  %v2528_v49 = vpop.f32.mrb[37].mxu0 }
 0x13b   : > { %v871_v50 = vpop.f32.mrb[34].mxu1  ;;  %v1049_v51 = vpop.f32.mrb[38].mxu0 }
 0x13c   : > { %v1078_v52 = vadd.f32 %v1046_v44, %v900_v45  ;;  %v901_v53 = vadd.f32 %v871_v50, %v723_v58  ;;  %v2497_v26 = vpop.f32.mrb[35].mxu1  ;;  %v2529_v43 = vpop.f32.mrb[39].mxu0 }
 0x13e   : > { %v1079_v54 = vadd.f32 %v1049_v51, %v901_v53 }
 0x141   : > { %v876_v56 = vpop.f32.mrb[36].mxu1  ;;  %v1054_v33 = vpop.f32.mrb[40].mxu0 }
 0x142   : > { %v902_v57 = vadd.f32 %v876_v56, %v724_v48  ;;  %v2500_v59 = vpop.f32.mrb[37].mxu1  ;;  %v2532_v47 = vpop.f32.mrb[41].mxu0 }
 0x143   : > { %v879_v60 = vpop.f32.mrb[38].mxu1  ;;  %v1057_v61 = vpop.f32.mrb[42].mxu0 }
 0x144   : > { %v1080_v62 = vadd.f32 %v1054_v33, %v902_v57  ;;  %v903_v63 = vadd.f32 %v879_v60, %v725_v7  ;;  %v2501_v2 = vpop.f32.mrb[39].mxu1  ;;  %v2533_v55 = vpop.f32.mrb[43].mxu0 }
 0x146   : > { %v1081_v3 = vadd.f32 %v1057_v61, %v903_v63 }
 0x149   : > { %v884_v4 = vpop.f32.mrb[40].mxu1  ;;  %v1062_v5 = vpop.f32.mrb[44].mxu0 }
 0x14a   : > { %v904_v6 = vadd.f32 %v884_v4, %v726_v14  ;;  %v2504_v8 = vpop.f32.mrb[41].mxu1  ;;  %v2536_v58 = vpop.f32.mrb[45].mxu0 }
 0x14b   : > { %v887_v9 = vpop.f32.mrb[42].mxu1  ;;  %v1065_v10 = vpop.f32.mrb[46].mxu0 }
 0x14c   : > { %v1082_v0 = vadd.f32 %v1062_v5, %v904_v6  ;;  %v905_v11 = vadd.f32 %v887_v9, %v727_v19  ;;  %v2505_v12 = vpop.f32.mrb[43].mxu1  ;;  %v2537_v48 = vpop.f32.mrb[47].mxu0 }
 0x14e   : > { %v1083_v13 = vadd.f32 %v1065_v10, %v905_v11 }
 0x151   : > { %v892_v15 = vpop.f32.mrb[44].mxu1  ;;  %v1070_v17 = vpop.f32.mrb[48].mxu0 }
 0x152   : > { %v906_v18 = vadd.f32 %v892_v15, %v728_v1  ;;  %v2508_v21 = vpop.f32.mrb[45].mxu1  ;;  %v2540_v7 = vpop.f32.mrb[49].mxu0 }
 0x153   : > { %v895_v22 = vpop.f32.mrb[46].mxu1  ;;  %v1073_v23 = vpop.f32.mrb[50].mxu0 }
 0x154   : > { %v1084_v25 = vadd.f32 %v1070_v17, %v906_v18  ;;  %v2509_v27 = vpop.f32.mrb[47].mxu1  ;;  %v2541_v28 = vpop.f32.mrb[51].mxu0 }
 0x159   : > { %v1257_v14 = vpop.f32.mrb[48].mxu1  ;;  %v1476_v29 = vpop.f32.mrb[52].mxu0 }
 0x15a   : > { %v1295_v30 = vadd.f32 %v1257_v14, %v1076_v38  ;;  %v2556_v31 = vpop.f32.mrb[49].mxu1  ;;  %v2588_v16 = vpop.f32.mrb[53].mxu0  ;;  %v3294_v14 = vld [vmem:[%s3339_s2] ss:$0 sm:$0xff] }
 0x15b   : > { %v1260_v32 = vpop.f32.mrb[50].mxu1  ;;  %v1479_v19 = vpop.f32.mrb[54].mxu0 }
 0x15c   : > { %v1514_v34 = vadd.f32 %v1476_v29, %v1295_v30  ;;  %v1296_v35 = vadd.f32 %v1260_v32, %v1077_v42  ;;  %v2557_v36 = vpop.f32.mrb[51].mxu1  ;;  %v2589_v37 = vpop.f32.mrb[55].mxu0 }
 0x15e   : > { %v1515_v20 = vadd.f32 %v1479_v19, %v1296_v35 }
 0x161   : > { %v1265_v1 = vpop.f32.mrb[52].mxu1  ;;  %v1484_v39 = vpop.f32.mrb[56].mxu0 }
 0x162   : > { %v1297_v40 = vadd.f32 %v1265_v1, %v1078_v52  ;;  %v2560_v41 = vpop.f32.mrb[53].mxu1  ;;  %v2592_v24 = vpop.f32.mrb[57].mxu0 }
 0x163   : > { %v1268_v44 = vpop.f32.mrb[54].mxu1  ;;  %v1487_v45 = vpop.f32.mrb[58].mxu0 }
 0x164   : > { %v1516_v46 = vadd.f32 %v1484_v39, %v1297_v40  ;;  %v1298_v49 = vadd.f32 %v1268_v44, %v1079_v54  ;;  %v2561_v50 = vpop.f32.mrb[55].mxu1  ;;  %v2593_v38 = vpop.f32.mrb[59].mxu0 }
 0x166   : > { %v3278_v51 = vadd.f32 %v1487_v45, %v1298_v49 }
 0x169   : > { %v1273_v53 = vpop.f32.mrb[56].mxu1  ;;  %v1492_v26 = vpop.f32.mrb[60].mxu0 }
 0x16a   : > { %v1299_v43 = vadd.f32 %v1273_v53, %v1080_v62  ;;  %v2564_v42 = vpop.f32.mrb[57].mxu1  ;;  %v2596_v56 = vpop.f32.mrb[61].mxu0 }
 0x16b   : > { %v1276_v33 = vpop.f32.mrb[58].mxu1  ;;  %v1495_v57 = vpop.f32.mrb[62].mxu0 }
 0x16c   : > { %v3280_v59 = vadd.f32 %v1492_v26, %v1299_v43  ;;  %v1300_v52 = vadd.f32 %v1276_v33, %v1081_v3  ;;  %v2565_v47 = vpop.f32.mrb[59].mxu1  ;;  %v2597_v60 = vpop.f32.mrb[63].mxu0 }
 0x16e   : > { %v3282_v61 = vadd.f32 %v1495_v57, %v1300_v52 }
 0x171   : > { %v1281_v63 = vpop.f32.mrb[60].mxu1  ;;  %v1500_v54 = vpop.f32.mrb[64].mxu0 }
 0x172   : > { %v1301_v2 = vadd.f32 %v1281_v63, %v1082_v0  ;;  %v2568_v55 = vpop.f32.mrb[61].mxu1  ;;  %v2600_v4 = vpop.f32.mrb[65].mxu0 }
 0x173   : > { %v1284_v5 = vpop.f32.mrb[62].mxu1  ;;  %v1503_v6 = vpop.f32.mrb[66].mxu0 }
 0x174   : > { %v3284_v8 = vadd.f32 %v1500_v54, %v1301_v2  ;;  %v1302_v62 = vadd.f32 %v1284_v5, %v1083_v13  ;;  %v2569_v58 = vpop.f32.mrb[63].mxu1  ;;  %v2601_v9 = vpop.f32.mrb[67].mxu0 }
 0x176   : > { %v3286_v10 = vadd.f32 %v1503_v6, %v1302_v62 }
 0x179   : > { %v1289_v3 = vpop.f32.mrb[64].mxu1  ;;  %v1508_v11 = vpop.f32.mrb[68].mxu0 }
 0x17a   : > { %v1303_v12 = vadd.f32 %v1289_v3, %v1084_v25  ;;  %v2572_v48 = vpop.f32.mrb[65].mxu1  ;;  %v2604_v15 = vpop.f32.mrb[69].mxu0 }
 0x17b   : > { %v1292_v17 = vpop.f32.mrb[66].mxu1  ;;  %v1511_v18 = vpop.f32.mrb[70].mxu0 }
 0x17c   : > { %v3288_v0 = vadd.f32 %v1508_v11, %v1303_v12  ;;  %v2573_v21 = vpop.f32.mrb[67].mxu1  ;;  %v2605_v7 = vpop.f32.mrb[71].mxu0 }
 0x181   : > { %v1695_v22 = vpop.f32.mrb[68].mxu1  ;;  %v1854_v23 = vpop.f32.mrb[72].mxu0 }
 0x182   : > { %v1733_v27 = vadd.f32 %v1695_v22, %v1514_v34  ;;  %v2620_v13 = vpop.f32.mrb[69].mxu1  ;;  %v2652_v28 = vpop.f32.mrb[73].mxu0 }
 0x183   : > { %v1698_v25 = vpop.f32.mrb[70].mxu1  ;;  %v1857_v29 = vpop.f32.mrb[74].mxu0 }
 0x184   : > { %v1892_v30 = vadd.f32 %v1854_v23, %v1733_v27  ;;  %v1734_v31 = vadd.f32 %v1698_v25, %v1515_v20  ;;  %v2621_v16 = vpop.f32.mrb[71].mxu1  ;;  %v2653_v32 = vpop.f32.mrb[75].mxu0 }
 0x186   : > { %v1908_v19 = vadd.f32 %v3294_v14, %v1892_v30  ;;  %v1893_v35 = vadd.f32 %v1857_v29, %v1734_v31 }
 0x188   : > { %v1917_v34 = vmax.f32 %v1908_v19, 0.0  ;;  %v1909_v36 = vadd.f32 %v3294_v14, %v1893_v35 }
 0x189   : > { %v1703_v37 = vpop.f32.mrb[72].mxu1  ;;  %v1862_v1 = vpop.f32.mrb[76].mxu0 }
 0x18a   : > { %1926 = vst.msk [vmem:[%s3300_s7] sm:$0xff] %vm275_vm1, %v1917_v34  ;;  %v1918_v20 = vmax.f32 %v1909_v36, 0.0  ;;  %v1735_v39 = vadd.f32 %v1703_v37, %v1516_v46  ;;  %v2624_v40 = vpop.f32.mrb[73].mxu1  ;;  %v2656_v41 = vpop.f32.mrb[77].mxu0 }
 0x18b   : > { %v1706_v24 = vpop.f32.mrb[74].mxu1  ;;  %v1865_v44 = vpop.f32.mrb[78].mxu0 }
 0x18c   : > { %1927 = vst.msk [vmem:[%s3300_s7 + $0x8] sm:$0xff] %vm275_vm1, %v1918_v20  ;;  %v1894_v45 = vadd.f32 %v1862_v1, %v1735_v39  ;;  %v1736_v49 = vadd.f32 %v1706_v24, %v3278_v51  ;;  %v2625_v50 = vpop.f32.mrb[75].mxu1  ;;  %v2657_v38 = vpop.f32.mrb[79].mxu0 }
 0x18e   : > { %v1910_v53 = vadd.f32 %v3294_v14, %v1894_v45  ;;  %v1895_v26 = vadd.f32 %v1865_v44, %v1736_v49 }
 0x190   : > { %v1919_v43 = vmax.f32 %v1910_v53, 0.0  ;;  %v1911_v42 = vadd.f32 %v3294_v14, %v1895_v26 }
 0x191   : > { %v1711_v46 = vpop.f32.mrb[76].mxu1  ;;  %v1870_v56 = vpop.f32.mrb[80].mxu0 }
 0x192   : > { %1928 = vst.msk [vmem:[%s3300_s7 + $0x10] sm:$0xff] %vm275_vm1, %v1919_v43  ;;  %v1920_v33 = vmax.f32 %v1911_v42, 0.0  ;;  %v1737_v57 = vadd.f32 %v1711_v46, %v3280_v59  ;;  %v2628_v52 = vpop.f32.mrb[77].mxu1  ;;  %v2660_v47 = vpop.f32.mrb[81].mxu0 }
 0x193   : > { %v1714_v51 = vpop.f32.mrb[78].mxu1  ;;  %v1873_v60 = vpop.f32.mrb[82].mxu0 }
 0x194   : > { %1929 = vst.msk [vmem:[%s3300_s7 + $0x18] sm:$0xff] %vm275_vm1, %v1920_v33  ;;  %v1896_v63 = vadd.f32 %v1870_v56, %v1737_v57  ;;  %v1738_v54 = vadd.f32 %v1714_v51, %v3282_v61  ;;  %v2629_v2 = vpop.f32.mrb[79].mxu1  ;;  %v2661_v55 = vpop.f32.mrb[83].mxu0 }
 0x196   : > { %v1912_v4 = vadd.f32 %v3294_v14, %v1896_v63  ;;  %v1897_v5 = vadd.f32 %v1873_v60, %v1738_v54 }
 0x198   : > { %v1921_v6 = vmax.f32 %v1912_v4, 0.0  ;;  %v1913_v62 = vadd.f32 %v3294_v14, %v1897_v5 }
 0x199   : > { %v1719_v59 = vpop.f32.mrb[80].mxu1  ;;  %v1878_v58 = vpop.f32.mrb[84].mxu0 }
 0x19a   : > { %1930 = vst.msk [vmem:[%s3300_s7 + $0x20] sm:$0xff] %vm275_vm1, %v1921_v6  ;;  %v1922_v9 = vmax.f32 %v1913_v62, 0.0  ;;  %v1739_v3 = vadd.f32 %v1719_v59, %v3284_v8  ;;  %v2632_v11 = vpop.f32.mrb[81].mxu1  ;;  %v2664_v12 = vpop.f32.mrb[85].mxu0 }
 0x19b   : > { %v1722_v61 = vpop.f32.mrb[82].mxu1  ;;  %v1881_v48 = vpop.f32.mrb[86].mxu0 }
 0x19c   : > { %1931 = vst.msk [vmem:[%s3300_s7 + $0x28] sm:$0xff] %vm275_vm1, %v1922_v9  ;;  %v1898_v15 = vadd.f32 %v1878_v58, %v1739_v3  ;;  %v1740_v17 = vadd.f32 %v1722_v61, %v3286_v10  ;;  %v2633_v18 = vpop.f32.mrb[83].mxu1  ;;  %v2665_v21 = vpop.f32.mrb[87].mxu0 }
 0x19e   : > { %v1914_v7 = vadd.f32 %v3294_v14, %v1898_v15  ;;  %v1899_v22 = vadd.f32 %v1881_v48, %v1740_v17 }
 0x1a0   : > { %v1923_v23 = vmax.f32 %v1914_v7, 0.0  ;;  %v1915_v27 = vadd.f32 %v3294_v14, %v1899_v22 }
 0x1a1   : > { %v1727_v8 = vpop.f32.mrb[84].mxu1  ;;  %v1886_v13 = vpop.f32.mrb[88].mxu0 }
 0x1a2   : > { %1932 = vst.msk [vmem:[%s3300_s7 + $0x30] sm:$0xff] %vm275_vm1, %v1923_v23  ;;  %v1924_v28 = vmax.f32 %v1915_v27, 0.0  ;;  %v1741_v25 = vadd.f32 %v1727_v8, %v3288_v0  ;;  %v2636_v29 = vpop.f32.mrb[85].mxu1  ;;  %v2668_v30 = vpop.f32.mrb[89].mxu0 }
 0x1a3   : > { %v1730_v10 = vpop.f32.mrb[86].mxu1  ;;  %v1889_v31 = vpop.f32.mrb[90].mxu0 }
 0x1a4   : > { %1933 = vst.msk [vmem:[%s3300_s7 + $0x38] sm:$0xff] %vm275_vm1, %v1924_v28  ;;  %v1900_v16 = vadd.f32 %v1886_v13, %v1741_v25  ;;  %v2637_v32 = vpop.f32.mrb[87].mxu1  ;;  %v2669_v19 = vpop.f32.mrb[91].mxu0 }
 0x1a6   : > { %v1916_v35 = vadd.f32 %v3294_v14, %v1900_v16 }
 0x1a8   : > { %v1925_v34 = vmax.f32 %v1916_v35, 0.0 }
 0x1aa   : > { %1934 = vst.msk [vmem:[%s3300_s7 + $0x40] sm:$0xff] %vm275_vm1, %v1925_v34 }
 0x1ab PF: > { %s13_s12 = sadd.s32 1, %s2795_s12  }
 0x1ac   : > { %p10_p4 = scmp.ge.s32.totalorder %s13_s12, 4  }
 0x1ae   :  { %12 = sbr.rel (!%p10_p4) target bundleno = 1 (0x1), region = 73 }

// kernel: inception_b_forward.5
= control target key start
LH: loop header
LB: loop body
LE: loop exit
PB: predicated region body
PF: predicated region fallthrough
CT: control target
= control target key end

     0   :  { %s3706_s12 = smov 0   ;;  %s4396_s0 = inlined_call_operand.vmem [shape: bf16[2,4,82,32], index: 0, kind: input, shape index: {}]   ;;  %s4397_s1 = inlined_call_operand.vmem [shape: bf16[9,32,384], index: 1, kind: input, shape index: {}]   ;;  %s4398_s2 = inlined_call_operand.vmem [shape: f32[1,384], index: 2, kind: input, shape index: {}]   ;;  %s4399_s3 = inlined_call_operand.vmem [shape: f32[2,72,384], index: 3, kind: output, shape index: {}]  }
   0x1 LB: > { %s2837_s13 = sadd.s32 4294967295, %s3681_s12   ;;  %p2841_p0 = scmp.ge.s32.totalorder %s3681_s12, 1  ;;  %s3681_s12 = sphi %s3706_s12, %s13_s12  }
   0x2   : > { %p137_p1 = scmp.lt.s32.totalorder %s3681_s12, 3 }
   0x4   : > { %p138_p2 = pnand %p2841_p0, %p137_p1 }
   0x5   : > { %v3562_v0 = vld [vmem:[%s4397_s1 + $0x34] ss:$12 sps:$4 sm:$0xff] (!%p138_p2)   ;;  %v3683_v1 = vmov (!%p138_p2), 0.0   ;;  %v3564_v2 = vld [vmem:[%s4397_s1 + $0x38] ss:$12 sps:$4 sm:$0xff] (!%p138_p2)   ;;  %vm3684_vm0 = vmmov (!%p138_p2), 0  }
   0x6   : > { %141 = sbr.rel (%p138_p2) target bundleno = 590 (0x24e), region = 32  ;;  %3205 = vmatprep.subr.bf16.mxu1 (!%p138_p2), %v3683_v1  ;;  %3209 = vmatprep.mubr.msk.bf16.mxu1 (!%p138_p2), %vm3684_vm0, %v3683_v1  ;;  %v3565_v3 = vld [vmem:[%s4397_s1 + $0x30] ss:$12 sps:$4 sm:$0xff] (!%p138_p2)   ;;  %p161_p3 = scmp.lt.s32.totalorder (!%p138_p2), %s2837_s13, 1  ;;  %v3566_v4 = vld [vmem:[%s4397_s1 + $0x4c] ss:$12 sps:$4 sm:$0xff] (!%p138_p2)  }
   0x7   : > { %279 = vmatprep.subr.bf16.mxu0 (!%p138_p2), %v3562_v0  ;;  %3206 = vmatpush3.bf16.msra.mxu1 (!%p138_p2), %v3564_v2  ;;  %v3685_v5 = vmov (!%p138_p2), 0   ;;  %v3568_v6 = vld [vmem:[%s4397_s1 + $0x50] ss:$12 sps:$4 sm:$0xff] (!%p138_p2)   ;;  %v3569_v7 = vld [vmem:[%s4397_s1 + $0x48] ss:$12 sps:$4 sm:$0xff] (!%p138_p2)   ;;  %vm263_vm1 = vcmask (!%p138_p2), 261120  }
   0x8   : > { %311 = vmatprep.mubr.bf16.mxu0 (!%p138_p2), %v3685_v5  ;;  %280 = vmatpush1.bf16.msra.mxu0 (!%p138_p2), %v3565_v3  ;;  %v3573_v8 = vld [vmem:[%s4397_s1 + $0x4] ss:$12 sps:$4 sm:$0xff] (!%p138_p2)   ;;  %v3571_v9 = vld [vmem:[%s4397_s1] ss:$12 sps:$4 sm:$0xff] (!%p138_p2)   ;;  %v3574_v10 = vld [vmem:[%s4397_s1 + $0x8] ss:$12 sps:$4 sm:$0xff] (!%p138_p2)  }
   0x9   : > { %3207 = vmatprep.subr.bf16.mxu1 (!%p138_p2), %v3683_v1  ;;  %281 = vmatprep.subr.bf16.mxu0 (!%p138_p2), %v3566_v4  ;;  %v3579_v12 = vld [vmem:[%s4397_s1 + $0x1c] ss:$12 sps:$4 sm:$0xff] (!%p138_p2)   ;;  %v3577_v13 = vld [vmem:[%s4397_s1 + $0x18] ss:$12 sps:$4 sm:$0xff] (!%p138_p2)   ;;  %v3580_v14 = vld [vmem:[%s4397_s1 + $0x20] ss:$12 sps:$4 sm:$0xff] (!%p138_p2)  }
   0xa   : > { %v3586_v16 = vld [vmem:[%s4397_s1 + $0x64] ss:$12 sps:$4 sm:$0xff] (!%p138_p2)   ;;  %v3584_v21 = vld [vmem:[%s4397_s1 + $0x60] ss:$12 sps:$4 sm:$0xff] (!%p138_p2)   ;;  %v3587_v22 = vld [vmem:[%s4397_s1 + $0x68] ss:$12 sps:$4 sm:$0xff] (!%p138_p2)  }
   0xb   : > { %3208 = vmatpush3.bf16.msra.mxu1 (!%p138_p2), %v3568_v6  ;;  %v3592_v23 = vld [vmem:[%s4397_s1 + $0x7c] ss:$12 sps:$4 sm:$0xff] (!%p138_p2)   ;;  %v3590_v24 = vld [vmem:[%s4397_s1 + $0x78] ss:$12 sps:$4 sm:$0xff] (!%p138_p2)   ;;  %v3593_v25 = vld [vmem:[%s4397_s1 + $0x80] ss:$12 sps:$4 sm:$0xff] (!%p138_p2)  }
   0xc   : > { %282 = vmatpush1.bf16.msra.mxu0 (!%p138_p2), %v3569_v7  ;;  %3229 = vmatprep.subr.bf16.mxu1 (!%p138_p2), %v3683_v1  ;;  %v3600_v26 = vld [vmem:[%s4397_s1 + $0x94] ss:$12 sps:$4 sm:$0xff] (!%p138_p2)   ;;  %vm699_vm2 = vsmask.f32 (!%p138_p2), 7424  ;;  %v3598_v41 = vld [vmem:[%s4397_s1 + $0x90] ss:$12 sps:$4 sm:$0xff] (!%p138_p2)  }
   0xd   : > { %s4401_s13 = smov (!%p161_p3, %s2837_s13), 1  ;;  %502 = vmatprep.subr.bf16.mxu0 %v3573_v8  ;;  %v3601_v42 = vld [vmem:[%s4397_s1 + $0x98] ss:$12 sps:$4 sm:$0xff]   ;;  %v3604_v49 = vld [vmem:[%s4397_s1 + $0xa8] ss:$12 sps:$4 sm:$0xff]   ;;  %vm2447_vm3 = vcmask 1046528  }
   0xe   : > { %s3549_s26 = smul.u32 176, %s4401_s13  ;;  %v3606_v45 = vld [vmem:[%s4397_s1 + $0xac] ss:$12 sps:$4 sm:$0xff]   ;;  %v3607_v50 = vld [vmem:[%s4397_s1 + $0xb0] ss:$12 sps:$4 sm:$0xff]  }
   0xf   : > { %v3612_v51 = vld [vmem:[%s4397_s1 + $0xc4] ss:$12 sps:$4 sm:$0xff]   ;;  %v3610_v4 = vld [vmem:[%s4397_s1 + $0xc0] ss:$12 sps:$4 sm:$0xff]   ;;  %v3613_v6 = vld [vmem:[%s4397_s1 + $0xc8] ss:$12 sps:$4 sm:$0xff]  }
  0x10   : > { %s3746_s4 = scalar_lea.vmem %s4396_s0, %s3549_s26  ;;  %v3618_v7 = vld [vmem:[%s4397_s1 + $0xdc] ss:$12 sps:$4 sm:$0xff]   ;;  %v3616_v8 = vld [vmem:[%s4397_s1 + $0xd8] ss:$12 sps:$4 sm:$0xff]   ;;  %s3550_s30 = smul.u32 216, %s4401_s13 }
  0x11   : > { %v3570_v11 = vld [vmem:[%s3746_s4 + $0x2c] sm:$0xff]   ;;  %v3575_v15 = vld [vmem:[%s3746_s4 + $0x34] sm:$0xff]   ;;  %v3576_v17 = vld [vmem:[%s3746_s4 + $0x3c] sm:$0xff]  }
  0x12   : > { %3210 = vmatmul.mubr.msk.bf16.vlgmr.msra.gmra.mrb[0].mxu1 %vm263_vm1, %v3570_v11  ;;  %2872 = vmatmul.mubr.msk.bf16.vlgmr.msra.gmra.mrb[0].mxu0 %vm263_vm1, %v3570_v11  ;;  %v3581_v18 = vld [vmem:[%s3746_s4 + $0x44] sm:$0xff]   ;;  %v3582_v19 = vld [vmem:[%s3746_s4 + $0x4c] ss:$0 sps:$4 sm:$0xff]   ;;  %v3589_v28 = vld [vmem:[%s3746_s4 + $0x10] sm:$0xff]   ;;  %s4329_s7 = scalar_lea.vmem %s4399_s3, %s3550_s30 }
  0x13   : > { %503 = vmatpush1.bf16.msra.mxu0 %v3571_v9  ;;  %3230 = vmatpush3.bf16.msra.mxu1 %v3574_v10  ;;  %v3583_v20 = vld [vmem:[%s3746_s4] sm:$0xff]   ;;  %v3588_v27 = vld [vmem:[%s3746_s4 + $0x8] sm:$0xff]   ;;  %v3594_v29 = vld [vmem:[%s3746_s4 + $0x18] sm:$0xff]  }
  0x14   : > { %3213 = vmatprep.mubr.msk.bf16.mxu1 %vm3684_vm0, %v3683_v1  ;;  %321 = vmatprep.mubr.bf16.mxu0 %v3685_v5  ;;  %v3596_v30 = vld [vmem:[%s3746_s4] sm:$0xff]   ;;  %v3597_v31 = vld [vmem:[%s3746_s4 + $0x8] sm:$0xff]   ;;  %v3602_v39 = vld [vmem:[%s3746_s4 + $0x10] sm:$0xff]  }
  0x15   : > { %504 = vmatprep.subr.bf16.mxu0 %v3579_v12  ;;  %3231 = vmatprep.subr.bf16.mxu1 %v3683_v1  ;;  %v703_v32 = vshll.u32 %v3596_v30, 16  ;;  %v3595_v33 = vld [vmem:[%s3746_s4 + $0x20] ss:$0 sps:$4 sm:$0xff]   ;;  %v701_v34 = vshrl.u32 %v3596_v30, 16  ;;  %v708_v36 = vshll.u32 %v3597_v31, 16  ;;  %v712_v43 = vshrl.u32 %v3597_v31, 16 }
  0x16   : > { %v716_v44 = vshll.u32 %v3602_v39, 16  ;;  %v3603_v48 = vld [vmem:[%s3746_s4 + $0x18] sm:$0xff]   ;;  %v720_v53 = vshrl.u32 %v3602_v39, 16  ;;  %v3608_v57 = vld [vmem:[%s3746_s4 + $0x20] sm:$0x1f]   ;;  %v3615_v12 = vld [vmem:[%s3746_s4 + $0x68] sm:$0xff]  }
  0x17   : > { %505 = vmatpush1.bf16.msra.mxu0 %v3577_v13  ;;  %3232 = vmatpush3.bf16.msra.mxu1 %v3580_v14  ;;  %v705_v35 = vrot.slane %v703_v32, 1  ;;  %v710_v38 = vrot.slane %v708_v36, 1  ;;  %v724_v54 = vshll.u32 %v3603_v48, 16  ;;  %v728_v59 = vshrl.u32 %v3603_v48, 16  ;;  %v3609_v3 = vld [vmem:[%s3746_s4 + $0x58] sm:$0xff]   ;;  %v3614_v11 = vld [vmem:[%s3746_s4 + $0x60] sm:$0xff]  }
  0x18   : > { %3253 = vmatprep.subr.bf16.mxu1 %v3683_v1  ;;  %786 = vmatprep.subr.bf16.mxu0 %v3586_v16  ;;  %v718_v47 = vrot.slane %v716_v44, 1  ;;  %v732_v60 = vshll.u32 %v3608_v57, 16  ;;  %v736_v0 = vshrl.u32 %v3608_v57, 16  ;;  %v3619_v9 = vld [vmem:[%s4397_s1 + $0xe0] ss:$12 sps:$4 sm:$0xff]   ;;  %v3620_v13 = vld [vmem:[%s3746_s4 + $0x70] sm:$0xff]  }
  0x19   : > { %v706_v37 = vor.u32 %v705_v35, %v701_v34  ;;  %v714_v46 = vor.u32 %v712_v43, %v710_v38  ;;  %v726_v56 = vrot.slane %v724_v54, 1  ;;  %v3625_v10 = vld [vmem:[%s4397_s1 + $0xf4] ss:$12 sps:$4 sm:$0xff]   ;;  %v3621_v14 = vld [vmem:[%s3746_s4 + $0x78] ss:$0 sps:$4 sm:$0xff]   ;;  %v3641_v34 = vld [vmem:[%s3746_s4 + $0x68] sm:$0xff]  }
  0x1a   : > { %3214 = vmatmul.mubr.msk.bf16.gmra.mrb[4].mxu1 %vm263_vm1, %v3575_v15  ;;  %2873 = vmatmul.mubr.msk.bf16.gmra.mrb[4].mxu0 %vm263_vm1, %v3575_v15  ;;  %v722_v55 = vor.u32 %v720_v53, %v718_v47  ;;  %v734_v62 = vrot.slane %v732_v60, 1  ;;  %v3622_v15 = vld [vmem:[%s3746_s4 + $0x84] sm:$0xff]   ;;  %v3623_v16 = vld [vmem:[%s4397_s1 + $0xf0] ss:$12 sps:$4 sm:$0xff]   ;;  %v3637_v36 = vld [vmem:[%s4397_s1 + $0x120] ss:$12 sps:$4 sm:$0xff]  }
  0x1b   : > { %3217 = vmatprep.mubr.msk.bf16.mxu1 %vm3684_vm0, %v3683_v1  ;;  %331 = vmatprep.mubr.bf16.mxu0 %v3685_v5  ;;  %v711_v40 = vsel %vm699_vm2, %v706_v37, %v710_v38  ;;  %v719_v52 = vsel %vm699_vm2, %v714_v46, %v718_v47  ;;  %v730_v61 = vor.u32 %v728_v59, %v726_v56  ;;  %v3640_v37 = vld [vmem:[%s4397_s1 + $0x128] ss:$12 sps:$4 sm:$0xff]   ;;  %v1564_v39 = vshll.u32 %v3641_v34, 16  ;;  %v3643_v44 = vld [vmem:[%s4397_s1 + $0x138] ss:$12 sps:$4 sm:$0xff]  }
  0x1c   : > { %v727_v58 = vsel %vm699_vm2, %v722_v55, %v726_v56  ;;  %v738_v2 = vor.u32 %v736_v0, %v734_v62  ;;  %v3642_v43 = vld [vmem:[%s3746_s4 + $0x70] sm:$0xff]   ;;  %v1568_v48 = vshrl.u32 %v3641_v34, 16  ;;  %v4100_v34 = vld [vmem:[%s3746_s4 + $0x1c] sm:$0xff]  }
  0x1d   : > { %v735_v63 = vsel %vm699_vm2, %v730_v61, %v734_v62  ;;  %v3652_v46 = vld [vmem:[%s4397_s1 + $0x154] ss:$12 sps:$4 sm:$0xff]   ;;  %v1576_v57 = vshrl.u32 %v3642_v43, 16  ;;  %v1814_v62 = vld [vmem:[%s3746_s4 + $0x4] sm:$0xf] }
  0x22   : > { %3218 = vmatmul.mubr.msk.bf16.gmra.mrb[8].mxu1 %vm263_vm1, %v3576_v17  ;;  %2874 = vmatmul.mubr.msk.bf16.gmra.mrb[8].mxu0 %vm263_vm1, %v3576_v17  ;;  %v3626_v17 = vld [vmem:[%s4397_s1 + $0xf8] ss:$12 sps:$4 sm:$0xff]  }
  0x23   : > { %3221 = vmatprep.mubr.msk.bf16.mxu1 %vm3684_vm0, %v3683_v1  ;;  %341 = vmatprep.mubr.bf16.mxu0 %v3685_v5 }
  0x2a   : > { %3222 = vmatmul.mubr.msk.bf16.gmra.mrb[12].mxu1 %vm263_vm1, %v3581_v18  ;;  %2875 = vmatmul.mubr.msk.bf16.gmra.mrb[12].mxu0 %vm263_vm1, %v3581_v18  ;;  %v3631_v18 = vld [vmem:[%s4397_s1 + $0x10c] ss:$12 sps:$4 sm:$0xff]  }
  0x2b   : > { %3225 = vmatprep.mubr.msk.bf16.mxu1 %vm3684_vm0, %v3683_v1  ;;  %351 = vmatprep.mubr.bf16.mxu0 %v3685_v5 }
  0x32   : > { %3226 = vmatmul.mubr.msk.bf16.gmra.mrb[16].mxu1 %vm263_vm1, %v3582_v19  ;;  %2876 = vmatmul.mubr.msk.bf16.gmra.mrb[16].mxu0 %vm263_vm1, %v3582_v19  ;;  %v3629_v19 = vld [vmem:[%s4397_s1 + $0x108] ss:$12 sps:$4 sm:$0xff]  }
  0x33   : > { %3233 = vmatprep.mubr.msk.bf16.mxu1 %vm3684_vm0, %v3683_v1  ;;  %534 = vmatprep.mubr.bf16.mxu0 %v3685_v5 }
  0x3a   : > { %3234 = vmatmul.mubr.msk.bf16.vlgmr.msra.gmra.mrb[20].mxu1 %vm263_vm1, %v3583_v20  ;;  %2893 = vmatmul.mubr.msk.bf16.vlgmr.msra.gmra.mrb[0].mxu0 %vm263_vm1, %v3583_v20  ;;  %v3632_v20 = vld [vmem:[%s4397_s1 + $0x110] ss:$12 sps:$4 sm:$0xff]  }
  0x3b   : > { %787 = vmatpush1.bf16.msra.mxu0 %v3584_v21  ;;  %3254 = vmatpush3.bf16.msra.mxu1 %v3587_v22  ;;  %v3639_v21 = vld [vmem:[%s4397_s1 + $0x124] ss:$12 sps:$4 sm:$0xff]  }
  0x3c   : > { %3237 = vmatprep.mubr.msk.bf16.mxu1 %vm3684_vm0, %v3683_v1  ;;  %544 = vmatprep.mubr.bf16.mxu0 %v3685_v5  ;;  %v3627_v22 = vld [vmem:[%s3746_s4 + $0x8c] sm:$0xff]  }
  0x3d   : > { %788 = vmatprep.subr.bf16.mxu0 %v3592_v23  ;;  %3255 = vmatprep.subr.bf16.mxu1 %v3683_v1  ;;  %v3628_v23 = vld [vmem:[%s3746_s4 + $0x94] sm:$0xff]  }
  0x3f   : > { %789 = vmatpush1.bf16.msra.mxu0 %v3590_v24  ;;  %3256 = vmatpush3.bf16.msra.mxu1 %v3593_v25  ;;  %v3633_v24 = vld [vmem:[%s3746_s4 + $0x9c] sm:$0xff]  }
  0x40   : > { %1055 = vmatprep.subr.bf16.mxu0 %v3600_v26  ;;  %3277 = vmatprep.subr.bf16.mxu1 %v3683_v1  ;;  %v3635_v25 = vld [vmem:[%s3746_s4 + $0x58] sm:$0xff]   ;;  %v3636_v26 = vld [vmem:[%s3746_s4 + $0x60] sm:$0xff]  }
  0x41   : > { %v1556_v31 = vshll.u32 %v3636_v26, 16  ;;  %v1560_v38 = vshrl.u32 %v3636_v26, 16 }
  0x42   : > { %3238 = vmatmul.mubr.msk.bf16.gmra.mrb[24].mxu1 %vm263_vm1, %v3588_v27  ;;  %2894 = vmatmul.mubr.msk.bf16.gmra.mrb[4].mxu0 %vm263_vm1, %v3588_v27  ;;  %v1551_v27 = vshll.u32 %v3635_v25, 16 }
  0x43   : > { %3241 = vmatprep.mubr.msk.bf16.mxu1 %vm3684_vm0, %v3683_v1  ;;  %554 = vmatprep.mubr.bf16.mxu0 %v3685_v5 }
  0x44   : > { %v1553_v30 = vrot.slane %v1551_v27, 1  ;;  %v3653_v27 = vld [vmem:[%s4397_s1 + $0x158] ss:$12 sps:$4 sm:$0xff]  }
  0x4a   : > { %3242 = vmatmul.mubr.msk.bf16.gmra.mrb[28].mxu1 %vm263_vm1, %v3589_v28  ;;  %2895 = vmatmul.mubr.msk.bf16.gmra.mrb[8].mxu0 %vm263_vm1, %v3589_v28  ;;  %v3634_v28 = vld [vmem:[%s3746_s4 + $0xa4] ss:$0 sps:$4 sm:$0xff]  }
  0x4b   : > { %3245 = vmatprep.mubr.msk.bf16.mxu1 %vm3684_vm0, %v3683_v1  ;;  %564 = vmatprep.mubr.bf16.mxu0 %v3685_v5 }
  0x52   : > { %3246 = vmatmul.mubr.msk.bf16.gmra.mrb[32].mxu1 %vm263_vm1, %v3594_v29  ;;  %2896 = vmatmul.mubr.msk.bf16.gmra.mrb[12].mxu0 %vm263_vm1, %v3594_v29  ;;  %v1549_v29 = vshrl.u32 %v3635_v25, 16 }
  0x53   : > { %3249 = vmatprep.mubr.msk.bf16.mxu1 %vm3684_vm0, %v3683_v1  ;;  %574 = vmatprep.mubr.bf16.mxu0 %v3685_v5 }
  0x54   : > { %v1554_v32 = vor.u32 %v1553_v30, %v1549_v29 }
  0x5a   : > { %3250 = vmatmul.mubr.msk.bf16.gmra.mrb[36].mxu1 %vm263_vm1, %v3595_v33  ;;  %2897 = vmatmul.mubr.msk.bf16.gmra.mrb[20].mxu0 %vm263_vm1, %v3595_v33  ;;  %v1558_v33 = vrot.slane %v1556_v31, 1  ;;  %v3658_v31 = vld [vmem:[%s4397_s1 + $0x16c] ss:$12 sps:$4 sm:$0xff]  }
  0x5b   : > { %3257 = vmatprep.mubr.msk.bf16.mxu1 %vm3684_vm0, %v3683_v1  ;;  %818 = vmatprep.mubr.bf16.mxu0 %v3685_v5 }
  0x5c   : > { %v1559_v35 = vsel %vm699_vm2, %v1554_v32, %v1558_v33 }
  0x62   : > { %3258 = vmatmul.mubr.msk.bf16.vlgmr.msra.gmra.mrb[40].mxu1 %vm263_vm1, %v711_v40  ;;  %2922 = vmatmul.mubr.msk.bf16.vlgmr.msra.gmra.mrb[0].mxu0 %vm263_vm1, %v711_v40  ;;  %v3645_v40 = vld [vmem:[%s4397_s1 + $0x13c] ss:$12 sps:$4 sm:$0xff]  }
  0x63   : > { %1056 = vmatpush1.bf16.msra.mxu0 %v3598_v41  ;;  %3278 = vmatpush3.bf16.msra.mxu1 %v3601_v42  ;;  %v1562_v41 = vor.u32 %v1560_v38, %v1558_v33  ;;  %v1566_v42 = vrot.slane %v1564_v39, 1 }
  0x64   : > { %3261 = vmatprep.mubr.msk.bf16.mxu1 %vm3684_vm0, %v3683_v1  ;;  %828 = vmatprep.mubr.bf16.mxu0 %v3685_v5 }
  0x65   : > { %1057 = vmatprep.subr.bf16.mxu0 %v3606_v45  ;;  %3279 = vmatprep.subr.bf16.mxu1 %v3683_v1  ;;  %v3646_v45 = vld [vmem:[%s4397_s1 + $0x140] ss:$12 sps:$4 sm:$0xff]   ;;  %v1567_v47 = vsel %vm699_vm2, %v1562_v41, %v1566_v42 }
  0x67   : > { %1058 = vmatpush1.bf16.msra.mxu0 %v3604_v49  ;;  %3280 = vmatpush3.bf16.msra.mxu1 %v3607_v50  ;;  %v1572_v49 = vshll.u32 %v3642_v43, 16  ;;  %v1570_v50 = vor.u32 %v1568_v48, %v1566_v42 }
  0x68   : > { %1324 = vmatprep.subr.bf16.mxu0 %v3612_v51  ;;  %3301 = vmatprep.subr.bf16.mxu1 %v3683_v1 }
  0x69   : > { %v1574_v51 = vrot.slane %v1572_v49, 1 }
  0x6a   : > { %3262 = vmatmul.mubr.msk.bf16.gmra.mrb[44].mxu1 %vm263_vm1, %v719_v52  ;;  %2923 = vmatmul.mubr.msk.bf16.gmra.mrb[4].mxu0 %vm263_vm1, %v719_v52  ;;  %v3647_v52 = vld [vmem:[%s3746_s4 + $0x78] sm:$0x1f]  }
  0x6b   : > { %3265 = vmatprep.mubr.msk.bf16.mxu1 %vm3684_vm0, %v3683_v1  ;;  %838 = vmatprep.mubr.bf16.mxu0 %v3685_v5  ;;  %v1575_v56 = vsel %vm699_vm2, %v1570_v50, %v1574_v51  ;;  %v1578_v60 = vor.u32 %v1576_v57, %v1574_v51  ;;  %v4131_v51 = vld [vmem:[%s3746_s4 + $0x24] sm:$0x1f]  }
  0x72   : > { %3266 = vmatmul.mubr.msk.bf16.gmra.mrb[48].mxu1 %vm263_vm1, %v727_v58  ;;  %2924 = vmatmul.mubr.msk.bf16.gmra.mrb[8].mxu0 %vm263_vm1, %v727_v58  ;;  %v1580_v58 = vshll.u32 %v3647_v52, 16 }
  0x73   : > { %3269 = vmatprep.mubr.msk.bf16.mxu1 %vm3684_vm0, %v3683_v1  ;;  %848 = vmatprep.mubr.bf16.mxu0 %v3685_v5 }
  0x74   : > { %v1582_v61 = vrot.slane %v1580_v58, 1 }
  0x7a   : > { %3270 = vmatmul.mubr.msk.bf16.gmra.mrb[52].mxu1 %vm263_vm1, %v735_v63  ;;  %2925 = vmatmul.mubr.msk.bf16.gmra.mrb[12].mxu0 %vm263_vm1, %v735_v63  ;;  %v4052_v63 = vld [vmem:[%s3746_s4 + $0x8] sm:$0xf] }
  0x7b   : > { %3273 = vmatprep.mubr.msk.bf16.mxu1 %vm3684_vm0, %v3683_v1  ;;  %858 = vmatprep.mubr.bf16.mxu0 %v3685_v5 }
  0x82   : > { %3274 = vmatmul.mubr.msk.bf16.gmra.mrb[56].mxu1 %vm263_vm1, %v738_v2  ;;  %2926 = vmatmul.mubr.msk.bf16.gmra.mrb[24].mxu0 %vm263_vm1, %v738_v2 }
  0x83   : > { %3281 = vmatprep.mubr.msk.bf16.mxu1 %vm3684_vm0, %v3683_v1  ;;  %1087 = vmatprep.mubr.bf16.mxu0 %v3685_v5 }
  0x8a   : > { %3282 = vmatmul.mubr.msk.bf16.vlgmr.msra.gmra.mrb[60].mxu1 %vm263_vm1, %v3609_v3  ;;  %2960 = vmatmul.mubr.msk.bf16.vlgmr.msra.gmra.mrb[0].mxu0 %vm263_vm1, %v3609_v3 }
  0x8b   : > { %1325 = vmatpush1.bf16.msra.mxu0 %v3610_v4  ;;  %3302 = vmatpush3.bf16.msra.mxu1 %v3613_v6  ;;  %v1583_v4 = vsel %vm699_vm2, %v1578_v60, %v1582_v61  ;;  %v3055_v6 = vcombine.low %v1814_v62, %v4052_v63  ;;  %v1890_v60 = vshll.u32 %v4131_v51, 16 }
  0x8c   : > { %3285 = vmatprep.mubr.msk.bf16.mxu1 %vm3684_vm0, %v3683_v1  ;;  %1097 = vmatprep.mubr.bf16.mxu0 %v3685_v5 }
  0x8d   : > { %1326 = vmatprep.subr.bf16.mxu0 %v3618_v7  ;;  %3303 = vmatprep.subr.bf16.mxu1 %v3683_v1 }
  0x8f   : > { %1327 = vmatpush1.bf16.msra.mxu0 %v3616_v8  ;;  %3304 = vmatpush3.bf16.msra.mxu1 %v3619_v9  ;;  %v1584_v8 = vshrl.u32 %v3647_v52, 16  ;;  %v4066_v9 = vld [vmem:[%s3746_s4 + $0xc] sm:$0xff]  }
  0x90   : > { %1634 = vmatprep.subr.bf16.mxu0 %v3625_v10  ;;  %3325 = vmatprep.subr.bf16.mxu1 %v3683_v1  ;;  %v1861_v10 = vshll.u32 %v3055_v6, 16 }
  0x92   : > { %3286 = vmatmul.mubr.msk.bf16.gmra.mrb[64].mxu1 %vm263_vm1, %v3614_v11  ;;  %2961 = vmatmul.mubr.msk.bf16.gmra.mrb[4].mxu0 %vm263_vm1, %v3614_v11 }
  0x93   : > { %3289 = vmatprep.mubr.msk.bf16.mxu1 %vm3684_vm0, %v3683_v1  ;;  %1107 = vmatprep.mubr.bf16.mxu0 %v3685_v5 }
  0x9a   : > { %3290 = vmatmul.mubr.msk.bf16.gmra.mrb[68].mxu1 %vm263_vm1, %v3615_v12  ;;  %2962 = vmatmul.mubr.msk.bf16.gmra.mrb[8].mxu0 %vm263_vm1, %v3615_v12 }
  0x9b   : > { %3293 = vmatprep.mubr.msk.bf16.mxu1 %vm3684_vm0, %v3683_v1  ;;  %1117 = vmatprep.mubr.bf16.mxu0 %v3685_v5 }
  0xa2   : > { %3294 = vmatmul.mubr.msk.bf16.gmra.mrb[72].mxu1 %vm263_vm1, %v3620_v13  ;;  %2963 = vmatmul.mubr.msk.bf16.gmra.mrb[12].mxu0 %vm263_vm1, %v3620_v13  ;;  %v1586_v13 = vor.u32 %v1584_v8, %v1582_v61 }
  0xa3   : > { %3297 = vmatprep.mubr.msk.bf16.mxu1 %vm3684_vm0, %v3683_v1  ;;  %1127 = vmatprep.mubr.bf16.mxu0 %v3685_v5 }
  0xaa   : > { %3298 = vmatmul.mubr.msk.bf16.gmra.mrb[76].mxu1 %vm263_vm1, %v3621_v14  ;;  %2964 = vmatmul.mubr.msk.bf16.gmra.mrb[28].mxu0 %vm263_vm1, %v3621_v14 }
  0xab   : > { %3305 = vmatprep.mubr.msk.bf16.mxu1 %vm3684_vm0, %v3683_v1  ;;  %1356 = vmatprep.mubr.bf16.mxu0 %v3685_v5 }
  0xb2   : > { %3306 = vmatmul.mubr.msk.bf16.vlgmr.msra.gmra.mrb[80].mxu1 %vm263_vm1, %v3622_v15  ;;  %2998 = vmatmul.mubr.msk.bf16.vlgmr.msra.gmra.mrb[0].mxu0 %vm263_vm1, %v3622_v15  ;;  %v1859_v15 = vshrl.u32 %v3055_v6, 16 }
  0xb3   : > { %1635 = vmatpush1.bf16.msra.mxu0 %v3623_v16  ;;  %3326 = vmatpush3.bf16.msra.mxu1 %v3626_v17  ;;  %v1863_v16 = vrot.slane %v1861_v10, 1  ;;  %v1866_v17 = vshll.u32 %v4066_v9, 16  ;;  %v3661_v10 = vld [vmem:[%s3746_s4 + $0x30] sm:$0xff]  }
  0xb4   : > { %3309 = vmatprep.mubr.msk.bf16.mxu1 %vm3684_vm0, %v3683_v1  ;;  %1366 = vmatprep.mubr.bf16.mxu0 %v3685_v5 }
  0xb5   : > { %1636 = vmatprep.subr.bf16.mxu0 %v3631_v18  ;;  %3327 = vmatprep.subr.bf16.mxu1 %v3683_v1 }
  0xb7   : > { %1637 = vmatpush1.bf16.msra.mxu0 %v3629_v19  ;;  %3328 = vmatpush3.bf16.msra.mxu1 %v3632_v20  ;;  %v1864_v19 = vor.u32 %v1863_v16, %v1859_v15  ;;  %v1868_v20 = vrot.slane %v1866_v17, 1  ;;  %v1894_v15 = vshrl.u32 %v4131_v51, 16  ;;  %v2171_v16 = vshll.u32 %v3661_v10, 16 }
  0xb8   : > { %1944 = vmatprep.subr.bf16.mxu0 %v3639_v21  ;;  %3349 = vmatprep.subr.bf16.mxu1 %v3683_v1  ;;  %v4079_v21 = vld [vmem:[%s3746_s4 + $0x14] sm:$0xff]  }
  0xb9   : > { %v1869_v26 = vsel %vm699_vm2, %v1864_v19, %v1868_v20  ;;  %v1874_v29 = vshll.u32 %v4079_v21, 16 }
  0xba   : > { %3310 = vmatmul.mubr.msk.bf16.gmra.mrb[84].mxu1 %vm263_vm1, %v3627_v22  ;;  %2999 = vmatmul.mubr.msk.bf16.gmra.mrb[4].mxu0 %vm263_vm1, %v3627_v22 }
  0xbb   : > { %3313 = vmatprep.mubr.msk.bf16.mxu1 %vm3684_vm0, %v3683_v1  ;;  %1376 = vmatprep.mubr.bf16.mxu0 %v3685_v5  ;;  %v1876_v33 = vrot.slane %v1874_v29, 1 }
  0xc2   : > { %3314 = vmatmul.mubr.msk.bf16.gmra.mrb[88].mxu1 %vm263_vm1, %v3628_v23  ;;  %3000 = vmatmul.mubr.msk.bf16.gmra.mrb[8].mxu0 %vm263_vm1, %v3628_v23 }
  0xc3   : > { %3317 = vmatprep.mubr.msk.bf16.mxu1 %vm3684_vm0, %v3683_v1  ;;  %1386 = vmatprep.mubr.bf16.mxu0 %v3685_v5 }
  0xca   : > { %3318 = vmatmul.mubr.msk.bf16.gmra.mrb[92].mxu1 %vm263_vm1, %v3633_v24  ;;  %3001 = vmatmul.mubr.msk.bf16.gmra.mrb[12].mxu0 %vm263_vm1, %v3633_v24  ;;  %v3650_v24 = vld [vmem:[%s4397_s1 + $0x150] ss:$12 sps:$4 sm:$0xff]  }
  0xcb   : > { %3321 = vmatprep.mubr.msk.bf16.mxu1 %vm3684_vm0, %v3683_v1  ;;  %1396 = vmatprep.mubr.bf16.mxu0 %v3685_v5 }
  0xd2   : > { %3322 = vmatmul.mubr.msk.bf16.gmra.mrb[96].mxu1 %vm263_vm1, %v3634_v28  ;;  %3002 = vmatmul.mubr.msk.bf16.gmra.mrb[32].mxu0 %vm263_vm1, %v3634_v28  ;;  %v1870_v28 = vshrl.u32 %v4066_v9, 16 }
  0xd3   : > { %3329 = vmatprep.mubr.msk.bf16.mxu1 %vm3684_vm0, %v3683_v1  ;;  %1666 = vmatprep.mubr.bf16.mxu0 %v3685_v5 }
  0xd4   : > { %v1872_v32 = vor.u32 %v1870_v28, %v1868_v20 }
  0xda   : > { %3330 = vmatmul.mubr.msk.bf16.vlgmr.msra.gmra.mrb[100].mxu1 %vm263_vm1, %v1559_v35  ;;  %3037 = vmatmul.mubr.msk.bf16.vlgmr.msra.gmra.mrb[0].mxu0 %vm263_vm1, %v1559_v35  ;;  %v3656_v35 = vld [vmem:[%s4397_s1 + $0x168] ss:$12 sps:$4 sm:$0xff]  }
  0xdb   : > { %1945 = vmatpush1.bf16.msra.mxu0 %v3637_v36  ;;  %3350 = vmatpush3.bf16.msra.mxu1 %v3640_v37  ;;  %v3659_v36 = vld [vmem:[%s4397_s1 + $0x170] ss:$12 sps:$4 sm:$0xff]  }
  0xdc   : > { %3333 = vmatprep.mubr.msk.bf16.mxu1 %vm3684_vm0, %v3683_v1  ;;  %1676 = vmatprep.mubr.bf16.mxu0 %v3685_v5  ;;  %v3665_v37 = vld [vmem:[%s4397_s1 + $0x184] ss:$12 sps:$4 sm:$0xff]  }
  0xdd   : > { %1946 = vmatprep.subr.bf16.mxu0 %v3645_v40  ;;  %3351 = vmatprep.subr.bf16.mxu1 %v3683_v1 }
  0xdf   : > { %1947 = vmatpush1.bf16.msra.mxu0 %v3643_v44  ;;  %3352 = vmatpush3.bf16.msra.mxu1 %v3646_v45  ;;  %v1877_v44 = vsel %vm699_vm2, %v1872_v32, %v1876_v33  ;;  %v1878_v45 = vshrl.u32 %v4079_v21, 16 }
  0xe0   : > { %2254 = vmatprep.subr.bf16.mxu0 %v3652_v46  ;;  %3373 = vmatprep.subr.bf16.mxu1 %v3683_v1  ;;  %v1882_v46 = vshll.u32 %v4100_v34, 16 }
  0xe1   : > { %v1880_v49 = vor.u32 %v1878_v45, %v1876_v33 }
  0xe2   : > { %3334 = vmatmul.mubr.msk.bf16.gmra.mrb[104].mxu1 %vm263_vm1, %v1567_v47  ;;  %3038 = vmatmul.mubr.msk.bf16.gmra.mrb[4].mxu0 %vm263_vm1, %v1567_v47  ;;  %v1884_v50 = vrot.slane %v1882_v46, 1 }
  0xe3   : > { %3337 = vmatprep.mubr.msk.bf16.mxu1 %vm3684_vm0, %v3683_v1  ;;  %1686 = vmatprep.mubr.bf16.mxu0 %v3685_v5 }
  0xe4   : > { %v1885_v58 = vsel %vm699_vm2, %v1880_v49, %v1884_v50 }
  0xe5   : > { %v4040_v53 = vpop.f32.mrb[0].mxu1 }
  0xe6   : > { %v3211_v54 = vpop.f32.mrb[1].mxu1 }
  0xe7   : > { %v4042_v55 = vpop.f32.mrb[2].mxu1 }
  0xe8   : > { %v3212_v59 = vpop.f32.mrb[3].mxu1 }
  0xe9   : > { %v1886_v59 = vshrl.u32 %v4100_v34, 16 }
  0xea   : > { %3338 = vmatmul.mubr.msk.bf16.gmra.mrb[108].mxu1 %vm263_vm1, %v1575_v56  ;;  %3039 = vmatmul.mubr.msk.bf16.gmra.mrb[8].mxu0 %vm263_vm1, %v1575_v56 }
  0xeb   : > { %3341 = vmatprep.mubr.msk.bf16.mxu1 %vm3684_vm0, %v3683_v1  ;;  %1696 = vmatprep.mubr.bf16.mxu0 %v3685_v5 }
  0xed   : > { %v4054_v0 = vpop.f32.mrb[4].mxu1 }
  0xee   : > { %v3215_v2 = vpop.f32.mrb[5].mxu1 }
  0xef   : > { %v4056_v3 = vpop.f32.mrb[6].mxu1  ;;  %v1892_v2 = vrot.slane %v1890_v60, 1 }
  0xf0   : > { %v3216_v7 = vpop.f32.mrb[7].mxu1 }
  0xf1   : > { %v1896_v19 = vor.u32 %v1894_v15, %v1892_v2 }
  0xf2   : > { %3342 = vmatmul.mubr.msk.bf16.gmra.mrb[112].mxu1 %vm263_vm1, %v1583_v4  ;;  %3040 = vmatmul.mubr.msk.bf16.gmra.mrb[12].mxu0 %vm263_vm1, %v1583_v4 }
  0xf3   : > { %3345 = vmatprep.mubr.msk.bf16.mxu1 %vm3684_vm0, %v3683_v1  ;;  %1706 = vmatprep.mubr.bf16.mxu0 %v3685_v5 }
  0xf5   : > { %v4068_v11 = vpop.f32.mrb[8].mxu1 }
  0xf6   : > { %v3219_v12 = vpop.f32.mrb[9].mxu1 }
  0xf7   : > { %v4070_v14 = vpop.f32.mrb[10].mxu1 }
  0xf8   : > { %v3220_v18 = vpop.f32.mrb[11].mxu1 }
  0xfa   : > { %3346 = vmatmul.mubr.msk.bf16.gmra.mrb[116].mxu1 %vm263_vm1, %v1586_v13  ;;  %3041 = vmatmul.mubr.msk.bf16.gmra.mrb[36].mxu0 %vm263_vm1, %v1586_v13 }
  0xfb   : > { %3353 = vmatprep.mubr.msk.bf16.mxu1 %vm3684_vm0, %v3683_v1  ;;  %1976 = vmatprep.mubr.bf16.mxu0 %v3685_v5 }
  0xfd   : > { %v4081_v22 = vpop.f32.mrb[12].mxu1 }
  0xfe   : > { %v3223_v23 = vpop.f32.mrb[13].mxu1 }
  0xff   : > { %v4086_v25 = vpop.f32.mrb[14].mxu1  ;;  %v2169_v23 = vshrl.u32 %v3661_v10, 16 }
 0x100   : > { %v3224_v30 = vpop.f32.mrb[15].mxu1 }
 0x101   : > { %v3667_v30 = vld [vmem:[%s3746_s4 + $0x40] sm:$0xff]  }
 0x102   : > { %3354 = vmatmul.mubr.msk.bf16.vlgmr.msra.gmra.mrb[120].mxu1 %vm263_vm1, %v1869_v26  ;;  %3066 = vmatmul.mubr.msk.bf16.vlgmr.msra.gmra.mrb[0].mxu0 %vm263_vm1, %v1869_v26 }
 0x103   : > { %2255 = vmatpush1.bf16.msra.mxu0 %v3650_v24  ;;  %3374 = vmatpush3.bf16.msra.mxu1 %v3653_v27  ;;  %v2173_v24 = vrot.slane %v2171_v16, 1 }
 0x104   : > { %3357 = vmatprep.mubr.msk.bf16.mxu1 %vm3684_vm0, %v3683_v1  ;;  %1986 = vmatprep.mubr.bf16.mxu0 %v3685_v5 }
 0x105   : > { %v4114_v38 = vpop.f32.mrb[16].mxu1  ;;  %v4116_v39 = vpop.f32.mrb[16].mxu0  ;;  %2256 = vmatprep.subr.bf16.mxu0 %v3658_v31  ;;  %3375 = vmatprep.subr.bf16.mxu1 %v3683_v1 }
 0x106   : > { %v3227_v40 = vpop.f32.mrb[17].mxu1  ;;  %v4119_v41 = vpop.f32.mrb[17].mxu0 }
 0x107   : > { %v429_v42 = vpop.f32.mrb[18].mxu1  ;;  %v357_v43 = vpop.f32.mrb[18].mxu0  ;;  %2257 = vmatpush1.bf16.msra.mxu0 %v3656_v35  ;;  %3376 = vmatpush3.bf16.msra.mxu1 %v3659_v36 }
 0x108   : > { %v3228_v47 = vpop.f32.mrb[19].mxu1  ;;  %v358_v48 = vpop.f32.mrb[19].mxu0  ;;  %2504 = vmatprep.subr.bf16.mxu0 %v3665_v37  ;;  %3397 = vmatprep.subr.bf16.mxu1 %v3683_v1  ;;  %v3666_v37 = vld [vmem:[%s4397_s1 + $0x188] ss:$12 sps:$4 sm:$0xff]   ;;  %v2184_v42 = vshll.u32 %v3667_v30, 16 }
 0x109   : > { %v3668_v47 = vld [vmem:[%s3746_s4 + $0x48] sm:$0xff]   ;;  %v3669_v48 = vld [vmem:[%s4397_s1 + $0x198] ss:$12 sps:$4 sm:$0xff]  }
 0x10a   : > { %3358 = vmatmul.mubr.msk.bf16.gmra.mrb[124].mxu1 %vm263_vm1, %v1877_v44  ;;  %3067 = vmatmul.mubr.msk.bf16.gmra.mrb[4].mxu0 %vm263_vm1, %v1877_v44  ;;  %v3671_v44 = vld [vmem:[%s4397_s1 + $0x19c] ss:$12 sps:$4 sm:$0xff]   ;;  %v2186_v46 = vrot.slane %v2184_v42, 1  ;;  %v2196_v16 = vshrl.u32 %v3668_v47, 16  ;;  %v2449_v42 = vrot.slane %v4066_v9, 1  ;;  %v2451_v9 = vrot.slane %v4079_v21, 1 }
 0x10b   : > { %3361 = vmatprep.mubr.msk.bf16.mxu1 %vm3684_vm0, %v3683_v1  ;;  %1996 = vmatprep.mubr.bf16.mxu0 %v3685_v5  ;;  %v2453_v21 = vrot.slane %v4100_v34, 1  ;;  %v2455_v34 = vrot.slane %v4131_v51, 1 }
 0x10d   : > { %v617_v52 = vpop.f32.mrb[20].mxu1 }
 0x10e   : > { %v4134_v54 = vadd.f32 %v617_v52, %v4040_v53  ;;  %v3235_v56 = vpop.f32.mrb[21].mxu1  ;;  %v1888_v53 = vor.u32 %v1886_v59, %v1884_v50 }
 0x10f   : > { %v620_v57 = vpop.f32.mrb[22].mxu1 }
 0x110   : > { %v4140_v61 = vadd.f32 %v620_v57, %v4042_v55  ;;  %v3236_v62 = vpop.f32.mrb[23].mxu1  ;;  %v1893_v8 = vsel %vm699_vm2, %v1888_v53, %v1892_v2  ;;  %v2188_v2 = vshrl.u32 %v3667_v30, 16 }
 0x112   : > { %3362 = vmatmul.mubr.msk.bf16.gmra.mrb[128].mxu1 %vm263_vm1, %v1885_v58  ;;  %3068 = vmatmul.mubr.msk.bf16.gmra.mrb[8].mxu0 %vm263_vm1, %v1885_v58 }
 0x113   : > { %3365 = vmatprep.mubr.msk.bf16.mxu1 %vm3684_vm0, %v3683_v1  ;;  %2006 = vmatprep.mubr.bf16.mxu0 %v3685_v5 }
 0x115   : > { %v625_v4 = vpop.f32.mrb[24].mxu1 }
 0x116   : > { %v4148_v6 = vadd.f32 %v625_v4, %v4054_v0  ;;  %v3239_v7 = vpop.f32.mrb[25].mxu1  ;;  %v3662_v0 = vld [vmem:[%s3746_s4 + $0x38] sm:$0xff]   ;;  %v2192_v4 = vshll.u32 %v3668_v47, 16 }
 0x117   : > { %v628_v55 = vpop.f32.mrb[26].mxu1  ;;  %v2176_v26 = vshll.u32 %v3662_v0, 16  ;;  %v2180_v40 = vshrl.u32 %v3662_v0, 16 }
 0x118   : > { %v4153_v12 = vadd.f32 %v628_v55, %v4056_v3  ;;  %v3240_v13 = vpop.f32.mrb[27].mxu1  ;;  %v3673_v55 = vld [vmem:[%s3746_s4 + $0x50] sm:$0x1f]  }
 0x119   : > { %v2178_v29 = vrot.slane %v2176_v26, 1  ;;  %v2204_v30 = vshrl.u32 %v3673_v55, 16 }
 0x11a   : > { %3366 = vmatmul.mubr.msk.bf16.gmra.mrb[132].mxu1 %vm263_vm1, %v1893_v8  ;;  %3069 = vmatmul.mubr.msk.bf16.gmra.mrb[12].mxu0 %vm263_vm1, %v1893_v8 }
 0x11b   : > { %3369 = vmatprep.mubr.msk.bf16.mxu1 %vm3684_vm0, %v3683_v1  ;;  %2016 = vmatprep.mubr.bf16.mxu0 %v3685_v5  ;;  %v2182_v45 = vor.u32 %v2180_v40, %v2178_v29 }
 0x11d   : > { %v633_v17 = vpop.f32.mrb[28].mxu1  ;;  %v2187_v53 = vsel %vm699_vm2, %v2182_v45, %v2186_v46 }
 0x11e   : > { %v4163_v18 = vadd.f32 %v633_v17, %v4068_v11  ;;  %v3243_v3 = vpop.f32.mrb[29].mxu1  ;;  %v2174_v11 = vor.u32 %v2173_v24, %v2169_v23  ;;  %v2200_v17 = vshll.u32 %v3673_v55, 16 }
 0x11f   : > { %v636_v20 = vpop.f32.mrb[30].mxu1 }
 0x120   : > { %v4166_v27 = vadd.f32 %v636_v20, %v4070_v14  ;;  %v3244_v28 = vpop.f32.mrb[31].mxu1  ;;  %v3663_v14 = vld [vmem:[%s4397_s1 + $0x180] ss:$12 sps:$4 sm:$0xff]   ;;  %v2179_v36 = vsel %vm699_vm2, %v2174_v11, %v2178_v29  ;;  %v2202_v20 = vrot.slane %v2200_v17, 1 }
 0x122   : > { %3370 = vmatmul.mubr.msk.bf16.gmra.mrb[136].mxu1 %vm263_vm1, %v1896_v19  ;;  %3070 = vmatmul.mubr.msk.bf16.gmra.mrb[40].mxu0 %vm263_vm1, %v1896_v19 }
 0x123   : > { %3377 = vmatprep.mubr.msk.bf16.mxu1 %vm3684_vm0, %v3683_v1  ;;  %2286 = vmatprep.mubr.bf16.mxu0 %v3685_v5 }
 0x125   : > { %v641_v31 = vpop.f32.mrb[32].mxu1 }
 0x126   : > { %v4175_v32 = vadd.f32 %v641_v31, %v4081_v22  ;;  %v3247_v33 = vpop.f32.mrb[33].mxu1 }
 0x127   : > { %v644_v35 = vpop.f32.mrb[34].mxu1 }
 0x128   : > { %v4185_v43 = vadd.f32 %v644_v35, %v4086_v25  ;;  %v3248_v22 = vpop.f32.mrb[35].mxu1  ;;  %v3672_v25 = vld [vmem:[%s4397_s1 + $0x1a0] ss:$12 sps:$4 sm:$0xff]   ;;  %v2206_v35 = vor.u32 %v2204_v30, %v2202_v20 }
 0x12a   : > { %3378 = vmatmul.mubr.msk.bf16.vlgmr.msra.gmra.mrb[140].mxu1 %vm263_vm1, %v2179_v36  ;;  %3105 = vmatmul.mubr.msk.bf16.vlgmr.msra.gmra.mrb[0].mxu0 %vm263_vm1, %v2179_v36 }
 0x12b   : > { %2505 = vmatpush1.bf16.msra.mxu0 %v3663_v14  ;;  %3398 = vmatpush3.bf16.msra.mxu1 %v3666_v37 }
 0x12c   : > { %3381 = vmatprep.mubr.msk.bf16.mxu1 %vm3684_vm0, %v3683_v1  ;;  %2296 = vmatprep.mubr.bf16.mxu0 %v3685_v5 }
 0x12d   : > { %v649_v49 = vpop.f32.mrb[36].mxu1  ;;  %v576_v50 = vpop.f32.mrb[20].mxu0  ;;  %2506 = vmatprep.subr.bf16.mxu0 %v3671_v44  ;;  %3399 = vmatprep.subr.bf16.mxu1 %v3683_v1 }
 0x12e   : > { %v4204_v52 = vadd.f32 %v649_v49, %v4114_v38  ;;  %v4207_v56 = vadd.f32 %v576_v50, %v4116_v39  ;;  %v3251_v57 = vpop.f32.mrb[37].mxu1  ;;  %v578_v58 = vpop.f32.mrb[21].mxu0  ;;  %v2190_v39 = vor.u32 %v2188_v2, %v2186_v46 }
 0x12f   : > { %v4210_v59 = vadd.f32 %v578_v58, %v4119_v41  ;;  %v652_v60 = vpop.f32.mrb[38].mxu1  ;;  %v580_v62 = vpop.f32.mrb[22].mxu0  ;;  %2507 = vmatpush1.bf16.msra.mxu0 %v3669_v48  ;;  %3400 = vmatpush3.bf16.msra.mxu1 %v3672_v25  ;;  %v2194_v41 = vrot.slane %v2192_v4, 1 }
 0x130   : > { %v3252_v7 = vpop.f32.mrb[39].mxu1  ;;  %v581_v38 = vpop.f32.mrb[23].mxu0  ;;  %v2452_v62 = vsel %vm2447_vm3, %v2449_v42, %v2451_v9 }
 0x131   : > { %v2195_v0 = vsel %vm699_vm2, %v2190_v39, %v2194_v41  ;;  %v2454_v7 = vsel %vm2447_vm3, %v2451_v9, %v2453_v21 }
 0x132   : > { %3382 = vmatmul.mubr.msk.bf16.gmra.mrb[144].mxu1 %vm263_vm1, %v2187_v53  ;;  %3106 = vmatmul.mubr.msk.bf16.gmra.mrb[4].mxu0 %vm263_vm1, %v2187_v53 }
 0x133   : > { %3385 = vmatprep.mubr.msk.bf16.mxu1 %vm3684_vm0, %v3683_v1  ;;  %2306 = vmatprep.mubr.bf16.mxu0 %v3685_v5 }
 0x135   : > { %v901_v8 = vpop.f32.mrb[40].mxu1 }
 0x136   : > { %v4220_v10 = vadd.f32 %v901_v8, %v4134_v54  ;;  %v3259_v13 = vpop.f32.mrb[41].mxu1  ;;  %v2198_v54 = vor.u32 %v2196_v16, %v2194_v41 }
 0x137   : > { %v904_v15 = vpop.f32.mrb[42].mxu1  ;;  %v2456_v13 = vsel %vm2447_vm3, %v2453_v21, %v2455_v34 }
 0x138   : > { %v4224_v3 = vadd.f32 %v904_v15, %v4140_v61  ;;  %v3260_v19 = vpop.f32.mrb[43].mxu1  ;;  %v2203_v28 = vsel %vm699_vm2, %v2198_v54, %v2202_v20 }
 0x13a   : > { %3386 = vmatmul.mubr.msk.bf16.gmra.mrb[148].mxu1 %vm263_vm1, %v2195_v0  ;;  %3107 = vmatmul.mubr.msk.bf16.gmra.mrb[8].mxu0 %vm263_vm1, %v2195_v0 }
 0x13b   : > { %3389 = vmatprep.mubr.msk.bf16.mxu1 %vm3684_vm0, %v3683_v1  ;;  %2316 = vmatprep.mubr.bf16.mxu0 %v3685_v5 }
 0x13d   : > { %v909_v23 = vpop.f32.mrb[44].mxu1 }
 0x13e   : > { %v4232_v24 = vadd.f32 %v909_v23, %v4148_v6  ;;  %v3263_v26 = vpop.f32.mrb[45].mxu1  ;;  %v2434_v6 = vld [vmem:[%s3746_s4 + $0x4] sm:$0xe] }
 0x13f   : > { %v912_v61 = vpop.f32.mrb[46].mxu1  ;;  %v3123_v36 = vcombine.low %v2434_v6, %v4052_v63 }
 0x140   : > { %v4236_v11 = vadd.f32 %v912_v61, %v4153_v12  ;;  %v3264_v29 = vpop.f32.mrb[47].mxu1 }
 0x142   : > { %3390 = vmatmul.mubr.msk.bf16.gmra.mrb[152].mxu1 %vm263_vm1, %v2203_v28  ;;  %3108 = vmatmul.mubr.msk.bf16.gmra.mrb[12].mxu0 %vm263_vm1, %v2203_v28 }
 0x143   : > { %3393 = vmatprep.mubr.msk.bf16.mxu1 %vm3684_vm0, %v3683_v1  ;;  %2326 = vmatprep.mubr.bf16.mxu0 %v3685_v5 }
 0x145   : > { %v917_v31 = vpop.f32.mrb[48].mxu1 }
 0x146   : > { %v4245_v33 = vadd.f32 %v917_v31, %v4163_v18  ;;  %v3267_v14 = vpop.f32.mrb[49].mxu1  ;;  %v2448_v18 = vrot.slane %v3123_v36, 1 }
 0x147   : > { %v920_v12 = vpop.f32.mrb[50].mxu1 }
 0x148   : > { %v4249_v37 = vadd.f32 %v920_v12, %v4166_v27  ;;  %v3268_v40 = vpop.f32.mrb[51].mxu1  ;;  %v2450_v45 = vsel %vm2447_vm3, %v2448_v18, %v2449_v42 }
 0x14a   : > { %3394 = vmatmul.mubr.msk.bf16.gmra.mrb[156].mxu1 %vm263_vm1, %v2206_v35  ;;  %3109 = vmatmul.mubr.msk.bf16.gmra.mrb[44].mxu0 %vm263_vm1, %v2206_v35 }
 0x14b   : > { %3401 = vmatprep.mubr.msk.bf16.mxu1 %vm3684_vm0, %v3683_v1  ;;  %2536 = vmatprep.mubr.bf16.mxu0 %v3685_v5 }
 0x14d   : > { %v925_v22 = vpop.f32.mrb[52].mxu1 }
 0x14e   : > { %v959_v63 = vadd.f32 %v925_v22, %v4175_v32  ;;  %v3271_v44 = vpop.f32.mrb[53].mxu1 }
 0x14f   : > { %v928_v27 = vpop.f32.mrb[54].mxu1 }
 0x150   : > { %v962_v46 = vadd.f32 %v928_v27, %v4185_v43  ;;  %v3272_v47 = vpop.f32.mrb[55].mxu1 }
 0x152   : > { %3402 = vmatmul.mubr.msk.bf16.vlgmr.msra.gmra.mrb[160].mxu1 %vm263_vm1, %v2450_v45  ;;  %3130 = vmatmul.mubr.msk.bf16.vlgmr.msra.gmra.mrb[0].mxu0 %vm263_vm1, %v2450_v45 }
 0x153   : > { %3405 = vmatprep.mubr.msk.bf16.mxu1 %vm3684_vm0, %v3683_v1  ;;  %2546 = vmatprep.mubr.bf16.mxu0 %v3685_v5 }
 0x155   : > { %v933_v48 = vpop.f32.mrb[56].mxu1  ;;  %v860_v32 = vpop.f32.mrb[24].mxu0 }
 0x156   : > { %v965_v25 = vadd.f32 %v933_v48, %v4204_v52  ;;  %v963_v49 = vadd.f32 %v860_v32, %v4207_v56  ;;  %v3275_v50 = vpop.f32.mrb[57].mxu1  ;;  %v862_v43 = vpop.f32.mrb[25].mxu0 }
 0x157   : > { %v964_v57 = vadd.f32 %v862_v43, %v4210_v59  ;;  %v936_v58 = vpop.f32.mrb[58].mxu1  ;;  %v864_v60 = vpop.f32.mrb[26].mxu0 }
 0x158   : > { %v3276_v53 = vpop.f32.mrb[59].mxu1  ;;  %v865_v2 = vpop.f32.mrb[27].mxu0 }
 0x15a   : > { %3406 = vmatmul.mubr.msk.bf16.gmra.mrb[164].mxu1 %vm263_vm1, %v2452_v62  ;;  %3131 = vmatmul.mubr.msk.bf16.gmra.mrb[4].mxu0 %vm263_vm1, %v2452_v62 }
 0x15b   : > { %3409 = vmatprep.mubr.msk.bf16.mxu1 %vm3684_vm0, %v3683_v1  ;;  %2556 = vmatprep.mubr.bf16.mxu0 %v3685_v5 }
 0x15d   : > { %v1170_v52 = vpop.f32.mrb[60].mxu1 }
 0x15e   : > { %v1210_v56 = vadd.f32 %v1170_v52, %v4220_v10  ;;  %v3283_v59 = vpop.f32.mrb[61].mxu1 }
 0x15f   : > { %v1173_v4 = vpop.f32.mrb[62].mxu1 }
 0x160   : > { %v1213_v38 = vadd.f32 %v1173_v4, %v4224_v3  ;;  %v3284_v39 = vpop.f32.mrb[63].mxu1 }
 0x162   : > { %3410 = vmatmul.mubr.msk.bf16.gmra.mrb[168].mxu1 %vm263_vm1, %v2454_v7  ;;  %3132 = vmatmul.mubr.msk.bf16.gmra.mrb[8].mxu0 %vm263_vm1, %v2454_v7 }
 0x163   : > { %3413 = vmatprep.mubr.msk.bf16.mxu1 %vm3684_vm0, %v3683_v1  ;;  %2566 = vmatprep.mubr.bf16.mxu0 %v3685_v5 }
 0x165   : > { %v1178_v41 = vpop.f32.mrb[64].mxu1 }
 0x166   : > { %v1216_v55 = vadd.f32 %v1178_v41, %v4232_v24  ;;  %v3287_v8 = vpop.f32.mrb[65].mxu1 }
 0x167   : > { %v1181_v10 = vpop.f32.mrb[66].mxu1 }
 0x168   : > { %v1219_v15 = vadd.f32 %v1181_v10, %v4236_v11  ;;  %v3288_v0 = vpop.f32.mrb[67].mxu1 }
 0x16a   : > { %3414 = vmatmul.mubr.msk.bf16.gmra.mrb[172].mxu1 %vm263_vm1, %v2456_v13  ;;  %3133 = vmatmul.mubr.msk.bf16.gmra.mrb[12].mxu0 %vm263_vm1, %v2456_v13 }
 0x16b   : > { %3417 = vmatprep.mubr.msk.bf16.mxu1 %vm3684_vm0, %v3683_v1  ;;  %2576 = vmatprep.mubr.bf16.mxu0 %v3685_v5 }
 0x16d   : > { %v1186_v51 = vpop.f32.mrb[68].mxu1 }
 0x16e   : > { %v1222_v16 = vadd.f32 %v1186_v51, %v4245_v33  ;;  %v3291_v17 = vpop.f32.mrb[69].mxu1 }
 0x16f   : > { %v1189_v3 = vpop.f32.mrb[70].mxu1 }
 0x170   : > { %v1225_v19 = vadd.f32 %v1189_v3, %v4249_v37  ;;  %v3292_v54 = vpop.f32.mrb[71].mxu1 }
 0x172   : > { %3418 = vmatmul.mubr.msk.bf16.gmra.mrb[176].mxu1 %vm263_vm1, %v2455_v34  ;;  %3134 = vmatmul.mubr.msk.bf16.gmra.mrb[48].mxu0 %vm263_vm1, %v2455_v34 }
 0x175   : > { %v1194_v20 = vpop.f32.mrb[72].mxu1 }
 0x176   : > { %v1228_v23 = vadd.f32 %v1194_v20, %v959_v63  ;;  %v3295_v24 = vpop.f32.mrb[73].mxu1 }
 0x177   : > { %v1197_v26 = vpop.f32.mrb[74].mxu1 }
 0x178   : > { %v1231_v61 = vadd.f32 %v1197_v26, %v962_v46  ;;  %v3296_v1 = vpop.f32.mrb[75].mxu1 }
 0x17d   : > { %v1202_v28 = vpop.f32.mrb[76].mxu1  ;;  %v1129_v5 = vpop.f32.mrb[28].mxu0 }
 0x17e   : > { %v1234_v11 = vadd.f32 %v1202_v28, %v965_v25  ;;  %v1232_v29 = vadd.f32 %v1129_v5, %v963_v49  ;;  %v3299_v30 = vpop.f32.mrb[77].mxu1  ;;  %v1131_v6 = vpop.f32.mrb[29].mxu0 }
 0x17f   : > { %v1233_v31 = vadd.f32 %v1131_v6, %v964_v57  ;;  %v1205_v33 = vpop.f32.mrb[78].mxu1  ;;  %v1133_v14 = vpop.f32.mrb[30].mxu0 }
 0x180   : > { %v3300_v35 = vpop.f32.mrb[79].mxu1  ;;  %v1134_v12 = vpop.f32.mrb[31].mxu0 }
 0x185   : > { %v1439_v36 = vpop.f32.mrb[80].mxu1 }
 0x186   : > { %v1479_v37 = vadd.f32 %v1439_v36, %v1210_v56  ;;  %v3307_v40 = vpop.f32.mrb[81].mxu1 }
 0x187   : > { %v1442_v18 = vpop.f32.mrb[82].mxu1 }
 0x188   : > { %v1482_v42 = vadd.f32 %v1442_v18, %v1213_v38  ;;  %v3308_v22 = vpop.f32.mrb[83].mxu1 }
 0x18d   : > { %v1447_v63 = vpop.f32.mrb[84].mxu1 }
 0x18e   : > { %v1485_v44 = vadd.f32 %v1447_v63, %v1216_v55  ;;  %v3311_v27 = vpop.f32.mrb[85].mxu1 }
 0x18f   : > { %v1450_v45 = vpop.f32.mrb[86].mxu1 }
 0x190   : > { %v1488_v46 = vadd.f32 %v1450_v45, %v1219_v15  ;;  %v3312_v47 = vpop.f32.mrb[87].mxu1 }
 0x195   : > { %v1455_v9 = vpop.f32.mrb[88].mxu1 }
 0x196   : > { %v1491_v48 = vadd.f32 %v1455_v9, %v1222_v16  ;;  %v3315_v32 = vpop.f32.mrb[89].mxu1 }
 0x197   : > { %v1458_v25 = vpop.f32.mrb[90].mxu1 }
 0x198   : > { %v1494_v49 = vadd.f32 %v1458_v25, %v1225_v19  ;;  %v3316_v50 = vpop.f32.mrb[91].mxu1 }
 0x19d   : > { %v1463_v43 = vpop.f32.mrb[92].mxu1 }
 0x19e   : > { %v1497_v57 = vadd.f32 %v1463_v43, %v1228_v23  ;;  %v3319_v58 = vpop.f32.mrb[93].mxu1 }
 0x19f   : > { %v1466_v60 = vpop.f32.mrb[94].mxu1 }
 0x1a0   : > { %v1500_v62 = vadd.f32 %v1466_v60, %v1231_v61  ;;  %v3320_v53 = vpop.f32.mrb[95].mxu1 }
 0x1a5   : > { %v1471_v2 = vpop.f32.mrb[96].mxu1  ;;  %v1398_v21 = vpop.f32.mrb[32].mxu0 }
 0x1a6   : > { %v1503_v52 = vadd.f32 %v1471_v2, %v1234_v11  ;;  %v1501_v56 = vadd.f32 %v1398_v21, %v1232_v29  ;;  %v3323_v59 = vpop.f32.mrb[97].mxu1  ;;  %v1400_v4 = vpop.f32.mrb[33].mxu0 }
 0x1a7   : > { %v1502_v7 = vadd.f32 %v1400_v4, %v1233_v31  ;;  %v1474_v38 = vpop.f32.mrb[98].mxu1  ;;  %v1402_v39 = vpop.f32.mrb[34].mxu0 }
 0x1a8   : > { %v3324_v34 = vpop.f32.mrb[99].mxu1  ;;  %v1403_v41 = vpop.f32.mrb[35].mxu0 }
 0x1ad   : > { %v1749_v55 = vpop.f32.mrb[100].mxu1 }
 0x1ae   : > { %v1789_v8 = vadd.f32 %v1749_v55, %v1479_v37  ;;  %v3331_v10 = vpop.f32.mrb[101].mxu1 }
 0x1af   : > { %v1752_v13 = vpop.f32.mrb[102].mxu1 }
 0x1b0   : > { %v1792_v15 = vadd.f32 %v1752_v13, %v1482_v42  ;;  %v3332_v0 = vpop.f32.mrb[103].mxu1 }
 0x1b5   : > { %v1757_v51 = vpop.f32.mrb[104].mxu1 }
 0x1b6   : > { %v1795_v16 = vadd.f32 %v1757_v51, %v1485_v44  ;;  %v3335_v17 = vpop.f32.mrb[105].mxu1 }
 0x1b7   : > { %v1760_v3 = vpop.f32.mrb[106].mxu1 }
 0x1b8   : > { %v1798_v19 = vadd.f32 %v1760_v3, %v1488_v46  ;;  %v3336_v54 = vpop.f32.mrb[107].mxu1 }
 0x1bd   : > { %v1765_v20 = vpop.f32.mrb[108].mxu1 }
 0x1be   : > { %v1801_v23 = vadd.f32 %v1765_v20, %v1491_v48  ;;  %v3339_v24 = vpop.f32.mrb[109].mxu1 }
 0x1bf   : > { %v1768_v26 = vpop.f32.mrb[110].mxu1 }
 0x1c0   : > { %v1804_v61 = vadd.f32 %v1768_v26, %v1494_v49  ;;  %v3340_v1 = vpop.f32.mrb[111].mxu1 }
 0x1c5   : > { %v1773_v28 = vpop.f32.mrb[112].mxu1 }
 0x1c6   : > { %v1807_v5 = vadd.f32 %v1773_v28, %v1497_v57  ;;  %v3343_v11 = vpop.f32.mrb[113].mxu1 }
 0x1c7   : > { %v1776_v29 = vpop.f32.mrb[114].mxu1 }
 0x1c8   : > { %v1810_v30 = vadd.f32 %v1776_v29, %v1500_v62  ;;  %v3344_v6 = vpop.f32.mrb[115].mxu1 }
 0x1cd   : > { %v1781_v31 = vpop.f32.mrb[116].mxu1  ;;  %v1708_v33 = vpop.f32.mrb[36].mxu0 }
 0x1ce   : > { %v1813_v14 = vadd.f32 %v1781_v31, %v1503_v52  ;;  %v1811_v35 = vadd.f32 %v1708_v33, %v1501_v56  ;;  %v3347_v12 = vpop.f32.mrb[117].mxu1  ;;  %v1710_v36 = vpop.f32.mrb[37].mxu0 }
 0x1cf   : > { %v1812_v37 = vadd.f32 %v1710_v36, %v1502_v7  ;;  %v1784_v40 = vpop.f32.mrb[118].mxu1  ;;  %v1712_v18 = vpop.f32.mrb[38].mxu0 }
 0x1d0   : > { %v3348_v42 = vpop.f32.mrb[119].mxu1  ;;  %v1713_v22 = vpop.f32.mrb[39].mxu0 }
 0x1d5   : > { %v2059_v63 = vpop.f32.mrb[120].mxu1 }
 0x1d6   : > { %v2099_v44 = vadd.f32 %v2059_v63, %v1789_v8  ;;  %v3355_v27 = vpop.f32.mrb[121].mxu1 }
 0x1d7   : > { %v2062_v45 = vpop.f32.mrb[122].mxu1 }
 0x1d8   : > { %v2102_v46 = vadd.f32 %v2062_v45, %v1792_v15  ;;  %v3356_v47 = vpop.f32.mrb[123].mxu1 }
 0x1dd   : > { %v2067_v9 = vpop.f32.mrb[124].mxu1 }
 0x1de   : > { %v2105_v48 = vadd.f32 %v2067_v9, %v1795_v16  ;;  %v3359_v32 = vpop.f32.mrb[125].mxu1 }
 0x1df   : > { %v2070_v25 = vpop.f32.mrb[126].mxu1 }
 0x1e0   : > { %v2108_v49 = vadd.f32 %v2070_v25, %v1798_v19  ;;  %v3360_v50 = vpop.f32.mrb[127].mxu1 }
 0x1e5   : > { %v2075_v43 = vpop.f32.mrb[128].mxu1 }
 0x1e6   : > { %v2111_v57 = vadd.f32 %v2075_v43, %v1801_v23  ;;  %v3363_v58 = vpop.f32.mrb[129].mxu1 }
 0x1e7   : > { %v2078_v60 = vpop.f32.mrb[130].mxu1 }
 0x1e8   : > { %v2114_v62 = vadd.f32 %v2078_v60, %v1804_v61  ;;  %v3364_v53 = vpop.f32.mrb[131].mxu1 }
 0x1ed   : > { %v2083_v2 = vpop.f32.mrb[132].mxu1 }
 0x1ee   : > { %v2117_v21 = vadd.f32 %v2083_v2, %v1807_v5  ;;  %v3367_v52 = vpop.f32.mrb[133].mxu1 }
 0x1ef   : > { %v2086_v56 = vpop.f32.mrb[134].mxu1 }
 0x1f0   : > { %v2120_v59 = vadd.f32 %v2086_v56, %v1810_v30  ;;  %v3368_v4 = vpop.f32.mrb[135].mxu1 }
 0x1f5   : > { %v2091_v7 = vpop.f32.mrb[136].mxu1  ;;  %v2018_v38 = vpop.f32.mrb[40].mxu0 }
 0x1f6   : > { %v2123_v39 = vadd.f32 %v2091_v7, %v1813_v14  ;;  %v2121_v34 = vadd.f32 %v2018_v38, %v1811_v35  ;;  %v3371_v41 = vpop.f32.mrb[137].mxu1  ;;  %v2020_v55 = vpop.f32.mrb[41].mxu0  ;;  %v2686_v35 = vlaneseq }
 0x1f7   : > { %v2122_v8 = vadd.f32 %v2020_v55, %v1812_v37  ;;  %v2094_v10 = vpop.f32.mrb[138].mxu1  ;;  %v2022_v13 = vpop.f32.mrb[42].mxu0 }
 0x1f8   : > { %v3372_v15 = vpop.f32.mrb[139].mxu1  ;;  %v2023_v0 = vpop.f32.mrb[43].mxu0  ;;  %v2687_v40 = vshrl.u32 %v2686_v35, 7 }
 0x1fa   : > { %v2688_v45 = vsub.s32 0, %v2687_v40  ;;  %v2692_v32 = vsub.s32 1, %v2687_v40  ;;  %v2696_v50 = vsub.s32 2, %v2687_v40 }
 0x1fd   : > { %v2369_v51 = vpop.f32.mrb[140].mxu1 }
 0x1fe   : > { %v2409_v16 = vadd.f32 %v2369_v51, %v2099_v44  ;;  %v3379_v17 = vpop.f32.mrb[141].mxu1 }
 0x1ff   : > { %v2372_v3 = vpop.f32.mrb[142].mxu1 }
 0x200   : > { %v2412_v19 = vadd.f32 %v2372_v3, %v2102_v46  ;;  %v3380_v54 = vpop.f32.mrb[143].mxu1 }
 0x205   : > { %v2377_v20 = vpop.f32.mrb[144].mxu1 }
 0x206   : > { %v4297_v23 = vadd.f32 %v2377_v20, %v2105_v48  ;;  %v3383_v24 = vpop.f32.mrb[145].mxu1  ;;  %v2684_v48 = vld [vmem:[%s4398_s2] sm:$0x7] }
 0x207   : > { %v2380_v26 = vpop.f32.mrb[146].mxu1  ;;  %v4318_v43 = vrot.slane %v2684_v48, %v2688_v45  ;;  %v4323_v58 = vrot.slane %v2684_v48, %v2696_v50 }
 0x208   : > { %v4299_v61 = vadd.f32 %v2380_v26, %v2108_v49  ;;  %v3384_v1 = vpop.f32.mrb[147].mxu1 }
 0x20d   : > { %v2385_v28 = vpop.f32.mrb[148].mxu1 }
 0x20e   : > { %v4301_v5 = vadd.f32 %v2385_v28, %v2111_v57  ;;  %v3387_v11 = vpop.f32.mrb[149].mxu1  ;;  %v4321_v57 = vrot.slane %v2684_v48, %v2692_v32 }
 0x20f   : > { %v2388_v29 = vpop.f32.mrb[150].mxu1 }
 0x210   : > { %v4303_v30 = vadd.f32 %v2388_v29, %v2114_v62  ;;  %v3388_v6 = vpop.f32.mrb[151].mxu1 }
 0x215   : > { %v2393_v31 = vpop.f32.mrb[152].mxu1 }
 0x216   : > { %v4305_v33 = vadd.f32 %v2393_v31, %v2117_v21  ;;  %v3391_v14 = vpop.f32.mrb[153].mxu1 }
 0x217   : > { %v2396_v12 = vpop.f32.mrb[154].mxu1 }
 0x218   : > { %v4307_v36 = vadd.f32 %v2396_v12, %v2120_v59  ;;  %v3392_v37 = vpop.f32.mrb[155].mxu1 }
 0x21d   : > { %v2401_v18 = vpop.f32.mrb[156].mxu1  ;;  %v2328_v42 = vpop.f32.mrb[44].mxu0 }
 0x21e   : > { %v4309_v22 = vadd.f32 %v2401_v18, %v2123_v39  ;;  %v4311_v63 = vadd.f32 %v2328_v42, %v2121_v34  ;;  %v3395_v44 = vpop.f32.mrb[157].mxu1  ;;  %v2330_v27 = vpop.f32.mrb[45].mxu0 }
 0x21f   : > { %v4313_v46 = vadd.f32 %v2330_v27, %v2122_v8  ;;  %v2404_v47 = vpop.f32.mrb[158].mxu1  ;;  %v2332_v9 = vpop.f32.mrb[46].mxu0 }
 0x220   : > { %v3396_v25 = vpop.f32.mrb[159].mxu1  ;;  %v2333_v49 = vpop.f32.mrb[47].mxu0 }
 0x225   : > { %v2619_v60 = vpop.f32.mrb[160].mxu1  ;;  %v2538_v62 = vpop.f32.mrb[0].mxu0 }
 0x226   : > { %v2659_v53 = vadd.f32 %v2619_v60, %v2409_v16  ;;  %v2701_v2 = vadd.f32 %v4318_v43, %v2538_v62  ;;  %v3403_v21 = vpop.f32.mrb[161].mxu1  ;;  %v2540_v52 = vpop.f32.mrb[1].mxu0 }
 0x227   : > { %v2702_v56 = vadd.f32 %v4321_v57, %v2540_v52  ;;  %v2622_v59 = vpop.f32.mrb[162].mxu1  ;;  %v2542_v4 = vpop.f32.mrb[2].mxu0 }
 0x228   : > { %v2703_v7 = vadd.f32 %v4323_v58, %v2659_v53  ;;  %v2728_v38 = vmax.f32 %v2701_v2, 0.0  ;;  %v2662_v39 = vadd.f32 %v2622_v59, %v2412_v19  ;;  %v2704_v34 = vadd.f32 %v4318_v43, %v2542_v4  ;;  %v3404_v41 = vpop.f32.mrb[163].mxu1  ;;  %v2544_v55 = vpop.f32.mrb[3].mxu0 }
 0x229   : > { %v2729_v8 = vmax.f32 %v2702_v56, 0.0  ;;  %v2705_v10 = vadd.f32 %v4321_v57, %v2544_v55 }
 0x22a   : > { %v2730_v13 = vmax.f32 %v2703_v7, 0.0  ;;  %2755 = vst [vmem:[%s4329_s7] sm:$0xff] %v2728_v38  ;;  %v2706_v15 = vadd.f32 %v4323_v58, %v2662_v39  ;;  %v2731_v0 = vmax.f32 %v2704_v34, 0.0 }
 0x22b   : > { %2756 = vst [vmem:[%s4329_s7 + $0x8] sm:$0xff] %v2729_v8  ;;  %v2732_v51 = vmax.f32 %v2705_v10, 0.0 }
 0x22c   : > { %2757 = vst [vmem:[%s4329_s7 + $0x10] sm:$0xff] %v2730_v13  ;;  %v2733_v16 = vmax.f32 %v2706_v15, 0.0  ;;  %2758 = vst [vmem:[%s4329_s7 + $0x18] sm:$0xff] %v2731_v0 }
 0x22d   : > { %2759 = vst [vmem:[%s4329_s7 + $0x20] sm:$0xff] %v2732_v51  ;;  %v2627_v17 = vpop.f32.mrb[164].mxu1  ;;  %v2548_v3 = vpop.f32.mrb[4].mxu0 }
 0x22e   : > { %2760 = vst [vmem:[%s4329_s7 + $0x28] sm:$0xff] %v2733_v16  ;;  %v2665_v19 = vadd.f32 %v2627_v17, %v4297_v23  ;;  %v2707_v54 = vadd.f32 %v4318_v43, %v2548_v3  ;;  %v3407_v20 = vpop.f32.mrb[165].mxu1  ;;  %v2550_v24 = vpop.f32.mrb[5].mxu0 }
 0x22f   : > { %v2708_v26 = vadd.f32 %v4321_v57, %v2550_v24  ;;  %v2630_v1 = vpop.f32.mrb[166].mxu1  ;;  %v2552_v28 = vpop.f32.mrb[6].mxu0 }
 0x230   : > { %v2709_v11 = vadd.f32 %v4323_v58, %v2665_v19  ;;  %v2734_v29 = vmax.f32 %v2707_v54, 0.0  ;;  %v2668_v6 = vadd.f32 %v2630_v1, %v4299_v61  ;;  %v2710_v23 = vadd.f32 %v4318_v43, %v2552_v28  ;;  %v3408_v31 = vpop.f32.mrb[167].mxu1  ;;  %v2554_v14 = vpop.f32.mrb[7].mxu0 }
 0x231   : > { %v2735_v35 = vmax.f32 %v2708_v26, 0.0  ;;  %v2711_v12 = vadd.f32 %v4321_v57, %v2554_v14 }
 0x232   : > { %v2736_v37 = vmax.f32 %v2709_v11, 0.0  ;;  %2761 = vst [vmem:[%s4329_s7 + $0x30] sm:$0xff] %v2734_v29  ;;  %v2712_v40 = vadd.f32 %v4323_v58, %v2668_v6  ;;  %v2737_v18 = vmax.f32 %v2710_v23, 0.0 }
 0x233   : > { %2762 = vst [vmem:[%s4329_s7 + $0x38] sm:$0xff] %v2735_v35  ;;  %v2738_v42 = vmax.f32 %v2711_v12, 0.0 }
 0x234   : > { %2763 = vst [vmem:[%s4329_s7 + $0x40] sm:$0xff] %v2736_v37  ;;  %v2739_v44 = vmax.f32 %v2712_v40, 0.0  ;;  %2764 = vst [vmem:[%s4329_s7 + $0x48] sm:$0xff] %v2737_v18 }
 0x235   : > { %2765 = vst [vmem:[%s4329_s7 + $0x50] sm:$0xff] %v2738_v42  ;;  %v2635_v61 = vpop.f32.mrb[168].mxu1  ;;  %v2558_v27 = vpop.f32.mrb[8].mxu0 }
 0x236   : > { %2766 = vst [vmem:[%s4329_s7 + $0x58] sm:$0xff] %v2739_v44  ;;  %v2671_v45 = vadd.f32 %v2635_v61, %v4301_v5  ;;  %v2713_v47 = vadd.f32 %v4318_v43, %v2558_v27  ;;  %v3411_v9 = vpop.f32.mrb[169].mxu1  ;;  %v2560_v48 = vpop.f32.mrb[9].mxu0 }
 0x237   : > { %v2714_v32 = vadd.f32 %v4321_v57, %v2560_v48  ;;  %v2638_v25 = vpop.f32.mrb[170].mxu1  ;;  %v2562_v49 = vpop.f32.mrb[10].mxu0 }
 0x238   : > { %v2715_v50 = vadd.f32 %v4323_v58, %v2671_v45  ;;  %v2740_v60 = vmax.f32 %v2713_v47, 0.0  ;;  %v2674_v62 = vadd.f32 %v2638_v25, %v4303_v30  ;;  %v2716_v5 = vadd.f32 %v4318_v43, %v2562_v49  ;;  %v3412_v53 = vpop.f32.mrb[171].mxu1  ;;  %v2564_v2 = vpop.f32.mrb[11].mxu0 }
 0x239   : > { %v2741_v21 = vmax.f32 %v2714_v32, 0.0  ;;  %v2717_v52 = vadd.f32 %v4321_v57, %v2564_v2 }
 0x23a   : > { %v2742_v56 = vmax.f32 %v2715_v50, 0.0  ;;  %2767 = vst [vmem:[%s4329_s7 + $0x60] sm:$0xff] %v2740_v60  ;;  %v2718_v59 = vadd.f32 %v4323_v58, %v2674_v62  ;;  %v2743_v4 = vmax.f32 %v2716_v5, 0.0 }
 0x23b   : > { %2768 = vst [vmem:[%s4329_s7 + $0x68] sm:$0xff] %v2741_v21  ;;  %v2744_v7 = vmax.f32 %v2717_v52, 0.0 }
 0x23c   : > { %2769 = vst [vmem:[%s4329_s7 + $0x70] sm:$0xff] %v2742_v56  ;;  %v2745_v38 = vmax.f32 %v2718_v59, 0.0  ;;  %2770 = vst [vmem:[%s4329_s7 + $0x78] sm:$0xff] %v2743_v4 }
 0x23d   : > { %2771 = vst [vmem:[%s4329_s7 + $0x80] sm:$0xff] %v2744_v7  ;;  %v2643_v30 = vpop.f32.mrb[172].mxu1  ;;  %v2568_v39 = vpop.f32.mrb[12].mxu0 }
 0x23e   : > { %2772 = vst [vmem:[%s4329_s7 + $0x88] sm:$0xff] %v2745_v38  ;;  %v2677_v34 = vadd.f32 %v2643_v30, %v4305_v33  ;;  %v2719_v41 = vadd.f32 %v4318_v43, %v2568_v39  ;;  %v3415_v55 = vpop.f32.mrb[173].mxu1  ;;  %v2570_v8 = vpop.f32.mrb[13].mxu0 }
 0x23f   : > { %v2720_v10 = vadd.f32 %v4321_v57, %v2570_v8  ;;  %v2646_v13 = vpop.f32.mrb[174].mxu1  ;;  %v2572_v15 = vpop.f32.mrb[14].mxu0 }
 0x240   : > { %v2721_v0 = vadd.f32 %v4323_v58, %v2677_v34  ;;  %v2746_v51 = vmax.f32 %v2719_v41, 0.0  ;;  %v2680_v16 = vadd.f32 %v2646_v13, %v4307_v36  ;;  %v2722_v33 = vadd.f32 %v4318_v43, %v2572_v15  ;;  %v3416_v17 = vpop.f32.mrb[175].mxu1  ;;  %v2574_v3 = vpop.f32.mrb[15].mxu0 }
 0x241   : > { %v2747_v19 = vmax.f32 %v2720_v10, 0.0  ;;  %v2723_v54 = vadd.f32 %v4321_v57, %v2574_v3 }
 0x242   : > { %v2748_v20 = vmax.f32 %v2721_v0, 0.0  ;;  %2773 = vst [vmem:[%s4329_s7 + $0x90] sm:$0xff] %v2746_v51  ;;  %v2724_v24 = vadd.f32 %v4323_v58, %v2680_v16  ;;  %v2749_v26 = vmax.f32 %v2722_v33, 0.0 }
 0x243   : > { %2774 = vst [vmem:[%s4329_s7 + $0x98] sm:$0xff] %v2747_v19  ;;  %v2750_v1 = vmax.f32 %v2723_v54, 0.0 }
 0x244   : > { %2775 = vst [vmem:[%s4329_s7 + $0xa0] sm:$0xff] %v2748_v20  ;;  %v2751_v28 = vmax.f32 %v2724_v24, 0.0  ;;  %2776 = vst [vmem:[%s4329_s7 + $0xa8] sm:$0xff] %v2749_v26 }
 0x245   : > { %2777 = vst [vmem:[%s4329_s7 + $0xb0] sm:$0xff] %v2750_v1  ;;  %v2651_v36 = vpop.f32.mrb[176].mxu1  ;;  %v2578_v11 = vpop.f32.mrb[48].mxu0 }
 0x246   : > { %2778 = vst [vmem:[%s4329_s7 + $0xb8] sm:$0xff] %v2751_v28  ;;  %v2683_v29 = vadd.f32 %v2651_v36, %v4309_v22  ;;  %v2681_v6 = vadd.f32 %v2578_v11, %v4311_v63  ;;  %v3419_v23 = vpop.f32.mrb[177].mxu1  ;;  %v2580_v31 = vpop.f32.mrb[49].mxu0 }
 0x247   : > { %v2682_v14 = vadd.f32 %v2580_v31, %v4313_v46  ;;  %v2654_v35 = vpop.f32.mrb[178].mxu1  ;;  %v2582_v12 = vpop.f32.mrb[50].mxu0 }
 0x248   : > { %v2727_v37 = vadd.f32 %v4323_v58, %v2683_v29  ;;  %v2725_v40 = vadd.f32 %v4318_v43, %v2681_v6  ;;  %v3420_v18 = vpop.f32.mrb[179].mxu1  ;;  %v2583_v42 = vpop.f32.mrb[51].mxu0 }
 0x249   : > { %v2726_v44 = vadd.f32 %v4321_v57, %v2682_v14 }
 0x24a   : > { %v2754_v61 = vmax.f32 %v2727_v37, 0.0  ;;  %v2752_v22 = vmax.f32 %v2725_v40, 0.0 }
 0x24b   : > { %v2753_v27 = vmax.f32 %v2726_v44, 0.0 }
 0x24c   : > { %2781 = vst [vmem:[%s4329_s7 + $0xd0] sm:$0xff] %v2754_v61  ;;  %2779 = vst [vmem:[%s4329_s7 + $0xc0] sm:$0xff] %v2752_v22 }
 0x24d   : > { %2780 = vst [vmem:[%s4329_s7 + $0xc8] sm:$0xff] %v2753_v27 }
 0x24e PF: > { %s13_s12 = sadd.s32 1, %s3681_s12  }
 0x24f   : > { %p10_p4 = scmp.ge.s32.totalorder %s13_s12, 4  }
 0x251   :  { %12 = sbr.rel (!%p10_p4) target bundleno = 1 (0x1), region = 73 }

// kernel: inception_b_forward.9
= control target key start
LH: loop header
LB: loop body
LE: loop exit
PB: predicated region body
PF: predicated region fallthrough
CT: control target
= control target key end

     0   :  { %s412_s6 = smov 0   ;;  %s528_s0 = inlined_call_operand.vmem [shape: f32[2,4,82,32], index: 0, kind: input, shape index: {}]   ;;  %s529_s1 = inlined_call_operand.vmem [shape: f32[2,72,32], index: 1, kind: output, shape index: {}]  }
   0x1 LB: > { %s330_s7 = sadd.s32 4294967295, %s400_s6   ;;  %p334_p0 = scmp.ge.s32.totalorder %s400_s6, 1  ;;  %s400_s6 = sphi %s412_s6, %s11_s6  }
   0x2   : > { %p87_p1 = scmp.lt.s32.totalorder %s400_s6, 3 }
   0x4   : > { %p88_p2 = pnand %p334_p0, %p87_p1 }
   0x5   : > { %p107_p3 = scmp.lt.s32.totalorder (!%p88_p2), %s330_s7, 1  ;;  %vm265_vm0 = vcmask (!%p88_p2), 261120  }
   0x6   : > { %91 = sbr.rel (%p88_p2) target bundleno = 53 (0x35), region = 24 }
   0xd   : > { %s531_s7 = smov (!%p107_p3, %s330_s7), 1 }
   0xe   : > { %s384_s8 = smul.u32 352, %s531_s7 }
   0xf   : > { %s385_s12 = smul.u32 72, %s531_s7 }
  0x10   : > { %s426_s11 = scalar_lea.vmem %s528_s0, %s384_s8 }
  0x11   : > { %v117_v0 = vld [vmem:[%s426_s11] sm:$0xff]  ;;  %v118_v1 = vld [vmem:[%s426_s11 + $0x8] sm:$0xff]  ;;  %v337_v2 = vld [vmem:[%s426_s11 + $0x58] sm:$0xff]  ;;  %s468_s15 = scalar_lea.vmem %s529_s1, %s385_s12 }
  0x12   : > { %v338_v3 = vld [vmem:[%s426_s11 + $0x60] sm:$0xff]  ;;  %v136_v4 = vmax.f32 %v117_v0, %v337_v2  ;;  %v146_v6 = vld [vmem:[%s426_s11 + $0x9] sm:$0xff]  ;;  %v347_v10 = vld [vmem:[%s426_s11 + $0xb8] sm:$0xff] }
  0x13   : > { %v145_v5 = vld [vmem:[%s426_s11 + $0x1] sm:$0xff]  ;;  %v137_v7 = vmax.f32 %v118_v1, %v338_v3  ;;  %v346_v8 = vld [vmem:[%s426_s11 + $0xb0] sm:$0xff]  ;;  %v120_v22 = vld [vmem:[%s426_s11 + $0x18] sm:$0xff] }
  0x14   : > { %v154_v9 = vmax.f32 %v136_v4, %v145_v5  ;;  %v355_v11 = vld [vmem:[%s426_s11 + $0x108] sm:$0xff]  ;;  %v119_v13 = vld [vmem:[%s426_s11 + $0x10] sm:$0xff]  ;;  %v348_v21 = vld [vmem:[%s426_s11 + $0xc0] sm:$0xff] }
  0x15   : > { %v155_v12 = vmax.f32 %v137_v7, %v146_v6  ;;  %v339_v14 = vld [vmem:[%s426_s11 + $0x68] sm:$0xff]  ;;  %v147_v15 = vld [vmem:[%s426_s11 + $0x11] sm:$0xff]  ;;  %v365_v25 = vld [vmem:[%s426_s11 + $0xb9] sm:$0xff] }
  0x16   : > { %v173_v16 = vmax.f32 %v154_v9, %v346_v8  ;;  %v138_v17 = vmax.f32 %v119_v13, %v339_v14  ;;  %v356_v18 = vld [vmem:[%s426_s11 + $0x110] sm:$0xff]  ;;  %v148_v27 = vld [vmem:[%s426_s11 + $0x19] sm:$0xff]  ;;  %v373_v28 = vld [vmem:[%s426_s11 + $0x61] sm:$0xff] }
  0x17   : > { %v174_v19 = vmax.f32 %v155_v12, %v347_v10  ;;  %v364_v20 = vld [vmem:[%s426_s11 + $0xb1] sm:$0xff]  ;;  %v349_v34 = vld [vmem:[%s426_s11 + $0xc8] sm:$0xff]  ;;  %v121_v35 = vld [vmem:[%s426_s11 + $0x20] sm:$0xff] }
  0x18   : > { %v192_v23 = vmax.f32 %v173_v16, %v355_v11  ;;  %v156_v24 = vmax.f32 %v138_v17, %v147_v15  ;;  %v340_v26 = vld [vmem:[%s426_s11 + $0x70] sm:$0xff]  ;;  %v357_v31 = vld [vmem:[%s426_s11 + $0x118] sm:$0xff]  ;;  %v366_v40 = vld [vmem:[%s426_s11 + $0xc1] sm:$0xff] }
  0x19   : > { %v193_v29 = vmax.f32 %v174_v19, %v356_v18  ;;  %v139_v30 = vmax.f32 %v120_v22, %v340_v26  ;;  %v341_v36 = vld [vmem:[%s426_s11 + $0x78] sm:$0xff]  ;;  %v247_v37 = vld [vmem:[%s426_s11 + $0xa] sm:$0xff]  ;;  %v149_v42 = vld [vmem:[%s426_s11 + $0x21] sm:$0xff] }
  0x1a   : > { %v210_v32 = vmax.f32 %v192_v23, %v364_v20  ;;  %v175_v33 = vmax.f32 %v156_v24, %v348_v21  ;;  %v140_v41 = vmax.f32 %v121_v35, %v341_v36  ;;  %v374_v44 = vld [vmem:[%s426_s11 + $0x69] sm:$0xff]  ;;  %v358_v47 = vld [vmem:[%s426_s11 + $0x120] sm:$0xff]  ;;  %v248_v55 = vld [vmem:[%s426_s11 + $0x12] sm:$0xff] }
  0x1b   : > { %v211_v38 = vmax.f32 %v193_v29, %v365_v25  ;;  %v157_v39 = vmax.f32 %v139_v30, %v148_v27  ;;  %v350_v46 = vld [vmem:[%s426_s11 + $0xd0] sm:$0xff]  ;;  %v122_v51 = vld [vmem:[%s426_s11 + $0x28] sm:$0xff]  ;;  %v342_v52 = vld [vmem:[%s426_s11 + $0x80] sm:$0xff] }
  0x1c   : > { %v220_v43 = vmax.f32 %v210_v32, %v146_v6  ;;  %v194_v45 = vmax.f32 %v175_v33, %v357_v31  ;;  %v158_v50 = vmax.f32 %v140_v41, %v149_v42  ;;  %v150_v53 = vld [vmem:[%s426_s11 + $0x29] sm:$0xff]  ;;  %v141_v58 = vmax.f32 %v122_v51, %v342_v52  ;;  %v375_v61 = vld [vmem:[%s426_s11 + $0x71] sm:$0xff]  ;;  %v249_v9 = vld [vmem:[%s426_s11 + $0x1a] sm:$0xff] }
  0x1d   : > { %v221_v48 = vmax.f32 %v211_v38, %v147_v15  ;;  %v176_v49 = vmax.f32 %v157_v39, %v349_v34  ;;  %v367_v57 = vld [vmem:[%s426_s11 + $0xc9] sm:$0xff]  ;;  %v351_v0 = vld [vmem:[%s426_s11 + $0xd8] sm:$0xff]  ;;  %v352_v17 = vld [vmem:[%s426_s11 + $0xe0] sm:$0xff] }
  0x1e   : > { %v238_v54 = vmax.f32 %v220_v43, %v373_v28  ;;  %v212_v56 = vmax.f32 %v194_v45, %v366_v40  ;;  %v359_v59 = vld [vmem:[%s426_s11 + $0x128] sm:$0xff]  ;;  %v177_v62 = vmax.f32 %v158_v50, %v350_v46  ;;  %v123_v1 = vld [vmem:[%s426_s11 + $0x30] sm:$0xff]  ;;  %v159_v4 = vmax.f32 %v141_v58, %v150_v53  ;;  %v376_v11 = vld [vmem:[%s426_s11 + $0x79] sm:$0xff] }
  0x1f   : > { %v239_v60 = vmax.f32 %v221_v48, %v374_v44  ;;  %v195_v63 = vmax.f32 %v176_v49, %v358_v47  ;;  %v368_v5 = vld [vmem:[%s426_s11 + $0xd1] sm:$0xff]  ;;  %v343_v6 = vld [vmem:[%s426_s11 + $0x88] sm:$0xff]  ;;  %v369_v24 = vld [vmem:[%s426_s11 + $0xd9] sm:$0xff] }
  0x20   : > { %v256_v2 = vmax.f32 %v238_v54, %v247_v37  ;;  %v222_v3 = vmax.f32 %v212_v56, %v148_v27  ;;  %v151_v7 = vld [vmem:[%s426_s11 + $0x31] sm:$0xff]  ;;  %v196_v12 = vmax.f32 %v177_v62, %v359_v59  ;;  %v142_v13 = vmax.f32 %v123_v1, %v343_v6  ;;  %v250_v21 = vld [vmem:[%s426_s11 + $0x22] sm:$0xff]  ;;  %v152_v26 = vld [vmem:[%s426_s11 + $0x39] sm:$0xff] }
  0x21   : > { %v257_v8 = vmax.f32 %v239_v60, %v248_v55  ;;  %v213_v10 = vmax.f32 %v195_v63, %v367_v57  ;;  %v360_v14 = vld [vmem:[%s426_s11 + $0x130] sm:$0xff]  ;;  %v178_v16 = vmax.f32 %v159_v4, %v351_v0  ;;  %v124_v18 = vld [vmem:[%s426_s11 + $0x38] sm:$0xff]  ;;  %v377_v28 = vld [vmem:[%s426_s11 + $0x81] sm:$0xff] }
  0x22   : > { %266 = vst.msk [vmem:[%s468_s15] sm:$0xff] %vm265_vm0, %v256_v2  ;;  %v240_v15 = vmax.f32 %v222_v3, %v375_v61  ;;  %v344_v19 = vld [vmem:[%s426_s11 + $0x90] sm:$0xff]  ;;  %v214_v22 = vmax.f32 %v196_v12, %v368_v5  ;;  %v160_v23 = vmax.f32 %v142_v13, %v151_v7  ;;  %v353_v30 = vld [vmem:[%s426_s11 + $0xe8] sm:$0xff]  ;;  %v361_v31 = vld [vmem:[%s426_s11 + $0x138] sm:$0xff] }
  0x23   : > { %267 = vst.msk [vmem:[%s468_s15 + $0x8] sm:$0xff] %vm265_vm0, %v257_v8  ;;  %v223_v20 = vmax.f32 %v213_v10, %v149_v42  ;;  %v143_v25 = vmax.f32 %v124_v18, %v344_v19  ;;  %v197_v29 = vmax.f32 %v178_v16, %v360_v14  ;;  %v125_v36 = vld [vmem:[%s426_s11 + $0x40] sm:$0xff]  ;;  %v345_v37 = vld [vmem:[%s426_s11 + $0x98] sm:$0xff]  ;;  %v251_v39 = vld [vmem:[%s426_s11 + $0x2a] sm:$0xff] }
  0x24   : > { %v258_v27 = vmax.f32 %v240_v15, %v249_v9  ;;  %v224_v33 = vmax.f32 %v214_v22, %v150_v53  ;;  %v179_v34 = vmax.f32 %v160_v23, %v352_v17  ;;  %v153_v38 = vld [vmem:[%s426_s11 + $0x41] sm:$0xff]  ;;  %v144_v42 = vmax.f32 %v125_v36, %v345_v37  ;;  %v378_v46 = vld [vmem:[%s426_s11 + $0x89] sm:$0xff]  ;;  %v252_v54 = vld [vmem:[%s426_s11 + $0x32] sm:$0xff] }
  0x25   : > { %v241_v32 = vmax.f32 %v223_v20, %v376_v11  ;;  %v161_v35 = vmax.f32 %v143_v25, %v152_v26  ;;  %v215_v40 = vmax.f32 %v197_v29, %v369_v24  ;;  %v370_v41 = vld [vmem:[%s426_s11 + $0xe1] sm:$0xff]  ;;  %v354_v49 = vld [vmem:[%s426_s11 + $0xf0] sm:$0xff]  ;;  %v380_v2 = vld [vmem:[%s426_s11 + $0x99] sm:$0xff] }
  0x26   : > { %268 = vst.msk [vmem:[%s468_s15 + $0x10] sm:$0xff] %vm265_vm0, %v258_v27  ;;  %v362_v43 = vld [vmem:[%s426_s11 + $0x140] sm:$0xff]  ;;  %v242_v45 = vmax.f32 %v224_v33, %v377_v28  ;;  %v198_v48 = vmax.f32 %v179_v34, %v361_v31  ;;  %v162_v51 = vmax.f32 %v144_v42, %v153_v38  ;;  %v371_v52 = vld [vmem:[%s426_s11 + $0xe9] sm:$0xff]  ;;  %v379_v59 = vld [vmem:[%s426_s11 + $0x91] sm:$0xff] }
  0x27   : > { %v259_v44 = vmax.f32 %v241_v32, %v250_v21  ;;  %v180_v47 = vmax.f32 %v161_v35, %v353_v30  ;;  %v225_v50 = vmax.f32 %v215_v40, %v151_v7  ;;  %v363_v57 = vld [vmem:[%s426_s11 + $0x148] sm:$0xff]  ;;  %v372_v63 = vld [vmem:[%s426_s11 + $0xf1] sm:$0xff]  ;;  %v253_v1 = vld [vmem:[%s426_s11 + $0x3a] sm:$0xff] }
  0x28   : > { %v260_v53 = vmax.f32 %v242_v45, %v251_v39  ;;  %v216_v55 = vmax.f32 %v198_v48, %v370_v41  ;;  %v181_v60 = vmax.f32 %v162_v51, %v354_v49  ;;  %v219_v6 = vld [vmem:[%s426_s11 + $0x49] sm:$0xff]  ;;  %v381_v11 = vld [vmem:[%s426_s11 + $0xa1] sm:$0xff] }
  0x29   : > { %269 = vst.msk [vmem:[%s468_s15 + $0x18] sm:$0xff] %vm265_vm0, %v259_v44  ;;  %v199_v56 = vmax.f32 %v180_v47, %v362_v43  ;;  %v243_v58 = vmax.f32 %v225_v50, %v378_v46  ;;  %v254_v7 = vld [vmem:[%s426_s11 + $0x42] sm:$0xff]  ;;  %v255_v14 = vld [vmem:[%s426_s11 + $0x4a] sm:$0xff] }
  0x2a   : > { %270 = vst.msk [vmem:[%s468_s15 + $0x20] sm:$0xff] %vm265_vm0, %v260_v53  ;;  %v226_v61 = vmax.f32 %v216_v55, %v152_v26  ;;  %v200_v3 = vmax.f32 %v181_v60, %v363_v57 }
  0x2b   : > { %v217_v62 = vmax.f32 %v199_v56, %v371_v52  ;;  %v261_v0 = vmax.f32 %v243_v58, %v252_v54 }
  0x2c   : > { %v244_v4 = vmax.f32 %v226_v61, %v379_v59  ;;  %v218_v8 = vmax.f32 %v200_v3, %v372_v63 }
  0x2d   : > { %v227_v5 = vmax.f32 %v217_v62, %v153_v38  ;;  %271 = vst.msk [vmem:[%s468_s15 + $0x28] sm:$0xff] %vm265_vm0, %v261_v0 }
  0x2e   : > { %v262_v9 = vmax.f32 %v244_v4, %v253_v1  ;;  %v228_v12 = vmax.f32 %v218_v8, %v219_v6 }
  0x2f   : > { %v245_v10 = vmax.f32 %v227_v5, %v380_v2 }
  0x30   : > { %272 = vst.msk [vmem:[%s468_s15 + $0x30] sm:$0xff] %vm265_vm0, %v262_v9  ;;  %v246_v15 = vmax.f32 %v228_v12, %v381_v11 }
  0x31   : > { %v263_v13 = vmax.f32 %v245_v10, %v254_v7 }
  0x32   : > { %v264_v16 = vmax.f32 %v246_v15, %v255_v14 }
  0x33   : > { %273 = vst.msk [vmem:[%s468_s15 + $0x38] sm:$0xff] %vm265_vm0, %v263_v13 }
  0x34   : > { %274 = vst.msk [vmem:[%s468_s15 + $0x40] sm:$0xff] %vm265_vm0, %v264_v16 }
  0x35 PF: > { %s11_s6 = sadd.s32 1, %s400_s6  }
  0x36   : > { %p8_p4 = scmp.ge.s32.totalorder %s11_s6, 4  }
  0x38   :  { %10 = sbr.rel (!%p8_p4) target bundleno = 1 (0x1), region = 57 }

</bundles_post_ra>
